<compile_context>
chip_gen: v6e
topology: v6e:2x2x1
jax: 0.10.0
libtpu: 0.0.40
codegen_flags: <defaults>
</compile_context>

<pallas_src>
import warnings

import numpy as np
import jax
import jax.numpy as jnp
from jax.experimental import pallas as pl
from jax.experimental.pallas import tpu as pltpu

warnings.filterwarnings("ignore", message="Some donated buffers were not usable")

_COMPUTE_DTYPE = jnp.bfloat16     # slab + packed-weight dtype (f32 accumulation)


# ----------------------------------------------------------------------------
# helpers shared by the kernel (slab layout) and the weight packer
# ----------------------------------------------------------------------------
def _ceil8(x):
    return ((x + 7) // 8) * 8


def _part_layout(part_channels):
    """Sublane-aligned row offset of each channel-part inside one tap block."""
    offs, total = [], 0
    for c in part_channels:
        offs.append(total)
        total += _ceil8(c)
    return offs, total               # total == padded channels per tap (mult of 8)


def _build_wmat(w, b, part_channels, dtype):
    """HWIO conv weight (kh,kw,Cin,Cout) + bias -> (Cout, kh*kw*Cpad + 8).

    K is ordered (tap-major, padded-channel-minor) to match the in-kernel
    im2col slab.  The trailing 8-column block carries the bias in its first
    column; the kernel writes a matching constant ones/zeros block into the
    slab so the bias is folded into the single MXU matmul.
    """
    kh, kw, cin, cout = w.shape
    assert cin == sum(part_channels)
    offs, cpad = _part_layout(part_channels)
    wt = jnp.transpose(w, (3, 0, 1, 2)).reshape(cout, kh * kw, cin)
    wm = jnp.zeros((cout, kh * kw, cpad), jnp.float32)
    s = 0
    for c, off in zip(part_channels, offs):
        wm = wm.at[:, :, off:off + c].set(wt[:, :, s:s + c].astype(jnp.float32))
        s += c
    wm = wm.reshape(cout, kh * kw * cpad)
    bias_blk = jnp.zeros((cout, 8), jnp.float32).at[:, 0].set(b.astype(jnp.float32))
    return jnp.concatenate([wm, bias_blk], axis=1).astype(dtype)


def _build_masks(H, W, kh, kw):
    """Per-tap border-validity masks, pre-broadcast to 8 sublanes (f32)."""
    HW = H * W
    ph, pw = kh // 2, kw // 2
    pos = np.arange(HW)
    hh, ww = pos // W, pos % W
    ms = np.ones((kh * kw, 8, HW), np.float32)
    for dy in range(kh):
        for dx in range(kw):
            sy, sx = dy - ph, dx - pw
            ok = ((hh >= -sy) & (hh < H - sy) & (ww >= -sx) & (ww < W - sx))
            ms[dy * kw + dx, :, :] = ok.astype(np.float32)[None, :]
    return jnp.asarray(ms)


# ----------------------------------------------------------------------------
# fused per-timestep kernel builder
# ----------------------------------------------------------------------------
def _build_step_fn(*, B, H, W, Cin, Cin_pad, hc, ranks, order, steps, lags,
                   kh, kw, masks, W1, W2, W3, dtype):
    HW = H * W
    ph, pw = kh // 2, kw // 2
    cdtype = _COMPUTE_DTYPE
    K1e, K2e, K3e = W1.shape[-1], W2.shape[-1], W3.shape[-1]
    slab_rows = max(K1e, K2e, K3e)    # = kh*kw*max padded per-tap channels + 8

    def kernel(hsel_ref, x_ref, hs_ref, cell_ref, masks_ref,
               w1_ref, w2_ref, w3_ref,
               out_ref, newhs_ref, newcell_ref, slab_a, slab_b):
        slabs = (slab_a, slab_b)
        conv_count = [0]

        # constant ones/zeros block row used to fold the bias into the matmul
        row_idx = jax.lax.broadcasted_iota(jnp.int32, (8, HW), 0)
        bias_rows = (row_idx == 0).astype(cdtype)

        def conv(parts, w_mat):
            """5x5 'same' conv of channel-concat(parts) as ONE MXU matmul.

            parts: list of (C_i, HW) f32 with C_i % 8 == 0.  The 25 taps (and
            the channel concat) are folded into the contraction dim via an
            im2col slab (bf16) built with XLU lane-rolls + precomputed border
            masks.  Every row read by the matmul is written here, so no stale
            / uninitialized VMEM can poison the accumulation.
            """
            slab = slabs[conv_count[0] & 1]          # ping-pong: hide slab
            conv_count[0] += 1                       # rebuild under prev matmul
            offs, cpad = [], 0
            for p in parts:
                offs.append(cpad)
                cpad += p.shape[0]
            kbase = kh * kw * cpad
            assert w_mat.shape[-1] == kbase + 8
            for dy in range(kh):
                for dx in range(kw):
                    sy, sx = dy - ph, dx - pw
                    tap = dy * kw + dx
                    base = tap * cpad
                    shift = (-(sy * W + sx)) % HW
                    center = (sy == 0 and sx == 0)
                    m = None if center else masks_ref[tap]      # (8, HW) f32
                    for p, off in zip(parts, offs):
                        v = p if shift == 0 else pltpu.roll(p, shift, axis=1)
                        if m is not None:
                            if p.shape[0] == m.shape[0]:
                                v = v * m
                            else:
                                v = v * jnp.broadcast_to(m[0:1, :], v.shape)
                        slab[base + off: base + off + p.shape[0], :] = \
                            v.astype(cdtype)
                    # (all cpad rows per tap are covered: parts are 8-padded)
            slab[kbase: kbase + 8, :] = bias_rows          # bias fold-in rows
            return jnp.dot(w_mat, slab[:kbase + 8, :],
                           preferred_element_type=jnp.float32)

        # ---- three independent `layers_` convs, issued back-to-back ----
        lag_outs = []
        for l in range(order):
            states = [hs_ref[hsel_ref[l * lags + t], 0] for t in range(lags)]
            lag_outs.append(conv(states, w1_ref[l]))

        # ---- serial convolutional tensor-train chain ----
        temp = lag_outs[0]
        for l in range(1, order):
            temp = lag_outs[l] + conv([temp], w2_ref[l - 1])

        # ---- final conv over [inputs, temp] fused with the LSTM gate block ----
        cc = conv([x_ref[0], temp], w3_ref[...])             # (4*hc, HW) f32

        i = jax.nn.sigmoid(cc[0 * hc:1 * hc, :])
        f = jax.nn.sigmoid(cc[1 * hc:2 * hc, :])
        o = jax.nn.sigmoid(cc[2 * hc:3 * hc, :])
        g = jnp.tanh(cc[3 * hc:4 * hc, :])
        cell = cell_ref[0]
        new_cell = f * cell + i * g                          # fuse_mul_add_mul
        out = o * jnp.tanh(new_cell)

        out_ref[0] = out.astype(out_ref.dtype)
        newcell_ref[0] = new_cell.astype(newcell_ref.dtype)
        # single-slot ring writeback: the output block for `newhs` is steered
        # to ring slot hsel[order*lags] by the index_map; all other slots stay
        # valid through input_output_aliases.
        newhs_ref[0, 0] = out.astype(newhs_ref.dtype)

    grid_spec = pltpu.PrefetchScalarGridSpec(
        num_scalar_prefetch=1,                               # hsel -> SMEM
        grid=(B,),
        in_specs=[
            pl.BlockSpec((1, Cin_pad, HW), lambda b, hsel: (b, 0, 0)),     # x
            pl.BlockSpec((steps, 1, hc, HW), lambda b, hsel: (0, b, 0, 0)),  # ring
            pl.BlockSpec((1, hc, HW), lambda b, hsel: (b, 0, 0)),          # cell
            pl.BlockSpec((kh * kw, 8, HW), lambda b, hsel: (0, 0, 0)),     # masks
            pl.BlockSpec((order, ranks, K1e), lambda b, hsel: (0, 0, 0)),  # W1
            pl.BlockSpec((order - 1, ranks, K2e), lambda b, hsel: (0, 0, 0)),  # W2
            pl.BlockSpec((4 * hc, K3e), lambda b, hsel: (0, 0)),           # W3
        ],
        out_specs=(
            pl.BlockSpec((1, hc, HW), lambda b, hsel: (b, 0, 0)),          # out
            pl.BlockSpec((1, 1, hc, HW),
                         lambda b, hsel: (hsel[order * lags], b, 0, 0)),   # ring slot
            pl.BlockSpec((1, hc, HW), lambda b, hsel: (b, 0, 0)),          # cell
        ),
        scratch_shapes=[pltpu.VMEM((slab_rows, HW), cdtype),
                        pltpu.VMEM((slab_rows, HW), cdtype)],
    )

    kernel_call = pl.pallas_call(
        kernel,
        grid_spec=grid_spec,
        out_shape=(
            jax.ShapeDtypeStruct((B, hc, HW), dtype),
            jax.ShapeDtypeStruct((steps, B, hc, HW), dtype),
            jax.ShapeDtypeStruct((B, hc, HW), dtype),
        ),
        # in-place read-modify-write of the state tensors (operand indices
        # include the scalar-prefetch arg: hsel=0, x=1, hs=2, cell=3, ...)
        input_output_aliases={2: 1, 3: 2},
        compiler_params=pltpu.CompilerParams(
            dimension_semantics=("parallel",),
            vmem_limit_bytes=32 * 1024 * 1024),
    )

    def step(x_nchw, hidden_states, cell_states, hsel):
        x3 = x_nchw.reshape(B, Cin, HW).astype(dtype)
        if Cin_pad != Cin:          # zero-extend so every slab row gets written
            x3 = jnp.pad(x3, ((0, 0), (0, Cin_pad - Cin), (0, 0)))
        out3, new_hs, new_cell = kernel_call(
            hsel, x3, hidden_states, cell_states, masks, W1, W2, W3)
        return out3.reshape(B, hc, H, W), new_hs, new_cell

    return jax.jit(step, donate_argnums=(1, 2))


# ----------------------------------------------------------------------------
# Module-level wrapper mirroring ConvTTLSTMCell
# ----------------------------------------------------------------------------
class ConvTTLSTMCellPallas:
    def __init__(self, input_channels, hidden_channels, order=3, steps=3,
                 ranks=8, kernel_size=5, bias=True, key=None,
                 dtype=jnp.float32):
        assert bias, "bias=False not exercised here"
        assert order >= 2
        assert hidden_channels % 8 == 0 and ranks % 8 == 0, \
            "hidden_channels and ranks must be multiples of 8 (sublane tiling)"
        self.input_channels = input_channels
        self.hidden_channels = hidden_channels
        self.order = order
        self.steps = steps
        self.ranks = ranks
        self.lags = steps - order + 1
        if isinstance(kernel_size, int):
            kernel_size = (kernel_size, kernel_size)
        kh, kw = kernel_size
        assert kh % 2 == 1 and kw % 2 == 1
        self.kernel_size = (kh, kw)
        self.dtype = dtype

        if key is None:
            key = jax.random.PRNGKey(0)

        def make_conv(k, cin, cout):
            kw_k, kb_k = jax.random.split(k)
            bound = 1.0 / np.sqrt(cin * kh * kw)    # PyTorch-like uniform init
            w = jax.random.uniform(kw_k, (kh, kw, cin, cout), dtype, -bound, bound)
            b = jax.random.uniform(kb_k, (cout,), dtype, -bound, bound)
            return w, b

        # Mirrors self.layers / self.layers_ of the PyTorch module (HWIO).
        self.layers, self.layers_ = [], []
        for l in range(order):
            key, k1, k2 = jax.random.split(key, 3)
            cin = ranks if l < order - 1 else ranks + input_channels
            cout = ranks if l < order - 1 else 4 * hidden_channels
            self.layers.append(make_conv(k1, cin, cout))
            self.layers_.append(make_conv(k2, self.lags * hidden_channels, ranks))

        hc = hidden_channels
        cd = _COMPUTE_DTYPE
        # pre-packed (Cout, kh*kw*Cpad + 8) bf16 matmul weights, bias folded in
        self._W1 = jnp.stack([_build_wmat(w, b, [hc] * self.lags, cd)
                              for (w, b) in self.layers_])
        self._W2 = jnp.stack([_build_wmat(self.layers[l][0], self.layers[l][1],
                                          [ranks], cd)
                              for l in range(order - 1)])
        self._W3 = _build_wmat(self.layers[order - 1][0],
                               self.layers[order - 1][1],
                               [input_channels, ranks], cd)

        self._step = None
        self._spatial = None

    def initialize(self, B, H, W):
        hc = self.hidden_channels
        self.hidden_states = jnp.zeros((self.steps, B, hc, H * W), self.dtype)
        self.cell_states = jnp.zeros((B, hc, H * W), self.dtype)
        self.hidden_pointer = 0
        if self._step is None or self._spatial != (B, H, W):
            self._spatial = (B, H, W)
            kh, kw = self.kernel_size
            masks = _build_masks(H, W, kh, kw)
            self._step = _build_step_fn(
                B=B, H=H, W=W, Cin=self.input_channels,
                Cin_pad=_ceil8(self.input_channels), hc=hc,
                ranks=self.ranks, order=self.order, steps=self.steps,
                lags=self.lags, kh=kh, kw=kw, masks=masks,
                W1=self._W1, W2=self._W2, W3=self._W3, dtype=self.dtype)

    def __call__(self, inputs_nchw, first_step=False):
        # TODO(synk): `checkpointing=True` path is a memory/recompute trick with
        # identical forward math; no Pallas-level equivalent is needed.
        B, _, H, W = inputs_nchw.shape
        if first_step:
            self.initialize(B, H, W)
        ptr = self.hidden_pointer
        sel = [(ptr + l + t) % self.steps
               for l in range(self.order) for t in range(self.lags)] + [ptr]
        hsel = jnp.asarray(sel, dtype=jnp.int32)
        out, self.hidden_states, self.cell_states = self._step(
            inputs_nchw, self.hidden_states, self.cell_states, hsel)
        self.hidden_pointer = (ptr + 1) % self.steps
        return out                                     # NCHW (B, hc, H, W)


# ----------------------------------------------------------------------------
# Pure-JAX (lax conv, full f32 precision) reference for correctness checking
# ----------------------------------------------------------------------------
def _conv_ref(x, w, b):
    out = jax.lax.conv_general_dilated(
        x, w, window_strides=(1, 1), padding="SAME",
        dimension_numbers=("NHWC", "HWIO", "NHWC"),
        precision=jax.lax.Precision.HIGHEST)
    return out + b


def run_reference(cell, inputs_seq_nchw):
    hc = cell.hidden_channels
    outs = []
    hidden, cellst, ptr = None, None, 0
    for t, x_nchw in enumerate(inputs_seq_nchw):
        x = jnp.transpose(x_nchw, (0, 2, 3, 1))
        if t == 0:
            B, H, W, _ = x.shape
            hidden = [jnp.zeros((B, H, W, hc), x.dtype) for _ in range(cell.steps)]
            cellst = jnp.zeros((B, H, W, hc), x.dtype)
            ptr = 0
        ip = ptr
        temp = None
        for l in range(cell.order):
            ip = ptr if l == 0 else (ip + 1) % cell.steps
            states = [hidden[(ip + k) % cell.steps] for k in range(cell.lags)]
            inp = _conv_ref(jnp.concatenate(states, axis=-1), *cell.layers_[l])
            temp = inp if l == 0 else inp + _conv_ref(temp, *cell.layers[l - 1])
        cc = _conv_ref(jnp.concatenate([x, temp], axis=-1), *cell.layers[-1])
        i = jax.nn.sigmoid(cc[..., 0 * hc:1 * hc])
        f = jax.nn.sigmoid(cc[..., 1 * hc:2 * hc])
        o = jax.nn.sigmoid(cc[..., 2 * hc:3 * hc])
        g = jnp.tanh(cc[..., 3 * hc:4 * hc])
        cellst = f * cellst + i * g
        out = o * jnp.tanh(cellst)
        hidden[ptr] = out
        ptr = (ptr + 1) % cell.steps
        outs.append(jnp.transpose(out, (0, 3, 1, 2)))
    return outs


# ----------------------------------------------------------------------------
if __name__ == "__main__":
    key = jax.random.PRNGKey(0)
    B, Cin, H, W = 2, 4, 16, 16
    hidden_channels = 8
    T = 4  # number of sequence steps to run through the cell

    k_in, k_par = jax.random.split(key)
    xs = jax.random.normal(k_in, (T, B, Cin, H, W), jnp.float32)

    cell = ConvTTLSTMCellPallas(Cin, hidden_channels, order=3, steps=3,
                                ranks=8, kernel_size=5, bias=True, key=k_par)

    outs = []
    for t in range(T):
        outs.append(cell(xs[t], first_step=(t == 0)))
    outs = [jax.block_until_ready(o) for o in outs]

    refs = run_reference(cell, [xs[t] for t in range(T)])
    # bf16 conv inputs/weights with f32 accumulation -> 2e-2 tolerance vs the
    # f32 HIGHEST-precision reference (observed error is a few 1e-3).
    for o, r in zip(outs, refs):
        np.testing.assert_allclose(np.asarray(o), np.asarray(r),
                                   atol=2e-2, rtol=2e-2)

    print("KERNEL_OK")
</pallas_src>

<mosaic_0001>
module attributes {stable_mosaic.version = 11 : i64} {
  func.func @kernel(%arg0: i32, %arg1: memref<4xi32, #tpu.memory_space<smem>>, %arg2: memref<1x8x256xf32, #tpu.memory_space<vmem>>, %arg3: memref<3x1x8x256xf32, #tpu.memory_space<vmem>>, %arg4: memref<1x8x256xf32, #tpu.memory_space<vmem>>, %arg5: memref<25x8x256xf32, #tpu.memory_space<vmem>>, %arg6: memref<3x8x208xbf16, #tpu.memory_space<vmem>>, %arg7: memref<2x8x208xbf16, #tpu.memory_space<vmem>>, %arg8: memref<32x408xbf16, #tpu.memory_space<vmem>>, %arg9: memref<1x8x256xf32, #tpu.memory_space<vmem>>, %arg10: memref<1x1x8x256xf32, #tpu.memory_space<vmem>>, %arg11: memref<1x8x256xf32, #tpu.memory_space<vmem>>, %arg12: memref<408x256xbf16, #tpu.memory_space<vmem>>, %arg13: memref<408x256xbf16, #tpu.memory_space<vmem>>) attributes {dimension_semantics = [#tpu.dimension_semantics<parallel>], iteration_bounds = array<i64: 2>, scalar_prefetch = 1 : i64, scratch_operands = 2 : i64, tpu.core_type = #tpu.core_type<tc>, window_params = [{transform_indices = @transform_0, window_bounds = array<i64: 1, 8, 256>}, {transform_indices = @transform_1, window_bounds = array<i64: 3, 1, 8, 256>}, {transform_indices = @transform_2, window_bounds = array<i64: 1, 8, 256>}, {pipeline_mode = #tpu.pipeline_mode<synchronous>, transform_indices = @transform_3, window_bounds = array<i64: 25, 8, 256>}, {pipeline_mode = #tpu.pipeline_mode<synchronous>, transform_indices = @transform_4, window_bounds = array<i64: 3, 8, 208>}, {pipeline_mode = #tpu.pipeline_mode<synchronous>, transform_indices = @transform_5, window_bounds = array<i64: 2, 8, 208>}, {pipeline_mode = #tpu.pipeline_mode<synchronous>, transform_indices = @transform_6, window_bounds = array<i64: 32, 408>}, {transform_indices = @transform_7, window_bounds = array<i64: 1, 8, 256>}, {transform_indices = @transform_8, window_bounds = array<i64: 1, 1, 8, 256>}, {transform_indices = @transform_9, window_bounds = array<i64: 1, 8, 256>}]} {
    %0 = tpu.iota {dimensions = array<i32: 0>} : vector<8x256xi32>
    %c0_i32 = arith.constant 0 : i32
    %1 = vector.broadcast %c0_i32 : i32 to vector<8x256xi32>
    %2 = arith.cmpi eq, %0, %1 : vector<8x256xi32>
    %3 = arith.extui %2 : vector<8x256xi1> to vector<8x256xi32>
    %4 = arith.sitofp %3 : vector<8x256xi32> to vector<8x256xf32>
    %5 = arith.truncf %4 : vector<8x256xf32> to vector<8x256xbf16>
    %c0 = arith.constant 0 : index
    %6 = memref.load %arg1[%c0] : memref<4xi32, #tpu.memory_space<smem>>
    %7 = arith.index_cast %6 : i32 to index
    %c0_0 = arith.constant 0 : index
    %c0_1 = arith.constant 0 : index
    %c0_2 = arith.constant 0 : index
    %8 = vector.load %arg3[%7, %c0_0, %c0_1, %c0_2] : memref<3x1x8x256xf32, #tpu.memory_space<vmem>>, vector<1x1x8x256xf32>
    %9 = vector.shape_cast %8 : vector<1x1x8x256xf32> to vector<8x256xf32>
    %c0_3 = arith.constant 0 : index
    %c0_4 = arith.constant 0 : index
    %c0_5 = arith.constant 0 : index
    %10 = vector.load %arg6[%c0_3, %c0_4, %c0_5] : memref<3x8x208xbf16, #tpu.memory_space<vmem>>, vector<1x8x208xbf16>
    %11 = vector.shape_cast %10 : vector<1x8x208xbf16> to vector<8x208xbf16>
    %c0_6 = arith.constant 0 : index
    %c0_7 = arith.constant 0 : index
    %c0_8 = arith.constant 0 : index
    %12 = vector.load %arg5[%c0_6, %c0_7, %c0_8] : memref<25x8x256xf32, #tpu.memory_space<vmem>>, vector<1x8x256xf32>
    %13 = vector.shape_cast %12 : vector<1x8x256xf32> to vector<8x256xf32>
    %c34_i32 = arith.constant 34 : i32
    %14 = tpu.dynamic_rotate %9 by %c34_i32 dim 1 : vector<8x256xf32>, i32 -> vector<8x256xf32>
    %15 = arith.mulf %14, %13 : vector<8x256xf32>
    %16 = arith.truncf %15 : vector<8x256xf32> to vector<8x256xbf16>
    %c0_9 = arith.constant 0 : index
    %c0_10 = arith.constant 0 : index
    %17 = vector.load %arg12[%c0_9, %c0_10] : memref<408x256xbf16, #tpu.memory_space<vmem>>, vector<8x256xbf16>
    tpu.vector_store %arg12[%c0_9, %c0_10], %16 {strides = array<i32>} : memref<408x256xbf16, #tpu.memory_space<vmem>>, vector<8x256xbf16>,
    %c1 = arith.constant 1 : index
    %c0_11 = arith.constant 0 : index
    %c0_12 = arith.constant 0 : index
    %18 = vector.load %arg5[%c1, %c0_11, %c0_12] : memref<25x8x256xf32, #tpu.memory_space<vmem>>, vector<1x8x256xf32>
    %19 = vector.shape_cast %18 : vector<1x8x256xf32> to vector<8x256xf32>
    %c33_i32 = arith.constant 33 : i32
    %20 = tpu.dynamic_rotate %9 by %c33_i32 dim 1 : vector<8x256xf32>, i32 -> vector<8x256xf32>
    %21 = arith.mulf %20, %19 : vector<8x256xf32>
    %22 = arith.truncf %21 : vector<8x256xf32> to vector<8x256xbf16>
    %c8 = arith.constant 8 : index
    %c0_13 = arith.constant 0 : index
    %23 = vector.load %arg12[%c8, %c0_13] : memref<408x256xbf16, #tpu.memory_space<vmem>>, vector<8x256xbf16>
    tpu.vector_store %arg12[%c8, %c0_13], %22 {strides = array<i32>} : memref<408x256xbf16, #tpu.memory_space<vmem>>, vector<8x256xbf16>,
    %c2 = arith.constant 2 : index
    %c0_14 = arith.constant 0 : index
    %c0_15 = arith.constant 0 : index
    %24 = vector.load %arg5[%c2, %c0_14, %c0_15] : memref<25x8x256xf32, #tpu.memory_space<vmem>>, vector<1x8x256xf32>
    %25 = vector.shape_cast %24 : vector<1x8x256xf32> to vector<8x256xf32>
    %c32_i32 = arith.constant 32 : i32
    %26 = tpu.dynamic_rotate %9 by %c32_i32 dim 1 : vector<8x256xf32>, i32 -> vector<8x256xf32>
    %27 = arith.mulf %26, %25 : vector<8x256xf32>
    %28 = arith.truncf %27 : vector<8x256xf32> to vector<8x256xbf16>
    %c16 = arith.constant 16 : index
    %c0_16 = arith.constant 0 : index
    %29 = vector.load %arg12[%c16, %c0_16] : memref<408x256xbf16, #tpu.memory_space<vmem>>, vector<8x256xbf16>
    tpu.vector_store %arg12[%c16, %c0_16], %28 {strides = array<i32>} : memref<408x256xbf16, #tpu.memory_space<vmem>>, vector<8x256xbf16>,
    %c3 = arith.constant 3 : index
    %c0_17 = arith.constant 0 : index
    %c0_18 = arith.constant 0 : index
    %30 = vector.load %arg5[%c3, %c0_17, %c0_18] : memref<25x8x256xf32, #tpu.memory_space<vmem>>, vector<1x8x256xf32>
    %31 = vector.shape_cast %30 : vector<1x8x256xf32> to vector<8x256xf32>
    %c31_i32 = arith.constant 31 : i32
    %32 = tpu.dynamic_rotate %9 by %c31_i32 dim 1 : vector<8x256xf32>, i32 -> vector<8x256xf32>
    %33 = arith.mulf %32, %31 : vector<8x256xf32>
    %34 = arith.truncf %33 : vector<8x256xf32> to vector<8x256xbf16>
    %c24 = arith.constant 24 : index
    %c0_19 = arith.constant 0 : index
    %35 = vector.load %arg12[%c24, %c0_19] : memref<408x256xbf16, #tpu.memory_space<vmem>>, vector<8x256xbf16>
    tpu.vector_store %arg12[%c24, %c0_19], %34 {strides = array<i32>} : memref<408x256xbf16, #tpu.memory_space<vmem>>, vector<8x256xbf16>,
    %c4 = arith.constant 4 : index
    %c0_20 = arith.constant 0 : index
    %c0_21 = arith.constant 0 : index
    %36 = vector.load %arg5[%c4, %c0_20, %c0_21] : memref<25x8x256xf32, #tpu.memory_space<vmem>>, vector<1x8x256xf32>
    %37 = vector.shape_cast %36 : vector<1x8x256xf32> to vector<8x256xf32>
    %c30_i32 = arith.constant 30 : i32
    %38 = tpu.dynamic_rotate %9 by %c30_i32 dim 1 : vector<8x256xf32>, i32 -> vector<8x256xf32>
    %39 = arith.mulf %38, %37 : vector<8x256xf32>
    %40 = arith.truncf %39 : vector<8x256xf32> to vector<8x256xbf16>
    %c32 = arith.constant 32 : index
    %c0_22 = arith.constant 0 : index
    %41 = vector.load %arg12[%c32, %c0_22] : memref<408x256xbf16, #tpu.memory_space<vmem>>, vector<8x256xbf16>
    tpu.vector_store %arg12[%c32, %c0_22], %40 {strides = array<i32>} : memref<408x256xbf16, #tpu.memory_space<vmem>>, vector<8x256xbf16>,
    %c5 = arith.constant 5 : index
    %c0_23 = arith.constant 0 : index
    %c0_24 = arith.constant 0 : index
    %42 = vector.load %arg5[%c5, %c0_23, %c0_24] : memref<25x8x256xf32, #tpu.memory_space<vmem>>, vector<1x8x256xf32>
    %43 = vector.shape_cast %42 : vector<1x8x256xf32> to vector<8x256xf32>
    %c18_i32 = arith.constant 18 : i32
    %44 = tpu.dynamic_rotate %9 by %c18_i32 dim 1 : vector<8x256xf32>, i32 -> vector<8x256xf32>
    %45 = arith.mulf %44, %43 : vector<8x256xf32>
    %46 = arith.truncf %45 : vector<8x256xf32> to vector<8x256xbf16>
    %c40 = arith.constant 40 : index
    %c0_25 = arith.constant 0 : index
    %47 = vector.load %arg12[%c40, %c0_25] : memref<408x256xbf16, #tpu.memory_space<vmem>>, vector<8x256xbf16>
    tpu.vector_store %arg12[%c40, %c0_25], %46 {strides = array<i32>} : memref<408x256xbf16, #tpu.memory_space<vmem>>, vector<8x256xbf16>,
    %c6 = arith.constant 6 : index
    %c0_26 = arith.constant 0 : index
    %c0_27 = arith.constant 0 : index
    %48 = vector.load %arg5[%c6, %c0_26, %c0_27] : memref<25x8x256xf32, #tpu.memory_space<vmem>>, vector<1x8x256xf32>
    %49 = vector.shape_cast %48 : vector<1x8x256xf32> to vector<8x256xf32>
    %c17_i32 = arith.constant 17 : i32
    %50 = tpu.dynamic_rotate %9 by %c17_i32 dim 1 : vector<8x256xf32>, i32 -> vector<8x256xf32>
    %51 = arith.mulf %50, %49 : vector<8x256xf32>
    %52 = arith.truncf %51 : vector<8x256xf32> to vector<8x256xbf16>
    %c48 = arith.constant 48 : index
    %c0_28 = arith.constant 0 : index
    %53 = vector.load %arg12[%c48, %c0_28] : memref<408x256xbf16, #tpu.memory_space<vmem>>, vector<8x256xbf16>
    tpu.vector_store %arg12[%c48, %c0_28], %52 {strides = array<i32>} : memref<408x256xbf16, #tpu.memory_space<vmem>>, vector<8x256xbf16>,
    %c7 = arith.constant 7 : index
    %c0_29 = arith.constant 0 : index
    %c0_30 = arith.constant 0 : index
    %54 = vector.load %arg5[%c7, %c0_29, %c0_30] : memref<25x8x256xf32, #tpu.memory_space<vmem>>, vector<1x8x256xf32>
    %55 = vector.shape_cast %54 : vector<1x8x256xf32> to vector<8x256xf32>
    %c16_i32 = arith.constant 16 : i32
    %56 = tpu.dynamic_rotate %9 by %c16_i32 dim 1 : vector<8x256xf32>, i32 -> vector<8x256xf32>
    %57 = arith.mulf %56, %55 : vector<8x256xf32>
    %58 = arith.truncf %57 : vector<8x256xf32> to vector<8x256xbf16>
    %c56 = arith.constant 56 : index
    %c0_31 = arith.constant 0 : index
    %59 = vector.load %arg12[%c56, %c0_31] : memref<408x256xbf16, #tpu.memory_space<vmem>>, vector<8x256xbf16>
    tpu.vector_store %arg12[%c56, %c0_31], %58 {strides = array<i32>} : memref<408x256xbf16, #tpu.memory_space<vmem>>, vector<8x256xbf16>,
    %c8_32 = arith.constant 8 : index
    %c0_33 = arith.constant 0 : index
    %c0_34 = arith.constant 0 : index
    %60 = vector.load %arg5[%c8_32, %c0_33, %c0_34] : memref<25x8x256xf32, #tpu.memory_space<vmem>>, vector<1x8x256xf32>
    %61 = vector.shape_cast %60 : vector<1x8x256xf32> to vector<8x256xf32>
    %c15_i32 = arith.constant 15 : i32
    %62 = tpu.dynamic_rotate %9 by %c15_i32 dim 1 : vector<8x256xf32>, i32 -> vector<8x256xf32>
    %63 = arith.mulf %62, %61 : vector<8x256xf32>
    %64 = arith.truncf %63 : vector<8x256xf32> to vector<8x256xbf16>
    %c64 = arith.constant 64 : index
    %c0_35 = arith.constant 0 : index
    %65 = vector.load %arg12[%c64, %c0_35] : memref<408x256xbf16, #tpu.memory_space<vmem>>, vector<8x256xbf16>
    tpu.vector_store %arg12[%c64, %c0_35], %64 {strides = array<i32>} : memref<408x256xbf16, #tpu.memory_space<vmem>>, vector<8x256xbf16>,
    %c9 = arith.constant 9 : index
    %c0_36 = arith.constant 0 : index
    %c0_37 = arith.constant 0 : index
    %66 = vector.load %arg5[%c9, %c0_36, %c0_37] : memref<25x8x256xf32, #tpu.memory_space<vmem>>, vector<1x8x256xf32>
    %67 = vector.shape_cast %66 : vector<1x8x256xf32> to vector<8x256xf32>
    %c14_i32 = arith.constant 14 : i32
    %68 = tpu.dynamic_rotate %9 by %c14_i32 dim 1 : vector<8x256xf32>, i32 -> vector<8x256xf32>
    %69 = arith.mulf %68, %67 : vector<8x256xf32>
    %70 = arith.truncf %69 : vector<8x256xf32> to vector<8x256xbf16>
    %c72 = arith.constant 72 : index
    %c0_38 = arith.constant 0 : index
    %71 = vector.load %arg12[%c72, %c0_38] : memref<408x256xbf16, #tpu.memory_space<vmem>>, vector<8x256xbf16>
    tpu.vector_store %arg12[%c72, %c0_38], %70 {strides = array<i32>} : memref<408x256xbf16, #tpu.memory_space<vmem>>, vector<8x256xbf16>,
    %c10 = arith.constant 10 : index
    %c0_39 = arith.constant 0 : index
    %c0_40 = arith.constant 0 : index
    %72 = vector.load %arg5[%c10, %c0_39, %c0_40] : memref<25x8x256xf32, #tpu.memory_space<vmem>>, vector<1x8x256xf32>
    %73 = vector.shape_cast %72 : vector<1x8x256xf32> to vector<8x256xf32>
    %c2_i32 = arith.constant 2 : i32
    %74 = tpu.dynamic_rotate %9 by %c2_i32 dim 1 : vector<8x256xf32>, i32 -> vector<8x256xf32>
    %75 = arith.mulf %74, %73 : vector<8x256xf32>
    %76 = arith.truncf %75 : vector<8x256xf32> to vector<8x256xbf16>
    %c80 = arith.constant 80 : index
    %c0_41 = arith.constant 0 : index
    %77 = vector.load %arg12[%c80, %c0_41] : memref<408x256xbf16, #tpu.memory_space<vmem>>, vector<8x256xbf16>
    tpu.vector_store %arg12[%c80, %c0_41], %76 {strides = array<i32>} : memref<408x256xbf16, #tpu.memory_space<vmem>>, vector<8x256xbf16>,
    %c11 = arith.constant 11 : index
    %c0_42 = arith.constant 0 : index
    %c0_43 = arith.constant 0 : index
    %78 = vector.load %arg5[%c11, %c0_42, %c0_43] : memref<25x8x256xf32, #tpu.memory_space<vmem>>, vector<1x8x256xf32>
    %79 = vector.shape_cast %78 : vector<1x8x256xf32> to vector<8x256xf32>
    %c1_i32 = arith.constant 1 : i32
    %80 = tpu.dynamic_rotate %9 by %c1_i32 dim 1 : vector<8x256xf32>, i32 -> vector<8x256xf32>
    %81 = arith.mulf %80, %79 : vector<8x256xf32>
    %82 = arith.truncf %81 : vector<8x256xf32> to vector<8x256xbf16>
    %c88 = arith.constant 88 : index
    %c0_44 = arith.constant 0 : index
    %83 = vector.load %arg12[%c88, %c0_44] : memref<408x256xbf16, #tpu.memory_space<vmem>>, vector<8x256xbf16>
    tpu.vector_store %arg12[%c88, %c0_44], %82 {strides = array<i32>} : memref<408x256xbf16, #tpu.memory_space<vmem>>, vector<8x256xbf16>,
    %84 = arith.truncf %9 : vector<8x256xf32> to vector<8x256xbf16>
    %c96 = arith.constant 96 : index
    %c0_45 = arith.constant 0 : index
    %85 = vector.load %arg12[%c96, %c0_45] : memref<408x256xbf16, #tpu.memory_space<vmem>>, vector<8x256xbf16>
    tpu.vector_store %arg12[%c96, %c0_45], %84 {strides = array<i32>} : memref<408x256xbf16, #tpu.memory_space<vmem>>, vector<8x256xbf16>,
    %c13 = arith.constant 13 : index
    %c0_46 = arith.constant 0 : index
    %c0_47 = arith.constant 0 : index
    %86 = vector.load %arg5[%c13, %c0_46, %c0_47] : memref<25x8x256xf32, #tpu.memory_space<vmem>>, vector<1x8x256xf32>
    %87 = vector.shape_cast %86 : vector<1x8x256xf32> to vector<8x256xf32>
    %c255_i32 = arith.constant 255 : i32
    %88 = tpu.dynamic_rotate %9 by %c255_i32 dim 1 : vector<8x256xf32>, i32 -> vector<8x256xf32>
    %89 = arith.mulf %88, %87 : vector<8x256xf32>
    %90 = arith.truncf %89 : vector<8x256xf32> to vector<8x256xbf16>
    %c104 = arith.constant 104 : index
    %c0_48 = arith.constant 0 : index
    %91 = vector.load %arg12[%c104, %c0_48] : memref<408x256xbf16, #tpu.memory_space<vmem>>, vector<8x256xbf16>
    tpu.vector_store %arg12[%c104, %c0_48], %90 {strides = array<i32>} : memref<408x256xbf16, #tpu.memory_space<vmem>>, vector<8x256xbf16>,
    %c14 = arith.constant 14 : index
    %c0_49 = arith.constant 0 : index
    %c0_50 = arith.constant 0 : index
    %92 = vector.load %arg5[%c14, %c0_49, %c0_50] : memref<25x8x256xf32, #tpu.memory_space<vmem>>, vector<1x8x256xf32>
    %93 = vector.shape_cast %92 : vector<1x8x256xf32> to vector<8x256xf32>
    %c254_i32 = arith.constant 254 : i32
    %94 = tpu.dynamic_rotate %9 by %c254_i32 dim 1 : vector<8x256xf32>, i32 -> vector<8x256xf32>
    %95 = arith.mulf %94, %93 : vector<8x256xf32>
    %96 = arith.truncf %95 : vector<8x256xf32> to vector<8x256xbf16>
    %c112 = arith.constant 112 : index
    %c0_51 = arith.constant 0 : index
    %97 = vector.load %arg12[%c112, %c0_51] : memref<408x256xbf16, #tpu.memory_space<vmem>>, vector<8x256xbf16>
    tpu.vector_store %arg12[%c112, %c0_51], %96 {strides = array<i32>} : memref<408x256xbf16, #tpu.memory_space<vmem>>, vector<8x256xbf16>,
    %c15 = arith.constant 15 : index
    %c0_52 = arith.constant 0 : index
    %c0_53 = arith.constant 0 : index
    %98 = vector.load %arg5[%c15, %c0_52, %c0_53] : memref<25x8x256xf32, #tpu.memory_space<vmem>>, vector<1x8x256xf32>
    %99 = vector.shape_cast %98 : vector<1x8x256xf32> to vector<8x256xf32>
    %c242_i32 = arith.constant 242 : i32
    %100 = tpu.dynamic_rotate %9 by %c242_i32 dim 1 : vector<8x256xf32>, i32 -> vector<8x256xf32>
    %101 = arith.mulf %100, %99 : vector<8x256xf32>
    %102 = arith.truncf %101 : vector<8x256xf32> to vector<8x256xbf16>
    %c120 = arith.constant 120 : index
    %c0_54 = arith.constant 0 : index
    %103 = vector.load %arg12[%c120, %c0_54] : memref<408x256xbf16, #tpu.memory_space<vmem>>, vector<8x256xbf16>
    tpu.vector_store %arg12[%c120, %c0_54], %102 {strides = array<i32>} : memref<408x256xbf16, #tpu.memory_space<vmem>>, vector<8x256xbf16>,
    %c16_55 = arith.constant 16 : index
    %c0_56 = arith.constant 0 : index
    %c0_57 = arith.constant 0 : index
    %104 = vector.load %arg5[%c16_55, %c0_56, %c0_57] : memref<25x8x256xf32, #tpu.memory_space<vmem>>, vector<1x8x256xf32>
    %105 = vector.shape_cast %104 : vector<1x8x256xf32> to vector<8x256xf32>
    %c241_i32 = arith.constant 241 : i32
    %106 = tpu.dynamic_rotate %9 by %c241_i32 dim 1 : vector<8x256xf32>, i32 -> vector<8x256xf32>
    %107 = arith.mulf %106, %105 : vector<8x256xf32>
    %108 = arith.truncf %107 : vector<8x256xf32> to vector<8x256xbf16>
    %c128 = arith.constant 128 : index
    %c0_58 = arith.constant 0 : index
    %109 = vector.load %arg12[%c128, %c0_58] : memref<408x256xbf16, #tpu.memory_space<vmem>>, vector<8x256xbf16>
    tpu.vector_store %arg12[%c128, %c0_58], %108 {strides = array<i32>} : memref<408x256xbf16, #tpu.memory_space<vmem>>, vector<8x256xbf16>,
    %c17 = arith.constant 17 : index
    %c0_59 = arith.constant 0 : index
    %c0_60 = arith.constant 0 : index
    %110 = vector.load %arg5[%c17, %c0_59, %c0_60] : memref<25x8x256xf32, #tpu.memory_space<vmem>>, vector<1x8x256xf32>
    %111 = vector.shape_cast %110 : vector<1x8x256xf32> to vector<8x256xf32>
    %c240_i32 = arith.constant 240 : i32
    %112 = tpu.dynamic_rotate %9 by %c240_i32 dim 1 : vector<8x256xf32>, i32 -> vector<8x256xf32>
    %113 = arith.mulf %112, %111 : vector<8x256xf32>
    %114 = arith.truncf %113 : vector<8x256xf32> to vector<8x256xbf16>
    %c136 = arith.constant 136 : index
    %c0_61 = arith.constant 0 : index
    %115 = vector.load %arg12[%c136, %c0_61] : memref<408x256xbf16, #tpu.memory_space<vmem>>, vector<8x256xbf16>
    tpu.vector_store %arg12[%c136, %c0_61], %114 {strides = array<i32>} : memref<408x256xbf16, #tpu.memory_space<vmem>>, vector<8x256xbf16>,
    %c18 = arith.constant 18 : index
    %c0_62 = arith.constant 0 : index
    %c0_63 = arith.constant 0 : index
    %116 = vector.load %arg5[%c18, %c0_62, %c0_63] : memref<25x8x256xf32, #tpu.memory_space<vmem>>, vector<1x8x256xf32>
    %117 = vector.shape_cast %116 : vector<1x8x256xf32> to vector<8x256xf32>
    %c239_i32 = arith.constant 239 : i32
    %118 = tpu.dynamic_rotate %9 by %c239_i32 dim 1 : vector<8x256xf32>, i32 -> vector<8x256xf32>
    %119 = arith.mulf %118, %117 : vector<8x256xf32>
    %120 = arith.truncf %119 : vector<8x256xf32> to vector<8x256xbf16>
    %c144 = arith.constant 144 : index
    %c0_64 = arith.constant 0 : index
    %121 = vector.load %arg12[%c144, %c0_64] : memref<408x256xbf16, #tpu.memory_space<vmem>>, vector<8x256xbf16>
    tpu.vector_store %arg12[%c144, %c0_64], %120 {strides = array<i32>} : memref<408x256xbf16, #tpu.memory_space<vmem>>, vector<8x256xbf16>,
    %c19 = arith.constant 19 : index
    %c0_65 = arith.constant 0 : index
    %c0_66 = arith.constant 0 : index
    %122 = vector.load %arg5[%c19, %c0_65, %c0_66] : memref<25x8x256xf32, #tpu.memory_space<vmem>>, vector<1x8x256xf32>
    %123 = vector.shape_cast %122 : vector<1x8x256xf32> to vector<8x256xf32>
    %c238_i32 = arith.constant 238 : i32
    %124 = tpu.dynamic_rotate %9 by %c238_i32 dim 1 : vector<8x256xf32>, i32 -> vector<8x256xf32>
    %125 = arith.mulf %124, %123 : vector<8x256xf32>
    %126 = arith.truncf %125 : vector<8x256xf32> to vector<8x256xbf16>
    %c152 = arith.constant 152 : index
    %c0_67 = arith.constant 0 : index
    %127 = vector.load %arg12[%c152, %c0_67] : memref<408x256xbf16, #tpu.memory_space<vmem>>, vector<8x256xbf16>
    tpu.vector_store %arg12[%c152, %c0_67], %126 {strides = array<i32>} : memref<408x256xbf16, #tpu.memory_space<vmem>>, vector<8x256xbf16>,
    %c20 = arith.constant 20 : index
    %c0_68 = arith.constant 0 : index
    %c0_69 = arith.constant 0 : index
    %128 = vector.load %arg5[%c20, %c0_68, %c0_69] : memref<25x8x256xf32, #tpu.memory_space<vmem>>, vector<1x8x256xf32>
    %129 = vector.shape_cast %128 : vector<1x8x256xf32> to vector<8x256xf32>
    %c226_i32 = arith.constant 226 : i32
    %130 = tpu.dynamic_rotate %9 by %c226_i32 dim 1 : vector<8x256xf32>, i32 -> vector<8x256xf32>
    %131 = arith.mulf %130, %129 : vector<8x256xf32>
    %132 = arith.truncf %131 : vector<8x256xf32> to vector<8x256xbf16>
    %c160 = arith.constant 160 : index
    %c0_70 = arith.constant 0 : index
    %133 = vector.load %arg12[%c160, %c0_70] : memref<408x256xbf16, #tpu.memory_space<vmem>>, vector<8x256xbf16>
    tpu.vector_store %arg12[%c160, %c0_70], %132 {strides = array<i32>} : memref<408x256xbf16, #tpu.memory_space<vmem>>, vector<8x256xbf16>,
    %c21 = arith.constant 21 : index
    %c0_71 = arith.constant 0 : index
    %c0_72 = arith.constant 0 : index
    %134 = vector.load %arg5[%c21, %c0_71, %c0_72] : memref<25x8x256xf32, #tpu.memory_space<vmem>>, vector<1x8x256xf32>
    %135 = vector.shape_cast %134 : vector<1x8x256xf32> to vector<8x256xf32>
    %c225_i32 = arith.constant 225 : i32
    %136 = tpu.dynamic_rotate %9 by %c225_i32 dim 1 : vector<8x256xf32>, i32 -> vector<8x256xf32>
    %137 = arith.mulf %136, %135 : vector<8x256xf32>
    %138 = arith.truncf %137 : vector<8x256xf32> to vector<8x256xbf16>
    %c168 = arith.constant 168 : index
    %c0_73 = arith.constant 0 : index
    %139 = vector.load %arg12[%c168, %c0_73] : memref<408x256xbf16, #tpu.memory_space<vmem>>, vector<8x256xbf16>
    tpu.vector_store %arg12[%c168, %c0_73], %138 {strides = array<i32>} : memref<408x256xbf16, #tpu.memory_space<vmem>>, vector<8x256xbf16>,
    %c22 = arith.constant 22 : index
    %c0_74 = arith.constant 0 : index
    %c0_75 = arith.constant 0 : index
    %140 = vector.load %arg5[%c22, %c0_74, %c0_75] : memref<25x8x256xf32, #tpu.memory_space<vmem>>, vector<1x8x256xf32>
    %141 = vector.shape_cast %140 : vector<1x8x256xf32> to vector<8x256xf32>
    %c224_i32 = arith.constant 224 : i32
    %142 = tpu.dynamic_rotate %9 by %c224_i32 dim 1 : vector<8x256xf32>, i32 -> vector<8x256xf32>
    %143 = arith.mulf %142, %141 : vector<8x256xf32>
    %144 = arith.truncf %143 : vector<8x256xf32> to vector<8x256xbf16>
    %c176 = arith.constant 176 : index
    %c0_76 = arith.constant 0 : index
    %145 = vector.load %arg12[%c176, %c0_76] : memref<408x256xbf16, #tpu.memory_space<vmem>>, vector<8x256xbf16>
    tpu.vector_store %arg12[%c176, %c0_76], %144 {strides = array<i32>} : memref<408x256xbf16, #tpu.memory_space<vmem>>, vector<8x256xbf16>,
    %c23 = arith.constant 23 : index
    %c0_77 = arith.constant 0 : index
    %c0_78 = arith.constant 0 : index
    %146 = vector.load %arg5[%c23, %c0_77, %c0_78] : memref<25x8x256xf32, #tpu.memory_space<vmem>>, vector<1x8x256xf32>
    %147 = vector.shape_cast %146 : vector<1x8x256xf32> to vector<8x256xf32>
    %c223_i32 = arith.constant 223 : i32
    %148 = tpu.dynamic_rotate %9 by %c223_i32 dim 1 : vector<8x256xf32>, i32 -> vector<8x256xf32>
    %149 = arith.mulf %148, %147 : vector<8x256xf32>
    %150 = arith.truncf %149 : vector<8x256xf32> to vector<8x256xbf16>
    %c184 = arith.constant 184 : index
    %c0_79 = arith.constant 0 : index
    %151 = vector.load %arg12[%c184, %c0_79] : memref<408x256xbf16, #tpu.memory_space<vmem>>, vector<8x256xbf16>
    tpu.vector_store %arg12[%c184, %c0_79], %150 {strides = array<i32>} : memref<408x256xbf16, #tpu.memory_space<vmem>>, vector<8x256xbf16>,
    %c24_80 = arith.constant 24 : index
    %c0_81 = arith.constant 0 : index
    %c0_82 = arith.constant 0 : index
    %152 = vector.load %arg5[%c24_80, %c0_81, %c0_82] : memref<25x8x256xf32, #tpu.memory_space<vmem>>, vector<1x8x256xf32>
    %153 = vector.shape_cast %152 : vector<1x8x256xf32> to vector<8x256xf32>
    %c222_i32 = arith.constant 222 : i32
    %154 = tpu.dynamic_rotate %9 by %c222_i32 dim 1 : vector<8x256xf32>, i32 -> vector<8x256xf32>
    %155 = arith.mulf %154, %153 : vector<8x256xf32>
    %156 = arith.truncf %155 : vector<8x256xf32> to vector<8x256xbf16>
    %c192 = arith.constant 192 : index
    %c0_83 = arith.constant 0 : index
    %157 = vector.load %arg12[%c192, %c0_83] : memref<408x256xbf16, #tpu.memory_space<vmem>>, vector<8x256xbf16>
    tpu.vector_store %arg12[%c192, %c0_83], %156 {strides = array<i32>} : memref<408x256xbf16, #tpu.memory_space<vmem>>, vector<8x256xbf16>,
    %c200 = arith.constant 200 : index
    %c0_84 = arith.constant 0 : index
    %158 = vector.load %arg12[%c200, %c0_84] : memref<408x256xbf16, #tpu.memory_space<vmem>>, vector<8x256xbf16>
    tpu.vector_store %arg12[%c200, %c0_84], %5 {strides = array<i32>} : memref<408x256xbf16, #tpu.memory_space<vmem>>, vector<8x256xbf16>,
    %c0_85 = arith.constant 0 : index
    %c0_86 = arith.constant 0 : index
    %159 = vector.load %arg12[%c0_85, %c0_86] : memref<408x256xbf16, #tpu.memory_space<vmem>>, vector<208x256xbf16>
    %cst = arith.constant dense<0.000000e+00> : vector<8x256xf32>
    %160 = tpu.matmul %11, %159, %cst {dimension_numbers = #tpu.dot_dimension_numbers<[1], [0], [0], [1], [0, 0, 1, 1], [], []>} : vector<8x208xbf16>, vector<208x256xbf16>, vector<8x256xf32> -> vector<8x256xf32>
    %c1_87 = arith.constant 1 : index
    %161 = memref.load %arg1[%c1_87] : memref<4xi32, #tpu.memory_space<smem>>
    %162 = arith.index_cast %161 : i32 to index
    %c0_88 = arith.constant 0 : index
    %c0_89 = arith.constant 0 : index
    %c0_90 = arith.constant 0 : index
    %163 = vector.load %arg3[%162, %c0_88, %c0_89, %c0_90] : memref<3x1x8x256xf32, #tpu.memory_space<vmem>>, vector<1x1x8x256xf32>
    %164 = vector.shape_cast %163 : vector<1x1x8x256xf32> to vector<8x256xf32>
    %c1_91 = arith.constant 1 : index
    %c0_92 = arith.constant 0 : index
    %c0_93 = arith.constant 0 : index
    %165 = vector.load %arg6[%c1_91, %c0_92, %c0_93] : memref<3x8x208xbf16, #tpu.memory_space<vmem>>, vector<1x8x208xbf16>
    %166 = vector.shape_cast %165 : vector<1x8x208xbf16> to vector<8x208xbf16>
    %c0_94 = arith.constant 0 : index
    %c0_95 = arith.constant 0 : index
    %c0_96 = arith.constant 0 : index
    %167 = vector.load %arg5[%c0_94, %c0_95, %c0_96] : memref<25x8x256xf32, #tpu.memory_space<vmem>>, vector<1x8x256xf32>
    %168 = vector.shape_cast %167 : vector<1x8x256xf32> to vector<8x256xf32>
    %c34_i32_97 = arith.constant 34 : i32
    %169 = tpu.dynamic_rotate %164 by %c34_i32_97 dim 1 : vector<8x256xf32>, i32 -> vector<8x256xf32>
    %170 = arith.mulf %169, %168 : vector<8x256xf32>
    %171 = arith.truncf %170 : vector<8x256xf32> to vector<8x256xbf16>
    %c0_98 = arith.constant 0 : index
    %c0_99 = arith.constant 0 : index
    %172 = vector.load %arg13[%c0_98, %c0_99] : memref<408x256xbf16, #tpu.memory_space<vmem>>, vector<8x256xbf16>
    tpu.vector_store %arg13[%c0_98, %c0_99], %171 {strides = array<i32>} : memref<408x256xbf16, #tpu.memory_space<vmem>>, vector<8x256xbf16>,
    %c1_100 = arith.constant 1 : index
    %c0_101 = arith.constant 0 : index
    %c0_102 = arith.constant 0 : index
    %173 = vector.load %arg5[%c1_100, %c0_101, %c0_102] : memref<25x8x256xf32, #tpu.memory_space<vmem>>, vector<1x8x256xf32>
    %174 = vector.shape_cast %173 : vector<1x8x256xf32> to vector<8x256xf32>
    %c33_i32_103 = arith.constant 33 : i32
    %175 = tpu.dynamic_rotate %164 by %c33_i32_103 dim 1 : vector<8x256xf32>, i32 -> vector<8x256xf32>
    %176 = arith.mulf %175, %174 : vector<8x256xf32>
    %177 = arith.truncf %176 : vector<8x256xf32> to vector<8x256xbf16>
    %c8_104 = arith.constant 8 : index
    %c0_105 = arith.constant 0 : index
    %178 = vector.load %arg13[%c8_104, %c0_105] : memref<408x256xbf16, #tpu.memory_space<vmem>>, vector<8x256xbf16>
    tpu.vector_store %arg13[%c8_104, %c0_105], %177 {strides = array<i32>} : memref<408x256xbf16, #tpu.memory_space<vmem>>, vector<8x256xbf16>,
    %c2_106 = arith.constant 2 : index
    %c0_107 = arith.constant 0 : index
    %c0_108 = arith.constant 0 : index
    %179 = vector.load %arg5[%c2_106, %c0_107, %c0_108] : memref<25x8x256xf32, #tpu.memory_space<vmem>>, vector<1x8x256xf32>
    %180 = vector.shape_cast %179 : vector<1x8x256xf32> to vector<8x256xf32>
    %c32_i32_109 = arith.constant 32 : i32
    %181 = tpu.dynamic_rotate %164 by %c32_i32_109 dim 1 : vector<8x256xf32>, i32 -> vector<8x256xf32>
    %182 = arith.mulf %181, %180 : vector<8x256xf32>
    %183 = arith.truncf %182 : vector<8x256xf32> to vector<8x256xbf16>
    %c16_110 = arith.constant 16 : index
    %c0_111 = arith.constant 0 : index
    %184 = vector.load %arg13[%c16_110, %c0_111] : memref<408x256xbf16, #tpu.memory_space<vmem>>, vector<8x256xbf16>
    tpu.vector_store %arg13[%c16_110, %c0_111], %183 {strides = array<i32>} : memref<408x256xbf16, #tpu.memory_space<vmem>>, vector<8x256xbf16>,
    %c3_112 = arith.constant 3 : index
    %c0_113 = arith.constant 0 : index
    %c0_114 = arith.constant 0 : index
    %185 = vector.load %arg5[%c3_112, %c0_113, %c0_114] : memref<25x8x256xf32, #tpu.memory_space<vmem>>, vector<1x8x256xf32>
    %186 = vector.shape_cast %185 : vector<1x8x256xf32> to vector<8x256xf32>
    %c31_i32_115 = arith.constant 31 : i32
    %187 = tpu.dynamic_rotate %164 by %c31_i32_115 dim 1 : vector<8x256xf32>, i32 -> vector<8x256xf32>
    %188 = arith.mulf %187, %186 : vector<8x256xf32>
    %189 = arith.truncf %188 : vector<8x256xf32> to vector<8x256xbf16>
    %c24_116 = arith.constant 24 : index
    %c0_117 = arith.constant 0 : index
    %190 = vector.load %arg13[%c24_116, %c0_117] : memref<408x256xbf16, #tpu.memory_space<vmem>>, vector<8x256xbf16>
    tpu.vector_store %arg13[%c24_116, %c0_117], %189 {strides = array<i32>} : memref<408x256xbf16, #tpu.memory_space<vmem>>, vector<8x256xbf16>,
    %c4_118 = arith.constant 4 : index
    %c0_119 = arith.constant 0 : index
    %c0_120 = arith.constant 0 : index
    %191 = vector.load %arg5[%c4_118, %c0_119, %c0_120] : memref<25x8x256xf32, #tpu.memory_space<vmem>>, vector<1x8x256xf32>
    %192 = vector.shape_cast %191 : vector<1x8x256xf32> to vector<8x256xf32>
    %c30_i32_121 = arith.constant 30 : i32
    %193 = tpu.dynamic_rotate %164 by %c30_i32_121 dim 1 : vector<8x256xf32>, i32 -> vector<8x256xf32>
    %194 = arith.mulf %193, %192 : vector<8x256xf32>
    %195 = arith.truncf %194 : vector<8x256xf32> to vector<8x256xbf16>
    %c32_122 = arith.constant 32 : index
    %c0_123 = arith.constant 0 : index
    %196 = vector.load %arg13[%c32_122, %c0_123] : memref<408x256xbf16, #tpu.memory_space<vmem>>, vector<8x256xbf16>
    tpu.vector_store %arg13[%c32_122, %c0_123], %195 {strides = array<i32>} : memref<408x256xbf16, #tpu.memory_space<vmem>>, vector<8x256xbf16>,
    %c5_124 = arith.constant 5 : index
    %c0_125 = arith.constant 0 : index
    %c0_126 = arith.constant 0 : index
    %197 = vector.load %arg5[%c5_124, %c0_125, %c0_126] : memref<25x8x256xf32, #tpu.memory_space<vmem>>, vector<1x8x256xf32>
    %198 = vector.shape_cast %197 : vector<1x8x256xf32> to vector<8x256xf32>
    %c18_i32_127 = arith.constant 18 : i32
    %199 = tpu.dynamic_rotate %164 by %c18_i32_127 dim 1 : vector<8x256xf32>, i32 -> vector<8x256xf32>
    %200 = arith.mulf %199, %198 : vector<8x256xf32>
    %201 = arith.truncf %200 : vector<8x256xf32> to vector<8x256xbf16>
    %c40_128 = arith.constant 40 : index
    %c0_129 = arith.constant 0 : index
    %202 = vector.load %arg13[%c40_128, %c0_129] : memref<408x256xbf16, #tpu.memory_space<vmem>>, vector<8x256xbf16>
    tpu.vector_store %arg13[%c40_128, %c0_129], %201 {strides = array<i32>} : memref<408x256xbf16, #tpu.memory_space<vmem>>, vector<8x256xbf16>,
    %c6_130 = arith.constant 6 : index
    %c0_131 = arith.constant 0 : index
    %c0_132 = arith.constant 0 : index
    %203 = vector.load %arg5[%c6_130, %c0_131, %c0_132] : memref<25x8x256xf32, #tpu.memory_space<vmem>>, vector<1x8x256xf32>
    %204 = vector.shape_cast %203 : vector<1x8x256xf32> to vector<8x256xf32>
    %c17_i32_133 = arith.constant 17 : i32
    %205 = tpu.dynamic_rotate %164 by %c17_i32_133 dim 1 : vector<8x256xf32>, i32 -> vector<8x256xf32>
    %206 = arith.mulf %205, %204 : vector<8x256xf32>
    %207 = arith.truncf %206 : vector<8x256xf32> to vector<8x256xbf16>
    %c48_134 = arith.constant 48 : index
    %c0_135 = arith.constant 0 : index
    %208 = vector.load %arg13[%c48_134, %c0_135] : memref<408x256xbf16, #tpu.memory_space<vmem>>, vector<8x256xbf16>
    tpu.vector_store %arg13[%c48_134, %c0_135], %207 {strides = array<i32>} : memref<408x256xbf16, #tpu.memory_space<vmem>>, vector<8x256xbf16>,
    %c7_136 = arith.constant 7 : index
    %c0_137 = arith.constant 0 : index
    %c0_138 = arith.constant 0 : index
    %209 = vector.load %arg5[%c7_136, %c0_137, %c0_138] : memref<25x8x256xf32, #tpu.memory_space<vmem>>, vector<1x8x256xf32>
    %210 = vector.shape_cast %209 : vector<1x8x256xf32> to vector<8x256xf32>
    %c16_i32_139 = arith.constant 16 : i32
    %211 = tpu.dynamic_rotate %164 by %c16_i32_139 dim 1 : vector<8x256xf32>, i32 -> vector<8x256xf32>
    %212 = arith.mulf %211, %210 : vector<8x256xf32>
    %213 = arith.truncf %212 : vector<8x256xf32> to vector<8x256xbf16>
    %c56_140 = arith.constant 56 : index
    %c0_141 = arith.constant 0 : index
    %214 = vector.load %arg13[%c56_140, %c0_141] : memref<408x256xbf16, #tpu.memory_space<vmem>>, vector<8x256xbf16>
    tpu.vector_store %arg13[%c56_140, %c0_141], %213 {strides = array<i32>} : memref<408x256xbf16, #tpu.memory_space<vmem>>, vector<8x256xbf16>,
    %c8_142 = arith.constant 8 : index
    %c0_143 = arith.constant 0 : index
    %c0_144 = arith.constant 0 : index
    %215 = vector.load %arg5[%c8_142, %c0_143, %c0_144] : memref<25x8x256xf32, #tpu.memory_space<vmem>>, vector<1x8x256xf32>
    %216 = vector.shape_cast %215 : vector<1x8x256xf32> to vector<8x256xf32>
    %c15_i32_145 = arith.constant 15 : i32
    %217 = tpu.dynamic_rotate %164 by %c15_i32_145 dim 1 : vector<8x256xf32>, i32 -> vector<8x256xf32>
    %218 = arith.mulf %217, %216 : vector<8x256xf32>
    %219 = arith.truncf %218 : vector<8x256xf32> to vector<8x256xbf16>
    %c64_146 = arith.constant 64 : index
    %c0_147 = arith.constant 0 : index
    %220 = vector.load %arg13[%c64_146, %c0_147] : memref<408x256xbf16, #tpu.memory_space<vmem>>, vector<8x256xbf16>
    tpu.vector_store %arg13[%c64_146, %c0_147], %219 {strides = array<i32>} : memref<408x256xbf16, #tpu.memory_space<vmem>>, vector<8x256xbf16>,
    %c9_148 = arith.constant 9 : index
    %c0_149 = arith.constant 0 : index
    %c0_150 = arith.constant 0 : index
    %221 = vector.load %arg5[%c9_148, %c0_149, %c0_150] : memref<25x8x256xf32, #tpu.memory_space<vmem>>, vector<1x8x256xf32>
    %222 = vector.shape_cast %221 : vector<1x8x256xf32> to vector<8x256xf32>
    %c14_i32_151 = arith.constant 14 : i32
    %223 = tpu.dynamic_rotate %164 by %c14_i32_151 dim 1 : vector<8x256xf32>, i32 -> vector<8x256xf32>
    %224 = arith.mulf %223, %222 : vector<8x256xf32>
    %225 = arith.truncf %224 : vector<8x256xf32> to vector<8x256xbf16>
    %c72_152 = arith.constant 72 : index
    %c0_153 = arith.constant 0 : index
    %226 = vector.load %arg13[%c72_152, %c0_153] : memref<408x256xbf16, #tpu.memory_space<vmem>>, vector<8x256xbf16>
    tpu.vector_store %arg13[%c72_152, %c0_153], %225 {strides = array<i32>} : memref<408x256xbf16, #tpu.memory_space<vmem>>, vector<8x256xbf16>,
    %c10_154 = arith.constant 10 : index
    %c0_155 = arith.constant 0 : index
    %c0_156 = arith.constant 0 : index
    %227 = vector.load %arg5[%c10_154, %c0_155, %c0_156] : memref<25x8x256xf32, #tpu.memory_space<vmem>>, vector<1x8x256xf32>
    %228 = vector.shape_cast %227 : vector<1x8x256xf32> to vector<8x256xf32>
    %c2_i32_157 = arith.constant 2 : i32
    %229 = tpu.dynamic_rotate %164 by %c2_i32_157 dim 1 : vector<8x256xf32>, i32 -> vector<8x256xf32>
    %230 = arith.mulf %229, %228 : vector<8x256xf32>
    %231 = arith.truncf %230 : vector<8x256xf32> to vector<8x256xbf16>
    %c80_158 = arith.constant 80 : index
    %c0_159 = arith.constant 0 : index
    %232 = vector.load %arg13[%c80_158, %c0_159] : memref<408x256xbf16, #tpu.memory_space<vmem>>, vector<8x256xbf16>
    tpu.vector_store %arg13[%c80_158, %c0_159], %231 {strides = array<i32>} : memref<408x256xbf16, #tpu.memory_space<vmem>>, vector<8x256xbf16>,
    %c11_160 = arith.constant 11 : index
    %c0_161 = arith.constant 0 : index
    %c0_162 = arith.constant 0 : index
    %233 = vector.load %arg5[%c11_160, %c0_161, %c0_162] : memref<25x8x256xf32, #tpu.memory_space<vmem>>, vector<1x8x256xf32>
    %234 = vector.shape_cast %233 : vector<1x8x256xf32> to vector<8x256xf32>
    %c1_i32_163 = arith.constant 1 : i32
    %235 = tpu.dynamic_rotate %164 by %c1_i32_163 dim 1 : vector<8x256xf32>, i32 -> vector<8x256xf32>
    %236 = arith.mulf %235, %234 : vector<8x256xf32>
    %237 = arith.truncf %236 : vector<8x256xf32> to vector<8x256xbf16>
    %c88_164 = arith.constant 88 : index
    %c0_165 = arith.constant 0 : index
    %238 = vector.load %arg13[%c88_164, %c0_165] : memref<408x256xbf16, #tpu.memory_space<vmem>>, vector<8x256xbf16>
    tpu.vector_store %arg13[%c88_164, %c0_165], %237 {strides = array<i32>} : memref<408x256xbf16, #tpu.memory_space<vmem>>, vector<8x256xbf16>,
    %239 = arith.truncf %164 : vector<8x256xf32> to vector<8x256xbf16>
    %c96_166 = arith.constant 96 : index
    %c0_167 = arith.constant 0 : index
    %240 = vector.load %arg13[%c96_166, %c0_167] : memref<408x256xbf16, #tpu.memory_space<vmem>>, vector<8x256xbf16>
    tpu.vector_store %arg13[%c96_166, %c0_167], %239 {strides = array<i32>} : memref<408x256xbf16, #tpu.memory_space<vmem>>, vector<8x256xbf16>,
    %c13_168 = arith.constant 13 : index
    %c0_169 = arith.constant 0 : index
    %c0_170 = arith.constant 0 : index
    %241 = vector.load %arg5[%c13_168, %c0_169, %c0_170] : memref<25x8x256xf32, #tpu.memory_space<vmem>>, vector<1x8x256xf32>
    %242 = vector.shape_cast %241 : vector<1x8x256xf32> to vector<8x256xf32>
    %c255_i32_171 = arith.constant 255 : i32
    %243 = tpu.dynamic_rotate %164 by %c255_i32_171 dim 1 : vector<8x256xf32>, i32 -> vector<8x256xf32>
    %244 = arith.mulf %243, %242 : vector<8x256xf32>
    %245 = arith.truncf %244 : vector<8x256xf32> to vector<8x256xbf16>
    %c104_172 = arith.constant 104 : index
    %c0_173 = arith.constant 0 : index
    %246 = vector.load %arg13[%c104_172, %c0_173] : memref<408x256xbf16, #tpu.memory_space<vmem>>, vector<8x256xbf16>
    tpu.vector_store %arg13[%c104_172, %c0_173], %245 {strides = array<i32>} : memref<408x256xbf16, #tpu.memory_space<vmem>>, vector<8x256xbf16>,
    %c14_174 = arith.constant 14 : index
    %c0_175 = arith.constant 0 : index
    %c0_176 = arith.constant 0 : index
    %247 = vector.load %arg5[%c14_174, %c0_175, %c0_176] : memref<25x8x256xf32, #tpu.memory_space<vmem>>, vector<1x8x256xf32>
    %248 = vector.shape_cast %247 : vector<1x8x256xf32> to vector<8x256xf32>
    %c254_i32_177 = arith.constant 254 : i32
    %249 = tpu.dynamic_rotate %164 by %c254_i32_177 dim 1 : vector<8x256xf32>, i32 -> vector<8x256xf32>
    %250 = arith.mulf %249, %248 : vector<8x256xf32>
    %251 = arith.truncf %250 : vector<8x256xf32> to vector<8x256xbf16>
    %c112_178 = arith.constant 112 : index
    %c0_179 = arith.constant 0 : index
    %252 = vector.load %arg13[%c112_178, %c0_179] : memref<408x256xbf16, #tpu.memory_space<vmem>>, vector<8x256xbf16>
    tpu.vector_store %arg13[%c112_178, %c0_179], %251 {strides = array<i32>} : memref<408x256xbf16, #tpu.memory_space<vmem>>, vector<8x256xbf16>,
    %c15_180 = arith.constant 15 : index
    %c0_181 = arith.constant 0 : index
    %c0_182 = arith.constant 0 : index
    %253 = vector.load %arg5[%c15_180, %c0_181, %c0_182] : memref<25x8x256xf32, #tpu.memory_space<vmem>>, vector<1x8x256xf32>
    %254 = vector.shape_cast %253 : vector<1x8x256xf32> to vector<8x256xf32>
    %c242_i32_183 = arith.constant 242 : i32
    %255 = tpu.dynamic_rotate %164 by %c242_i32_183 dim 1 : vector<8x256xf32>, i32 -> vector<8x256xf32>
    %256 = arith.mulf %255, %254 : vector<8x256xf32>
    %257 = arith.truncf %256 : vector<8x256xf32> to vector<8x256xbf16>
    %c120_184 = arith.constant 120 : index
    %c0_185 = arith.constant 0 : index
    %258 = vector.load %arg13[%c120_184, %c0_185] : memref<408x256xbf16, #tpu.memory_space<vmem>>, vector<8x256xbf16>
    tpu.vector_store %arg13[%c120_184, %c0_185], %257 {strides = array<i32>} : memref<408x256xbf16, #tpu.memory_space<vmem>>, vector<8x256xbf16>,
    %c16_186 = arith.constant 16 : index
    %c0_187 = arith.constant 0 : index
    %c0_188 = arith.constant 0 : index
    %259 = vector.load %arg5[%c16_186, %c0_187, %c0_188] : memref<25x8x256xf32, #tpu.memory_space<vmem>>, vector<1x8x256xf32>
    %260 = vector.shape_cast %259 : vector<1x8x256xf32> to vector<8x256xf32>
    %c241_i32_189 = arith.constant 241 : i32
    %261 = tpu.dynamic_rotate %164 by %c241_i32_189 dim 1 : vector<8x256xf32>, i32 -> vector<8x256xf32>
    %262 = arith.mulf %261, %260 : vector<8x256xf32>
    %263 = arith.truncf %262 : vector<8x256xf32> to vector<8x256xbf16>
    %c128_190 = arith.constant 128 : index
    %c0_191 = arith.constant 0 : index
    %264 = vector.load %arg13[%c128_190, %c0_191] : memref<408x256xbf16, #tpu.memory_space<vmem>>, vector<8x256xbf16>
    tpu.vector_store %arg13[%c128_190, %c0_191], %263 {strides = array<i32>} : memref<408x256xbf16, #tpu.memory_space<vmem>>, vector<8x256xbf16>,
    %c17_192 = arith.constant 17 : index
    %c0_193 = arith.constant 0 : index
    %c0_194 = arith.constant 0 : index
    %265 = vector.load %arg5[%c17_192, %c0_193, %c0_194] : memref<25x8x256xf32, #tpu.memory_space<vmem>>, vector<1x8x256xf32>
    %266 = vector.shape_cast %265 : vector<1x8x256xf32> to vector<8x256xf32>
    %c240_i32_195 = arith.constant 240 : i32
    %267 = tpu.dynamic_rotate %164 by %c240_i32_195 dim 1 : vector<8x256xf32>, i32 -> vector<8x256xf32>
    %268 = arith.mulf %267, %266 : vector<8x256xf32>
    %269 = arith.truncf %268 : vector<8x256xf32> to vector<8x256xbf16>
    %c136_196 = arith.constant 136 : index
    %c0_197 = arith.constant 0 : index
    %270 = vector.load %arg13[%c136_196, %c0_197] : memref<408x256xbf16, #tpu.memory_space<vmem>>, vector<8x256xbf16>
    tpu.vector_store %arg13[%c136_196, %c0_197], %269 {strides = array<i32>} : memref<408x256xbf16, #tpu.memory_space<vmem>>, vector<8x256xbf16>,
    %c18_198 = arith.constant 18 : index
    %c0_199 = arith.constant 0 : index
    %c0_200 = arith.constant 0 : index
    %271 = vector.load %arg5[%c18_198, %c0_199, %c0_200] : memref<25x8x256xf32, #tpu.memory_space<vmem>>, vector<1x8x256xf32>
    %272 = vector.shape_cast %271 : vector<1x8x256xf32> to vector<8x256xf32>
    %c239_i32_201 = arith.constant 239 : i32
    %273 = tpu.dynamic_rotate %164 by %c239_i32_201 dim 1 : vector<8x256xf32>, i32 -> vector<8x256xf32>
    %274 = arith.mulf %273, %272 : vector<8x256xf32>
    %275 = arith.truncf %274 : vector<8x256xf32> to vector<8x256xbf16>
    %c144_202 = arith.constant 144 : index
    %c0_203 = arith.constant 0 : index
    %276 = vector.load %arg13[%c144_202, %c0_203] : memref<408x256xbf16, #tpu.memory_space<vmem>>, vector<8x256xbf16>
    tpu.vector_store %arg13[%c144_202, %c0_203], %275 {strides = array<i32>} : memref<408x256xbf16, #tpu.memory_space<vmem>>, vector<8x256xbf16>,
    %c19_204 = arith.constant 19 : index
    %c0_205 = arith.constant 0 : index
    %c0_206 = arith.constant 0 : index
    %277 = vector.load %arg5[%c19_204, %c0_205, %c0_206] : memref<25x8x256xf32, #tpu.memory_space<vmem>>, vector<1x8x256xf32>
    %278 = vector.shape_cast %277 : vector<1x8x256xf32> to vector<8x256xf32>
    %c238_i32_207 = arith.constant 238 : i32
    %279 = tpu.dynamic_rotate %164 by %c238_i32_207 dim 1 : vector<8x256xf32>, i32 -> vector<8x256xf32>
    %280 = arith.mulf %279, %278 : vector<8x256xf32>
    %281 = arith.truncf %280 : vector<8x256xf32> to vector<8x256xbf16>
    %c152_208 = arith.constant 152 : index
    %c0_209 = arith.constant 0 : index
    %282 = vector.load %arg13[%c152_208, %c0_209] : memref<408x256xbf16, #tpu.memory_space<vmem>>, vector<8x256xbf16>
    tpu.vector_store %arg13[%c152_208, %c0_209], %281 {strides = array<i32>} : memref<408x256xbf16, #tpu.memory_space<vmem>>, vector<8x256xbf16>,
    %c20_210 = arith.constant 20 : index
    %c0_211 = arith.constant 0 : index
    %c0_212 = arith.constant 0 : index
    %283 = vector.load %arg5[%c20_210, %c0_211, %c0_212] : memref<25x8x256xf32, #tpu.memory_space<vmem>>, vector<1x8x256xf32>
    %284 = vector.shape_cast %283 : vector<1x8x256xf32> to vector<8x256xf32>
    %c226_i32_213 = arith.constant 226 : i32
    %285 = tpu.dynamic_rotate %164 by %c226_i32_213 dim 1 : vector<8x256xf32>, i32 -> vector<8x256xf32>
    %286 = arith.mulf %285, %284 : vector<8x256xf32>
    %287 = arith.truncf %286 : vector<8x256xf32> to vector<8x256xbf16>
    %c160_214 = arith.constant 160 : index
    %c0_215 = arith.constant 0 : index
    %288 = vector.load %arg13[%c160_214, %c0_215] : memref<408x256xbf16, #tpu.memory_space<vmem>>, vector<8x256xbf16>
    tpu.vector_store %arg13[%c160_214, %c0_215], %287 {strides = array<i32>} : memref<408x256xbf16, #tpu.memory_space<vmem>>, vector<8x256xbf16>,
    %c21_216 = arith.constant 21 : index
    %c0_217 = arith.constant 0 : index
    %c0_218 = arith.constant 0 : index
    %289 = vector.load %arg5[%c21_216, %c0_217, %c0_218] : memref<25x8x256xf32, #tpu.memory_space<vmem>>, vector<1x8x256xf32>
    %290 = vector.shape_cast %289 : vector<1x8x256xf32> to vector<8x256xf32>
    %c225_i32_219 = arith.constant 225 : i32
    %291 = tpu.dynamic_rotate %164 by %c225_i32_219 dim 1 : vector<8x256xf32>, i32 -> vector<8x256xf32>
    %292 = arith.mulf %291, %290 : vector<8x256xf32>
    %293 = arith.truncf %292 : vector<8x256xf32> to vector<8x256xbf16>
    %c168_220 = arith.constant 168 : index
    %c0_221 = arith.constant 0 : index
    %294 = vector.load %arg13[%c168_220, %c0_221] : memref<408x256xbf16, #tpu.memory_space<vmem>>, vector<8x256xbf16>
    tpu.vector_store %arg13[%c168_220, %c0_221], %293 {strides = array<i32>} : memref<408x256xbf16, #tpu.memory_space<vmem>>, vector<8x256xbf16>,
    %c22_222 = arith.constant 22 : index
    %c0_223 = arith.constant 0 : index
    %c0_224 = arith.constant 0 : index
    %295 = vector.load %arg5[%c22_222, %c0_223, %c0_224] : memref<25x8x256xf32, #tpu.memory_space<vmem>>, vector<1x8x256xf32>
    %296 = vector.shape_cast %295 : vector<1x8x256xf32> to vector<8x256xf32>
    %c224_i32_225 = arith.constant 224 : i32
    %297 = tpu.dynamic_rotate %164 by %c224_i32_225 dim 1 : vector<8x256xf32>, i32 -> vector<8x256xf32>
    %298 = arith.mulf %297, %296 : vector<8x256xf32>
    %299 = arith.truncf %298 : vector<8x256xf32> to vector<8x256xbf16>
    %c176_226 = arith.constant 176 : index
    %c0_227 = arith.constant 0 : index
    %300 = vector.load %arg13[%c176_226, %c0_227] : memref<408x256xbf16, #tpu.memory_space<vmem>>, vector<8x256xbf16>
    tpu.vector_store %arg13[%c176_226, %c0_227], %299 {strides = array<i32>} : memref<408x256xbf16, #tpu.memory_space<vmem>>, vector<8x256xbf16>,
    %c23_228 = arith.constant 23 : index
    %c0_229 = arith.constant 0 : index
    %c0_230 = arith.constant 0 : index
    %301 = vector.load %arg5[%c23_228, %c0_229, %c0_230] : memref<25x8x256xf32, #tpu.memory_space<vmem>>, vector<1x8x256xf32>
    %302 = vector.shape_cast %301 : vector<1x8x256xf32> to vector<8x256xf32>
    %c223_i32_231 = arith.constant 223 : i32
    %303 = tpu.dynamic_rotate %164 by %c223_i32_231 dim 1 : vector<8x256xf32>, i32 -> vector<8x256xf32>
    %304 = arith.mulf %303, %302 : vector<8x256xf32>
    %305 = arith.truncf %304 : vector<8x256xf32> to vector<8x256xbf16>
    %c184_232 = arith.constant 184 : index
    %c0_233 = arith.constant 0 : index
    %306 = vector.load %arg13[%c184_232, %c0_233] : memref<408x256xbf16, #tpu.memory_space<vmem>>, vector<8x256xbf16>
    tpu.vector_store %arg13[%c184_232, %c0_233], %305 {strides = array<i32>} : memref<408x256xbf16, #tpu.memory_space<vmem>>, vector<8x256xbf16>,
    %c24_234 = arith.constant 24 : index
    %c0_235 = arith.constant 0 : index
    %c0_236 = arith.constant 0 : index
    %307 = vector.load %arg5[%c24_234, %c0_235, %c0_236] : memref<25x8x256xf32, #tpu.memory_space<vmem>>, vector<1x8x256xf32>
    %308 = vector.shape_cast %307 : vector<1x8x256xf32> to vector<8x256xf32>
    %c222_i32_237 = arith.constant 222 : i32
    %309 = tpu.dynamic_rotate %164 by %c222_i32_237 dim 1 : vector<8x256xf32>, i32 -> vector<8x256xf32>
    %310 = arith.mulf %309, %308 : vector<8x256xf32>
    %311 = arith.truncf %310 : vector<8x256xf32> to vector<8x256xbf16>
    %c192_238 = arith.constant 192 : index
    %c0_239 = arith.constant 0 : index
    %312 = vector.load %arg13[%c192_238, %c0_239] : memref<408x256xbf16, #tpu.memory_space<vmem>>, vector<8x256xbf16>
    tpu.vector_store %arg13[%c192_238, %c0_239], %311 {strides = array<i32>} : memref<408x256xbf16, #tpu.memory_space<vmem>>, vector<8x256xbf16>,
    %c200_240 = arith.constant 200 : index
    %c0_241 = arith.constant 0 : index
    %313 = vector.load %arg13[%c200_240, %c0_241] : memref<408x256xbf16, #tpu.memory_space<vmem>>, vector<8x256xbf16>
    tpu.vector_store %arg13[%c200_240, %c0_241], %5 {strides = array<i32>} : memref<408x256xbf16, #tpu.memory_space<vmem>>, vector<8x256xbf16>,
    %c0_242 = arith.constant 0 : index
    %c0_243 = arith.constant 0 : index
    %314 = vector.load %arg13[%c0_242, %c0_243] : memref<408x256xbf16, #tpu.memory_space<vmem>>, vector<208x256xbf16>
    %cst_244 = arith.constant dense<0.000000e+00> : vector<8x256xf32>
    %315 = tpu.matmul %166, %314, %cst_244 {dimension_numbers = #tpu.dot_dimension_numbers<[1], [0], [0], [1], [0, 0, 1, 1], [], []>} : vector<8x208xbf16>, vector<208x256xbf16>, vector<8x256xf32> -> vector<8x256xf32>
    %c2_245 = arith.constant 2 : index
    %316 = memref.load %arg1[%c2_245] : memref<4xi32, #tpu.memory_space<smem>>
    %317 = arith.index_cast %316 : i32 to index
    %c0_246 = arith.constant 0 : index
    %c0_247 = arith.constant 0 : index
    %c0_248 = arith.constant 0 : index
    %318 = vector.load %arg3[%317, %c0_246, %c0_247, %c0_248] : memref<3x1x8x256xf32, #tpu.memory_space<vmem>>, vector<1x1x8x256xf32>
    %319 = vector.shape_cast %318 : vector<1x1x8x256xf32> to vector<8x256xf32>
    %c2_249 = arith.constant 2 : index
    %c0_250 = arith.constant 0 : index
    %c0_251 = arith.constant 0 : index
    %320 = vector.load %arg6[%c2_249, %c0_250, %c0_251] : memref<3x8x208xbf16, #tpu.memory_space<vmem>>, vector<1x8x208xbf16>
    %321 = vector.shape_cast %320 : vector<1x8x208xbf16> to vector<8x208xbf16>
    %c0_252 = arith.constant 0 : index
    %c0_253 = arith.constant 0 : index
    %c0_254 = arith.constant 0 : index
    %322 = vector.load %arg5[%c0_252, %c0_253, %c0_254] : memref<25x8x256xf32, #tpu.memory_space<vmem>>, vector<1x8x256xf32>
    %323 = vector.shape_cast %322 : vector<1x8x256xf32> to vector<8x256xf32>
    %c34_i32_255 = arith.constant 34 : i32
    %324 = tpu.dynamic_rotate %319 by %c34_i32_255 dim 1 : vector<8x256xf32>, i32 -> vector<8x256xf32>
    %325 = arith.mulf %324, %323 : vector<8x256xf32>
    %326 = arith.truncf %325 : vector<8x256xf32> to vector<8x256xbf16>
    %c0_256 = arith.constant 0 : index
    %c0_257 = arith.constant 0 : index
    %327 = vector.load %arg12[%c0_256, %c0_257] : memref<408x256xbf16, #tpu.memory_space<vmem>>, vector<8x256xbf16>
    tpu.vector_store %arg12[%c0_256, %c0_257], %326 {strides = array<i32>} : memref<408x256xbf16, #tpu.memory_space<vmem>>, vector<8x256xbf16>,
    %c1_258 = arith.constant 1 : index
    %c0_259 = arith.constant 0 : index
    %c0_260 = arith.constant 0 : index
    %328 = vector.load %arg5[%c1_258, %c0_259, %c0_260] : memref<25x8x256xf32, #tpu.memory_space<vmem>>, vector<1x8x256xf32>
    %329 = vector.shape_cast %328 : vector<1x8x256xf32> to vector<8x256xf32>
    %c33_i32_261 = arith.constant 33 : i32
    %330 = tpu.dynamic_rotate %319 by %c33_i32_261 dim 1 : vector<8x256xf32>, i32 -> vector<8x256xf32>
    %331 = arith.mulf %330, %329 : vector<8x256xf32>
    %332 = arith.truncf %331 : vector<8x256xf32> to vector<8x256xbf16>
    %c8_262 = arith.constant 8 : index
    %c0_263 = arith.constant 0 : index
    %333 = vector.load %arg12[%c8_262, %c0_263] : memref<408x256xbf16, #tpu.memory_space<vmem>>, vector<8x256xbf16>
    tpu.vector_store %arg12[%c8_262, %c0_263], %332 {strides = array<i32>} : memref<408x256xbf16, #tpu.memory_space<vmem>>, vector<8x256xbf16>,
    %c2_264 = arith.constant 2 : index
    %c0_265 = arith.constant 0 : index
    %c0_266 = arith.constant 0 : index
    %334 = vector.load %arg5[%c2_264, %c0_265, %c0_266] : memref<25x8x256xf32, #tpu.memory_space<vmem>>, vector<1x8x256xf32>
    %335 = vector.shape_cast %334 : vector<1x8x256xf32> to vector<8x256xf32>
    %c32_i32_267 = arith.constant 32 : i32
    %336 = tpu.dynamic_rotate %319 by %c32_i32_267 dim 1 : vector<8x256xf32>, i32 -> vector<8x256xf32>
    %337 = arith.mulf %336, %335 : vector<8x256xf32>
    %338 = arith.truncf %337 : vector<8x256xf32> to vector<8x256xbf16>
    %c16_268 = arith.constant 16 : index
    %c0_269 = arith.constant 0 : index
    %339 = vector.load %arg12[%c16_268, %c0_269] : memref<408x256xbf16, #tpu.memory_space<vmem>>, vector<8x256xbf16>
    tpu.vector_store %arg12[%c16_268, %c0_269], %338 {strides = array<i32>} : memref<408x256xbf16, #tpu.memory_space<vmem>>, vector<8x256xbf16>,
    %c3_270 = arith.constant 3 : index
    %c0_271 = arith.constant 0 : index
    %c0_272 = arith.constant 0 : index
    %340 = vector.load %arg5[%c3_270, %c0_271, %c0_272] : memref<25x8x256xf32, #tpu.memory_space<vmem>>, vector<1x8x256xf32>
    %341 = vector.shape_cast %340 : vector<1x8x256xf32> to vector<8x256xf32>
    %c31_i32_273 = arith.constant 31 : i32
    %342 = tpu.dynamic_rotate %319 by %c31_i32_273 dim 1 : vector<8x256xf32>, i32 -> vector<8x256xf32>
    %343 = arith.mulf %342, %341 : vector<8x256xf32>
    %344 = arith.truncf %343 : vector<8x256xf32> to vector<8x256xbf16>
    %c24_274 = arith.constant 24 : index
    %c0_275 = arith.constant 0 : index
    %345 = vector.load %arg12[%c24_274, %c0_275] : memref<408x256xbf16, #tpu.memory_space<vmem>>, vector<8x256xbf16>
    tpu.vector_store %arg12[%c24_274, %c0_275], %344 {strides = array<i32>} : memref<408x256xbf16, #tpu.memory_space<vmem>>, vector<8x256xbf16>,
    %c4_276 = arith.constant 4 : index
    %c0_277 = arith.constant 0 : index
    %c0_278 = arith.constant 0 : index
    %346 = vector.load %arg5[%c4_276, %c0_277, %c0_278] : memref<25x8x256xf32, #tpu.memory_space<vmem>>, vector<1x8x256xf32>
    %347 = vector.shape_cast %346 : vector<1x8x256xf32> to vector<8x256xf32>
    %c30_i32_279 = arith.constant 30 : i32
    %348 = tpu.dynamic_rotate %319 by %c30_i32_279 dim 1 : vector<8x256xf32>, i32 -> vector<8x256xf32>
    %349 = arith.mulf %348, %347 : vector<8x256xf32>
    %350 = arith.truncf %349 : vector<8x256xf32> to vector<8x256xbf16>
    %c32_280 = arith.constant 32 : index
    %c0_281 = arith.constant 0 : index
    %351 = vector.load %arg12[%c32_280, %c0_281] : memref<408x256xbf16, #tpu.memory_space<vmem>>, vector<8x256xbf16>
    tpu.vector_store %arg12[%c32_280, %c0_281], %350 {strides = array<i32>} : memref<408x256xbf16, #tpu.memory_space<vmem>>, vector<8x256xbf16>,
    %c5_282 = arith.constant 5 : index
    %c0_283 = arith.constant 0 : index
    %c0_284 = arith.constant 0 : index
    %352 = vector.load %arg5[%c5_282, %c0_283, %c0_284] : memref<25x8x256xf32, #tpu.memory_space<vmem>>, vector<1x8x256xf32>
    %353 = vector.shape_cast %352 : vector<1x8x256xf32> to vector<8x256xf32>
    %c18_i32_285 = arith.constant 18 : i32
    %354 = tpu.dynamic_rotate %319 by %c18_i32_285 dim 1 : vector<8x256xf32>, i32 -> vector<8x256xf32>
    %355 = arith.mulf %354, %353 : vector<8x256xf32>
    %356 = arith.truncf %355 : vector<8x256xf32> to vector<8x256xbf16>
    %c40_286 = arith.constant 40 : index
    %c0_287 = arith.constant 0 : index
    %357 = vector.load %arg12[%c40_286, %c0_287] : memref<408x256xbf16, #tpu.memory_space<vmem>>, vector<8x256xbf16>
    tpu.vector_store %arg12[%c40_286, %c0_287], %356 {strides = array<i32>} : memref<408x256xbf16, #tpu.memory_space<vmem>>, vector<8x256xbf16>,
    %c6_288 = arith.constant 6 : index
    %c0_289 = arith.constant 0 : index
    %c0_290 = arith.constant 0 : index
    %358 = vector.load %arg5[%c6_288, %c0_289, %c0_290] : memref<25x8x256xf32, #tpu.memory_space<vmem>>, vector<1x8x256xf32>
    %359 = vector.shape_cast %358 : vector<1x8x256xf32> to vector<8x256xf32>
    %c17_i32_291 = arith.constant 17 : i32
    %360 = tpu.dynamic_rotate %319 by %c17_i32_291 dim 1 : vector<8x256xf32>, i32 -> vector<8x256xf32>
    %361 = arith.mulf %360, %359 : vector<8x256xf32>
    %362 = arith.truncf %361 : vector<8x256xf32> to vector<8x256xbf16>
    %c48_292 = arith.constant 48 : index
    %c0_293 = arith.constant 0 : index
    %363 = vector.load %arg12[%c48_292, %c0_293] : memref<408x256xbf16, #tpu.memory_space<vmem>>, vector<8x256xbf16>
    tpu.vector_store %arg12[%c48_292, %c0_293], %362 {strides = array<i32>} : memref<408x256xbf16, #tpu.memory_space<vmem>>, vector<8x256xbf16>,
    %c7_294 = arith.constant 7 : index
    %c0_295 = arith.constant 0 : index
    %c0_296 = arith.constant 0 : index
    %364 = vector.load %arg5[%c7_294, %c0_295, %c0_296] : memref<25x8x256xf32, #tpu.memory_space<vmem>>, vector<1x8x256xf32>
    %365 = vector.shape_cast %364 : vector<1x8x256xf32> to vector<8x256xf32>
    %c16_i32_297 = arith.constant 16 : i32
    %366 = tpu.dynamic_rotate %319 by %c16_i32_297 dim 1 : vector<8x256xf32>, i32 -> vector<8x256xf32>
    %367 = arith.mulf %366, %365 : vector<8x256xf32>
    %368 = arith.truncf %367 : vector<8x256xf32> to vector<8x256xbf16>
    %c56_298 = arith.constant 56 : index
    %c0_299 = arith.constant 0 : index
    %369 = vector.load %arg12[%c56_298, %c0_299] : memref<408x256xbf16, #tpu.memory_space<vmem>>, vector<8x256xbf16>
    tpu.vector_store %arg12[%c56_298, %c0_299], %368 {strides = array<i32>} : memref<408x256xbf16, #tpu.memory_space<vmem>>, vector<8x256xbf16>,
    %c8_300 = arith.constant 8 : index
    %c0_301 = arith.constant 0 : index
    %c0_302 = arith.constant 0 : index
    %370 = vector.load %arg5[%c8_300, %c0_301, %c0_302] : memref<25x8x256xf32, #tpu.memory_space<vmem>>, vector<1x8x256xf32>
    %371 = vector.shape_cast %370 : vector<1x8x256xf32> to vector<8x256xf32>
    %c15_i32_303 = arith.constant 15 : i32
    %372 = tpu.dynamic_rotate %319 by %c15_i32_303 dim 1 : vector<8x256xf32>, i32 -> vector<8x256xf32>
    %373 = arith.mulf %372, %371 : vector<8x256xf32>
    %374 = arith.truncf %373 : vector<8x256xf32> to vector<8x256xbf16>
    %c64_304 = arith.constant 64 : index
    %c0_305 = arith.constant 0 : index
    %375 = vector.load %arg12[%c64_304, %c0_305] : memref<408x256xbf16, #tpu.memory_space<vmem>>, vector<8x256xbf16>
    tpu.vector_store %arg12[%c64_304, %c0_305], %374 {strides = array<i32>} : memref<408x256xbf16, #tpu.memory_space<vmem>>, vector<8x256xbf16>,
    %c9_306 = arith.constant 9 : index
    %c0_307 = arith.constant 0 : index
    %c0_308 = arith.constant 0 : index
    %376 = vector.load %arg5[%c9_306, %c0_307, %c0_308] : memref<25x8x256xf32, #tpu.memory_space<vmem>>, vector<1x8x256xf32>
    %377 = vector.shape_cast %376 : vector<1x8x256xf32> to vector<8x256xf32>
    %c14_i32_309 = arith.constant 14 : i32
    %378 = tpu.dynamic_rotate %319 by %c14_i32_309 dim 1 : vector<8x256xf32>, i32 -> vector<8x256xf32>
    %379 = arith.mulf %378, %377 : vector<8x256xf32>
    %380 = arith.truncf %379 : vector<8x256xf32> to vector<8x256xbf16>
    %c72_310 = arith.constant 72 : index
    %c0_311 = arith.constant 0 : index
    %381 = vector.load %arg12[%c72_310, %c0_311] : memref<408x256xbf16, #tpu.memory_space<vmem>>, vector<8x256xbf16>
    tpu.vector_store %arg12[%c72_310, %c0_311], %380 {strides = array<i32>} : memref<408x256xbf16, #tpu.memory_space<vmem>>, vector<8x256xbf16>,
    %c10_312 = arith.constant 10 : index
    %c0_313 = arith.constant 0 : index
    %c0_314 = arith.constant 0 : index
    %382 = vector.load %arg5[%c10_312, %c0_313, %c0_314] : memref<25x8x256xf32, #tpu.memory_space<vmem>>, vector<1x8x256xf32>
    %383 = vector.shape_cast %382 : vector<1x8x256xf32> to vector<8x256xf32>
    %c2_i32_315 = arith.constant 2 : i32
    %384 = tpu.dynamic_rotate %319 by %c2_i32_315 dim 1 : vector<8x256xf32>, i32 -> vector<8x256xf32>
    %385 = arith.mulf %384, %383 : vector<8x256xf32>
    %386 = arith.truncf %385 : vector<8x256xf32> to vector<8x256xbf16>
    %c80_316 = arith.constant 80 : index
    %c0_317 = arith.constant 0 : index
    %387 = vector.load %arg12[%c80_316, %c0_317] : memref<408x256xbf16, #tpu.memory_space<vmem>>, vector<8x256xbf16>
    tpu.vector_store %arg12[%c80_316, %c0_317], %386 {strides = array<i32>} : memref<408x256xbf16, #tpu.memory_space<vmem>>, vector<8x256xbf16>,
    %c11_318 = arith.constant 11 : index
    %c0_319 = arith.constant 0 : index
    %c0_320 = arith.constant 0 : index
    %388 = vector.load %arg5[%c11_318, %c0_319, %c0_320] : memref<25x8x256xf32, #tpu.memory_space<vmem>>, vector<1x8x256xf32>
    %389 = vector.shape_cast %388 : vector<1x8x256xf32> to vector<8x256xf32>
    %c1_i32_321 = arith.constant 1 : i32
    %390 = tpu.dynamic_rotate %319 by %c1_i32_321 dim 1 : vector<8x256xf32>, i32 -> vector<8x256xf32>
    %391 = arith.mulf %390, %389 : vector<8x256xf32>
    %392 = arith.truncf %391 : vector<8x256xf32> to vector<8x256xbf16>
    %c88_322 = arith.constant 88 : index
    %c0_323 = arith.constant 0 : index
    %393 = vector.load %arg12[%c88_322, %c0_323] : memref<408x256xbf16, #tpu.memory_space<vmem>>, vector<8x256xbf16>
    tpu.vector_store %arg12[%c88_322, %c0_323], %392 {strides = array<i32>} : memref<408x256xbf16, #tpu.memory_space<vmem>>, vector<8x256xbf16>,
    %394 = arith.truncf %319 : vector<8x256xf32> to vector<8x256xbf16>
    %c96_324 = arith.constant 96 : index
    %c0_325 = arith.constant 0 : index
    %395 = vector.load %arg12[%c96_324, %c0_325] : memref<408x256xbf16, #tpu.memory_space<vmem>>, vector<8x256xbf16>
    tpu.vector_store %arg12[%c96_324, %c0_325], %394 {strides = array<i32>} : memref<408x256xbf16, #tpu.memory_space<vmem>>, vector<8x256xbf16>,
    %c13_326 = arith.constant 13 : index
    %c0_327 = arith.constant 0 : index
    %c0_328 = arith.constant 0 : index
    %396 = vector.load %arg5[%c13_326, %c0_327, %c0_328] : memref<25x8x256xf32, #tpu.memory_space<vmem>>, vector<1x8x256xf32>
    %397 = vector.shape_cast %396 : vector<1x8x256xf32> to vector<8x256xf32>
    %c255_i32_329 = arith.constant 255 : i32
    %398 = tpu.dynamic_rotate %319 by %c255_i32_329 dim 1 : vector<8x256xf32>, i32 -> vector<8x256xf32>
    %399 = arith.mulf %398, %397 : vector<8x256xf32>
    %400 = arith.truncf %399 : vector<8x256xf32> to vector<8x256xbf16>
    %c104_330 = arith.constant 104 : index
    %c0_331 = arith.constant 0 : index
    %401 = vector.load %arg12[%c104_330, %c0_331] : memref<408x256xbf16, #tpu.memory_space<vmem>>, vector<8x256xbf16>
    tpu.vector_store %arg12[%c104_330, %c0_331], %400 {strides = array<i32>} : memref<408x256xbf16, #tpu.memory_space<vmem>>, vector<8x256xbf16>,
    %c14_332 = arith.constant 14 : index
    %c0_333 = arith.constant 0 : index
    %c0_334 = arith.constant 0 : index
    %402 = vector.load %arg5[%c14_332, %c0_333, %c0_334] : memref<25x8x256xf32, #tpu.memory_space<vmem>>, vector<1x8x256xf32>
    %403 = vector.shape_cast %402 : vector<1x8x256xf32> to vector<8x256xf32>
    %c254_i32_335 = arith.constant 254 : i32
    %404 = tpu.dynamic_rotate %319 by %c254_i32_335 dim 1 : vector<8x256xf32>, i32 -> vector<8x256xf32>
    %405 = arith.mulf %404, %403 : vector<8x256xf32>
    %406 = arith.truncf %405 : vector<8x256xf32> to vector<8x256xbf16>
    %c112_336 = arith.constant 112 : index
    %c0_337 = arith.constant 0 : index
    %407 = vector.load %arg12[%c112_336, %c0_337] : memref<408x256xbf16, #tpu.memory_space<vmem>>, vector<8x256xbf16>
    tpu.vector_store %arg12[%c112_336, %c0_337], %406 {strides = array<i32>} : memref<408x256xbf16, #tpu.memory_space<vmem>>, vector<8x256xbf16>,
    %c15_338 = arith.constant 15 : index
    %c0_339 = arith.constant 0 : index
    %c0_340 = arith.constant 0 : index
    %408 = vector.load %arg5[%c15_338, %c0_339, %c0_340] : memref<25x8x256xf32, #tpu.memory_space<vmem>>, vector<1x8x256xf32>
    %409 = vector.shape_cast %408 : vector<1x8x256xf32> to vector<8x256xf32>
    %c242_i32_341 = arith.constant 242 : i32
    %410 = tpu.dynamic_rotate %319 by %c242_i32_341 dim 1 : vector<8x256xf32>, i32 -> vector<8x256xf32>
    %411 = arith.mulf %410, %409 : vector<8x256xf32>
    %412 = arith.truncf %411 : vector<8x256xf32> to vector<8x256xbf16>
    %c120_342 = arith.constant 120 : index
    %c0_343 = arith.constant 0 : index
    %413 = vector.load %arg12[%c120_342, %c0_343] : memref<408x256xbf16, #tpu.memory_space<vmem>>, vector<8x256xbf16>
    tpu.vector_store %arg12[%c120_342, %c0_343], %412 {strides = array<i32>} : memref<408x256xbf16, #tpu.memory_space<vmem>>, vector<8x256xbf16>,
    %c16_344 = arith.constant 16 : index
    %c0_345 = arith.constant 0 : index
    %c0_346 = arith.constant 0 : index
    %414 = vector.load %arg5[%c16_344, %c0_345, %c0_346] : memref<25x8x256xf32, #tpu.memory_space<vmem>>, vector<1x8x256xf32>
    %415 = vector.shape_cast %414 : vector<1x8x256xf32> to vector<8x256xf32>
    %c241_i32_347 = arith.constant 241 : i32
    %416 = tpu.dynamic_rotate %319 by %c241_i32_347 dim 1 : vector<8x256xf32>, i32 -> vector<8x256xf32>
    %417 = arith.mulf %416, %415 : vector<8x256xf32>
    %418 = arith.truncf %417 : vector<8x256xf32> to vector<8x256xbf16>
    %c128_348 = arith.constant 128 : index
    %c0_349 = arith.constant 0 : index
    %419 = vector.load %arg12[%c128_348, %c0_349] : memref<408x256xbf16, #tpu.memory_space<vmem>>, vector<8x256xbf16>
    tpu.vector_store %arg12[%c128_348, %c0_349], %418 {strides = array<i32>} : memref<408x256xbf16, #tpu.memory_space<vmem>>, vector<8x256xbf16>,
    %c17_350 = arith.constant 17 : index
    %c0_351 = arith.constant 0 : index
    %c0_352 = arith.constant 0 : index
    %420 = vector.load %arg5[%c17_350, %c0_351, %c0_352] : memref<25x8x256xf32, #tpu.memory_space<vmem>>, vector<1x8x256xf32>
    %421 = vector.shape_cast %420 : vector<1x8x256xf32> to vector<8x256xf32>
    %c240_i32_353 = arith.constant 240 : i32
    %422 = tpu.dynamic_rotate %319 by %c240_i32_353 dim 1 : vector<8x256xf32>, i32 -> vector<8x256xf32>
    %423 = arith.mulf %422, %421 : vector<8x256xf32>
    %424 = arith.truncf %423 : vector<8x256xf32> to vector<8x256xbf16>
    %c136_354 = arith.constant 136 : index
    %c0_355 = arith.constant 0 : index
    %425 = vector.load %arg12[%c136_354, %c0_355] : memref<408x256xbf16, #tpu.memory_space<vmem>>, vector<8x256xbf16>
    tpu.vector_store %arg12[%c136_354, %c0_355], %424 {strides = array<i32>} : memref<408x256xbf16, #tpu.memory_space<vmem>>, vector<8x256xbf16>,
    %c18_356 = arith.constant 18 : index
    %c0_357 = arith.constant 0 : index
    %c0_358 = arith.constant 0 : index
    %426 = vector.load %arg5[%c18_356, %c0_357, %c0_358] : memref<25x8x256xf32, #tpu.memory_space<vmem>>, vector<1x8x256xf32>
    %427 = vector.shape_cast %426 : vector<1x8x256xf32> to vector<8x256xf32>
    %c239_i32_359 = arith.constant 239 : i32
    %428 = tpu.dynamic_rotate %319 by %c239_i32_359 dim 1 : vector<8x256xf32>, i32 -> vector<8x256xf32>
    %429 = arith.mulf %428, %427 : vector<8x256xf32>
    %430 = arith.truncf %429 : vector<8x256xf32> to vector<8x256xbf16>
    %c144_360 = arith.constant 144 : index
    %c0_361 = arith.constant 0 : index
    %431 = vector.load %arg12[%c144_360, %c0_361] : memref<408x256xbf16, #tpu.memory_space<vmem>>, vector<8x256xbf16>
    tpu.vector_store %arg12[%c144_360, %c0_361], %430 {strides = array<i32>} : memref<408x256xbf16, #tpu.memory_space<vmem>>, vector<8x256xbf16>,
    %c19_362 = arith.constant 19 : index
    %c0_363 = arith.constant 0 : index
    %c0_364 = arith.constant 0 : index
    %432 = vector.load %arg5[%c19_362, %c0_363, %c0_364] : memref<25x8x256xf32, #tpu.memory_space<vmem>>, vector<1x8x256xf32>
    %433 = vector.shape_cast %432 : vector<1x8x256xf32> to vector<8x256xf32>
    %c238_i32_365 = arith.constant 238 : i32
    %434 = tpu.dynamic_rotate %319 by %c238_i32_365 dim 1 : vector<8x256xf32>, i32 -> vector<8x256xf32>
    %435 = arith.mulf %434, %433 : vector<8x256xf32>
    %436 = arith.truncf %435 : vector<8x256xf32> to vector<8x256xbf16>
    %c152_366 = arith.constant 152 : index
    %c0_367 = arith.constant 0 : index
    %437 = vector.load %arg12[%c152_366, %c0_367] : memref<408x256xbf16, #tpu.memory_space<vmem>>, vector<8x256xbf16>
    tpu.vector_store %arg12[%c152_366, %c0_367], %436 {strides = array<i32>} : memref<408x256xbf16, #tpu.memory_space<vmem>>, vector<8x256xbf16>,
    %c20_368 = arith.constant 20 : index
    %c0_369 = arith.constant 0 : index
    %c0_370 = arith.constant 0 : index
    %438 = vector.load %arg5[%c20_368, %c0_369, %c0_370] : memref<25x8x256xf32, #tpu.memory_space<vmem>>, vector<1x8x256xf32>
    %439 = vector.shape_cast %438 : vector<1x8x256xf32> to vector<8x256xf32>
    %c226_i32_371 = arith.constant 226 : i32
    %440 = tpu.dynamic_rotate %319 by %c226_i32_371 dim 1 : vector<8x256xf32>, i32 -> vector<8x256xf32>
    %441 = arith.mulf %440, %439 : vector<8x256xf32>
    %442 = arith.truncf %441 : vector<8x256xf32> to vector<8x256xbf16>
    %c160_372 = arith.constant 160 : index
    %c0_373 = arith.constant 0 : index
    %443 = vector.load %arg12[%c160_372, %c0_373] : memref<408x256xbf16, #tpu.memory_space<vmem>>, vector<8x256xbf16>
    tpu.vector_store %arg12[%c160_372, %c0_373], %442 {strides = array<i32>} : memref<408x256xbf16, #tpu.memory_space<vmem>>, vector<8x256xbf16>,
    %c21_374 = arith.constant 21 : index
    %c0_375 = arith.constant 0 : index
    %c0_376 = arith.constant 0 : index
    %444 = vector.load %arg5[%c21_374, %c0_375, %c0_376] : memref<25x8x256xf32, #tpu.memory_space<vmem>>, vector<1x8x256xf32>
    %445 = vector.shape_cast %444 : vector<1x8x256xf32> to vector<8x256xf32>
    %c225_i32_377 = arith.constant 225 : i32
    %446 = tpu.dynamic_rotate %319 by %c225_i32_377 dim 1 : vector<8x256xf32>, i32 -> vector<8x256xf32>
    %447 = arith.mulf %446, %445 : vector<8x256xf32>
    %448 = arith.truncf %447 : vector<8x256xf32> to vector<8x256xbf16>
    %c168_378 = arith.constant 168 : index
    %c0_379 = arith.constant 0 : index
    %449 = vector.load %arg12[%c168_378, %c0_379] : memref<408x256xbf16, #tpu.memory_space<vmem>>, vector<8x256xbf16>
    tpu.vector_store %arg12[%c168_378, %c0_379], %448 {strides = array<i32>} : memref<408x256xbf16, #tpu.memory_space<vmem>>, vector<8x256xbf16>,
    %c22_380 = arith.constant 22 : index
    %c0_381 = arith.constant 0 : index
    %c0_382 = arith.constant 0 : index
    %450 = vector.load %arg5[%c22_380, %c0_381, %c0_382] : memref<25x8x256xf32, #tpu.memory_space<vmem>>, vector<1x8x256xf32>
    %451 = vector.shape_cast %450 : vector<1x8x256xf32> to vector<8x256xf32>
    %c224_i32_383 = arith.constant 224 : i32
    %452 = tpu.dynamic_rotate %319 by %c224_i32_383 dim 1 : vector<8x256xf32>, i32 -> vector<8x256xf32>
    %453 = arith.mulf %452, %451 : vector<8x256xf32>
    %454 = arith.truncf %453 : vector<8x256xf32> to vector<8x256xbf16>
    %c176_384 = arith.constant 176 : index
    %c0_385 = arith.constant 0 : index
    %455 = vector.load %arg12[%c176_384, %c0_385] : memref<408x256xbf16, #tpu.memory_space<vmem>>, vector<8x256xbf16>
    tpu.vector_store %arg12[%c176_384, %c0_385], %454 {strides = array<i32>} : memref<408x256xbf16, #tpu.memory_space<vmem>>, vector<8x256xbf16>,
    %c23_386 = arith.constant 23 : index
    %c0_387 = arith.constant 0 : index
    %c0_388 = arith.constant 0 : index
    %456 = vector.load %arg5[%c23_386, %c0_387, %c0_388] : memref<25x8x256xf32, #tpu.memory_space<vmem>>, vector<1x8x256xf32>
    %457 = vector.shape_cast %456 : vector<1x8x256xf32> to vector<8x256xf32>
    %c223_i32_389 = arith.constant 223 : i32
    %458 = tpu.dynamic_rotate %319 by %c223_i32_389 dim 1 : vector<8x256xf32>, i32 -> vector<8x256xf32>
    %459 = arith.mulf %458, %457 : vector<8x256xf32>
    %460 = arith.truncf %459 : vector<8x256xf32> to vector<8x256xbf16>
    %c184_390 = arith.constant 184 : index
    %c0_391 = arith.constant 0 : index
    %461 = vector.load %arg12[%c184_390, %c0_391] : memref<408x256xbf16, #tpu.memory_space<vmem>>, vector<8x256xbf16>
    tpu.vector_store %arg12[%c184_390, %c0_391], %460 {strides = array<i32>} : memref<408x256xbf16, #tpu.memory_space<vmem>>, vector<8x256xbf16>,
    %c24_392 = arith.constant 24 : index
    %c0_393 = arith.constant 0 : index
    %c0_394 = arith.constant 0 : index
    %462 = vector.load %arg5[%c24_392, %c0_393, %c0_394] : memref<25x8x256xf32, #tpu.memory_space<vmem>>, vector<1x8x256xf32>
    %463 = vector.shape_cast %462 : vector<1x8x256xf32> to vector<8x256xf32>
    %c222_i32_395 = arith.constant 222 : i32
    %464 = tpu.dynamic_rotate %319 by %c222_i32_395 dim 1 : vector<8x256xf32>, i32 -> vector<8x256xf32>
    %465 = arith.mulf %464, %463 : vector<8x256xf32>
    %466 = arith.truncf %465 : vector<8x256xf32> to vector<8x256xbf16>
    %c192_396 = arith.constant 192 : index
    %c0_397 = arith.constant 0 : index
    %467 = vector.load %arg12[%c192_396, %c0_397] : memref<408x256xbf16, #tpu.memory_space<vmem>>, vector<8x256xbf16>
    tpu.vector_store %arg12[%c192_396, %c0_397], %466 {strides = array<i32>} : memref<408x256xbf16, #tpu.memory_space<vmem>>, vector<8x256xbf16>,
    %c200_398 = arith.constant 200 : index
    %c0_399 = arith.constant 0 : index
    %468 = vector.load %arg12[%c200_398, %c0_399] : memref<408x256xbf16, #tpu.memory_space<vmem>>, vector<8x256xbf16>
    tpu.vector_store %arg12[%c200_398, %c0_399], %5 {strides = array<i32>} : memref<408x256xbf16, #tpu.memory_space<vmem>>, vector<8x256xbf16>,
    %c0_400 = arith.constant 0 : index
    %c0_401 = arith.constant 0 : index
    %469 = vector.load %arg12[%c0_400, %c0_401] : memref<408x256xbf16, #tpu.memory_space<vmem>>, vector<208x256xbf16>
    %cst_402 = arith.constant dense<0.000000e+00> : vector<8x256xf32>
    %470 = tpu.matmul %321, %469, %cst_402 {dimension_numbers = #tpu.dot_dimension_numbers<[1], [0], [0], [1], [0, 0, 1, 1], [], []>} : vector<8x208xbf16>, vector<208x256xbf16>, vector<8x256xf32> -> vector<8x256xf32>
    %c0_403 = arith.constant 0 : index
    %c0_404 = arith.constant 0 : index
    %c0_405 = arith.constant 0 : index
    %471 = vector.load %arg7[%c0_403, %c0_404, %c0_405] : memref<2x8x208xbf16, #tpu.memory_space<vmem>>, vector<1x8x208xbf16>
    %472 = vector.shape_cast %471 : vector<1x8x208xbf16> to vector<8x208xbf16>
    %c0_406 = arith.constant 0 : index
    %c0_407 = arith.constant 0 : index
    %c0_408 = arith.constant 0 : index
    %473 = vector.load %arg5[%c0_406, %c0_407, %c0_408] : memref<25x8x256xf32, #tpu.memory_space<vmem>>, vector<1x8x256xf32>
    %474 = vector.shape_cast %473 : vector<1x8x256xf32> to vector<8x256xf32>
    %c34_i32_409 = arith.constant 34 : i32
    %475 = tpu.dynamic_rotate %160 by %c34_i32_409 dim 1 : vector<8x256xf32>, i32 -> vector<8x256xf32>
    %476 = arith.mulf %475, %474 : vector<8x256xf32>
    %477 = arith.truncf %476 : vector<8x256xf32> to vector<8x256xbf16>
    %c0_410 = arith.constant 0 : index
    %c0_411 = arith.constant 0 : index
    %478 = vector.load %arg13[%c0_410, %c0_411] : memref<408x256xbf16, #tpu.memory_space<vmem>>, vector<8x256xbf16>
    tpu.vector_store %arg13[%c0_410, %c0_411], %477 {strides = array<i32>} : memref<408x256xbf16, #tpu.memory_space<vmem>>, vector<8x256xbf16>,
    %c1_412 = arith.constant 1 : index
    %c0_413 = arith.constant 0 : index
    %c0_414 = arith.constant 0 : index
    %479 = vector.load %arg5[%c1_412, %c0_413, %c0_414] : memref<25x8x256xf32, #tpu.memory_space<vmem>>, vector<1x8x256xf32>
    %480 = vector.shape_cast %479 : vector<1x8x256xf32> to vector<8x256xf32>
    %c33_i32_415 = arith.constant 33 : i32
    %481 = tpu.dynamic_rotate %160 by %c33_i32_415 dim 1 : vector<8x256xf32>, i32 -> vector<8x256xf32>
    %482 = arith.mulf %481, %480 : vector<8x256xf32>
    %483 = arith.truncf %482 : vector<8x256xf32> to vector<8x256xbf16>
    %c8_416 = arith.constant 8 : index
    %c0_417 = arith.constant 0 : index
    %484 = vector.load %arg13[%c8_416, %c0_417] : memref<408x256xbf16, #tpu.memory_space<vmem>>, vector<8x256xbf16>
    tpu.vector_store %arg13[%c8_416, %c0_417], %483 {strides = array<i32>} : memref<408x256xbf16, #tpu.memory_space<vmem>>, vector<8x256xbf16>,
    %c2_418 = arith.constant 2 : index
    %c0_419 = arith.constant 0 : index
    %c0_420 = arith.constant 0 : index
    %485 = vector.load %arg5[%c2_418, %c0_419, %c0_420] : memref<25x8x256xf32, #tpu.memory_space<vmem>>, vector<1x8x256xf32>
    %486 = vector.shape_cast %485 : vector<1x8x256xf32> to vector<8x256xf32>
    %c32_i32_421 = arith.constant 32 : i32
    %487 = tpu.dynamic_rotate %160 by %c32_i32_421 dim 1 : vector<8x256xf32>, i32 -> vector<8x256xf32>
    %488 = arith.mulf %487, %486 : vector<8x256xf32>
    %489 = arith.truncf %488 : vector<8x256xf32> to vector<8x256xbf16>
    %c16_422 = arith.constant 16 : index
    %c0_423 = arith.constant 0 : index
    %490 = vector.load %arg13[%c16_422, %c0_423] : memref<408x256xbf16, #tpu.memory_space<vmem>>, vector<8x256xbf16>
    tpu.vector_store %arg13[%c16_422, %c0_423], %489 {strides = array<i32>} : memref<408x256xbf16, #tpu.memory_space<vmem>>, vector<8x256xbf16>,
    %c3_424 = arith.constant 3 : index
    %c0_425 = arith.constant 0 : index
    %c0_426 = arith.constant 0 : index
    %491 = vector.load %arg5[%c3_424, %c0_425, %c0_426] : memref<25x8x256xf32, #tpu.memory_space<vmem>>, vector<1x8x256xf32>
    %492 = vector.shape_cast %491 : vector<1x8x256xf32> to vector<8x256xf32>
    %c31_i32_427 = arith.constant 31 : i32
    %493 = tpu.dynamic_rotate %160 by %c31_i32_427 dim 1 : vector<8x256xf32>, i32 -> vector<8x256xf32>
    %494 = arith.mulf %493, %492 : vector<8x256xf32>
    %495 = arith.truncf %494 : vector<8x256xf32> to vector<8x256xbf16>
    %c24_428 = arith.constant 24 : index
    %c0_429 = arith.constant 0 : index
    %496 = vector.load %arg13[%c24_428, %c0_429] : memref<408x256xbf16, #tpu.memory_space<vmem>>, vector<8x256xbf16>
    tpu.vector_store %arg13[%c24_428, %c0_429], %495 {strides = array<i32>} : memref<408x256xbf16, #tpu.memory_space<vmem>>, vector<8x256xbf16>,
    %c4_430 = arith.constant 4 : index
    %c0_431 = arith.constant 0 : index
    %c0_432 = arith.constant 0 : index
    %497 = vector.load %arg5[%c4_430, %c0_431, %c0_432] : memref<25x8x256xf32, #tpu.memory_space<vmem>>, vector<1x8x256xf32>
    %498 = vector.shape_cast %497 : vector<1x8x256xf32> to vector<8x256xf32>
    %c30_i32_433 = arith.constant 30 : i32
    %499 = tpu.dynamic_rotate %160 by %c30_i32_433 dim 1 : vector<8x256xf32>, i32 -> vector<8x256xf32>
    %500 = arith.mulf %499, %498 : vector<8x256xf32>
    %501 = arith.truncf %500 : vector<8x256xf32> to vector<8x256xbf16>
    %c32_434 = arith.constant 32 : index
    %c0_435 = arith.constant 0 : index
    %502 = vector.load %arg13[%c32_434, %c0_435] : memref<408x256xbf16, #tpu.memory_space<vmem>>, vector<8x256xbf16>
    tpu.vector_store %arg13[%c32_434, %c0_435], %501 {strides = array<i32>} : memref<408x256xbf16, #tpu.memory_space<vmem>>, vector<8x256xbf16>,
    %c5_436 = arith.constant 5 : index
    %c0_437 = arith.constant 0 : index
    %c0_438 = arith.constant 0 : index
    %503 = vector.load %arg5[%c5_436, %c0_437, %c0_438] : memref<25x8x256xf32, #tpu.memory_space<vmem>>, vector<1x8x256xf32>
    %504 = vector.shape_cast %503 : vector<1x8x256xf32> to vector<8x256xf32>
    %c18_i32_439 = arith.constant 18 : i32
    %505 = tpu.dynamic_rotate %160 by %c18_i32_439 dim 1 : vector<8x256xf32>, i32 -> vector<8x256xf32>
    %506 = arith.mulf %505, %504 : vector<8x256xf32>
    %507 = arith.truncf %506 : vector<8x256xf32> to vector<8x256xbf16>
    %c40_440 = arith.constant 40 : index
    %c0_441 = arith.constant 0 : index
    %508 = vector.load %arg13[%c40_440, %c0_441] : memref<408x256xbf16, #tpu.memory_space<vmem>>, vector<8x256xbf16>
    tpu.vector_store %arg13[%c40_440, %c0_441], %507 {strides = array<i32>} : memref<408x256xbf16, #tpu.memory_space<vmem>>, vector<8x256xbf16>,
    %c6_442 = arith.constant 6 : index
    %c0_443 = arith.constant 0 : index
    %c0_444 = arith.constant 0 : index
    %509 = vector.load %arg5[%c6_442, %c0_443, %c0_444] : memref<25x8x256xf32, #tpu.memory_space<vmem>>, vector<1x8x256xf32>
    %510 = vector.shape_cast %509 : vector<1x8x256xf32> to vector<8x256xf32>
    %c17_i32_445 = arith.constant 17 : i32
    %511 = tpu.dynamic_rotate %160 by %c17_i32_445 dim 1 : vector<8x256xf32>, i32 -> vector<8x256xf32>
    %512 = arith.mulf %511, %510 : vector<8x256xf32>
    %513 = arith.truncf %512 : vector<8x256xf32> to vector<8x256xbf16>
    %c48_446 = arith.constant 48 : index
    %c0_447 = arith.constant 0 : index
    %514 = vector.load %arg13[%c48_446, %c0_447] : memref<408x256xbf16, #tpu.memory_space<vmem>>, vector<8x256xbf16>
    tpu.vector_store %arg13[%c48_446, %c0_447], %513 {strides = array<i32>} : memref<408x256xbf16, #tpu.memory_space<vmem>>, vector<8x256xbf16>,
    %c7_448 = arith.constant 7 : index
    %c0_449 = arith.constant 0 : index
    %c0_450 = arith.constant 0 : index
    %515 = vector.load %arg5[%c7_448, %c0_449, %c0_450] : memref<25x8x256xf32, #tpu.memory_space<vmem>>, vector<1x8x256xf32>
    %516 = vector.shape_cast %515 : vector<1x8x256xf32> to vector<8x256xf32>
    %c16_i32_451 = arith.constant 16 : i32
    %517 = tpu.dynamic_rotate %160 by %c16_i32_451 dim 1 : vector<8x256xf32>, i32 -> vector<8x256xf32>
    %518 = arith.mulf %517, %516 : vector<8x256xf32>
    %519 = arith.truncf %518 : vector<8x256xf32> to vector<8x256xbf16>
    %c56_452 = arith.constant 56 : index
    %c0_453 = arith.constant 0 : index
    %520 = vector.load %arg13[%c56_452, %c0_453] : memref<408x256xbf16, #tpu.memory_space<vmem>>, vector<8x256xbf16>
    tpu.vector_store %arg13[%c56_452, %c0_453], %519 {strides = array<i32>} : memref<408x256xbf16, #tpu.memory_space<vmem>>, vector<8x256xbf16>,
    %c8_454 = arith.constant 8 : index
    %c0_455 = arith.constant 0 : index
    %c0_456 = arith.constant 0 : index
    %521 = vector.load %arg5[%c8_454, %c0_455, %c0_456] : memref<25x8x256xf32, #tpu.memory_space<vmem>>, vector<1x8x256xf32>
    %522 = vector.shape_cast %521 : vector<1x8x256xf32> to vector<8x256xf32>
    %c15_i32_457 = arith.constant 15 : i32
    %523 = tpu.dynamic_rotate %160 by %c15_i32_457 dim 1 : vector<8x256xf32>, i32 -> vector<8x256xf32>
    %524 = arith.mulf %523, %522 : vector<8x256xf32>
    %525 = arith.truncf %524 : vector<8x256xf32> to vector<8x256xbf16>
    %c64_458 = arith.constant 64 : index
    %c0_459 = arith.constant 0 : index
    %526 = vector.load %arg13[%c64_458, %c0_459] : memref<408x256xbf16, #tpu.memory_space<vmem>>, vector<8x256xbf16>
    tpu.vector_store %arg13[%c64_458, %c0_459], %525 {strides = array<i32>} : memref<408x256xbf16, #tpu.memory_space<vmem>>, vector<8x256xbf16>,
    %c9_460 = arith.constant 9 : index
    %c0_461 = arith.constant 0 : index
    %c0_462 = arith.constant 0 : index
    %527 = vector.load %arg5[%c9_460, %c0_461, %c0_462] : memref<25x8x256xf32, #tpu.memory_space<vmem>>, vector<1x8x256xf32>
    %528 = vector.shape_cast %527 : vector<1x8x256xf32> to vector<8x256xf32>
    %c14_i32_463 = arith.constant 14 : i32
    %529 = tpu.dynamic_rotate %160 by %c14_i32_463 dim 1 : vector<8x256xf32>, i32 -> vector<8x256xf32>
    %530 = arith.mulf %529, %528 : vector<8x256xf32>
    %531 = arith.truncf %530 : vector<8x256xf32> to vector<8x256xbf16>
    %c72_464 = arith.constant 72 : index
    %c0_465 = arith.constant 0 : index
    %532 = vector.load %arg13[%c72_464, %c0_465] : memref<408x256xbf16, #tpu.memory_space<vmem>>, vector<8x256xbf16>
    tpu.vector_store %arg13[%c72_464, %c0_465], %531 {strides = array<i32>} : memref<408x256xbf16, #tpu.memory_space<vmem>>, vector<8x256xbf16>,
    %c10_466 = arith.constant 10 : index
    %c0_467 = arith.constant 0 : index
    %c0_468 = arith.constant 0 : index
    %533 = vector.load %arg5[%c10_466, %c0_467, %c0_468] : memref<25x8x256xf32, #tpu.memory_space<vmem>>, vector<1x8x256xf32>
    %534 = vector.shape_cast %533 : vector<1x8x256xf32> to vector<8x256xf32>
    %c2_i32_469 = arith.constant 2 : i32
    %535 = tpu.dynamic_rotate %160 by %c2_i32_469 dim 1 : vector<8x256xf32>, i32 -> vector<8x256xf32>
    %536 = arith.mulf %535, %534 : vector<8x256xf32>
    %537 = arith.truncf %536 : vector<8x256xf32> to vector<8x256xbf16>
    %c80_470 = arith.constant 80 : index
    %c0_471 = arith.constant 0 : index
    %538 = vector.load %arg13[%c80_470, %c0_471] : memref<408x256xbf16, #tpu.memory_space<vmem>>, vector<8x256xbf16>
    tpu.vector_store %arg13[%c80_470, %c0_471], %537 {strides = array<i32>} : memref<408x256xbf16, #tpu.memory_space<vmem>>, vector<8x256xbf16>,
    %c11_472 = arith.constant 11 : index
    %c0_473 = arith.constant 0 : index
    %c0_474 = arith.constant 0 : index
    %539 = vector.load %arg5[%c11_472, %c0_473, %c0_474] : memref<25x8x256xf32, #tpu.memory_space<vmem>>, vector<1x8x256xf32>
    %540 = vector.shape_cast %539 : vector<1x8x256xf32> to vector<8x256xf32>
    %c1_i32_475 = arith.constant 1 : i32
    %541 = tpu.dynamic_rotate %160 by %c1_i32_475 dim 1 : vector<8x256xf32>, i32 -> vector<8x256xf32>
    %542 = arith.mulf %541, %540 : vector<8x256xf32>
    %543 = arith.truncf %542 : vector<8x256xf32> to vector<8x256xbf16>
    %c88_476 = arith.constant 88 : index
    %c0_477 = arith.constant 0 : index
    %544 = vector.load %arg13[%c88_476, %c0_477] : memref<408x256xbf16, #tpu.memory_space<vmem>>, vector<8x256xbf16>
    tpu.vector_store %arg13[%c88_476, %c0_477], %543 {strides = array<i32>} : memref<408x256xbf16, #tpu.memory_space<vmem>>, vector<8x256xbf16>,
    %545 = arith.truncf %160 : vector<8x256xf32> to vector<8x256xbf16>
    %c96_478 = arith.constant 96 : index
    %c0_479 = arith.constant 0 : index
    %546 = vector.load %arg13[%c96_478, %c0_479] : memref<408x256xbf16, #tpu.memory_space<vmem>>, vector<8x256xbf16>
    tpu.vector_store %arg13[%c96_478, %c0_479], %545 {strides = array<i32>} : memref<408x256xbf16, #tpu.memory_space<vmem>>, vector<8x256xbf16>,
    %c13_480 = arith.constant 13 : index
    %c0_481 = arith.constant 0 : index
    %c0_482 = arith.constant 0 : index
    %547 = vector.load %arg5[%c13_480, %c0_481, %c0_482] : memref<25x8x256xf32, #tpu.memory_space<vmem>>, vector<1x8x256xf32>
    %548 = vector.shape_cast %547 : vector<1x8x256xf32> to vector<8x256xf32>
    %c255_i32_483 = arith.constant 255 : i32
    %549 = tpu.dynamic_rotate %160 by %c255_i32_483 dim 1 : vector<8x256xf32>, i32 -> vector<8x256xf32>
    %550 = arith.mulf %549, %548 : vector<8x256xf32>
    %551 = arith.truncf %550 : vector<8x256xf32> to vector<8x256xbf16>
    %c104_484 = arith.constant 104 : index
    %c0_485 = arith.constant 0 : index
    %552 = vector.load %arg13[%c104_484, %c0_485] : memref<408x256xbf16, #tpu.memory_space<vmem>>, vector<8x256xbf16>
    tpu.vector_store %arg13[%c104_484, %c0_485], %551 {strides = array<i32>} : memref<408x256xbf16, #tpu.memory_space<vmem>>, vector<8x256xbf16>,
    %c14_486 = arith.constant 14 : index
    %c0_487 = arith.constant 0 : index
    %c0_488 = arith.constant 0 : index
    %553 = vector.load %arg5[%c14_486, %c0_487, %c0_488] : memref<25x8x256xf32, #tpu.memory_space<vmem>>, vector<1x8x256xf32>
    %554 = vector.shape_cast %553 : vector<1x8x256xf32> to vector<8x256xf32>
    %c254_i32_489 = arith.constant 254 : i32
    %555 = tpu.dynamic_rotate %160 by %c254_i32_489 dim 1 : vector<8x256xf32>, i32 -> vector<8x256xf32>
    %556 = arith.mulf %555, %554 : vector<8x256xf32>
    %557 = arith.truncf %556 : vector<8x256xf32> to vector<8x256xbf16>
    %c112_490 = arith.constant 112 : index
    %c0_491 = arith.constant 0 : index
    %558 = vector.load %arg13[%c112_490, %c0_491] : memref<408x256xbf16, #tpu.memory_space<vmem>>, vector<8x256xbf16>
    tpu.vector_store %arg13[%c112_490, %c0_491], %557 {strides = array<i32>} : memref<408x256xbf16, #tpu.memory_space<vmem>>, vector<8x256xbf16>,
    %c15_492 = arith.constant 15 : index
    %c0_493 = arith.constant 0 : index
    %c0_494 = arith.constant 0 : index
    %559 = vector.load %arg5[%c15_492, %c0_493, %c0_494] : memref<25x8x256xf32, #tpu.memory_space<vmem>>, vector<1x8x256xf32>
    %560 = vector.shape_cast %559 : vector<1x8x256xf32> to vector<8x256xf32>
    %c242_i32_495 = arith.constant 242 : i32
    %561 = tpu.dynamic_rotate %160 by %c242_i32_495 dim 1 : vector<8x256xf32>, i32 -> vector<8x256xf32>
    %562 = arith.mulf %561, %560 : vector<8x256xf32>
    %563 = arith.truncf %562 : vector<8x256xf32> to vector<8x256xbf16>
    %c120_496 = arith.constant 120 : index
    %c0_497 = arith.constant 0 : index
    %564 = vector.load %arg13[%c120_496, %c0_497] : memref<408x256xbf16, #tpu.memory_space<vmem>>, vector<8x256xbf16>
    tpu.vector_store %arg13[%c120_496, %c0_497], %563 {strides = array<i32>} : memref<408x256xbf16, #tpu.memory_space<vmem>>, vector<8x256xbf16>,
    %c16_498 = arith.constant 16 : index
    %c0_499 = arith.constant 0 : index
    %c0_500 = arith.constant 0 : index
    %565 = vector.load %arg5[%c16_498, %c0_499, %c0_500] : memref<25x8x256xf32, #tpu.memory_space<vmem>>, vector<1x8x256xf32>
    %566 = vector.shape_cast %565 : vector<1x8x256xf32> to vector<8x256xf32>
    %c241_i32_501 = arith.constant 241 : i32
    %567 = tpu.dynamic_rotate %160 by %c241_i32_501 dim 1 : vector<8x256xf32>, i32 -> vector<8x256xf32>
    %568 = arith.mulf %567, %566 : vector<8x256xf32>
    %569 = arith.truncf %568 : vector<8x256xf32> to vector<8x256xbf16>
    %c128_502 = arith.constant 128 : index
    %c0_503 = arith.constant 0 : index
    %570 = vector.load %arg13[%c128_502, %c0_503] : memref<408x256xbf16, #tpu.memory_space<vmem>>, vector<8x256xbf16>
    tpu.vector_store %arg13[%c128_502, %c0_503], %569 {strides = array<i32>} : memref<408x256xbf16, #tpu.memory_space<vmem>>, vector<8x256xbf16>,
    %c17_504 = arith.constant 17 : index
    %c0_505 = arith.constant 0 : index
    %c0_506 = arith.constant 0 : index
    %571 = vector.load %arg5[%c17_504, %c0_505, %c0_506] : memref<25x8x256xf32, #tpu.memory_space<vmem>>, vector<1x8x256xf32>
    %572 = vector.shape_cast %571 : vector<1x8x256xf32> to vector<8x256xf32>
    %c240_i32_507 = arith.constant 240 : i32
    %573 = tpu.dynamic_rotate %160 by %c240_i32_507 dim 1 : vector<8x256xf32>, i32 -> vector<8x256xf32>
    %574 = arith.mulf %573, %572 : vector<8x256xf32>
    %575 = arith.truncf %574 : vector<8x256xf32> to vector<8x256xbf16>
    %c136_508 = arith.constant 136 : index
    %c0_509 = arith.constant 0 : index
    %576 = vector.load %arg13[%c136_508, %c0_509] : memref<408x256xbf16, #tpu.memory_space<vmem>>, vector<8x256xbf16>
    tpu.vector_store %arg13[%c136_508, %c0_509], %575 {strides = array<i32>} : memref<408x256xbf16, #tpu.memory_space<vmem>>, vector<8x256xbf16>,
    %c18_510 = arith.constant 18 : index
    %c0_511 = arith.constant 0 : index
    %c0_512 = arith.constant 0 : index
    %577 = vector.load %arg5[%c18_510, %c0_511, %c0_512] : memref<25x8x256xf32, #tpu.memory_space<vmem>>, vector<1x8x256xf32>
    %578 = vector.shape_cast %577 : vector<1x8x256xf32> to vector<8x256xf32>
    %c239_i32_513 = arith.constant 239 : i32
    %579 = tpu.dynamic_rotate %160 by %c239_i32_513 dim 1 : vector<8x256xf32>, i32 -> vector<8x256xf32>
    %580 = arith.mulf %579, %578 : vector<8x256xf32>
    %581 = arith.truncf %580 : vector<8x256xf32> to vector<8x256xbf16>
    %c144_514 = arith.constant 144 : index
    %c0_515 = arith.constant 0 : index
    %582 = vector.load %arg13[%c144_514, %c0_515] : memref<408x256xbf16, #tpu.memory_space<vmem>>, vector<8x256xbf16>
    tpu.vector_store %arg13[%c144_514, %c0_515], %581 {strides = array<i32>} : memref<408x256xbf16, #tpu.memory_space<vmem>>, vector<8x256xbf16>,
    %c19_516 = arith.constant 19 : index
    %c0_517 = arith.constant 0 : index
    %c0_518 = arith.constant 0 : index
    %583 = vector.load %arg5[%c19_516, %c0_517, %c0_518] : memref<25x8x256xf32, #tpu.memory_space<vmem>>, vector<1x8x256xf32>
    %584 = vector.shape_cast %583 : vector<1x8x256xf32> to vector<8x256xf32>
    %c238_i32_519 = arith.constant 238 : i32
    %585 = tpu.dynamic_rotate %160 by %c238_i32_519 dim 1 : vector<8x256xf32>, i32 -> vector<8x256xf32>
    %586 = arith.mulf %585, %584 : vector<8x256xf32>
    %587 = arith.truncf %586 : vector<8x256xf32> to vector<8x256xbf16>
    %c152_520 = arith.constant 152 : index
    %c0_521 = arith.constant 0 : index
    %588 = vector.load %arg13[%c152_520, %c0_521] : memref<408x256xbf16, #tpu.memory_space<vmem>>, vector<8x256xbf16>
    tpu.vector_store %arg13[%c152_520, %c0_521], %587 {strides = array<i32>} : memref<408x256xbf16, #tpu.memory_space<vmem>>, vector<8x256xbf16>,
    %c20_522 = arith.constant 20 : index
    %c0_523 = arith.constant 0 : index
    %c0_524 = arith.constant 0 : index
    %589 = vector.load %arg5[%c20_522, %c0_523, %c0_524] : memref<25x8x256xf32, #tpu.memory_space<vmem>>, vector<1x8x256xf32>
    %590 = vector.shape_cast %589 : vector<1x8x256xf32> to vector<8x256xf32>
    %c226_i32_525 = arith.constant 226 : i32
    %591 = tpu.dynamic_rotate %160 by %c226_i32_525 dim 1 : vector<8x256xf32>, i32 -> vector<8x256xf32>
    %592 = arith.mulf %591, %590 : vector<8x256xf32>
    %593 = arith.truncf %592 : vector<8x256xf32> to vector<8x256xbf16>
    %c160_526 = arith.constant 160 : index
    %c0_527 = arith.constant 0 : index
    %594 = vector.load %arg13[%c160_526, %c0_527] : memref<408x256xbf16, #tpu.memory_space<vmem>>, vector<8x256xbf16>
    tpu.vector_store %arg13[%c160_526, %c0_527], %593 {strides = array<i32>} : memref<408x256xbf16, #tpu.memory_space<vmem>>, vector<8x256xbf16>,
    %c21_528 = arith.constant 21 : index
    %c0_529 = arith.constant 0 : index
    %c0_530 = arith.constant 0 : index
    %595 = vector.load %arg5[%c21_528, %c0_529, %c0_530] : memref<25x8x256xf32, #tpu.memory_space<vmem>>, vector<1x8x256xf32>
    %596 = vector.shape_cast %595 : vector<1x8x256xf32> to vector<8x256xf32>
    %c225_i32_531 = arith.constant 225 : i32
    %597 = tpu.dynamic_rotate %160 by %c225_i32_531 dim 1 : vector<8x256xf32>, i32 -> vector<8x256xf32>
    %598 = arith.mulf %597, %596 : vector<8x256xf32>
    %599 = arith.truncf %598 : vector<8x256xf32> to vector<8x256xbf16>
    %c168_532 = arith.constant 168 : index
    %c0_533 = arith.constant 0 : index
    %600 = vector.load %arg13[%c168_532, %c0_533] : memref<408x256xbf16, #tpu.memory_space<vmem>>, vector<8x256xbf16>
    tpu.vector_store %arg13[%c168_532, %c0_533], %599 {strides = array<i32>} : memref<408x256xbf16, #tpu.memory_space<vmem>>, vector<8x256xbf16>,
    %c22_534 = arith.constant 22 : index
    %c0_535 = arith.constant 0 : index
    %c0_536 = arith.constant 0 : index
    %601 = vector.load %arg5[%c22_534, %c0_535, %c0_536] : memref<25x8x256xf32, #tpu.memory_space<vmem>>, vector<1x8x256xf32>
    %602 = vector.shape_cast %601 : vector<1x8x256xf32> to vector<8x256xf32>
    %c224_i32_537 = arith.constant 224 : i32
    %603 = tpu.dynamic_rotate %160 by %c224_i32_537 dim 1 : vector<8x256xf32>, i32 -> vector<8x256xf32>
    %604 = arith.mulf %603, %602 : vector<8x256xf32>
    %605 = arith.truncf %604 : vector<8x256xf32> to vector<8x256xbf16>
    %c176_538 = arith.constant 176 : index
    %c0_539 = arith.constant 0 : index
    %606 = vector.load %arg13[%c176_538, %c0_539] : memref<408x256xbf16, #tpu.memory_space<vmem>>, vector<8x256xbf16>
    tpu.vector_store %arg13[%c176_538, %c0_539], %605 {strides = array<i32>} : memref<408x256xbf16, #tpu.memory_space<vmem>>, vector<8x256xbf16>,
    %c23_540 = arith.constant 23 : index
    %c0_541 = arith.constant 0 : index
    %c0_542 = arith.constant 0 : index
    %607 = vector.load %arg5[%c23_540, %c0_541, %c0_542] : memref<25x8x256xf32, #tpu.memory_space<vmem>>, vector<1x8x256xf32>
    %608 = vector.shape_cast %607 : vector<1x8x256xf32> to vector<8x256xf32>
    %c223_i32_543 = arith.constant 223 : i32
    %609 = tpu.dynamic_rotate %160 by %c223_i32_543 dim 1 : vector<8x256xf32>, i32 -> vector<8x256xf32>
    %610 = arith.mulf %609, %608 : vector<8x256xf32>
    %611 = arith.truncf %610 : vector<8x256xf32> to vector<8x256xbf16>
    %c184_544 = arith.constant 184 : index
    %c0_545 = arith.constant 0 : index
    %612 = vector.load %arg13[%c184_544, %c0_545] : memref<408x256xbf16, #tpu.memory_space<vmem>>, vector<8x256xbf16>
    tpu.vector_store %arg13[%c184_544, %c0_545], %611 {strides = array<i32>} : memref<408x256xbf16, #tpu.memory_space<vmem>>, vector<8x256xbf16>,
    %c24_546 = arith.constant 24 : index
    %c0_547 = arith.constant 0 : index
    %c0_548 = arith.constant 0 : index
    %613 = vector.load %arg5[%c24_546, %c0_547, %c0_548] : memref<25x8x256xf32, #tpu.memory_space<vmem>>, vector<1x8x256xf32>
    %614 = vector.shape_cast %613 : vector<1x8x256xf32> to vector<8x256xf32>
    %c222_i32_549 = arith.constant 222 : i32
    %615 = tpu.dynamic_rotate %160 by %c222_i32_549 dim 1 : vector<8x256xf32>, i32 -> vector<8x256xf32>
    %616 = arith.mulf %615, %614 : vector<8x256xf32>
    %617 = arith.truncf %616 : vector<8x256xf32> to vector<8x256xbf16>
    %c192_550 = arith.constant 192 : index
    %c0_551 = arith.constant 0 : index
    %618 = vector.load %arg13[%c192_550, %c0_551] : memref<408x256xbf16, #tpu.memory_space<vmem>>, vector<8x256xbf16>
    tpu.vector_store %arg13[%c192_550, %c0_551], %617 {strides = array<i32>} : memref<408x256xbf16, #tpu.memory_space<vmem>>, vector<8x256xbf16>,
    %c200_552 = arith.constant 200 : index
    %c0_553 = arith.constant 0 : index
    %619 = vector.load %arg13[%c200_552, %c0_553] : memref<408x256xbf16, #tpu.memory_space<vmem>>, vector<8x256xbf16>
    tpu.vector_store %arg13[%c200_552, %c0_553], %5 {strides = array<i32>} : memref<408x256xbf16, #tpu.memory_space<vmem>>, vector<8x256xbf16>,
    %c0_554 = arith.constant 0 : index
    %c0_555 = arith.constant 0 : index
    %620 = vector.load %arg13[%c0_554, %c0_555] : memref<408x256xbf16, #tpu.memory_space<vmem>>, vector<208x256xbf16>
    %cst_556 = arith.constant dense<0.000000e+00> : vector<8x256xf32>
    %621 = tpu.matmul %472, %620, %cst_556 {dimension_numbers = #tpu.dot_dimension_numbers<[1], [0], [0], [1], [0, 0, 1, 1], [], []>} : vector<8x208xbf16>, vector<208x256xbf16>, vector<8x256xf32> -> vector<8x256xf32>
    %622 = arith.addf %315, %621 : vector<8x256xf32>
    %c1_557 = arith.constant 1 : index
    %c0_558 = arith.constant 0 : index
    %c0_559 = arith.constant 0 : index
    %623 = vector.load %arg7[%c1_557, %c0_558, %c0_559] : memref<2x8x208xbf16, #tpu.memory_space<vmem>>, vector<1x8x208xbf16>
    %624 = vector.shape_cast %623 : vector<1x8x208xbf16> to vector<8x208xbf16>
    %c0_560 = arith.constant 0 : index
    %c0_561 = arith.constant 0 : index
    %c0_562 = arith.constant 0 : index
    %625 = vector.load %arg5[%c0_560, %c0_561, %c0_562] : memref<25x8x256xf32, #tpu.memory_space<vmem>>, vector<1x8x256xf32>
    %626 = vector.shape_cast %625 : vector<1x8x256xf32> to vector<8x256xf32>
    %c34_i32_563 = arith.constant 34 : i32
    %627 = tpu.dynamic_rotate %622 by %c34_i32_563 dim 1 : vector<8x256xf32>, i32 -> vector<8x256xf32>
    %628 = arith.mulf %627, %626 : vector<8x256xf32>
    %629 = arith.truncf %628 : vector<8x256xf32> to vector<8x256xbf16>
    %c0_564 = arith.constant 0 : index
    %c0_565 = arith.constant 0 : index
    %630 = vector.load %arg12[%c0_564, %c0_565] : memref<408x256xbf16, #tpu.memory_space<vmem>>, vector<8x256xbf16>
    tpu.vector_store %arg12[%c0_564, %c0_565], %629 {strides = array<i32>} : memref<408x256xbf16, #tpu.memory_space<vmem>>, vector<8x256xbf16>,
    %c1_566 = arith.constant 1 : index
    %c0_567 = arith.constant 0 : index
    %c0_568 = arith.constant 0 : index
    %631 = vector.load %arg5[%c1_566, %c0_567, %c0_568] : memref<25x8x256xf32, #tpu.memory_space<vmem>>, vector<1x8x256xf32>
    %632 = vector.shape_cast %631 : vector<1x8x256xf32> to vector<8x256xf32>
    %c33_i32_569 = arith.constant 33 : i32
    %633 = tpu.dynamic_rotate %622 by %c33_i32_569 dim 1 : vector<8x256xf32>, i32 -> vector<8x256xf32>
    %634 = arith.mulf %633, %632 : vector<8x256xf32>
    %635 = arith.truncf %634 : vector<8x256xf32> to vector<8x256xbf16>
    %c8_570 = arith.constant 8 : index
    %c0_571 = arith.constant 0 : index
    %636 = vector.load %arg12[%c8_570, %c0_571] : memref<408x256xbf16, #tpu.memory_space<vmem>>, vector<8x256xbf16>
    tpu.vector_store %arg12[%c8_570, %c0_571], %635 {strides = array<i32>} : memref<408x256xbf16, #tpu.memory_space<vmem>>, vector<8x256xbf16>,
    %c2_572 = arith.constant 2 : index
    %c0_573 = arith.constant 0 : index
    %c0_574 = arith.constant 0 : index
    %637 = vector.load %arg5[%c2_572, %c0_573, %c0_574] : memref<25x8x256xf32, #tpu.memory_space<vmem>>, vector<1x8x256xf32>
    %638 = vector.shape_cast %637 : vector<1x8x256xf32> to vector<8x256xf32>
    %c32_i32_575 = arith.constant 32 : i32
    %639 = tpu.dynamic_rotate %622 by %c32_i32_575 dim 1 : vector<8x256xf32>, i32 -> vector<8x256xf32>
    %640 = arith.mulf %639, %638 : vector<8x256xf32>
    %641 = arith.truncf %640 : vector<8x256xf32> to vector<8x256xbf16>
    %c16_576 = arith.constant 16 : index
    %c0_577 = arith.constant 0 : index
    %642 = vector.load %arg12[%c16_576, %c0_577] : memref<408x256xbf16, #tpu.memory_space<vmem>>, vector<8x256xbf16>
    tpu.vector_store %arg12[%c16_576, %c0_577], %641 {strides = array<i32>} : memref<408x256xbf16, #tpu.memory_space<vmem>>, vector<8x256xbf16>,
    %c3_578 = arith.constant 3 : index
    %c0_579 = arith.constant 0 : index
    %c0_580 = arith.constant 0 : index
    %643 = vector.load %arg5[%c3_578, %c0_579, %c0_580] : memref<25x8x256xf32, #tpu.memory_space<vmem>>, vector<1x8x256xf32>
    %644 = vector.shape_cast %643 : vector<1x8x256xf32> to vector<8x256xf32>
    %c31_i32_581 = arith.constant 31 : i32
    %645 = tpu.dynamic_rotate %622 by %c31_i32_581 dim 1 : vector<8x256xf32>, i32 -> vector<8x256xf32>
    %646 = arith.mulf %645, %644 : vector<8x256xf32>
    %647 = arith.truncf %646 : vector<8x256xf32> to vector<8x256xbf16>
    %c24_582 = arith.constant 24 : index
    %c0_583 = arith.constant 0 : index
    %648 = vector.load %arg12[%c24_582, %c0_583] : memref<408x256xbf16, #tpu.memory_space<vmem>>, vector<8x256xbf16>
    tpu.vector_store %arg12[%c24_582, %c0_583], %647 {strides = array<i32>} : memref<408x256xbf16, #tpu.memory_space<vmem>>, vector<8x256xbf16>,
    %c4_584 = arith.constant 4 : index
    %c0_585 = arith.constant 0 : index
    %c0_586 = arith.constant 0 : index
    %649 = vector.load %arg5[%c4_584, %c0_585, %c0_586] : memref<25x8x256xf32, #tpu.memory_space<vmem>>, vector<1x8x256xf32>
    %650 = vector.shape_cast %649 : vector<1x8x256xf32> to vector<8x256xf32>
    %c30_i32_587 = arith.constant 30 : i32
    %651 = tpu.dynamic_rotate %622 by %c30_i32_587 dim 1 : vector<8x256xf32>, i32 -> vector<8x256xf32>
    %652 = arith.mulf %651, %650 : vector<8x256xf32>
    %653 = arith.truncf %652 : vector<8x256xf32> to vector<8x256xbf16>
    %c32_588 = arith.constant 32 : index
    %c0_589 = arith.constant 0 : index
    %654 = vector.load %arg12[%c32_588, %c0_589] : memref<408x256xbf16, #tpu.memory_space<vmem>>, vector<8x256xbf16>
    tpu.vector_store %arg12[%c32_588, %c0_589], %653 {strides = array<i32>} : memref<408x256xbf16, #tpu.memory_space<vmem>>, vector<8x256xbf16>,
    %c5_590 = arith.constant 5 : index
    %c0_591 = arith.constant 0 : index
    %c0_592 = arith.constant 0 : index
    %655 = vector.load %arg5[%c5_590, %c0_591, %c0_592] : memref<25x8x256xf32, #tpu.memory_space<vmem>>, vector<1x8x256xf32>
    %656 = vector.shape_cast %655 : vector<1x8x256xf32> to vector<8x256xf32>
    %c18_i32_593 = arith.constant 18 : i32
    %657 = tpu.dynamic_rotate %622 by %c18_i32_593 dim 1 : vector<8x256xf32>, i32 -> vector<8x256xf32>
    %658 = arith.mulf %657, %656 : vector<8x256xf32>
    %659 = arith.truncf %658 : vector<8x256xf32> to vector<8x256xbf16>
    %c40_594 = arith.constant 40 : index
    %c0_595 = arith.constant 0 : index
    %660 = vector.load %arg12[%c40_594, %c0_595] : memref<408x256xbf16, #tpu.memory_space<vmem>>, vector<8x256xbf16>
    tpu.vector_store %arg12[%c40_594, %c0_595], %659 {strides = array<i32>} : memref<408x256xbf16, #tpu.memory_space<vmem>>, vector<8x256xbf16>,
    %c6_596 = arith.constant 6 : index
    %c0_597 = arith.constant 0 : index
    %c0_598 = arith.constant 0 : index
    %661 = vector.load %arg5[%c6_596, %c0_597, %c0_598] : memref<25x8x256xf32, #tpu.memory_space<vmem>>, vector<1x8x256xf32>
    %662 = vector.shape_cast %661 : vector<1x8x256xf32> to vector<8x256xf32>
    %c17_i32_599 = arith.constant 17 : i32
    %663 = tpu.dynamic_rotate %622 by %c17_i32_599 dim 1 : vector<8x256xf32>, i32 -> vector<8x256xf32>
    %664 = arith.mulf %663, %662 : vector<8x256xf32>
    %665 = arith.truncf %664 : vector<8x256xf32> to vector<8x256xbf16>
    %c48_600 = arith.constant 48 : index
    %c0_601 = arith.constant 0 : index
    %666 = vector.load %arg12[%c48_600, %c0_601] : memref<408x256xbf16, #tpu.memory_space<vmem>>, vector<8x256xbf16>
    tpu.vector_store %arg12[%c48_600, %c0_601], %665 {strides = array<i32>} : memref<408x256xbf16, #tpu.memory_space<vmem>>, vector<8x256xbf16>,
    %c7_602 = arith.constant 7 : index
    %c0_603 = arith.constant 0 : index
    %c0_604 = arith.constant 0 : index
    %667 = vector.load %arg5[%c7_602, %c0_603, %c0_604] : memref<25x8x256xf32, #tpu.memory_space<vmem>>, vector<1x8x256xf32>
    %668 = vector.shape_cast %667 : vector<1x8x256xf32> to vector<8x256xf32>
    %c16_i32_605 = arith.constant 16 : i32
    %669 = tpu.dynamic_rotate %622 by %c16_i32_605 dim 1 : vector<8x256xf32>, i32 -> vector<8x256xf32>
    %670 = arith.mulf %669, %668 : vector<8x256xf32>
    %671 = arith.truncf %670 : vector<8x256xf32> to vector<8x256xbf16>
    %c56_606 = arith.constant 56 : index
    %c0_607 = arith.constant 0 : index
    %672 = vector.load %arg12[%c56_606, %c0_607] : memref<408x256xbf16, #tpu.memory_space<vmem>>, vector<8x256xbf16>
    tpu.vector_store %arg12[%c56_606, %c0_607], %671 {strides = array<i32>} : memref<408x256xbf16, #tpu.memory_space<vmem>>, vector<8x256xbf16>,
    %c8_608 = arith.constant 8 : index
    %c0_609 = arith.constant 0 : index
    %c0_610 = arith.constant 0 : index
    %673 = vector.load %arg5[%c8_608, %c0_609, %c0_610] : memref<25x8x256xf32, #tpu.memory_space<vmem>>, vector<1x8x256xf32>
    %674 = vector.shape_cast %673 : vector<1x8x256xf32> to vector<8x256xf32>
    %c15_i32_611 = arith.constant 15 : i32
    %675 = tpu.dynamic_rotate %622 by %c15_i32_611 dim 1 : vector<8x256xf32>, i32 -> vector<8x256xf32>
    %676 = arith.mulf %675, %674 : vector<8x256xf32>
    %677 = arith.truncf %676 : vector<8x256xf32> to vector<8x256xbf16>
    %c64_612 = arith.constant 64 : index
    %c0_613 = arith.constant 0 : index
    %678 = vector.load %arg12[%c64_612, %c0_613] : memref<408x256xbf16, #tpu.memory_space<vmem>>, vector<8x256xbf16>
    tpu.vector_store %arg12[%c64_612, %c0_613], %677 {strides = array<i32>} : memref<408x256xbf16, #tpu.memory_space<vmem>>, vector<8x256xbf16>,
    %c9_614 = arith.constant 9 : index
    %c0_615 = arith.constant 0 : index
    %c0_616 = arith.constant 0 : index
    %679 = vector.load %arg5[%c9_614, %c0_615, %c0_616] : memref<25x8x256xf32, #tpu.memory_space<vmem>>, vector<1x8x256xf32>
    %680 = vector.shape_cast %679 : vector<1x8x256xf32> to vector<8x256xf32>
    %c14_i32_617 = arith.constant 14 : i32
    %681 = tpu.dynamic_rotate %622 by %c14_i32_617 dim 1 : vector<8x256xf32>, i32 -> vector<8x256xf32>
    %682 = arith.mulf %681, %680 : vector<8x256xf32>
    %683 = arith.truncf %682 : vector<8x256xf32> to vector<8x256xbf16>
    %c72_618 = arith.constant 72 : index
    %c0_619 = arith.constant 0 : index
    %684 = vector.load %arg12[%c72_618, %c0_619] : memref<408x256xbf16, #tpu.memory_space<vmem>>, vector<8x256xbf16>
    tpu.vector_store %arg12[%c72_618, %c0_619], %683 {strides = array<i32>} : memref<408x256xbf16, #tpu.memory_space<vmem>>, vector<8x256xbf16>,
    %c10_620 = arith.constant 10 : index
    %c0_621 = arith.constant 0 : index
    %c0_622 = arith.constant 0 : index
    %685 = vector.load %arg5[%c10_620, %c0_621, %c0_622] : memref<25x8x256xf32, #tpu.memory_space<vmem>>, vector<1x8x256xf32>
    %686 = vector.shape_cast %685 : vector<1x8x256xf32> to vector<8x256xf32>
    %c2_i32_623 = arith.constant 2 : i32
    %687 = tpu.dynamic_rotate %622 by %c2_i32_623 dim 1 : vector<8x256xf32>, i32 -> vector<8x256xf32>
    %688 = arith.mulf %687, %686 : vector<8x256xf32>
    %689 = arith.truncf %688 : vector<8x256xf32> to vector<8x256xbf16>
    %c80_624 = arith.constant 80 : index
    %c0_625 = arith.constant 0 : index
    %690 = vector.load %arg12[%c80_624, %c0_625] : memref<408x256xbf16, #tpu.memory_space<vmem>>, vector<8x256xbf16>
    tpu.vector_store %arg12[%c80_624, %c0_625], %689 {strides = array<i32>} : memref<408x256xbf16, #tpu.memory_space<vmem>>, vector<8x256xbf16>,
    %c11_626 = arith.constant 11 : index
    %c0_627 = arith.constant 0 : index
    %c0_628 = arith.constant 0 : index
    %691 = vector.load %arg5[%c11_626, %c0_627, %c0_628] : memref<25x8x256xf32, #tpu.memory_space<vmem>>, vector<1x8x256xf32>
    %692 = vector.shape_cast %691 : vector<1x8x256xf32> to vector<8x256xf32>
    %c1_i32_629 = arith.constant 1 : i32
    %693 = tpu.dynamic_rotate %622 by %c1_i32_629 dim 1 : vector<8x256xf32>, i32 -> vector<8x256xf32>
    %694 = arith.mulf %693, %692 : vector<8x256xf32>
    %695 = arith.truncf %694 : vector<8x256xf32> to vector<8x256xbf16>
    %c88_630 = arith.constant 88 : index
    %c0_631 = arith.constant 0 : index
    %696 = vector.load %arg12[%c88_630, %c0_631] : memref<408x256xbf16, #tpu.memory_space<vmem>>, vector<8x256xbf16>
    tpu.vector_store %arg12[%c88_630, %c0_631], %695 {strides = array<i32>} : memref<408x256xbf16, #tpu.memory_space<vmem>>, vector<8x256xbf16>,
    %697 = arith.truncf %622 : vector<8x256xf32> to vector<8x256xbf16>
    %c96_632 = arith.constant 96 : index
    %c0_633 = arith.constant 0 : index
    %698 = vector.load %arg12[%c96_632, %c0_633] : memref<408x256xbf16, #tpu.memory_space<vmem>>, vector<8x256xbf16>
    tpu.vector_store %arg12[%c96_632, %c0_633], %697 {strides = array<i32>} : memref<408x256xbf16, #tpu.memory_space<vmem>>, vector<8x256xbf16>,
    %c13_634 = arith.constant 13 : index
    %c0_635 = arith.constant 0 : index
    %c0_636 = arith.constant 0 : index
    %699 = vector.load %arg5[%c13_634, %c0_635, %c0_636] : memref<25x8x256xf32, #tpu.memory_space<vmem>>, vector<1x8x256xf32>
    %700 = vector.shape_cast %699 : vector<1x8x256xf32> to vector<8x256xf32>
    %c255_i32_637 = arith.constant 255 : i32
    %701 = tpu.dynamic_rotate %622 by %c255_i32_637 dim 1 : vector<8x256xf32>, i32 -> vector<8x256xf32>
    %702 = arith.mulf %701, %700 : vector<8x256xf32>
    %703 = arith.truncf %702 : vector<8x256xf32> to vector<8x256xbf16>
    %c104_638 = arith.constant 104 : index
    %c0_639 = arith.constant 0 : index
    %704 = vector.load %arg12[%c104_638, %c0_639] : memref<408x256xbf16, #tpu.memory_space<vmem>>, vector<8x256xbf16>
    tpu.vector_store %arg12[%c104_638, %c0_639], %703 {strides = array<i32>} : memref<408x256xbf16, #tpu.memory_space<vmem>>, vector<8x256xbf16>,
    %c14_640 = arith.constant 14 : index
    %c0_641 = arith.constant 0 : index
    %c0_642 = arith.constant 0 : index
    %705 = vector.load %arg5[%c14_640, %c0_641, %c0_642] : memref<25x8x256xf32, #tpu.memory_space<vmem>>, vector<1x8x256xf32>
    %706 = vector.shape_cast %705 : vector<1x8x256xf32> to vector<8x256xf32>
    %c254_i32_643 = arith.constant 254 : i32
    %707 = tpu.dynamic_rotate %622 by %c254_i32_643 dim 1 : vector<8x256xf32>, i32 -> vector<8x256xf32>
    %708 = arith.mulf %707, %706 : vector<8x256xf32>
    %709 = arith.truncf %708 : vector<8x256xf32> to vector<8x256xbf16>
    %c112_644 = arith.constant 112 : index
    %c0_645 = arith.constant 0 : index
    %710 = vector.load %arg12[%c112_644, %c0_645] : memref<408x256xbf16, #tpu.memory_space<vmem>>, vector<8x256xbf16>
    tpu.vector_store %arg12[%c112_644, %c0_645], %709 {strides = array<i32>} : memref<408x256xbf16, #tpu.memory_space<vmem>>, vector<8x256xbf16>,
    %c15_646 = arith.constant 15 : index
    %c0_647 = arith.constant 0 : index
    %c0_648 = arith.constant 0 : index
    %711 = vector.load %arg5[%c15_646, %c0_647, %c0_648] : memref<25x8x256xf32, #tpu.memory_space<vmem>>, vector<1x8x256xf32>
    %712 = vector.shape_cast %711 : vector<1x8x256xf32> to vector<8x256xf32>
    %c242_i32_649 = arith.constant 242 : i32
    %713 = tpu.dynamic_rotate %622 by %c242_i32_649 dim 1 : vector<8x256xf32>, i32 -> vector<8x256xf32>
    %714 = arith.mulf %713, %712 : vector<8x256xf32>
    %715 = arith.truncf %714 : vector<8x256xf32> to vector<8x256xbf16>
    %c120_650 = arith.constant 120 : index
    %c0_651 = arith.constant 0 : index
    %716 = vector.load %arg12[%c120_650, %c0_651] : memref<408x256xbf16, #tpu.memory_space<vmem>>, vector<8x256xbf16>
    tpu.vector_store %arg12[%c120_650, %c0_651], %715 {strides = array<i32>} : memref<408x256xbf16, #tpu.memory_space<vmem>>, vector<8x256xbf16>,
    %c16_652 = arith.constant 16 : index
    %c0_653 = arith.constant 0 : index
    %c0_654 = arith.constant 0 : index
    %717 = vector.load %arg5[%c16_652, %c0_653, %c0_654] : memref<25x8x256xf32, #tpu.memory_space<vmem>>, vector<1x8x256xf32>
    %718 = vector.shape_cast %717 : vector<1x8x256xf32> to vector<8x256xf32>
    %c241_i32_655 = arith.constant 241 : i32
    %719 = tpu.dynamic_rotate %622 by %c241_i32_655 dim 1 : vector<8x256xf32>, i32 -> vector<8x256xf32>
    %720 = arith.mulf %719, %718 : vector<8x256xf32>
    %721 = arith.truncf %720 : vector<8x256xf32> to vector<8x256xbf16>
    %c128_656 = arith.constant 128 : index
    %c0_657 = arith.constant 0 : index
    %722 = vector.load %arg12[%c128_656, %c0_657] : memref<408x256xbf16, #tpu.memory_space<vmem>>, vector<8x256xbf16>
    tpu.vector_store %arg12[%c128_656, %c0_657], %721 {strides = array<i32>} : memref<408x256xbf16, #tpu.memory_space<vmem>>, vector<8x256xbf16>,
    %c17_658 = arith.constant 17 : index
    %c0_659 = arith.constant 0 : index
    %c0_660 = arith.constant 0 : index
    %723 = vector.load %arg5[%c17_658, %c0_659, %c0_660] : memref<25x8x256xf32, #tpu.memory_space<vmem>>, vector<1x8x256xf32>
    %724 = vector.shape_cast %723 : vector<1x8x256xf32> to vector<8x256xf32>
    %c240_i32_661 = arith.constant 240 : i32
    %725 = tpu.dynamic_rotate %622 by %c240_i32_661 dim 1 : vector<8x256xf32>, i32 -> vector<8x256xf32>
    %726 = arith.mulf %725, %724 : vector<8x256xf32>
    %727 = arith.truncf %726 : vector<8x256xf32> to vector<8x256xbf16>
    %c136_662 = arith.constant 136 : index
    %c0_663 = arith.constant 0 : index
    %728 = vector.load %arg12[%c136_662, %c0_663] : memref<408x256xbf16, #tpu.memory_space<vmem>>, vector<8x256xbf16>
    tpu.vector_store %arg12[%c136_662, %c0_663], %727 {strides = array<i32>} : memref<408x256xbf16, #tpu.memory_space<vmem>>, vector<8x256xbf16>,
    %c18_664 = arith.constant 18 : index
    %c0_665 = arith.constant 0 : index
    %c0_666 = arith.constant 0 : index
    %729 = vector.load %arg5[%c18_664, %c0_665, %c0_666] : memref<25x8x256xf32, #tpu.memory_space<vmem>>, vector<1x8x256xf32>
    %730 = vector.shape_cast %729 : vector<1x8x256xf32> to vector<8x256xf32>
    %c239_i32_667 = arith.constant 239 : i32
    %731 = tpu.dynamic_rotate %622 by %c239_i32_667 dim 1 : vector<8x256xf32>, i32 -> vector<8x256xf32>
    %732 = arith.mulf %731, %730 : vector<8x256xf32>
    %733 = arith.truncf %732 : vector<8x256xf32> to vector<8x256xbf16>
    %c144_668 = arith.constant 144 : index
    %c0_669 = arith.constant 0 : index
    %734 = vector.load %arg12[%c144_668, %c0_669] : memref<408x256xbf16, #tpu.memory_space<vmem>>, vector<8x256xbf16>
    tpu.vector_store %arg12[%c144_668, %c0_669], %733 {strides = array<i32>} : memref<408x256xbf16, #tpu.memory_space<vmem>>, vector<8x256xbf16>,
    %c19_670 = arith.constant 19 : index
    %c0_671 = arith.constant 0 : index
    %c0_672 = arith.constant 0 : index
    %735 = vector.load %arg5[%c19_670, %c0_671, %c0_672] : memref<25x8x256xf32, #tpu.memory_space<vmem>>, vector<1x8x256xf32>
    %736 = vector.shape_cast %735 : vector<1x8x256xf32> to vector<8x256xf32>
    %c238_i32_673 = arith.constant 238 : i32
    %737 = tpu.dynamic_rotate %622 by %c238_i32_673 dim 1 : vector<8x256xf32>, i32 -> vector<8x256xf32>
    %738 = arith.mulf %737, %736 : vector<8x256xf32>
    %739 = arith.truncf %738 : vector<8x256xf32> to vector<8x256xbf16>
    %c152_674 = arith.constant 152 : index
    %c0_675 = arith.constant 0 : index
    %740 = vector.load %arg12[%c152_674, %c0_675] : memref<408x256xbf16, #tpu.memory_space<vmem>>, vector<8x256xbf16>
    tpu.vector_store %arg12[%c152_674, %c0_675], %739 {strides = array<i32>} : memref<408x256xbf16, #tpu.memory_space<vmem>>, vector<8x256xbf16>,
    %c20_676 = arith.constant 20 : index
    %c0_677 = arith.constant 0 : index
    %c0_678 = arith.constant 0 : index
    %741 = vector.load %arg5[%c20_676, %c0_677, %c0_678] : memref<25x8x256xf32, #tpu.memory_space<vmem>>, vector<1x8x256xf32>
    %742 = vector.shape_cast %741 : vector<1x8x256xf32> to vector<8x256xf32>
    %c226_i32_679 = arith.constant 226 : i32
    %743 = tpu.dynamic_rotate %622 by %c226_i32_679 dim 1 : vector<8x256xf32>, i32 -> vector<8x256xf32>
    %744 = arith.mulf %743, %742 : vector<8x256xf32>
    %745 = arith.truncf %744 : vector<8x256xf32> to vector<8x256xbf16>
    %c160_680 = arith.constant 160 : index
    %c0_681 = arith.constant 0 : index
    %746 = vector.load %arg12[%c160_680, %c0_681] : memref<408x256xbf16, #tpu.memory_space<vmem>>, vector<8x256xbf16>
    tpu.vector_store %arg12[%c160_680, %c0_681], %745 {strides = array<i32>} : memref<408x256xbf16, #tpu.memory_space<vmem>>, vector<8x256xbf16>,
    %c21_682 = arith.constant 21 : index
    %c0_683 = arith.constant 0 : index
    %c0_684 = arith.constant 0 : index
    %747 = vector.load %arg5[%c21_682, %c0_683, %c0_684] : memref<25x8x256xf32, #tpu.memory_space<vmem>>, vector<1x8x256xf32>
    %748 = vector.shape_cast %747 : vector<1x8x256xf32> to vector<8x256xf32>
    %c225_i32_685 = arith.constant 225 : i32
    %749 = tpu.dynamic_rotate %622 by %c225_i32_685 dim 1 : vector<8x256xf32>, i32 -> vector<8x256xf32>
    %750 = arith.mulf %749, %748 : vector<8x256xf32>
    %751 = arith.truncf %750 : vector<8x256xf32> to vector<8x256xbf16>
    %c168_686 = arith.constant 168 : index
    %c0_687 = arith.constant 0 : index
    %752 = vector.load %arg12[%c168_686, %c0_687] : memref<408x256xbf16, #tpu.memory_space<vmem>>, vector<8x256xbf16>
    tpu.vector_store %arg12[%c168_686, %c0_687], %751 {strides = array<i32>} : memref<408x256xbf16, #tpu.memory_space<vmem>>, vector<8x256xbf16>,
    %c22_688 = arith.constant 22 : index
    %c0_689 = arith.constant 0 : index
    %c0_690 = arith.constant 0 : index
    %753 = vector.load %arg5[%c22_688, %c0_689, %c0_690] : memref<25x8x256xf32, #tpu.memory_space<vmem>>, vector<1x8x256xf32>
    %754 = vector.shape_cast %753 : vector<1x8x256xf32> to vector<8x256xf32>
    %c224_i32_691 = arith.constant 224 : i32
    %755 = tpu.dynamic_rotate %622 by %c224_i32_691 dim 1 : vector<8x256xf32>, i32 -> vector<8x256xf32>
    %756 = arith.mulf %755, %754 : vector<8x256xf32>
    %757 = arith.truncf %756 : vector<8x256xf32> to vector<8x256xbf16>
    %c176_692 = arith.constant 176 : index
    %c0_693 = arith.constant 0 : index
    %758 = vector.load %arg12[%c176_692, %c0_693] : memref<408x256xbf16, #tpu.memory_space<vmem>>, vector<8x256xbf16>
    tpu.vector_store %arg12[%c176_692, %c0_693], %757 {strides = array<i32>} : memref<408x256xbf16, #tpu.memory_space<vmem>>, vector<8x256xbf16>,
    %c23_694 = arith.constant 23 : index
    %c0_695 = arith.constant 0 : index
    %c0_696 = arith.constant 0 : index
    %759 = vector.load %arg5[%c23_694, %c0_695, %c0_696] : memref<25x8x256xf32, #tpu.memory_space<vmem>>, vector<1x8x256xf32>
    %760 = vector.shape_cast %759 : vector<1x8x256xf32> to vector<8x256xf32>
    %c223_i32_697 = arith.constant 223 : i32
    %761 = tpu.dynamic_rotate %622 by %c223_i32_697 dim 1 : vector<8x256xf32>, i32 -> vector<8x256xf32>
    %762 = arith.mulf %761, %760 : vector<8x256xf32>
    %763 = arith.truncf %762 : vector<8x256xf32> to vector<8x256xbf16>
    %c184_698 = arith.constant 184 : index
    %c0_699 = arith.constant 0 : index
    %764 = vector.load %arg12[%c184_698, %c0_699] : memref<408x256xbf16, #tpu.memory_space<vmem>>, vector<8x256xbf16>
    tpu.vector_store %arg12[%c184_698, %c0_699], %763 {strides = array<i32>} : memref<408x256xbf16, #tpu.memory_space<vmem>>, vector<8x256xbf16>,
    %c24_700 = arith.constant 24 : index
    %c0_701 = arith.constant 0 : index
    %c0_702 = arith.constant 0 : index
    %765 = vector.load %arg5[%c24_700, %c0_701, %c0_702] : memref<25x8x256xf32, #tpu.memory_space<vmem>>, vector<1x8x256xf32>
    %766 = vector.shape_cast %765 : vector<1x8x256xf32> to vector<8x256xf32>
    %c222_i32_703 = arith.constant 222 : i32
    %767 = tpu.dynamic_rotate %622 by %c222_i32_703 dim 1 : vector<8x256xf32>, i32 -> vector<8x256xf32>
    %768 = arith.mulf %767, %766 : vector<8x256xf32>
    %769 = arith.truncf %768 : vector<8x256xf32> to vector<8x256xbf16>
    %c192_704 = arith.constant 192 : index
    %c0_705 = arith.constant 0 : index
    %770 = vector.load %arg12[%c192_704, %c0_705] : memref<408x256xbf16, #tpu.memory_space<vmem>>, vector<8x256xbf16>
    tpu.vector_store %arg12[%c192_704, %c0_705], %769 {strides = array<i32>} : memref<408x256xbf16, #tpu.memory_space<vmem>>, vector<8x256xbf16>,
    %c200_706 = arith.constant 200 : index
    %c0_707 = arith.constant 0 : index
    %771 = vector.load %arg12[%c200_706, %c0_707] : memref<408x256xbf16, #tpu.memory_space<vmem>>, vector<8x256xbf16>
    tpu.vector_store %arg12[%c200_706, %c0_707], %5 {strides = array<i32>} : memref<408x256xbf16, #tpu.memory_space<vmem>>, vector<8x256xbf16>,
    %c0_708 = arith.constant 0 : index
    %c0_709 = arith.constant 0 : index
    %772 = vector.load %arg12[%c0_708, %c0_709] : memref<408x256xbf16, #tpu.memory_space<vmem>>, vector<208x256xbf16>
    %cst_710 = arith.constant dense<0.000000e+00> : vector<8x256xf32>
    %773 = tpu.matmul %624, %772, %cst_710 {dimension_numbers = #tpu.dot_dimension_numbers<[1], [0], [0], [1], [0, 0, 1, 1], [], []>} : vector<8x208xbf16>, vector<208x256xbf16>, vector<8x256xf32> -> vector<8x256xf32>
    %774 = arith.addf %470, %773 : vector<8x256xf32>
    %c0_711 = arith.constant 0 : index
    %c0_712 = arith.constant 0 : index
    %c0_713 = arith.constant 0 : index
    %775 = vector.load %arg2[%c0_711, %c0_712, %c0_713] : memref<1x8x256xf32, #tpu.memory_space<vmem>>, vector<1x8x256xf32>
    %776 = vector.shape_cast %775 : vector<1x8x256xf32> to vector<8x256xf32>
    %c0_714 = arith.constant 0 : index
    %c0_715 = arith.constant 0 : index
    %777 = vector.load %arg8[%c0_714, %c0_715] : memref<32x408xbf16, #tpu.memory_space<vmem>>, vector<32x408xbf16>
    %c0_716 = arith.constant 0 : index
    %c0_717 = arith.constant 0 : index
    %c0_718 = arith.constant 0 : index
    %778 = vector.load %arg5[%c0_716, %c0_717, %c0_718] : memref<25x8x256xf32, #tpu.memory_space<vmem>>, vector<1x8x256xf32>
    %779 = vector.shape_cast %778 : vector<1x8x256xf32> to vector<8x256xf32>
    %c34_i32_719 = arith.constant 34 : i32
    %780 = tpu.dynamic_rotate %776 by %c34_i32_719 dim 1 : vector<8x256xf32>, i32 -> vector<8x256xf32>
    %781 = arith.mulf %780, %779 : vector<8x256xf32>
    %782 = arith.truncf %781 : vector<8x256xf32> to vector<8x256xbf16>
    %c0_720 = arith.constant 0 : index
    %c0_721 = arith.constant 0 : index
    %783 = vector.load %arg13[%c0_720, %c0_721] : memref<408x256xbf16, #tpu.memory_space<vmem>>, vector<8x256xbf16>
    tpu.vector_store %arg13[%c0_720, %c0_721], %782 {strides = array<i32>} : memref<408x256xbf16, #tpu.memory_space<vmem>>, vector<8x256xbf16>,
    %c34_i32_722 = arith.constant 34 : i32
    %784 = tpu.dynamic_rotate %774 by %c34_i32_722 dim 1 : vector<8x256xf32>, i32 -> vector<8x256xf32>
    %785 = arith.mulf %784, %779 : vector<8x256xf32>
    %786 = arith.truncf %785 : vector<8x256xf32> to vector<8x256xbf16>
    %c8_723 = arith.constant 8 : index
    %c0_724 = arith.constant 0 : index
    %787 = vector.load %arg13[%c8_723, %c0_724] : memref<408x256xbf16, #tpu.memory_space<vmem>>, vector<8x256xbf16>
    tpu.vector_store %arg13[%c8_723, %c0_724], %786 {strides = array<i32>} : memref<408x256xbf16, #tpu.memory_space<vmem>>, vector<8x256xbf16>,
    %c1_725 = arith.constant 1 : index
    %c0_726 = arith.constant 0 : index
    %c0_727 = arith.constant 0 : index
    %788 = vector.load %arg5[%c1_725, %c0_726, %c0_727] : memref<25x8x256xf32, #tpu.memory_space<vmem>>, vector<1x8x256xf32>
    %789 = vector.shape_cast %788 : vector<1x8x256xf32> to vector<8x256xf32>
    %c33_i32_728 = arith.constant 33 : i32
    %790 = tpu.dynamic_rotate %776 by %c33_i32_728 dim 1 : vector<8x256xf32>, i32 -> vector<8x256xf32>
    %791 = arith.mulf %790, %789 : vector<8x256xf32>
    %792 = arith.truncf %791 : vector<8x256xf32> to vector<8x256xbf16>
    %c16_729 = arith.constant 16 : index
    %c0_730 = arith.constant 0 : index
    %793 = vector.load %arg13[%c16_729, %c0_730] : memref<408x256xbf16, #tpu.memory_space<vmem>>, vector<8x256xbf16>
    tpu.vector_store %arg13[%c16_729, %c0_730], %792 {strides = array<i32>} : memref<408x256xbf16, #tpu.memory_space<vmem>>, vector<8x256xbf16>,
    %c33_i32_731 = arith.constant 33 : i32
    %794 = tpu.dynamic_rotate %774 by %c33_i32_731 dim 1 : vector<8x256xf32>, i32 -> vector<8x256xf32>
    %795 = arith.mulf %794, %789 : vector<8x256xf32>
    %796 = arith.truncf %795 : vector<8x256xf32> to vector<8x256xbf16>
    %c24_732 = arith.constant 24 : index
    %c0_733 = arith.constant 0 : index
    %797 = vector.load %arg13[%c24_732, %c0_733] : memref<408x256xbf16, #tpu.memory_space<vmem>>, vector<8x256xbf16>
    tpu.vector_store %arg13[%c24_732, %c0_733], %796 {strides = array<i32>} : memref<408x256xbf16, #tpu.memory_space<vmem>>, vector<8x256xbf16>,
    %c2_734 = arith.constant 2 : index
    %c0_735 = arith.constant 0 : index
    %c0_736 = arith.constant 0 : index
    %798 = vector.load %arg5[%c2_734, %c0_735, %c0_736] : memref<25x8x256xf32, #tpu.memory_space<vmem>>, vector<1x8x256xf32>
    %799 = vector.shape_cast %798 : vector<1x8x256xf32> to vector<8x256xf32>
    %c32_i32_737 = arith.constant 32 : i32
    %800 = tpu.dynamic_rotate %776 by %c32_i32_737 dim 1 : vector<8x256xf32>, i32 -> vector<8x256xf32>
    %801 = arith.mulf %800, %799 : vector<8x256xf32>
    %802 = arith.truncf %801 : vector<8x256xf32> to vector<8x256xbf16>
    %c32_738 = arith.constant 32 : index
    %c0_739 = arith.constant 0 : index
    %803 = vector.load %arg13[%c32_738, %c0_739] : memref<408x256xbf16, #tpu.memory_space<vmem>>, vector<8x256xbf16>
    tpu.vector_store %arg13[%c32_738, %c0_739], %802 {strides = array<i32>} : memref<408x256xbf16, #tpu.memory_space<vmem>>, vector<8x256xbf16>,
    %c32_i32_740 = arith.constant 32 : i32
    %804 = tpu.dynamic_rotate %774 by %c32_i32_740 dim 1 : vector<8x256xf32>, i32 -> vector<8x256xf32>
    %805 = arith.mulf %804, %799 : vector<8x256xf32>
    %806 = arith.truncf %805 : vector<8x256xf32> to vector<8x256xbf16>
    %c40_741 = arith.constant 40 : index
    %c0_742 = arith.constant 0 : index
    %807 = vector.load %arg13[%c40_741, %c0_742] : memref<408x256xbf16, #tpu.memory_space<vmem>>, vector<8x256xbf16>
    tpu.vector_store %arg13[%c40_741, %c0_742], %806 {strides = array<i32>} : memref<408x256xbf16, #tpu.memory_space<vmem>>, vector<8x256xbf16>,
    %c3_743 = arith.constant 3 : index
    %c0_744 = arith.constant 0 : index
    %c0_745 = arith.constant 0 : index
    %808 = vector.load %arg5[%c3_743, %c0_744, %c0_745] : memref<25x8x256xf32, #tpu.memory_space<vmem>>, vector<1x8x256xf32>
    %809 = vector.shape_cast %808 : vector<1x8x256xf32> to vector<8x256xf32>
    %c31_i32_746 = arith.constant 31 : i32
    %810 = tpu.dynamic_rotate %776 by %c31_i32_746 dim 1 : vector<8x256xf32>, i32 -> vector<8x256xf32>
    %811 = arith.mulf %810, %809 : vector<8x256xf32>
    %812 = arith.truncf %811 : vector<8x256xf32> to vector<8x256xbf16>
    %c48_747 = arith.constant 48 : index
    %c0_748 = arith.constant 0 : index
    %813 = vector.load %arg13[%c48_747, %c0_748] : memref<408x256xbf16, #tpu.memory_space<vmem>>, vector<8x256xbf16>
    tpu.vector_store %arg13[%c48_747, %c0_748], %812 {strides = array<i32>} : memref<408x256xbf16, #tpu.memory_space<vmem>>, vector<8x256xbf16>,
    %c31_i32_749 = arith.constant 31 : i32
    %814 = tpu.dynamic_rotate %774 by %c31_i32_749 dim 1 : vector<8x256xf32>, i32 -> vector<8x256xf32>
    %815 = arith.mulf %814, %809 : vector<8x256xf32>
    %816 = arith.truncf %815 : vector<8x256xf32> to vector<8x256xbf16>
    %c56_750 = arith.constant 56 : index
    %c0_751 = arith.constant 0 : index
    %817 = vector.load %arg13[%c56_750, %c0_751] : memref<408x256xbf16, #tpu.memory_space<vmem>>, vector<8x256xbf16>
    tpu.vector_store %arg13[%c56_750, %c0_751], %816 {strides = array<i32>} : memref<408x256xbf16, #tpu.memory_space<vmem>>, vector<8x256xbf16>,
    %c4_752 = arith.constant 4 : index
    %c0_753 = arith.constant 0 : index
    %c0_754 = arith.constant 0 : index
    %818 = vector.load %arg5[%c4_752, %c0_753, %c0_754] : memref<25x8x256xf32, #tpu.memory_space<vmem>>, vector<1x8x256xf32>
    %819 = vector.shape_cast %818 : vector<1x8x256xf32> to vector<8x256xf32>
    %c30_i32_755 = arith.constant 30 : i32
    %820 = tpu.dynamic_rotate %776 by %c30_i32_755 dim 1 : vector<8x256xf32>, i32 -> vector<8x256xf32>
    %821 = arith.mulf %820, %819 : vector<8x256xf32>
    %822 = arith.truncf %821 : vector<8x256xf32> to vector<8x256xbf16>
    %c64_756 = arith.constant 64 : index
    %c0_757 = arith.constant 0 : index
    %823 = vector.load %arg13[%c64_756, %c0_757] : memref<408x256xbf16, #tpu.memory_space<vmem>>, vector<8x256xbf16>
    tpu.vector_store %arg13[%c64_756, %c0_757], %822 {strides = array<i32>} : memref<408x256xbf16, #tpu.memory_space<vmem>>, vector<8x256xbf16>,
    %c30_i32_758 = arith.constant 30 : i32
    %824 = tpu.dynamic_rotate %774 by %c30_i32_758 dim 1 : vector<8x256xf32>, i32 -> vector<8x256xf32>
    %825 = arith.mulf %824, %819 : vector<8x256xf32>
    %826 = arith.truncf %825 : vector<8x256xf32> to vector<8x256xbf16>
    %c72_759 = arith.constant 72 : index
    %c0_760 = arith.constant 0 : index
    %827 = vector.load %arg13[%c72_759, %c0_760] : memref<408x256xbf16, #tpu.memory_space<vmem>>, vector<8x256xbf16>
    tpu.vector_store %arg13[%c72_759, %c0_760], %826 {strides = array<i32>} : memref<408x256xbf16, #tpu.memory_space<vmem>>, vector<8x256xbf16>,
    %c5_761 = arith.constant 5 : index
    %c0_762 = arith.constant 0 : index
    %c0_763 = arith.constant 0 : index
    %828 = vector.load %arg5[%c5_761, %c0_762, %c0_763] : memref<25x8x256xf32, #tpu.memory_space<vmem>>, vector<1x8x256xf32>
    %829 = vector.shape_cast %828 : vector<1x8x256xf32> to vector<8x256xf32>
    %c18_i32_764 = arith.constant 18 : i32
    %830 = tpu.dynamic_rotate %776 by %c18_i32_764 dim 1 : vector<8x256xf32>, i32 -> vector<8x256xf32>
    %831 = arith.mulf %830, %829 : vector<8x256xf32>
    %832 = arith.truncf %831 : vector<8x256xf32> to vector<8x256xbf16>
    %c80_765 = arith.constant 80 : index
    %c0_766 = arith.constant 0 : index
    %833 = vector.load %arg13[%c80_765, %c0_766] : memref<408x256xbf16, #tpu.memory_space<vmem>>, vector<8x256xbf16>
    tpu.vector_store %arg13[%c80_765, %c0_766], %832 {strides = array<i32>} : memref<408x256xbf16, #tpu.memory_space<vmem>>, vector<8x256xbf16>,
    %c18_i32_767 = arith.constant 18 : i32
    %834 = tpu.dynamic_rotate %774 by %c18_i32_767 dim 1 : vector<8x256xf32>, i32 -> vector<8x256xf32>
    %835 = arith.mulf %834, %829 : vector<8x256xf32>
    %836 = arith.truncf %835 : vector<8x256xf32> to vector<8x256xbf16>
    %c88_768 = arith.constant 88 : index
    %c0_769 = arith.constant 0 : index
    %837 = vector.load %arg13[%c88_768, %c0_769] : memref<408x256xbf16, #tpu.memory_space<vmem>>, vector<8x256xbf16>
    tpu.vector_store %arg13[%c88_768, %c0_769], %836 {strides = array<i32>} : memref<408x256xbf16, #tpu.memory_space<vmem>>, vector<8x256xbf16>,
    %c6_770 = arith.constant 6 : index
    %c0_771 = arith.constant 0 : index
    %c0_772 = arith.constant 0 : index
    %838 = vector.load %arg5[%c6_770, %c0_771, %c0_772] : memref<25x8x256xf32, #tpu.memory_space<vmem>>, vector<1x8x256xf32>
    %839 = vector.shape_cast %838 : vector<1x8x256xf32> to vector<8x256xf32>
    %c17_i32_773 = arith.constant 17 : i32
    %840 = tpu.dynamic_rotate %776 by %c17_i32_773 dim 1 : vector<8x256xf32>, i32 -> vector<8x256xf32>
    %841 = arith.mulf %840, %839 : vector<8x256xf32>
    %842 = arith.truncf %841 : vector<8x256xf32> to vector<8x256xbf16>
    %c96_774 = arith.constant 96 : index
    %c0_775 = arith.constant 0 : index
    %843 = vector.load %arg13[%c96_774, %c0_775] : memref<408x256xbf16, #tpu.memory_space<vmem>>, vector<8x256xbf16>
    tpu.vector_store %arg13[%c96_774, %c0_775], %842 {strides = array<i32>} : memref<408x256xbf16, #tpu.memory_space<vmem>>, vector<8x256xbf16>,
    %c17_i32_776 = arith.constant 17 : i32
    %844 = tpu.dynamic_rotate %774 by %c17_i32_776 dim 1 : vector<8x256xf32>, i32 -> vector<8x256xf32>
    %845 = arith.mulf %844, %839 : vector<8x256xf32>
    %846 = arith.truncf %845 : vector<8x256xf32> to vector<8x256xbf16>
    %c104_777 = arith.constant 104 : index
    %c0_778 = arith.constant 0 : index
    %847 = vector.load %arg13[%c104_777, %c0_778] : memref<408x256xbf16, #tpu.memory_space<vmem>>, vector<8x256xbf16>
    tpu.vector_store %arg13[%c104_777, %c0_778], %846 {strides = array<i32>} : memref<408x256xbf16, #tpu.memory_space<vmem>>, vector<8x256xbf16>,
    %c7_779 = arith.constant 7 : index
    %c0_780 = arith.constant 0 : index
    %c0_781 = arith.constant 0 : index
    %848 = vector.load %arg5[%c7_779, %c0_780, %c0_781] : memref<25x8x256xf32, #tpu.memory_space<vmem>>, vector<1x8x256xf32>
    %849 = vector.shape_cast %848 : vector<1x8x256xf32> to vector<8x256xf32>
    %c16_i32_782 = arith.constant 16 : i32
    %850 = tpu.dynamic_rotate %776 by %c16_i32_782 dim 1 : vector<8x256xf32>, i32 -> vector<8x256xf32>
    %851 = arith.mulf %850, %849 : vector<8x256xf32>
    %852 = arith.truncf %851 : vector<8x256xf32> to vector<8x256xbf16>
    %c112_783 = arith.constant 112 : index
    %c0_784 = arith.constant 0 : index
    %853 = vector.load %arg13[%c112_783, %c0_784] : memref<408x256xbf16, #tpu.memory_space<vmem>>, vector<8x256xbf16>
    tpu.vector_store %arg13[%c112_783, %c0_784], %852 {strides = array<i32>} : memref<408x256xbf16, #tpu.memory_space<vmem>>, vector<8x256xbf16>,
    %c16_i32_785 = arith.constant 16 : i32
    %854 = tpu.dynamic_rotate %774 by %c16_i32_785 dim 1 : vector<8x256xf32>, i32 -> vector<8x256xf32>
    %855 = arith.mulf %854, %849 : vector<8x256xf32>
    %856 = arith.truncf %855 : vector<8x256xf32> to vector<8x256xbf16>
    %c120_786 = arith.constant 120 : index
    %c0_787 = arith.constant 0 : index
    %857 = vector.load %arg13[%c120_786, %c0_787] : memref<408x256xbf16, #tpu.memory_space<vmem>>, vector<8x256xbf16>
    tpu.vector_store %arg13[%c120_786, %c0_787], %856 {strides = array<i32>} : memref<408x256xbf16, #tpu.memory_space<vmem>>, vector<8x256xbf16>,
    %c8_788 = arith.constant 8 : index
    %c0_789 = arith.constant 0 : index
    %c0_790 = arith.constant 0 : index
    %858 = vector.load %arg5[%c8_788, %c0_789, %c0_790] : memref<25x8x256xf32, #tpu.memory_space<vmem>>, vector<1x8x256xf32>
    %859 = vector.shape_cast %858 : vector<1x8x256xf32> to vector<8x256xf32>
    %c15_i32_791 = arith.constant 15 : i32
    %860 = tpu.dynamic_rotate %776 by %c15_i32_791 dim 1 : vector<8x256xf32>, i32 -> vector<8x256xf32>
    %861 = arith.mulf %860, %859 : vector<8x256xf32>
    %862 = arith.truncf %861 : vector<8x256xf32> to vector<8x256xbf16>
    %c128_792 = arith.constant 128 : index
    %c0_793 = arith.constant 0 : index
    %863 = vector.load %arg13[%c128_792, %c0_793] : memref<408x256xbf16, #tpu.memory_space<vmem>>, vector<8x256xbf16>
    tpu.vector_store %arg13[%c128_792, %c0_793], %862 {strides = array<i32>} : memref<408x256xbf16, #tpu.memory_space<vmem>>, vector<8x256xbf16>,
    %c15_i32_794 = arith.constant 15 : i32
    %864 = tpu.dynamic_rotate %774 by %c15_i32_794 dim 1 : vector<8x256xf32>, i32 -> vector<8x256xf32>
    %865 = arith.mulf %864, %859 : vector<8x256xf32>
    %866 = arith.truncf %865 : vector<8x256xf32> to vector<8x256xbf16>
    %c136_795 = arith.constant 136 : index
    %c0_796 = arith.constant 0 : index
    %867 = vector.load %arg13[%c136_795, %c0_796] : memref<408x256xbf16, #tpu.memory_space<vmem>>, vector<8x256xbf16>
    tpu.vector_store %arg13[%c136_795, %c0_796], %866 {strides = array<i32>} : memref<408x256xbf16, #tpu.memory_space<vmem>>, vector<8x256xbf16>,
    %c9_797 = arith.constant 9 : index
    %c0_798 = arith.constant 0 : index
    %c0_799 = arith.constant 0 : index
    %868 = vector.load %arg5[%c9_797, %c0_798, %c0_799] : memref<25x8x256xf32, #tpu.memory_space<vmem>>, vector<1x8x256xf32>
    %869 = vector.shape_cast %868 : vector<1x8x256xf32> to vector<8x256xf32>
    %c14_i32_800 = arith.constant 14 : i32
    %870 = tpu.dynamic_rotate %776 by %c14_i32_800 dim 1 : vector<8x256xf32>, i32 -> vector<8x256xf32>
    %871 = arith.mulf %870, %869 : vector<8x256xf32>
    %872 = arith.truncf %871 : vector<8x256xf32> to vector<8x256xbf16>
    %c144_801 = arith.constant 144 : index
    %c0_802 = arith.constant 0 : index
    %873 = vector.load %arg13[%c144_801, %c0_802] : memref<408x256xbf16, #tpu.memory_space<vmem>>, vector<8x256xbf16>
    tpu.vector_store %arg13[%c144_801, %c0_802], %872 {strides = array<i32>} : memref<408x256xbf16, #tpu.memory_space<vmem>>, vector<8x256xbf16>,
    %c14_i32_803 = arith.constant 14 : i32
    %874 = tpu.dynamic_rotate %774 by %c14_i32_803 dim 1 : vector<8x256xf32>, i32 -> vector<8x256xf32>
    %875 = arith.mulf %874, %869 : vector<8x256xf32>
    %876 = arith.truncf %875 : vector<8x256xf32> to vector<8x256xbf16>
    %c152_804 = arith.constant 152 : index
    %c0_805 = arith.constant 0 : index
    %877 = vector.load %arg13[%c152_804, %c0_805] : memref<408x256xbf16, #tpu.memory_space<vmem>>, vector<8x256xbf16>
    tpu.vector_store %arg13[%c152_804, %c0_805], %876 {strides = array<i32>} : memref<408x256xbf16, #tpu.memory_space<vmem>>, vector<8x256xbf16>,
    %c10_806 = arith.constant 10 : index
    %c0_807 = arith.constant 0 : index
    %c0_808 = arith.constant 0 : index
    %878 = vector.load %arg5[%c10_806, %c0_807, %c0_808] : memref<25x8x256xf32, #tpu.memory_space<vmem>>, vector<1x8x256xf32>
    %879 = vector.shape_cast %878 : vector<1x8x256xf32> to vector<8x256xf32>
    %c2_i32_809 = arith.constant 2 : i32
    %880 = tpu.dynamic_rotate %776 by %c2_i32_809 dim 1 : vector<8x256xf32>, i32 -> vector<8x256xf32>
    %881 = arith.mulf %880, %879 : vector<8x256xf32>
    %882 = arith.truncf %881 : vector<8x256xf32> to vector<8x256xbf16>
    %c160_810 = arith.constant 160 : index
    %c0_811 = arith.constant 0 : index
    %883 = vector.load %arg13[%c160_810, %c0_811] : memref<408x256xbf16, #tpu.memory_space<vmem>>, vector<8x256xbf16>
    tpu.vector_store %arg13[%c160_810, %c0_811], %882 {strides = array<i32>} : memref<408x256xbf16, #tpu.memory_space<vmem>>, vector<8x256xbf16>,
    %c2_i32_812 = arith.constant 2 : i32
    %884 = tpu.dynamic_rotate %774 by %c2_i32_812 dim 1 : vector<8x256xf32>, i32 -> vector<8x256xf32>
    %885 = arith.mulf %884, %879 : vector<8x256xf32>
    %886 = arith.truncf %885 : vector<8x256xf32> to vector<8x256xbf16>
    %c168_813 = arith.constant 168 : index
    %c0_814 = arith.constant 0 : index
    %887 = vector.load %arg13[%c168_813, %c0_814] : memref<408x256xbf16, #tpu.memory_space<vmem>>, vector<8x256xbf16>
    tpu.vector_store %arg13[%c168_813, %c0_814], %886 {strides = array<i32>} : memref<408x256xbf16, #tpu.memory_space<vmem>>, vector<8x256xbf16>,
    %c11_815 = arith.constant 11 : index
    %c0_816 = arith.constant 0 : index
    %c0_817 = arith.constant 0 : index
    %888 = vector.load %arg5[%c11_815, %c0_816, %c0_817] : memref<25x8x256xf32, #tpu.memory_space<vmem>>, vector<1x8x256xf32>
    %889 = vector.shape_cast %888 : vector<1x8x256xf32> to vector<8x256xf32>
    %c1_i32_818 = arith.constant 1 : i32
    %890 = tpu.dynamic_rotate %776 by %c1_i32_818 dim 1 : vector<8x256xf32>, i32 -> vector<8x256xf32>
    %891 = arith.mulf %890, %889 : vector<8x256xf32>
    %892 = arith.truncf %891 : vector<8x256xf32> to vector<8x256xbf16>
    %c176_819 = arith.constant 176 : index
    %c0_820 = arith.constant 0 : index
    %893 = vector.load %arg13[%c176_819, %c0_820] : memref<408x256xbf16, #tpu.memory_space<vmem>>, vector<8x256xbf16>
    tpu.vector_store %arg13[%c176_819, %c0_820], %892 {strides = array<i32>} : memref<408x256xbf16, #tpu.memory_space<vmem>>, vector<8x256xbf16>,
    %c1_i32_821 = arith.constant 1 : i32
    %894 = tpu.dynamic_rotate %774 by %c1_i32_821 dim 1 : vector<8x256xf32>, i32 -> vector<8x256xf32>
    %895 = arith.mulf %894, %889 : vector<8x256xf32>
    %896 = arith.truncf %895 : vector<8x256xf32> to vector<8x256xbf16>
    %c184_822 = arith.constant 184 : index
    %c0_823 = arith.constant 0 : index
    %897 = vector.load %arg13[%c184_822, %c0_823] : memref<408x256xbf16, #tpu.memory_space<vmem>>, vector<8x256xbf16>
    tpu.vector_store %arg13[%c184_822, %c0_823], %896 {strides = array<i32>} : memref<408x256xbf16, #tpu.memory_space<vmem>>, vector<8x256xbf16>,
    %898 = arith.truncf %776 : vector<8x256xf32> to vector<8x256xbf16>
    %c192_824 = arith.constant 192 : index
    %c0_825 = arith.constant 0 : index
    %899 = vector.load %arg13[%c192_824, %c0_825] : memref<408x256xbf16, #tpu.memory_space<vmem>>, vector<8x256xbf16>
    tpu.vector_store %arg13[%c192_824, %c0_825], %898 {strides = array<i32>} : memref<408x256xbf16, #tpu.memory_space<vmem>>, vector<8x256xbf16>,
    %900 = arith.truncf %774 : vector<8x256xf32> to vector<8x256xbf16>
    %c200_826 = arith.constant 200 : index
    %c0_827 = arith.constant 0 : index
    %901 = vector.load %arg13[%c200_826, %c0_827] : memref<408x256xbf16, #tpu.memory_space<vmem>>, vector<8x256xbf16>
    tpu.vector_store %arg13[%c200_826, %c0_827], %900 {strides = array<i32>} : memref<408x256xbf16, #tpu.memory_space<vmem>>, vector<8x256xbf16>,
    %c13_828 = arith.constant 13 : index
    %c0_829 = arith.constant 0 : index
    %c0_830 = arith.constant 0 : index
    %902 = vector.load %arg5[%c13_828, %c0_829, %c0_830] : memref<25x8x256xf32, #tpu.memory_space<vmem>>, vector<1x8x256xf32>
    %903 = vector.shape_cast %902 : vector<1x8x256xf32> to vector<8x256xf32>
    %c255_i32_831 = arith.constant 255 : i32
    %904 = tpu.dynamic_rotate %776 by %c255_i32_831 dim 1 : vector<8x256xf32>, i32 -> vector<8x256xf32>
    %905 = arith.mulf %904, %903 : vector<8x256xf32>
    %906 = arith.truncf %905 : vector<8x256xf32> to vector<8x256xbf16>
    %c208 = arith.constant 208 : index
    %c0_832 = arith.constant 0 : index
    %907 = vector.load %arg13[%c208, %c0_832] : memref<408x256xbf16, #tpu.memory_space<vmem>>, vector<8x256xbf16>
    tpu.vector_store %arg13[%c208, %c0_832], %906 {strides = array<i32>} : memref<408x256xbf16, #tpu.memory_space<vmem>>, vector<8x256xbf16>,
    %c255_i32_833 = arith.constant 255 : i32
    %908 = tpu.dynamic_rotate %774 by %c255_i32_833 dim 1 : vector<8x256xf32>, i32 -> vector<8x256xf32>
    %909 = arith.mulf %908, %903 : vector<8x256xf32>
    %910 = arith.truncf %909 : vector<8x256xf32> to vector<8x256xbf16>
    %c216 = arith.constant 216 : index
    %c0_834 = arith.constant 0 : index
    %911 = vector.load %arg13[%c216, %c0_834] : memref<408x256xbf16, #tpu.memory_space<vmem>>, vector<8x256xbf16>
    tpu.vector_store %arg13[%c216, %c0_834], %910 {strides = array<i32>} : memref<408x256xbf16, #tpu.memory_space<vmem>>, vector<8x256xbf16>,
    %c14_835 = arith.constant 14 : index
    %c0_836 = arith.constant 0 : index
    %c0_837 = arith.constant 0 : index
    %912 = vector.load %arg5[%c14_835, %c0_836, %c0_837] : memref<25x8x256xf32, #tpu.memory_space<vmem>>, vector<1x8x256xf32>
    %913 = vector.shape_cast %912 : vector<1x8x256xf32> to vector<8x256xf32>
    %c254_i32_838 = arith.constant 254 : i32
    %914 = tpu.dynamic_rotate %776 by %c254_i32_838 dim 1 : vector<8x256xf32>, i32 -> vector<8x256xf32>
    %915 = arith.mulf %914, %913 : vector<8x256xf32>
    %916 = arith.truncf %915 : vector<8x256xf32> to vector<8x256xbf16>
    %c224 = arith.constant 224 : index
    %c0_839 = arith.constant 0 : index
    %917 = vector.load %arg13[%c224, %c0_839] : memref<408x256xbf16, #tpu.memory_space<vmem>>, vector<8x256xbf16>
    tpu.vector_store %arg13[%c224, %c0_839], %916 {strides = array<i32>} : memref<408x256xbf16, #tpu.memory_space<vmem>>, vector<8x256xbf16>,
    %c254_i32_840 = arith.constant 254 : i32
    %918 = tpu.dynamic_rotate %774 by %c254_i32_840 dim 1 : vector<8x256xf32>, i32 -> vector<8x256xf32>
    %919 = arith.mulf %918, %913 : vector<8x256xf32>
    %920 = arith.truncf %919 : vector<8x256xf32> to vector<8x256xbf16>
    %c232 = arith.constant 232 : index
    %c0_841 = arith.constant 0 : index
    %921 = vector.load %arg13[%c232, %c0_841] : memref<408x256xbf16, #tpu.memory_space<vmem>>, vector<8x256xbf16>
    tpu.vector_store %arg13[%c232, %c0_841], %920 {strides = array<i32>} : memref<408x256xbf16, #tpu.memory_space<vmem>>, vector<8x256xbf16>,
    %c15_842 = arith.constant 15 : index
    %c0_843 = arith.constant 0 : index
    %c0_844 = arith.constant 0 : index
    %922 = vector.load %arg5[%c15_842, %c0_843, %c0_844] : memref<25x8x256xf32, #tpu.memory_space<vmem>>, vector<1x8x256xf32>
    %923 = vector.shape_cast %922 : vector<1x8x256xf32> to vector<8x256xf32>
    %c242_i32_845 = arith.constant 242 : i32
    %924 = tpu.dynamic_rotate %776 by %c242_i32_845 dim 1 : vector<8x256xf32>, i32 -> vector<8x256xf32>
    %925 = arith.mulf %924, %923 : vector<8x256xf32>
    %926 = arith.truncf %925 : vector<8x256xf32> to vector<8x256xbf16>
    %c240 = arith.constant 240 : index
    %c0_846 = arith.constant 0 : index
    %927 = vector.load %arg13[%c240, %c0_846] : memref<408x256xbf16, #tpu.memory_space<vmem>>, vector<8x256xbf16>
    tpu.vector_store %arg13[%c240, %c0_846], %926 {strides = array<i32>} : memref<408x256xbf16, #tpu.memory_space<vmem>>, vector<8x256xbf16>,
    %c242_i32_847 = arith.constant 242 : i32
    %928 = tpu.dynamic_rotate %774 by %c242_i32_847 dim 1 : vector<8x256xf32>, i32 -> vector<8x256xf32>
    %929 = arith.mulf %928, %923 : vector<8x256xf32>
    %930 = arith.truncf %929 : vector<8x256xf32> to vector<8x256xbf16>
    %c248 = arith.constant 248 : index
    %c0_848 = arith.constant 0 : index
    %931 = vector.load %arg13[%c248, %c0_848] : memref<408x256xbf16, #tpu.memory_space<vmem>>, vector<8x256xbf16>
    tpu.vector_store %arg13[%c248, %c0_848], %930 {strides = array<i32>} : memref<408x256xbf16, #tpu.memory_space<vmem>>, vector<8x256xbf16>,
    %c16_849 = arith.constant 16 : index
    %c0_850 = arith.constant 0 : index
    %c0_851 = arith.constant 0 : index
    %932 = vector.load %arg5[%c16_849, %c0_850, %c0_851] : memref<25x8x256xf32, #tpu.memory_space<vmem>>, vector<1x8x256xf32>
    %933 = vector.shape_cast %932 : vector<1x8x256xf32> to vector<8x256xf32>
    %c241_i32_852 = arith.constant 241 : i32
    %934 = tpu.dynamic_rotate %776 by %c241_i32_852 dim 1 : vector<8x256xf32>, i32 -> vector<8x256xf32>
    %935 = arith.mulf %934, %933 : vector<8x256xf32>
    %936 = arith.truncf %935 : vector<8x256xf32> to vector<8x256xbf16>
    %c256 = arith.constant 256 : index
    %c0_853 = arith.constant 0 : index
    %937 = vector.load %arg13[%c256, %c0_853] : memref<408x256xbf16, #tpu.memory_space<vmem>>, vector<8x256xbf16>
    tpu.vector_store %arg13[%c256, %c0_853], %936 {strides = array<i32>} : memref<408x256xbf16, #tpu.memory_space<vmem>>, vector<8x256xbf16>,
    %c241_i32_854 = arith.constant 241 : i32
    %938 = tpu.dynamic_rotate %774 by %c241_i32_854 dim 1 : vector<8x256xf32>, i32 -> vector<8x256xf32>
    %939 = arith.mulf %938, %933 : vector<8x256xf32>
    %940 = arith.truncf %939 : vector<8x256xf32> to vector<8x256xbf16>
    %c264 = arith.constant 264 : index
    %c0_855 = arith.constant 0 : index
    %941 = vector.load %arg13[%c264, %c0_855] : memref<408x256xbf16, #tpu.memory_space<vmem>>, vector<8x256xbf16>
    tpu.vector_store %arg13[%c264, %c0_855], %940 {strides = array<i32>} : memref<408x256xbf16, #tpu.memory_space<vmem>>, vector<8x256xbf16>,
    %c17_856 = arith.constant 17 : index
    %c0_857 = arith.constant 0 : index
    %c0_858 = arith.constant 0 : index
    %942 = vector.load %arg5[%c17_856, %c0_857, %c0_858] : memref<25x8x256xf32, #tpu.memory_space<vmem>>, vector<1x8x256xf32>
    %943 = vector.shape_cast %942 : vector<1x8x256xf32> to vector<8x256xf32>
    %c240_i32_859 = arith.constant 240 : i32
    %944 = tpu.dynamic_rotate %776 by %c240_i32_859 dim 1 : vector<8x256xf32>, i32 -> vector<8x256xf32>
    %945 = arith.mulf %944, %943 : vector<8x256xf32>
    %946 = arith.truncf %945 : vector<8x256xf32> to vector<8x256xbf16>
    %c272 = arith.constant 272 : index
    %c0_860 = arith.constant 0 : index
    %947 = vector.load %arg13[%c272, %c0_860] : memref<408x256xbf16, #tpu.memory_space<vmem>>, vector<8x256xbf16>
    tpu.vector_store %arg13[%c272, %c0_860], %946 {strides = array<i32>} : memref<408x256xbf16, #tpu.memory_space<vmem>>, vector<8x256xbf16>,
    %c240_i32_861 = arith.constant 240 : i32
    %948 = tpu.dynamic_rotate %774 by %c240_i32_861 dim 1 : vector<8x256xf32>, i32 -> vector<8x256xf32>
    %949 = arith.mulf %948, %943 : vector<8x256xf32>
    %950 = arith.truncf %949 : vector<8x256xf32> to vector<8x256xbf16>
    %c280 = arith.constant 280 : index
    %c0_862 = arith.constant 0 : index
    %951 = vector.load %arg13[%c280, %c0_862] : memref<408x256xbf16, #tpu.memory_space<vmem>>, vector<8x256xbf16>
    tpu.vector_store %arg13[%c280, %c0_862], %950 {strides = array<i32>} : memref<408x256xbf16, #tpu.memory_space<vmem>>, vector<8x256xbf16>,
    %c18_863 = arith.constant 18 : index
    %c0_864 = arith.constant 0 : index
    %c0_865 = arith.constant 0 : index
    %952 = vector.load %arg5[%c18_863, %c0_864, %c0_865] : memref<25x8x256xf32, #tpu.memory_space<vmem>>, vector<1x8x256xf32>
    %953 = vector.shape_cast %952 : vector<1x8x256xf32> to vector<8x256xf32>
    %c239_i32_866 = arith.constant 239 : i32
    %954 = tpu.dynamic_rotate %776 by %c239_i32_866 dim 1 : vector<8x256xf32>, i32 -> vector<8x256xf32>
    %955 = arith.mulf %954, %953 : vector<8x256xf32>
    %956 = arith.truncf %955 : vector<8x256xf32> to vector<8x256xbf16>
    %c288 = arith.constant 288 : index
    %c0_867 = arith.constant 0 : index
    %957 = vector.load %arg13[%c288, %c0_867] : memref<408x256xbf16, #tpu.memory_space<vmem>>, vector<8x256xbf16>
    tpu.vector_store %arg13[%c288, %c0_867], %956 {strides = array<i32>} : memref<408x256xbf16, #tpu.memory_space<vmem>>, vector<8x256xbf16>,
    %c239_i32_868 = arith.constant 239 : i32
    %958 = tpu.dynamic_rotate %774 by %c239_i32_868 dim 1 : vector<8x256xf32>, i32 -> vector<8x256xf32>
    %959 = arith.mulf %958, %953 : vector<8x256xf32>
    %960 = arith.truncf %959 : vector<8x256xf32> to vector<8x256xbf16>
    %c296 = arith.constant 296 : index
    %c0_869 = arith.constant 0 : index
    %961 = vector.load %arg13[%c296, %c0_869] : memref<408x256xbf16, #tpu.memory_space<vmem>>, vector<8x256xbf16>
    tpu.vector_store %arg13[%c296, %c0_869], %960 {strides = array<i32>} : memref<408x256xbf16, #tpu.memory_space<vmem>>, vector<8x256xbf16>,
    %c19_870 = arith.constant 19 : index
    %c0_871 = arith.constant 0 : index
    %c0_872 = arith.constant 0 : index
    %962 = vector.load %arg5[%c19_870, %c0_871, %c0_872] : memref<25x8x256xf32, #tpu.memory_space<vmem>>, vector<1x8x256xf32>
    %963 = vector.shape_cast %962 : vector<1x8x256xf32> to vector<8x256xf32>
    %c238_i32_873 = arith.constant 238 : i32
    %964 = tpu.dynamic_rotate %776 by %c238_i32_873 dim 1 : vector<8x256xf32>, i32 -> vector<8x256xf32>
    %965 = arith.mulf %964, %963 : vector<8x256xf32>
    %966 = arith.truncf %965 : vector<8x256xf32> to vector<8x256xbf16>
    %c304 = arith.constant 304 : index
    %c0_874 = arith.constant 0 : index
    %967 = vector.load %arg13[%c304, %c0_874] : memref<408x256xbf16, #tpu.memory_space<vmem>>, vector<8x256xbf16>
    tpu.vector_store %arg13[%c304, %c0_874], %966 {strides = array<i32>} : memref<408x256xbf16, #tpu.memory_space<vmem>>, vector<8x256xbf16>,
    %c238_i32_875 = arith.constant 238 : i32
    %968 = tpu.dynamic_rotate %774 by %c238_i32_875 dim 1 : vector<8x256xf32>, i32 -> vector<8x256xf32>
    %969 = arith.mulf %968, %963 : vector<8x256xf32>
    %970 = arith.truncf %969 : vector<8x256xf32> to vector<8x256xbf16>
    %c312 = arith.constant 312 : index
    %c0_876 = arith.constant 0 : index
    %971 = vector.load %arg13[%c312, %c0_876] : memref<408x256xbf16, #tpu.memory_space<vmem>>, vector<8x256xbf16>
    tpu.vector_store %arg13[%c312, %c0_876], %970 {strides = array<i32>} : memref<408x256xbf16, #tpu.memory_space<vmem>>, vector<8x256xbf16>,
    %c20_877 = arith.constant 20 : index
    %c0_878 = arith.constant 0 : index
    %c0_879 = arith.constant 0 : index
    %972 = vector.load %arg5[%c20_877, %c0_878, %c0_879] : memref<25x8x256xf32, #tpu.memory_space<vmem>>, vector<1x8x256xf32>
    %973 = vector.shape_cast %972 : vector<1x8x256xf32> to vector<8x256xf32>
    %c226_i32_880 = arith.constant 226 : i32
    %974 = tpu.dynamic_rotate %776 by %c226_i32_880 dim 1 : vector<8x256xf32>, i32 -> vector<8x256xf32>
    %975 = arith.mulf %974, %973 : vector<8x256xf32>
    %976 = arith.truncf %975 : vector<8x256xf32> to vector<8x256xbf16>
    %c320 = arith.constant 320 : index
    %c0_881 = arith.constant 0 : index
    %977 = vector.load %arg13[%c320, %c0_881] : memref<408x256xbf16, #tpu.memory_space<vmem>>, vector<8x256xbf16>
    tpu.vector_store %arg13[%c320, %c0_881], %976 {strides = array<i32>} : memref<408x256xbf16, #tpu.memory_space<vmem>>, vector<8x256xbf16>,
    %c226_i32_882 = arith.constant 226 : i32
    %978 = tpu.dynamic_rotate %774 by %c226_i32_882 dim 1 : vector<8x256xf32>, i32 -> vector<8x256xf32>
    %979 = arith.mulf %978, %973 : vector<8x256xf32>
    %980 = arith.truncf %979 : vector<8x256xf32> to vector<8x256xbf16>
    %c328 = arith.constant 328 : index
    %c0_883 = arith.constant 0 : index
    %981 = vector.load %arg13[%c328, %c0_883] : memref<408x256xbf16, #tpu.memory_space<vmem>>, vector<8x256xbf16>
    tpu.vector_store %arg13[%c328, %c0_883], %980 {strides = array<i32>} : memref<408x256xbf16, #tpu.memory_space<vmem>>, vector<8x256xbf16>,
    %c21_884 = arith.constant 21 : index
    %c0_885 = arith.constant 0 : index
    %c0_886 = arith.constant 0 : index
    %982 = vector.load %arg5[%c21_884, %c0_885, %c0_886] : memref<25x8x256xf32, #tpu.memory_space<vmem>>, vector<1x8x256xf32>
    %983 = vector.shape_cast %982 : vector<1x8x256xf32> to vector<8x256xf32>
    %c225_i32_887 = arith.constant 225 : i32
    %984 = tpu.dynamic_rotate %776 by %c225_i32_887 dim 1 : vector<8x256xf32>, i32 -> vector<8x256xf32>
    %985 = arith.mulf %984, %983 : vector<8x256xf32>
    %986 = arith.truncf %985 : vector<8x256xf32> to vector<8x256xbf16>
    %c336 = arith.constant 336 : index
    %c0_888 = arith.constant 0 : index
    %987 = vector.load %arg13[%c336, %c0_888] : memref<408x256xbf16, #tpu.memory_space<vmem>>, vector<8x256xbf16>
    tpu.vector_store %arg13[%c336, %c0_888], %986 {strides = array<i32>} : memref<408x256xbf16, #tpu.memory_space<vmem>>, vector<8x256xbf16>,
    %c225_i32_889 = arith.constant 225 : i32
    %988 = tpu.dynamic_rotate %774 by %c225_i32_889 dim 1 : vector<8x256xf32>, i32 -> vector<8x256xf32>
    %989 = arith.mulf %988, %983 : vector<8x256xf32>
    %990 = arith.truncf %989 : vector<8x256xf32> to vector<8x256xbf16>
    %c344 = arith.constant 344 : index
    %c0_890 = arith.constant 0 : index
    %991 = vector.load %arg13[%c344, %c0_890] : memref<408x256xbf16, #tpu.memory_space<vmem>>, vector<8x256xbf16>
    tpu.vector_store %arg13[%c344, %c0_890], %990 {strides = array<i32>} : memref<408x256xbf16, #tpu.memory_space<vmem>>, vector<8x256xbf16>,
    %c22_891 = arith.constant 22 : index
    %c0_892 = arith.constant 0 : index
    %c0_893 = arith.constant 0 : index
    %992 = vector.load %arg5[%c22_891, %c0_892, %c0_893] : memref<25x8x256xf32, #tpu.memory_space<vmem>>, vector<1x8x256xf32>
    %993 = vector.shape_cast %992 : vector<1x8x256xf32> to vector<8x256xf32>
    %c224_i32_894 = arith.constant 224 : i32
    %994 = tpu.dynamic_rotate %776 by %c224_i32_894 dim 1 : vector<8x256xf32>, i32 -> vector<8x256xf32>
    %995 = arith.mulf %994, %993 : vector<8x256xf32>
    %996 = arith.truncf %995 : vector<8x256xf32> to vector<8x256xbf16>
    %c352 = arith.constant 352 : index
    %c0_895 = arith.constant 0 : index
    %997 = vector.load %arg13[%c352, %c0_895] : memref<408x256xbf16, #tpu.memory_space<vmem>>, vector<8x256xbf16>
    tpu.vector_store %arg13[%c352, %c0_895], %996 {strides = array<i32>} : memref<408x256xbf16, #tpu.memory_space<vmem>>, vector<8x256xbf16>,
    %c224_i32_896 = arith.constant 224 : i32
    %998 = tpu.dynamic_rotate %774 by %c224_i32_896 dim 1 : vector<8x256xf32>, i32 -> vector<8x256xf32>
    %999 = arith.mulf %998, %993 : vector<8x256xf32>
    %1000 = arith.truncf %999 : vector<8x256xf32> to vector<8x256xbf16>
    %c360 = arith.constant 360 : index
    %c0_897 = arith.constant 0 : index
    %1001 = vector.load %arg13[%c360, %c0_897] : memref<408x256xbf16, #tpu.memory_space<vmem>>, vector<8x256xbf16>
    tpu.vector_store %arg13[%c360, %c0_897], %1000 {strides = array<i32>} : memref<408x256xbf16, #tpu.memory_space<vmem>>, vector<8x256xbf16>,
    %c23_898 = arith.constant 23 : index
    %c0_899 = arith.constant 0 : index
    %c0_900 = arith.constant 0 : index
    %1002 = vector.load %arg5[%c23_898, %c0_899, %c0_900] : memref<25x8x256xf32, #tpu.memory_space<vmem>>, vector<1x8x256xf32>
    %1003 = vector.shape_cast %1002 : vector<1x8x256xf32> to vector<8x256xf32>
    %c223_i32_901 = arith.constant 223 : i32
    %1004 = tpu.dynamic_rotate %776 by %c223_i32_901 dim 1 : vector<8x256xf32>, i32 -> vector<8x256xf32>
    %1005 = arith.mulf %1004, %1003 : vector<8x256xf32>
    %1006 = arith.truncf %1005 : vector<8x256xf32> to vector<8x256xbf16>
    %c368 = arith.constant 368 : index
    %c0_902 = arith.constant 0 : index
    %1007 = vector.load %arg13[%c368, %c0_902] : memref<408x256xbf16, #tpu.memory_space<vmem>>, vector<8x256xbf16>
    tpu.vector_store %arg13[%c368, %c0_902], %1006 {strides = array<i32>} : memref<408x256xbf16, #tpu.memory_space<vmem>>, vector<8x256xbf16>,
    %c223_i32_903 = arith.constant 223 : i32
    %1008 = tpu.dynamic_rotate %774 by %c223_i32_903 dim 1 : vector<8x256xf32>, i32 -> vector<8x256xf32>
    %1009 = arith.mulf %1008, %1003 : vector<8x256xf32>
    %1010 = arith.truncf %1009 : vector<8x256xf32> to vector<8x256xbf16>
    %c376 = arith.constant 376 : index
    %c0_904 = arith.constant 0 : index
    %1011 = vector.load %arg13[%c376, %c0_904] : memref<408x256xbf16, #tpu.memory_space<vmem>>, vector<8x256xbf16>
    tpu.vector_store %arg13[%c376, %c0_904], %1010 {strides = array<i32>} : memref<408x256xbf16, #tpu.memory_space<vmem>>, vector<8x256xbf16>,
    %c24_905 = arith.constant 24 : index
    %c0_906 = arith.constant 0 : index
    %c0_907 = arith.constant 0 : index
    %1012 = vector.load %arg5[%c24_905, %c0_906, %c0_907] : memref<25x8x256xf32, #tpu.memory_space<vmem>>, vector<1x8x256xf32>
    %1013 = vector.shape_cast %1012 : vector<1x8x256xf32> to vector<8x256xf32>
    %c222_i32_908 = arith.constant 222 : i32
    %1014 = tpu.dynamic_rotate %776 by %c222_i32_908 dim 1 : vector<8x256xf32>, i32 -> vector<8x256xf32>
    %1015 = arith.mulf %1014, %1013 : vector<8x256xf32>
    %1016 = arith.truncf %1015 : vector<8x256xf32> to vector<8x256xbf16>
    %c384 = arith.constant 384 : index
    %c0_909 = arith.constant 0 : index
    %1017 = vector.load %arg13[%c384, %c0_909] : memref<408x256xbf16, #tpu.memory_space<vmem>>, vector<8x256xbf16>
    tpu.vector_store %arg13[%c384, %c0_909], %1016 {strides = array<i32>} : memref<408x256xbf16, #tpu.memory_space<vmem>>, vector<8x256xbf16>,
    %c222_i32_910 = arith.constant 222 : i32
    %1018 = tpu.dynamic_rotate %774 by %c222_i32_910 dim 1 : vector<8x256xf32>, i32 -> vector<8x256xf32>
    %1019 = arith.mulf %1018, %1013 : vector<8x256xf32>
    %1020 = arith.truncf %1019 : vector<8x256xf32> to vector<8x256xbf16>
    %c392 = arith.constant 392 : index
    %c0_911 = arith.constant 0 : index
    %1021 = vector.load %arg13[%c392, %c0_911] : memref<408x256xbf16, #tpu.memory_space<vmem>>, vector<8x256xbf16>
    tpu.vector_store %arg13[%c392, %c0_911], %1020 {strides = array<i32>} : memref<408x256xbf16, #tpu.memory_space<vmem>>, vector<8x256xbf16>,
    %c400 = arith.constant 400 : index
    %c0_912 = arith.constant 0 : index
    %1022 = vector.load %arg13[%c400, %c0_912] : memref<408x256xbf16, #tpu.memory_space<vmem>>, vector<8x256xbf16>
    tpu.vector_store %arg13[%c400, %c0_912], %5 {strides = array<i32>} : memref<408x256xbf16, #tpu.memory_space<vmem>>, vector<8x256xbf16>,
    %c0_913 = arith.constant 0 : index
    %c0_914 = arith.constant 0 : index
    %1023 = vector.load %arg13[%c0_913, %c0_914] : memref<408x256xbf16, #tpu.memory_space<vmem>>, vector<408x256xbf16>
    %cst_915 = arith.constant dense<0.000000e+00> : vector<32x256xf32>
    %1024 = tpu.matmul %777, %1023, %cst_915 {dimension_numbers = #tpu.dot_dimension_numbers<[1], [0], [0], [1], [0, 0, 1, 1], [], []>} : vector<32x408xbf16>, vector<408x256xbf16>, vector<32x256xf32> -> vector<32x256xf32>
    %1025 = vector.extract_strided_slice %1024 {offsets = [0, 0], sizes = [8, 256], strides = [1, 1]} : vector<32x256xf32> to vector<8x256xf32>
    %1026 = arith.negf %1025 : vector<8x256xf32>
    %1027 = math.exp %1026 : vector<8x256xf32>
    %cst_916 = arith.constant 1.000000e+00 : f32
    %1028 = vector.broadcast %cst_916 : f32 to vector<8x256xf32>
    %1029 = arith.addf %1028, %1027 : vector<8x256xf32>
    %1030 = arith.divf %1028, %1029 : vector<8x256xf32>
    %1031 = vector.extract_strided_slice %1024 {offsets = [8, 0], sizes = [8, 256], strides = [1, 1]} : vector<32x256xf32> to vector<8x256xf32>
    %1032 = arith.negf %1031 : vector<8x256xf32>
    %1033 = math.exp %1032 : vector<8x256xf32>
    %cst_917 = arith.constant 1.000000e+00 : f32
    %1034 = vector.broadcast %cst_917 : f32 to vector<8x256xf32>
    %1035 = arith.addf %1034, %1033 : vector<8x256xf32>
    %1036 = arith.divf %1034, %1035 : vector<8x256xf32>
    %1037 = vector.extract_strided_slice %1024 {offsets = [16, 0], sizes = [8, 256], strides = [1, 1]} : vector<32x256xf32> to vector<8x256xf32>
    %1038 = arith.negf %1037 : vector<8x256xf32>
    %1039 = math.exp %1038 : vector<8x256xf32>
    %cst_918 = arith.constant 1.000000e+00 : f32
    %1040 = vector.broadcast %cst_918 : f32 to vector<8x256xf32>
    %1041 = arith.addf %1040, %1039 : vector<8x256xf32>
    %1042 = arith.divf %1040, %1041 : vector<8x256xf32>
    %1043 = vector.extract_strided_slice %1024 {offsets = [24, 0], sizes = [8, 256], strides = [1, 1]} : vector<32x256xf32> to vector<8x256xf32>
    %1044 = math.tanh %1043 : vector<8x256xf32>
    %c0_919 = arith.constant 0 : index
    %c0_920 = arith.constant 0 : index
    %c0_921 = arith.constant 0 : index
    %1045 = vector.load %arg4[%c0_919, %c0_920, %c0_921] : memref<1x8x256xf32, #tpu.memory_space<vmem>>, vector<1x8x256xf32>
    %1046 = vector.shape_cast %1045 : vector<1x8x256xf32> to vector<8x256xf32>
    %1047 = arith.mulf %1036, %1046 : vector<8x256xf32>
    %1048 = arith.mulf %1030, %1044 : vector<8x256xf32>
    %1049 = arith.addf %1047, %1048 : vector<8x256xf32>
    %1050 = math.tanh %1049 : vector<8x256xf32>
    %1051 = arith.mulf %1042, %1050 : vector<8x256xf32>
    %c0_922 = arith.constant 0 : index
    %c0_923 = arith.constant 0 : index
    %c0_924 = arith.constant 0 : index
    %1052 = vector.load %arg9[%c0_922, %c0_923, %c0_924] : memref<1x8x256xf32, #tpu.memory_space<vmem>>, vector<1x8x256xf32>
    %1053 = vector.shape_cast %1052 : vector<1x8x256xf32> to vector<8x256xf32>
    %1054 = vector.shape_cast %1051 : vector<8x256xf32> to vector<1x8x256xf32>
    tpu.vector_store %arg9[%c0_922, %c0_923, %c0_924], %1054 {strides = array<i32>} : memref<1x8x256xf32, #tpu.memory_space<vmem>>, vector<1x8x256xf32>,
    %c0_925 = arith.constant 0 : index
    %c0_926 = arith.constant 0 : index
    %c0_927 = arith.constant 0 : index
    %1055 = vector.load %arg11[%c0_925, %c0_926, %c0_927] : memref<1x8x256xf32, #tpu.memory_space<vmem>>, vector<1x8x256xf32>
    %1056 = vector.shape_cast %1055 : vector<1x8x256xf32> to vector<8x256xf32>
    %1057 = vector.shape_cast %1049 : vector<8x256xf32> to vector<1x8x256xf32>
    tpu.vector_store %arg11[%c0_925, %c0_926, %c0_927], %1057 {strides = array<i32>} : memref<1x8x256xf32, #tpu.memory_space<vmem>>, vector<1x8x256xf32>,
    %c0_928 = arith.constant 0 : index
    %c0_929 = arith.constant 0 : index
    %c0_930 = arith.constant 0 : index
    %c0_931 = arith.constant 0 : index
    %1058 = vector.load %arg10[%c0_928, %c0_929, %c0_930, %c0_931] : memref<1x1x8x256xf32, #tpu.memory_space<vmem>>, vector<1x1x8x256xf32>
    %1059 = vector.shape_cast %1058 : vector<1x1x8x256xf32> to vector<8x256xf32>
    %1060 = vector.shape_cast %1051 : vector<8x256xf32> to vector<1x1x8x256xf32>
    tpu.vector_store %arg10[%c0_928, %c0_929, %c0_930, %c0_931], %1060 {strides = array<i32>} : memref<1x1x8x256xf32, #tpu.memory_space<vmem>>, vector<1x1x8x256xf32>,
    return
  }
  func.func @transform_0(%arg0: i32, %arg1: memref<4xi32, #tpu.memory_space<smem>>) -> (i32, i32, i32) {
    %c0_i32 = arith.constant 0 : i32
    %c0_i32_0 = arith.constant 0 : i32
    %c0_i32_1 = arith.constant 0 : i32
    return %arg0, %c0_i32, %c0_i32_0 : i32, i32, i32
  }
  func.func @transform_1(%arg0: i32, %arg1: memref<4xi32, #tpu.memory_space<smem>>) -> (i32, i32, i32, i32) {
    %c0_i32 = arith.constant 0 : i32
    %c0_i32_0 = arith.constant 0 : i32
    %c0_i32_1 = arith.constant 0 : i32
    %c0_i32_2 = arith.constant 0 : i32
    return %c0_i32, %arg0, %c0_i32_0, %c0_i32_1 : i32, i32, i32, i32
  }
  func.func @transform_2(%arg0: i32, %arg1: memref<4xi32, #tpu.memory_space<smem>>) -> (i32, i32, i32) {
    %c0_i32 = arith.constant 0 : i32
    %c0_i32_0 = arith.constant 0 : i32
    %c0_i32_1 = arith.constant 0 : i32
    return %arg0, %c0_i32, %c0_i32_0 : i32, i32, i32
  }
  func.func @transform_3(%arg0: i32, %arg1: memref<4xi32, #tpu.memory_space<smem>>) -> (i32, i32, i32) {
    %c0_i32 = arith.constant 0 : i32
    %c0_i32_0 = arith.constant 0 : i32
    %c0_i32_1 = arith.constant 0 : i32
    %c0_i32_2 = arith.constant 0 : i32
    return %c0_i32, %c0_i32_0, %c0_i32_1 : i32, i32, i32
  }
  func.func @transform_4(%arg0: i32, %arg1: memref<4xi32, #tpu.memory_space<smem>>) -> (i32, i32, i32) {
    %c0_i32 = arith.constant 0 : i32
    %c0_i32_0 = arith.constant 0 : i32
    %c0_i32_1 = arith.constant 0 : i32
    %c0_i32_2 = arith.constant 0 : i32
    return %c0_i32, %c0_i32_0, %c0_i32_1 : i32, i32, i32
  }
  func.func @transform_5(%arg0: i32, %arg1: memref<4xi32, #tpu.memory_space<smem>>) -> (i32, i32, i32) {
    %c0_i32 = arith.constant 0 : i32
    %c0_i32_0 = arith.constant 0 : i32
    %c0_i32_1 = arith.constant 0 : i32
    %c0_i32_2 = arith.constant 0 : i32
    return %c0_i32, %c0_i32_0, %c0_i32_1 : i32, i32, i32
  }
  func.func @transform_6(%arg0: i32, %arg1: memref<4xi32, #tpu.memory_space<smem>>) -> (i32, i32) {
    %c0_i32 = arith.constant 0 : i32
    %c0_i32_0 = arith.constant 0 : i32
    %c0_i32_1 = arith.constant 0 : i32
    return %c0_i32, %c0_i32_0 : i32, i32
  }
  func.func @transform_7(%arg0: i32, %arg1: memref<4xi32, #tpu.memory_space<smem>>) -> (i32, i32, i32) {
    %c0_i32 = arith.constant 0 : i32
    %c0_i32_0 = arith.constant 0 : i32
    %c0_i32_1 = arith.constant 0 : i32
    return %arg0, %c0_i32, %c0_i32_0 : i32, i32, i32
  }
  func.func @transform_8(%arg0: i32, %arg1: memref<4xi32, #tpu.memory_space<smem>>) -> (i32, i32, i32, i32) {
    %c3 = arith.constant 3 : index
    %0 = memref.load %arg1[%c3] : memref<4xi32, #tpu.memory_space<smem>>
    %c0_i32 = arith.constant 0 : i32
    %c0_i32_0 = arith.constant 0 : i32
    %c0_i32_1 = arith.constant 0 : i32
    return %0, %arg0, %c0_i32, %c0_i32_0 : i32, i32, i32, i32
  }
  func.func @transform_9(%arg0: i32, %arg1: memref<4xi32, #tpu.memory_space<smem>>) -> (i32, i32, i32) {
    %c0_i32 = arith.constant 0 : i32
    %c0_i32_0 = arith.constant 0 : i32
    %c0_i32_1 = arith.constant 0 : i32
    return %arg0, %c0_i32, %c0_i32_0 : i32, i32, i32
  }
}

</mosaic_0001>

<bundles_post_ra>
// kernel: step.1
= control target key start
LH: loop header
LB: loop body
LE: loop exit
PB: predicated region body
PF: predicated region fallthrough
CT: control target
= control target key end

     0   :  { %s9053_s0 = inlined_call_operand.vmem [shape: s32[4], index: 0, kind: input, shape index: {}]   ;;  %s9054_s1 = inlined_call_operand.vmem [shape: f32[2,8,256], index: 1, kind: input, shape index: {}]   ;;  %s9055_s2 = inlined_call_operand.vmem [shape: f32[3,2,8,256], index: 2, kind: input, shape index: {}, may-alias: {2,9}]   ;;  %s9056_s3 = inlined_call_operand.vmem [shape: f32[2,8,256], index: 3, kind: input, shape index: {}, may-alias: {3,10}]   ;;  %s9057_s4 = inlined_call_operand.hbm [shape: f32[25,8,256], index: 4, kind: input, shape index: {}]   ;;  %s9058_s5 = inlined_call_operand.hbm [shape: bf16[3,8,208], index: 5, kind: input, shape index: {}]   ;;  %s9059_s6 = inlined_call_operand.hbm [shape: bf16[2,8,208], index: 6, kind: input, shape index: {}]   ;;  %s9060_s7 = inlined_call_operand.vmem [shape: bf16[32,408], index: 7, kind: input, shape index: {}]   ;;  %s9061_s8 = inlined_call_operand.vmem [shape: f32[2,8,256], index: 8, kind: output, shape index: {0}]   ;;  %s9062_s9 = inlined_call_operand.vmem [shape: f32[3,2,8,256], index: 9, kind: output, shape index: {1}, may-alias: {2,9}]   ;;  %s9063_s10 = inlined_call_operand.vmem [shape: f32[2,8,256], index: 10, kind: output, shape index: {2}, may-alias: {3,10}]  }
   0x1   :  { %9161 = sst [smem:[#allocation51_spill]] %s9055_s2  ;;  %s16_s15 = sshll.u32 %s9053_s0, 4  ;;  %s17_s15 = int_to_ptr.vmem [resolvable:$true] %s16_s15 }
   0x2   :  { %9162 = sst [smem:[#allocation52_spill]] %s9056_s3  ;;  %s6510_s16 = scalar_lea.vmem %s17_s15, 16 }
   0x3   :  { %9163 = sst [smem:[#allocation53_spill]] %s9057_s4  ;;  %p6511_p0 = scmp.ne.s32.totalorder %s17_s15, %s6510_s16 }
   0x4   :  { %9164 = sst [smem:[#allocation54_spill]] %s9058_s5  ;;  %p6515_p1 = scmp.lt.s32.totalorder %s17_s15, %s17_s15 }
   0x5   :  { %9165 = sst [smem:[#allocation55_spill]] %s9059_s6  ;;  %p6516_p2 = scmp.lt.s32.totalorder %s6510_s16, %s6510_s16 }
   0x6   :  { %9166 = sst [smem:[#allocation56_spill]] %s9061_s8 }
   0x7   :  { %9167 = sst [smem:[#allocation57_spill]] %s9062_s9  ;;  %p6517_p3 = por %p6516_p2, %p6515_p1 }
   0x8   :  { %9168 = sst [smem:[#allocation58_spill]] %s9063_s10 }
   0x9   :  { %p6518_p4 = pnand %p6517_p3, %p6511_p0 }
   0xb   :  { %6521 = shalt.err (!%p6518_p4)  }
   0xc   :  { %s6634_s17 = smov [#allocation5]  }
   0xd   :  { %19 = dma.vmem_to_smem %s17_s15, 16, %s6634_s17, [#allocation4] }
   0xe   :  { %6612 = dma.done.wait [#allocation4], 16 }
   0xf   :  { %6613 = vsyncadd [#allocation4], 4294967280 }
  0x10   :  { %21 = sfence }
  0x11   :  { %22 = vsyncpa [#allocation8], 0 }
  0x12   :  { %23 = vsyncpa [#allocation10], 0  ;;  %s6726_s18 = smov 0   ;;  %s6728_s19 = smov 0  }
  0x13   :  { %s6730_s0 = smov 0  }
  0x14 LB: > { %9169 = sst [smem:[#allocation15_spill]] %s6628_s19  ;;  %s6742_s20 = sadd.s32 4294967295, %s6632_s0   ;;  %s6632_s0 = sphi %s6730_s0, %s9433_s0   ;;  %s6628_s19 = sphi %s6728_s19, %s9435_s19   ;;  %s6624_s18 = sphi %s6726_s18, %s9434_s18  }
  0x15   : > { %s6745_s21 = sadd.s32 1, %s6632_s0   ;;  %s62_s23 = sadd.s32 1, %s6628_s19 }
  0x16   : > { %9170 = sst [smem:[#allocation16_spill]] %s6745_s21  ;;  %s59_s22 = ssub.s32 %s6632_s0, %s6745_s21 }
  0x17   : > { %p60_p5 = scmp.eq.s32.totalorder %s59_s22, 0  ;;  %p69_p6 = scmp.ne.s32.totalorder %s6628_s19, %s6624_s18 }
  0x18   : > { %p70_p7 = scmp.eq.s32.totalorder %s6632_s0, 0  ;;  %p5574_p8 = scmp.ge.s32.totalorder %s6632_s0, 1 }
  0x19   : > { %s6755_s24 = scalar_select %p60_p5, %s6628_s19, %s62_s23  }
  0x1a   : > { %p6757_p9 = por %p70_p7, %p69_p6  ;;  %p278_p10 = scmp.lt.s32.totalorder %s6632_s0, 3 }
  0x1b   : > { %9171 = sst [smem:[#allocation17_spill]] %s6755_s24  ;;  %p6374_p11 = scmp.eq.s32.totalorder %s6742_s20, 0 }
  0x1c   : > { %p6763_p12 = pnand %p5574_p8, %p278_p10  ;;  %s6635_s27 = smov [#allocation9]  }
  0x1d   : > { %s303_s28 = sshll.u32 %s6635_s27, 4  ;;  %s6636_s30 = smov [#allocation7]   ;;  %s304_s28 = int_to_ptr.vmem [resolvable:$true] %s303_s28 }
  0x1e   : > { %p6364_p13 = pneg %p6763_p12  ;;  %s290_s11 = sshll.u32 %s6636_s30, 4  ;;  %s291_s11 = int_to_ptr.vmem [resolvable:$true] %s290_s11 }
  0x1f   : > { %s6533_s12 = scalar_lea.vmem %s304_s28, 384  ;;  %p6541_p5 = scmp.lt.s32.totalorder %s304_s28, %s304_s28 }
  0x20   : > { %p6771_p0 = pnand %p6374_p11, %p6364_p13  ;;  %p6534_p2 = scmp.ne.s32.totalorder %s304_s28, %s6533_s12 }
  0x21   : > { %p6542_p6 = scmp.lt.s32.totalorder %s6533_s12, %s6533_s12 }
  0x22   : > { %p6524_p1 = pneg %p6771_p0 }
  0x23   : > { %p6543_p7 = por %p6542_p6, %p6541_p5 }
  0x24   : > { %p6536_p3 = pnand %p6534_p2, %p6524_p1 }
  0x26   : > { %p6537_p4 = pneg %p6536_p3 }
  0x28   : > { %p6544_p8 = pnand %p6543_p7, %p6537_p4 }
  0x2a   : > { %6547 = shalt.err (!%p6544_p8)
}
  0x2b   : > { %s6637_s13 = smov 128   ;;  %s6638_s14 = smov 8  }
  0x2c   : > { %s9175_s5 = sld [smem:[#allocation54_spill]]  ;;  %s6559_s17 = scalar_lea.vmem %s291_s11, 6400 }
  0x2d   : > { %p6560_p10 = scmp.ne.s32.totalorder %s291_s11, %s6559_s17  ;;  %p6567_p3 = scmp.lt.s32.totalorder %s291_s11, %s291_s11 }
  0x2e   : > { %p6568_p4 = scmp.lt.s32.totalorder %s6559_s17, %s6559_s17 }
  0x2f   : > { %p6562_p13 = pnand %p6560_p10, %p6524_p1 }
  0x30   : > { %p6569_p5 = por %p6568_p4, %p6567_p3 }
  0x31   : > { %p6563_p2 = pneg %p6562_p13 }
  0x32   : > { %6370 = dma.hbm_to_vmem [thread:$0]  (!%p6771_p0), %s9175_s5, 384, %s304_s28, [#allocation10], %s6637_s13, %s6637_s13, %s6638_s14  }
  0x33   : > { %p6570_p6 = pnand %p6569_p5, %p6563_p2 }
  0x35   : > { %6573 = shalt.err (!%p6570_p6)
}
  0x36   : > { %s6639_s22 = smov 256   ;;  %s6640_s23 = smov 16  }
  0x37   : > { %s9176_s4 = sld [smem:[#allocation53_spill]]  ;;  %s6641_s28 = smov [#allocation11]  }
  0x38   : > { %s316_s12 = sshll.u32 %s6641_s28, 4  ;;  %s317_s12 = int_to_ptr.vmem [resolvable:$true] %s316_s12 }
  0x39   : > { %s6585_s15 = scalar_lea.vmem %s317_s12, 256  ;;  %p6593_p13 = scmp.lt.s32.totalorder %s317_s12, %s317_s12 }
  0x3a   : > { %p6586_p7 = scmp.ne.s32.totalorder %s317_s12, %s6585_s15  ;;  %p6594_p2 = scmp.lt.s32.totalorder %s6585_s15, %s6585_s15 }
  0x3c   : > { %p6588_p8 = pnand %p6586_p7, %p6524_p1  ;;  %p6595_p3 = por %p6594_p2, %p6593_p13 }
  0x3d   : > { %6367 = dma.hbm_to_vmem [thread:$0]  (!%p6771_p0), %s9176_s4, 6400, %s291_s11, [#allocation8], %s6639_s22, %s6639_s22, %s6640_s23  }
  0x3e   : > { %p6589_p10 = pneg %p6588_p8 }
  0x40   : > { %p6596_p4 = pnand %p6595_p3, %p6589_p10 }
  0x42   : > { %6599 = shalt.err (!%p6596_p4)
}
  0x43   : > { %s9177_s6 = sld [smem:[#allocation55_spill]]  ;;  %p5578_p5 = scmp.ge.s32.totalorder %s6632_s0, 2 }
  0x45   : > { %329 = sbr.rel (%p5578_p5) target bundleno = 87 (0x57), region = 32 }
  0x49   : > { %6373 = dma.hbm_to_vmem [thread:$0]  (!%p6771_p0), %s9177_s6, 256, %s317_s12, [#allocation10], %s6637_s13, %s6637_s13, %s6638_s14  }
  0x4a   : > { %340 = sbr.rel (!%p6757_p9) target bundleno = 87 (0x57), region = 40  ;;  %s342_s17 = sand.u32 (%p6757_p9), 1, %s6628_s19  }
  0x4b   : > { %s5997_s22 = sshll.u32 (%p6757_p9), %s6632_s0, 4  ;;  %s6350_s23 = smul.u32 (%p6757_p9), 48, %s342_s17 }
  0x4c   : > { %s9178_s2 = sld [smem:[#allocation51_spill]] (%p6757_p9) }
  0x4d   : > { %s344_s13 = scalar_lea.vmem (%p6757_p9), [#allocation6], %s6350_s23 }
  0x52   : > { %s347_s30 = scalar_lea.vmem %s9178_s2, %s5997_s22 }
  0x53   : > { %v360_v0 = vld [vmem:[%s347_s30] sm:$0xff]  ;;  %v362_v1 = vld [vmem:[%s347_s30 + $0x8] sm:$0xff] }
  0x54   : > { %v364_v2 = vld [vmem:[%s347_s30 + $0x20] sm:$0xff]  ;;  %v366_v3 = vld [vmem:[%s347_s30 + $0x28] sm:$0xff]  ;;  %361 = vst [vmem:[%s344_s13] sm:$0xff] %v360_v0  ;;  %363 = vst [vmem:[%s344_s13 + $0x8] sm:$0xff] %v362_v1 }
  0x55   : > { %v368_v4 = vld [vmem:[%s347_s30 + $0x40] sm:$0xff]  ;;  %v370_v5 = vld [vmem:[%s347_s30 + $0x48] sm:$0xff]  ;;  %365 = vst [vmem:[%s344_s13 + $0x10] sm:$0xff] %v364_v2  ;;  %367 = vst [vmem:[%s344_s13 + $0x18] sm:$0xff] %v366_v3 }
  0x56   : > { %369 = vst [vmem:[%s344_s13 + $0x20] sm:$0xff] %v368_v4  ;;  %371 = vst [vmem:[%s344_s13 + $0x28] sm:$0xff] %v370_v5 }
  0x57 PF: > { %388 = sbr.rel (%p6763_p12) target bundleno = 1815 (0x717), region = 67 }
  0x5c   : > { %s391_s0 = sand.u32 1, %s6624_s18  }
  0x5d   : > { %s6351_s25 = smul.u32 48, %s391_s0 }
  0x5f   : > { %s6818_s14 = scalar_lea.vmem [#allocation6], %s6351_s25 }
  0x60   : > { %6615 = dma.done.wait (%p6374_p11), [#allocation8], 6400  }
  0x61   : > { %6617 = vsyncadd (%p6374_p11), [#allocation8], 4294960896 }
  0x62   : > { %6619 = dma.done.wait (%p6374_p11), [#allocation10], 640  }
  0x63   : > { %6621 = vsyncadd (%p6374_p11), [#allocation10], 4294966656  ;;  %s501_s26 = sld [smem:[#allocation5]]  ;;  %s9125_s18 = smov 114   ;;  %v6921_v8 = vld [vmem:[#allocation9] sm:$0xff]  ;;  %vm9094_vm0 = vcmask 654336   ;;  %v495_v12 = vlaneseq }
  0x64   : > { %s9121_s15 = smov 126   ;;  %s9127_s11 = smov 127   ;;  %v5626_v9 = vcombine.high %v6921_v8, %v6921_v8  ;;  %v6964_v16 = vld [vmem:[#allocation7 + $0xe8] sm:$0xff]  ;;  %v6966_v17 = vld [vmem:[#allocation7 + $0xf8] sm:$0xff]  ;;  %v6968_v18 = vld [vmem:[#allocation7 + $0xe0] sm:$0xff] }
  0x65   : > { %s9103_s16 = smov 2   ;;  %s9099_s17 = smov 1   ;;  %v6956_v13 = vand.u32 127, %v495_v12  ;;  %v6970_v19 = vld [vmem:[#allocation7 + $0xf0] sm:$0xff]  ;;  %v6991_v31 = vld [vmem:[#allocation7 + $0xd8] sm:$0xff]  ;;  %v7010_v44 = vld [vmem:[#allocation7 + $0xa0] sm:$0xff] }
  0x66   : > { %s9097_s22 = smov 15   ;;  %s9095_s23 = smov 14   ;;  %5653 = vmatprep.mubr.msk.bf16.mxu0 %vm9094_vm0, %v5626_v9  ;;  %v6989_v30 = vld [vmem:[#allocation7 + $0xd0] sm:$0xff]  ;;  %v7013_v45 = vld [vmem:[#allocation7 + $0xa8] sm:$0xff]  ;;  %v7021_v49 = vld [vmem:[#allocation7 + $0xb8] sm:$0xff] }
  0x67   : > { %s9092_s27 = smov 17   ;;  %s9090_s29 = smov 16   ;;  %vm819_vm1 = vcmp.lt.s32.totalorder %v6956_v13, 114  ;;  %vm798_vm2 = vcmp.lt.s32.totalorder %v6956_v13, 126  ;;  %vm777_vm3 = vcmp.lt.s32.totalorder %v6956_v13, 127  ;;  %vm726_vm4 = vcmp.lt.s32.totalorder %v6956_v13, 2 }
  0x68   : > { %s9088_s30 = smov 30   ;;  %s9086_s13 = smov 18   ;;  %vm747_vm5 = vcmp.lt.s32.totalorder %v6956_v13, 1  ;;  %v7019_v48 = vld [vmem:[#allocation7 + $0xb0] sm:$0xff]  ;;  %vm684_vm6 = vcmp.lt.s32.totalorder %v6956_v13, 15  ;;  %v7040_v62 = vld [vmem:[#allocation7 + $0x80] sm:$0xff] }
  0x69   : > { %s6002_s28 = sshll.u32 %s501_s26, 4  ;;  %s9084_s0 = smov 32   ;;  %vm705_vm7 = vcmp.lt.s32.totalorder %v6956_v13, 14  ;;  %v7043_v63 = vld [vmem:[#allocation7 + $0x88] sm:$0xff]  ;;  %v7049_v2 = vld [vmem:[#allocation7 + $0x90] sm:$0xff]  ;;  %v7051_v3 = vld [vmem:[#allocation7 + $0x98] sm:$0xff] }
  0x6a   : > { %s504_s12 = scalar_lea.vmem %s6818_s14, %s6002_s28 [#allocation6]  ;;  %s9064_s25 = smov 31   ;;  %vm9136_vm8 = vcmp.lt.s32.totalorder %v6956_v13, 17  ;;  %vm663_vm9 = vcmp.lt.s32.totalorder %v6956_v13, 16  ;;  %vm9118_vm10 = vcmp.lt.s32.totalorder %v6956_v13, 30  ;;  %vm9116_vm11 = vcmp.lt.s32.totalorder %v6956_v13, 18 }
  0x6b   : > { %v6829_v6 = vld [vmem:[%s504_s12] sm:$0xff]  ;;  %v6831_v7 = vld [vmem:[%s504_s12 + $0x8] sm:$0xff]  ;;  %s9066_s26 = smov 34   ;;  %s9068_s28 = smov 33   ;;  %vm9115_vm12 = vcmp.lt.s32.totalorder %v6956_v13, 32  ;;  %vm9117_vm13 = vcmp.lt.s32.totalorder %v6956_v13, 31 }
  0x6c   : > { %815 = vrot.lane.b32.xlu1 %v6829_v6, %s9125_s18  ;;  %794 = vrot.lane.b32.xlu0 %v6829_v6, %s9121_s15  ;;  %s9070_s12 = smov 94   ;;  %vm9108_vm15 = vcmp.lt.s32.totalorder %v6956_v13, 34  ;;  %vm9101_vm0 = vcmp.lt.s32.totalorder %v6956_v13, 33  ;;  %s9220_s2 = smov 16  }
  0x6d   : > { %s9221_s4 = smov 30   ;;  %s9222_s5 = smov 18  }
  0x6e   : > { %s9224_s6 = smov 113   ;;  %s5682_s24 = sld [smem:[#allocation5 + $0x2]] }
  0x6f   : > { %s9226_s19 = smov 112   ;;  %s9227_s8 = smov 126  }
  0x70   : > { %817 = vrot.lane.b32.xlu1 %v6831_v7, %s9125_s18  ;;  %796 = vrot.lane.b32.xlu0 %v6831_v7, %s9121_s15  ;;  %s9228_s10 = smov 114   ;;  %s9229_s3 = smov 127  }
  0x71   : > { %p463_p9 = scmp.lt.s32.totalorder %s6742_s20, 1 }
  0x73   : > { %s9437_s20 = smov (!%p463_p9, %s6742_s20), 1 }
  0x74   : > { %775 = vrot.lane.b32.xlu1 %v6831_v7, %s9127_s11  ;;  %773 = vrot.lane.b32.xlu0 %v6829_v6, %s9127_s11  ;;  %s6054_s21 = sshll.u32 %s5682_s24, 4  ;;  %s5592_s24 = sshll.u32 %s9437_s20, 1 }
  0x75   : > { %s1742_s9 = scalar_lea.vmem %s6818_s14, %s6054_s21 [#allocation6] }
  0x78   : > { %724 = vrot.lane.b32.xlu1 %v6831_v7, %s9103_s16  ;;  %722 = vrot.lane.b32.xlu0 %v6829_v6, %s9103_s16 }
  0x7c   : > { %745 = vrot.lane.b32.xlu1 %v6831_v7, %s9099_s17  ;;  %743 = vrot.lane.b32.xlu0 %v6829_v6, %s9099_s17 }
  0x80   : > { %682 = vrot.lane.b32.xlu1 %v6831_v7, %s9097_s22  ;;  %680 = vrot.lane.b32.xlu0 %v6829_v6, %s9097_s22 }
  0x84   : > { %703 = vrot.lane.b32.xlu1 %v6831_v7, %s9095_s23  ;;  %701 = vrot.lane.b32.xlu0 %v6829_v6, %s9095_s23 }
  0x88   : > { %640 = vrot.lane.b32.xlu1 %v6831_v7, %s9092_s27  ;;  %638 = vrot.lane.b32.xlu0 %v6829_v6, %s9092_s27 }
  0x8c   : > { %661 = vrot.lane.b32.xlu1 %v6831_v7, %s9090_s29  ;;  %659 = vrot.lane.b32.xlu0 %v6829_v6, %s9090_s29 }
  0x90   : > { %598 = vrot.lane.b32.xlu1 %v6831_v7, %s9088_s30  ;;  %596 = vrot.lane.b32.xlu0 %v6829_v6, %s9088_s30 }
  0x94   : > { %619 = vrot.lane.b32.xlu1 %v6831_v7, %s9086_s13  ;;  %617 = vrot.lane.b32.xlu0 %v6829_v6, %s9086_s13 }
  0x98   : > { %556 = vrot.lane.b32.xlu1 %v6831_v7, %s9084_s0  ;;  %554 = vrot.lane.b32.xlu0 %v6829_v6, %s9084_s0 }
  0x9c   : > { %577 = vrot.lane.b32.xlu1 %v6831_v7, %s9064_s25  ;;  %575 = vrot.lane.b32.xlu0 %v6829_v6, %s9064_s25  ;;  %s9072_s25 = smov 96  }
  0xa0   : > { %512 = vrot.lane.b32.xlu1 %v6831_v7, %s9066_s26  ;;  %510 = vrot.lane.b32.xlu0 %v6829_v6, %s9066_s26  ;;  %s9074_s26 = smov 95  }
  0xa4   : > { %535 = vrot.lane.b32.xlu1 %v6831_v7, %s9068_s28  ;;  %533 = vrot.lane.b32.xlu0 %v6829_v6, %s9068_s28  ;;  %s9080_s28 = smov 98  }
  0xa8   : > { %1006 = vrot.lane.b32.xlu1 %v6831_v7, %s9070_s12  ;;  %1004 = vrot.lane.b32.xlu0 %v6829_v6, %s9070_s12  ;;  %s9076_s12 = smov 97  }
  0xac   : > { %964 = vrot.lane.b32.xlu1 %v6831_v7, %s9072_s25  ;;  %962 = vrot.lane.b32.xlu0 %v6829_v6, %s9072_s25  ;;  %s9078_s25 = smov 111  }
  0xb0   : > { %985 = vrot.lane.b32.xlu1 %v6831_v7, %s9074_s26  ;;  %983 = vrot.lane.b32.xlu0 %v6829_v6, %s9074_s26  ;;  %s9082_s26 = smov 110  }
  0xb4   : > { %922 = vrot.lane.b32.xlu1 %v6831_v7, %s9080_s28  ;;  %920 = vrot.lane.b32.xlu0 %v6829_v6, %s9080_s28  ;;  %s9119_s28 = smov 112  }
  0xb8   : > { %943 = vrot.lane.b32.xlu1 %v6831_v7, %s9076_s12  ;;  %941 = vrot.lane.b32.xlu0 %v6829_v6, %s9076_s12  ;;  %s9123_s12 = smov 113  }
  0xbc   : > { %880 = vrot.lane.b32.xlu1 %v6831_v7, %s9078_s25  ;;  %878 = vrot.lane.b32.xlu0 %v6829_v6, %s9078_s25  ;;  %s5654_s25 = sld [smem:[#allocation5 + $0x1]] }
  0xc0   : > { %901 = vrot.lane.b32.xlu1 %v6831_v7, %s9082_s26  ;;  %899 = vrot.lane.b32.xlu0 %v6829_v6, %s9082_s26 }
  0xc2   : > { %s6028_s26 = sshll.u32 %s5654_s25, 4  ;;  %s9180_s25 = smov 31  }
  0xc3   : > { %s1242_s0 = scalar_lea.vmem %s6818_s14, %s6028_s26 [#allocation6]  ;;  %s9181_s26 = smov 34  }
  0xc4   : > { %838 = vrot.lane.b32.xlu1 %v6831_v7, %s9123_s12  ;;  %836 = vrot.lane.b32.xlu0 %v6829_v6, %s9123_s12  ;;  %v6935_v10 = vld [vmem:[%s1242_s0 + $0x8] sm:$0xff]  ;;  %v6937_v11 = vld [vmem:[%s1242_s0] sm:$0xff]  ;;  %s9179_s0 = smov 32  }
  0xc8   : > { %859 = vrot.lane.b32.xlu1 %v6831_v7, %s9119_s28  ;;  %857 = vrot.lane.b32.xlu0 %v6829_v6, %s9119_s28 }
  0xcc   : > { %1507 = vrot.lane.b32.xlu1 %v6935_v10, %s9121_s15  ;;  %1505 = vrot.lane.b32.xlu0 %v6937_v11, %s9121_s15 }
  0xd0   : > { %1526 = vrot.lane.b32.xlu1 %v6935_v10, %s9125_s18  ;;  %1524 = vrot.lane.b32.xlu0 %v6937_v11, %s9125_s18 }
  0xd4   : > { %1488 = vrot.lane.b32.xlu1 %v6935_v10, %s9127_s11  ;;  %1486 = vrot.lane.b32.xlu0 %v6937_v11, %s9127_s11 }
  0xd8   : > { %1441 = vrot.lane.b32.xlu1 %v6935_v10, %s9103_s16  ;;  %1439 = vrot.lane.b32.xlu0 %v6937_v11, %s9103_s16  ;;  %s9190_s16 = smov 110  }
  0xdc   : > { %1460 = vrot.lane.b32.xlu1 %v6935_v10, %s9099_s17  ;;  %1458 = vrot.lane.b32.xlu0 %v6937_v11, %s9099_s17  ;;  %s9189_s17 = smov 111  }
  0xde   : > { %v816_v14 = vpop.permute.xlu1 %815  ;;  %v795_v15 = vpop.permute.xlu0 %794 }
  0xe0   : > { %1403 = vrot.lane.b32.xlu1 %v6935_v10, %s9097_s22  ;;  %1401 = vrot.lane.b32.xlu0 %v6937_v11, %s9097_s22  ;;  %s9187_s22 = smov 97  }
  0xe2   : > { %v818_v20 = vpop.permute.xlu1 %817  ;;  %v797_v21 = vpop.permute.xlu0 %796 }
  0xe3   : > { %v820_v22 = vsel %vm819_vm1, %v816_v14, %v818_v20  ;;  %v799_v23 = vsel %vm798_vm2, %v795_v15, %v797_v21  ;;  %v800_v24 = vsel %vm798_vm2, %v797_v21, %v795_v15  ;;  %v821_v25 = vsel %vm819_vm1, %v818_v20, %v816_v14 }
  0xe4   : > { %v802_v26 = vmul.f32 %v800_v24, %v6964_v16  ;;  %v823_v27 = vmul.f32 %v821_v25, %v6966_v17  ;;  %v801_v28 = vmul.f32 %v799_v23, %v6968_v18  ;;  %v822_v29 = vmul.f32 %v820_v22, %v6970_v19  ;;  %1422 = vrot.lane.b32.xlu1 %v6935_v10, %s9095_s23  ;;  %v7070_v25 = vld [vmem:[#allocation7 + $0x60] sm:$0xff] }
  0xe5   : > { %1420 = vrot.lane.b32.xlu0 %v6937_v11, %s9095_s23  ;;  %s9186_s23 = smov 98  }
  0xe6   : > { %v776_v32 = vpop.permute.xlu1 %775  ;;  %v774_v33 = vpop.permute.xlu0 %773  ;;  %v6195_v34 = vpack.c.bf16 %v823_v27, %v802_v26  ;;  %v6194_v35 = vpack.c.bf16 %v822_v29, %v801_v28  ;;  %v7073_v26 = vld [vmem:[#allocation7 + $0x68] sm:$0xff]  ;;  %v7079_v29 = vld [vmem:[#allocation7 + $0x70] sm:$0xff] }
  0xe7   : > { %v778_v36 = vsel %vm777_vm3, %v774_v33, %v776_v32  ;;  %v779_v37 = vsel %vm777_vm3, %v776_v32, %v774_v33  ;;  %v7081_v32 = vld [vmem:[#allocation7 + $0x78] sm:$0xff] }
  0xe8   : > { %v780_v38 = vmul.f32 %v778_v36, %v6989_v30  ;;  %v781_v39 = vmul.f32 %v779_v37, %v6991_v31  ;;  %1198 = vmatprep.subr.bf16.mxu0 %v6195_v34  ;;  %1365 = vrot.lane.b32.xlu1 %v6935_v10, %s9092_s27 }
  0xe9   : > { %1199 = vmatpush1.bf16.msra.mxu0 %v6194_v35  ;;  %1363 = vrot.lane.b32.xlu0 %v6937_v11, %s9092_s27  ;;  %s9185_s27 = smov 95  }
  0xea   : > { %v725_v40 = vpop.permute.xlu1 %724  ;;  %v723_v41 = vpop.permute.xlu0 %722  ;;  %v6193_v42 = vpack.c.bf16 %v781_v39, %v6831_v7  ;;  %v6192_v43 = vpack.c.bf16 %v780_v38, %v6829_v6 }
  0xeb   : > { %v727_v46 = vsel %vm726_vm4, %v723_v41, %v725_v40  ;;  %v728_v47 = vsel %vm726_vm4, %v725_v40, %v723_v41 }
  0xec   : > { %1200 = vmatprep.subr.bf16.mxu0 %v6193_v42  ;;  %1384 = vrot.lane.b32.xlu1 %v6935_v10, %s9090_s29  ;;  %v729_v54 = vmul.f32 %v728_v47, %v7010_v44  ;;  %v730_v55 = vmul.f32 %v727_v46, %v7013_v45  ;;  %v7100_v47 = vld [vmem:[#allocation7 + $0x40] sm:$0xff] }
  0xed   : > { %1201 = vmatpush1.bf16.msra.mxu0 %v6192_v43  ;;  %1382 = vrot.lane.b32.xlu0 %v6937_v11, %s9090_s29  ;;  %s9184_s29 = smov 96  }
  0xee   : > { %v746_v50 = vpop.permute.xlu1 %745  ;;  %v744_v51 = vpop.permute.xlu0 %743 }
  0xef   : > { %v748_v52 = vsel %vm747_vm5, %v744_v51, %v746_v50  ;;  %v749_v53 = vsel %vm747_vm5, %v746_v50, %v744_v51  ;;  %v7103_v50 = vld [vmem:[#allocation7 + $0x48] sm:$0xff] }
  0xf0   : > { %v750_v56 = vmul.f32 %v749_v53, %v7019_v48  ;;  %v751_v57 = vmul.f32 %v748_v52, %v7021_v49  ;;  %1327 = vrot.lane.b32.xlu1 %v6935_v10, %s9088_s30  ;;  %v7109_v53 = vld [vmem:[#allocation7 + $0x50] sm:$0xff] }
  0xf1   : > { %1325 = vrot.lane.b32.xlu0 %v6937_v11, %s9088_s30  ;;  %s9183_s30 = smov 94  }
  0xf2   : > { %v683_v58 = vpop.permute.xlu1 %682  ;;  %v681_v59 = vpop.permute.xlu0 %680  ;;  %v6191_v60 = vpack.c.bf16 %v751_v57, %v730_v55  ;;  %v6190_v61 = vpack.c.bf16 %v750_v56, %v729_v54  ;;  %v7111_v54 = vld [vmem:[#allocation7 + $0x58] sm:$0xff] }
  0xf3   : > { %v685_v0 = vsel %vm684_vm6, %v681_v59, %v683_v58  ;;  %v686_v1 = vsel %vm684_vm6, %v683_v58, %v681_v59 }
  0xf4   : > { %1202 = vmatprep.subr.bf16.mxu0 %v6191_v60  ;;  %1346 = vrot.lane.b32.xlu1 %v6935_v10, %s9086_s13  ;;  %v687_v9 = vmul.f32 %v686_v1, %v7040_v62  ;;  %v688_v14 = vmul.f32 %v685_v0, %v7043_v63 }
  0xf5   : > { %1203 = vmatpush1.bf16.msra.mxu0 %v6190_v61  ;;  %1344 = vrot.lane.b32.xlu0 %v6937_v11, %s9086_s13  ;;  %s9182_s13 = smov 33  }
  0xf6   : > { %v704_v4 = vpop.permute.xlu1 %703  ;;  %v702_v5 = vpop.permute.xlu0 %701 }
  0xf7   : > { %v706_v6 = vsel %vm705_vm7, %v702_v5, %v704_v4  ;;  %v707_v7 = vsel %vm705_vm7, %v704_v4, %v702_v5 }
  0xf8   : > { %v708_v15 = vmul.f32 %v707_v7, %v7049_v2  ;;  %v709_v20 = vmul.f32 %v706_v6, %v7051_v3  ;;  %1289 = vrot.lane.b32.xlu1 %v6935_v10, %s9179_s0  ;;  %v7130_v7 = vld [vmem:[#allocation7 + $0x20] sm:$0xff] }
  0xf9   : > { %1287 = vrot.lane.b32.xlu0 %v6937_v11, %s9179_s0 }
  0xfa   : > { %v641_v21 = vpop.permute.xlu1 %640  ;;  %v639_v22 = vpop.permute.xlu0 %638  ;;  %v6189_v23 = vpack.c.bf16 %v709_v20, %v688_v14  ;;  %v6188_v24 = vpack.c.bf16 %v708_v15, %v687_v9  ;;  %v7133_v9 = vld [vmem:[#allocation7 + $0x28] sm:$0xff]  ;;  %v7139_v20 = vld [vmem:[#allocation7 + $0x30] sm:$0xff] }
  0xfb   : > { %v643_v27 = vsel %vm9136_vm8, %v639_v22, %v641_v21  ;;  %v644_v28 = vsel %vm9136_vm8, %v641_v21, %v639_v22  ;;  %v7141_v21 = vld [vmem:[#allocation7 + $0x38] sm:$0xff]  ;;  %v496_v22 = vshrl.u32 %v495_v12, 7 }
  0xfc   : > { %1204 = vmatprep.subr.bf16.mxu0 %v6189_v23  ;;  %1308 = vrot.lane.b32.xlu1 %v6935_v10, %s9180_s25  ;;  %v645_v37 = vmul.f32 %v644_v28, %v7070_v25  ;;  %v646_v38 = vmul.f32 %v643_v27, %v7073_v26 }
  0xfd   : > { %1205 = vmatpush1.bf16.msra.mxu0 %v6188_v24  ;;  %1306 = vrot.lane.b32.xlu0 %v6937_v11, %s9180_s25  ;;  %vm497_vm14 = vcmp.eq.s32.totalorder %v496_v22, 0 }
  0xfe   : > { %v662_v33 = vpop.permute.xlu1 %661  ;;  %v660_v34 = vpop.permute.xlu0 %659 }
  0xff   : > { %v664_v35 = vsel %vm663_vm9, %v660_v34, %v662_v33  ;;  %v665_v36 = vsel %vm663_vm9, %v662_v33, %v660_v34  ;;  %v6666_v33 = vmov 839922192  }
 0x100   : > { %v666_v39 = vmul.f32 %v665_v36, %v7079_v29  ;;  %v667_v40 = vmul.f32 %v664_v35, %v7081_v32  ;;  %1251 = vrot.lane.b32.xlu1 %v6935_v10, %s9181_s26  ;;  %v1024_v34 = vunpack.c.l.s4 %v6666_v33 }
 0x101   : > { %1249 = vrot.lane.b32.xlu0 %v6937_v11, %s9181_s26 }
 0x102   : > { %v599_v41 = vpop.permute.xlu1 %598  ;;  %v597_v42 = vpop.permute.xlu0 %596  ;;  %v6187_v43 = vpack.c.bf16 %v667_v40, %v646_v38  ;;  %v6186_v46 = vpack.c.bf16 %v666_v39, %v645_v37 }
 0x103   : > { %v601_v51 = vsel %vm9118_vm10, %v597_v42, %v599_v41  ;;  %v602_v52 = vsel %vm9118_vm10, %v599_v41, %v597_v42  ;;  %v1025_v42 = vunpack.c.0.s8 %v1024_v34 }
 0x104   : > { %1206 = vmatprep.subr.bf16.mxu0 %v6187_v43  ;;  %1270 = vrot.lane.b32.xlu1 %v6935_v10, %s9182_s13  ;;  %v603_v59 = vmul.f32 %v602_v52, %v7100_v47  ;;  %v604_v60 = vmul.f32 %v601_v51, %v7103_v50  ;;  %v7161_v43 = vld [vmem:[#allocation7] sm:$0xff]  ;;  %v7164_v52 = vld [vmem:[#allocation7 + $0x8] sm:$0xff] }
 0x105   : > { %1207 = vmatpush1.bf16.msra.mxu0 %v6186_v46  ;;  %1268 = vrot.lane.b32.xlu0 %v6937_v11, %s9182_s13  ;;  %v6667_v46 = vmov 0.0  }
 0x106   : > { %v620_v55 = vpop.permute.xlu1 %619  ;;  %v618_v56 = vpop.permute.xlu0 %617  ;;  %v5597_v51 = vsel %vm497_vm14, 1.0, %v6667_v46  ;;  %vm9102_vm14 = vcmp.lt.s32.totalorder %v6956_v13, 94 }
 0x107   : > { %v622_v57 = vsel %vm9116_vm11, %v618_v56, %v620_v55  ;;  %v623_v58 = vsel %vm9116_vm11, %v620_v55, %v618_v56 }
 0x108   : > { %v624_v61 = vmul.f32 %v623_v58, %v7109_v53  ;;  %v625_v0 = vmul.f32 %v622_v57, %v7111_v54  ;;  %1697 = vrot.lane.b32.xlu1 %v6935_v10, %s9183_s30  ;;  %v7170_v57 = vld [vmem:[#allocation7 + $0x10] sm:$0xff]  ;;  %v7172_v58 = vld [vmem:[#allocation7 + $0x18] sm:$0xff] }
 0x109   : > { %1695 = vrot.lane.b32.xlu0 %v6937_v11, %s9183_s30 }
 0x10a   : > { %v557_v1 = vpop.permute.xlu1 %556  ;;  %v555_v4 = vpop.permute.xlu0 %554  ;;  %v6185_v5 = vpack.c.bf16 %v625_v0, %v604_v60  ;;  %v6184_v6 = vpack.c.bf16 %v624_v61, %v603_v59 }
 0x10b   : > { %v559_v14 = vsel %vm9115_vm12, %v555_v4, %v557_v1  ;;  %v560_v15 = vsel %vm9115_vm12, %v557_v1, %v555_v4  ;;  %v500_v1 = vpack.c.bf16 %v5597_v51, %v5597_v51  ;;  %v1028_v4 = vsub.s32 %v1025_v42, %v496_v22  ;;  %v7213_v51 = vld [vmem:[#allocation7 + $0x168] sm:$0xff] }
 0x10c   : > { %1208 = vmatprep.subr.bf16.mxu0 %v6185_v5  ;;  %1659 = vrot.lane.b32.xlu1 %v6935_v10, %s9184_s29  ;;  %v561_v35 = vmul.f32 %v560_v15, %v7130_v7  ;;  %v562_v12 = vmul.f32 %v559_v14, %v7133_v9 }
 0x10d   : > { %1209 = vmatpush1.bf16.msra.mxu0 %v6184_v6  ;;  %1657 = vrot.lane.b32.xlu0 %v6937_v11, %s9184_s29 }
 0x10e   : > { %v578_v23 = vpop.permute.xlu1 %577  ;;  %v576_v24 = vpop.permute.xlu0 %575 }
 0x10f   : > { %v580_v27 = vsel %vm9117_vm13, %v576_v24, %v578_v23  ;;  %v581_v28 = vsel %vm9117_vm13, %v578_v23, %v576_v24  ;;  %v7187_v23 = vld [vmem:[#allocation7 + $0x180] sm:$0xff]  ;;  %v7189_v24 = vld [vmem:[#allocation7 + $0x188] sm:$0xff] }
 0x110   : > { %v582_v36 = vmul.f32 %v581_v28, %v7139_v20  ;;  %v583_v37 = vmul.f32 %v580_v27, %v7141_v21  ;;  %1678 = vrot.lane.b32.xlu1 %v6935_v10, %s9185_s27 }
 0x111   : > { %1676 = vrot.lane.b32.xlu0 %v6937_v11, %s9185_s27 }
 0x112   : > { %v513_v38 = vpop.permute.xlu1 %512  ;;  %v511_v39 = vpop.permute.xlu0 %510  ;;  %v6183_v40 = vpack.c.bf16 %v583_v37, %v562_v12  ;;  %v6182_v41 = vpack.c.bf16 %v582_v36, %v561_v35  ;;  %v7201_v37 = vrot.slane %v500_v1, %v1028_v4 }
 0x113   : > { %v517_v55 = vsel %vm9108_vm15, %v511_v39, %v513_v38  ;;  %v518_v56 = vsel %vm9108_vm15, %v513_v38, %v511_v39  ;;  %vm903_vm15 = vcmp.lt.s32.totalorder %v6956_v13, 110 }
 0x114   : > { %1210 = vmatprep.subr.bf16.mxu0 %v6183_v40  ;;  %1621 = vrot.lane.b32.xlu1 %v6935_v10, %s9186_s23  ;;  %v519_v5 = vmul.f32 %v518_v56, %v7161_v43  ;;  %v520_v6 = vmul.f32 %v517_v55, %v7164_v52  ;;  %9188 = vst [vmem:[#allocation18_spill] sm:$0xff] %v7201_v37 }
 0x115   : > { %1211 = vmatpush1.bf16.msra.mxu0 %v6182_v41  ;;  %1619 = vrot.lane.b32.xlu0 %v6937_v11, %s9186_s23  ;;  %v7208_v41 = vld [vmem:[#allocation7 + $0x160] sm:$0xff] }
 0x116   : > { %v536_v59 = vpop.permute.xlu1 %535  ;;  %v534_v60 = vpop.permute.xlu0 %533 }
 0x117   : > { %v538_v61 = vsel %vm9101_vm0, %v534_v60, %v536_v59  ;;  %v539_v0 = vsel %vm9101_vm0, %v536_v59, %v534_v60  ;;  %vm9105_vm0 = vcmp.lt.s32.totalorder %v6956_v13, 96  ;;  %v7219_v59 = vld [vmem:[#allocation7 + $0x170] sm:$0xff]  ;;  %v7221_v60 = vld [vmem:[#allocation7 + $0x178] sm:$0xff] }
 0x118   : > { %v540_v14 = vmul.f32 %v539_v0, %v7170_v57  ;;  %v541_v15 = vmul.f32 %v538_v61, %v7172_v58  ;;  %1640 = vrot.lane.b32.xlu1 %v6935_v10, %s9187_s22 }
 0x119   : > { %1638 = vrot.lane.b32.xlu0 %v6937_v11, %s9187_s22 }
 0x11a   : > { %v1007_v27 = vpop.permute.xlu1 %1006  ;;  %v1005_v28 = vpop.permute.xlu0 %1004  ;;  %v6181_v33 = vpack.c.bf16 %v541_v15, %v520_v6  ;;  %v6180_v34 = vpack.c.bf16 %v540_v14, %v519_v5 }
 0x11b   : > { %v1009_v22 = vsel %vm9102_vm14, %v1005_v28, %v1007_v27  ;;  %v1010_v35 = vsel %vm9102_vm14, %v1007_v27, %v1005_v28  ;;  %vm9106_vm14 = vcmp.lt.s32.totalorder %v6956_v13, 95 }
 0x11c   : > { %v1011_v12 = vmul.f32 %v1009_v22, %v7187_v23  ;;  %v1012_v36 = vmul.f32 %v1010_v35, %v7189_v24  ;;  %1212 = vmatprep.subr.bf16.mxu0 %v6181_v33  ;;  %1583 = vrot.lane.b32.xlu1 %v6935_v10, %s9189_s17  ;;  %v7240_v22 = vld [vmem:[#allocation7 + $0x140] sm:$0xff]  ;;  %v7243_v35 = vld [vmem:[#allocation7 + $0x148] sm:$0xff] }
 0x11d   : > { %1213 = vmatpush1.bf16.msra.mxu0 %v6180_v34  ;;  %1581 = vrot.lane.b32.xlu0 %v6937_v11, %s9189_s17 }
 0x11e   : > { %v965_v38 = vpop.permute.xlu1 %964  ;;  %v963_v39 = vpop.permute.xlu0 %962  ;;  %v6027_v40 = vpack.c.bf16 %v1012_v36, %v1011_v12 }
 0x11f   : > { %v967_v55 = vsel %vm9105_vm0, %v963_v39, %v965_v38  ;;  %v968_v56 = vsel %vm9105_vm0, %v965_v38, %v963_v39  ;;  %vm9107_vm0 = vcmp.lt.s32.totalorder %v6956_v13, 98  ;;  %v7249_v38 = vld [vmem:[#allocation7 + $0x150] sm:$0xff]  ;;  %v7251_v39 = vld [vmem:[#allocation7 + $0x158] sm:$0xff] }
 0x120   : > { %v5652_v42 = vcombine.high %v6027_v40, %v7201_v37  ;;  %v5651_v46 = vcombine.low %v6027_v40, %v7201_v37  ;;  %1602 = vrot.lane.b32.xlu1 %v6935_v10, %s9190_s16  ;;  %v969_v5 = vmul.f32 %v967_v55, %v7208_v41  ;;  %v970_v6 = vmul.f32 %v968_v56, %v7213_v51 }
 0x121   : > { %1600 = vrot.lane.b32.xlu0 %v6937_v11, %s9190_s16 }
 0x122   : > { %v986_v61 = vpop.permute.xlu1 %985  ;;  %1220 = vmatprep.subr.bf16.mxu0 %v5652_v42  ;;  %v984_v0 = vpop.permute.xlu0 %983 }
 0x123   : > { %v988_v1 = vsel %vm9106_vm14, %v984_v0, %v986_v61  ;;  %v989_v4 = vsel %vm9106_vm14, %v986_v61, %v984_v0  ;;  %1221 = vmatpush2.bf16.msra.mxu0 %v5651_v46  ;;  %vm9110_vm14 = vcmp.lt.s32.totalorder %v6956_v13, 97 }
 0x124   : > { %v990_v14 = vmul.f32 %v988_v1, %v7219_v59  ;;  %v991_v15 = vmul.f32 %v989_v4, %v7221_v60  ;;  %1545 = vrot.lane.b32.xlu1 %v6935_v10, %s9123_s12 }
 0x125   : > { %1543 = vrot.lane.b32.xlu0 %v6937_v11, %s9123_s12  ;;  %s9217_s12 = smov 15  }
 0x126   : > { %v923_v27 = vpop.permute.xlu1 %922  ;;  %v921_v28 = vpop.permute.xlu0 %920  ;;  %v6203_v33 = vpack.c.bf16 %v991_v15, %v970_v6  ;;  %v6202_v34 = vpack.c.bf16 %v990_v14, %v969_v5  ;;  %v7266_v15 = vld [vmem:[#allocation7 + $0x120] sm:$0xff] }
 0x127   : > { %v925_v12 = vsel %vm9107_vm0, %v921_v28, %v923_v27  ;;  %v926_v36 = vsel %vm9107_vm0, %v923_v27, %v921_v28  ;;  %vm9109_vm0 = vcmp.lt.s32.totalorder %v6956_v13, 111  ;;  %9191 = vst [vmem:[#allocation19_spill] sm:$0xff] %v7266_v15  ;;  %v7269_v27 = vld [vmem:[#allocation7 + $0x128] sm:$0xff] }
 0x128   : > { %1222 = vmatprep.subr.bf16.mxu0 %v6203_v33  ;;  %1564 = vrot.lane.b32.xlu1 %v6935_v10, %s9119_s28  ;;  %v927_v56 = vmul.f32 %v925_v12, %v7240_v22  ;;  %v928_v61 = vmul.f32 %v926_v36, %v7243_v35  ;;  %9192 = vst [vmem:[#allocation20_spill] sm:$0xff] %v7269_v27  ;;  %v7277_v12 = vld [vmem:[#allocation7 + $0x138] sm:$0xff] }
 0x129   : > { %1223 = vmatpush2.bf16.msra.mxu0 %v6202_v34  ;;  %1562 = vrot.lane.b32.xlu0 %v6937_v11, %s9119_s28  ;;  %v7275_v34 = vld [vmem:[#allocation7 + $0x130] sm:$0xff]  ;;  %9194 = vst [vmem:[#allocation22_spill] sm:$0xff] %v7277_v12  ;;  %s9215_s28 = smov 2  }
 0x12a   : > { %v944_v40 = vpop.permute.xlu1 %943  ;;  %v942_v42 = vpop.permute.xlu0 %941  ;;  %9193 = vst [vmem:[#allocation21_spill] sm:$0xff] %v7275_v34 }
 0x12b   : > { %v946_v46 = vsel %vm9110_vm14, %v942_v42, %v944_v40  ;;  %v947_v55 = vsel %vm9110_vm14, %v944_v40, %v942_v42  ;;  %vm861_vm14 = vcmp.lt.s32.totalorder %v6956_v13, 112 }
 0x12c   : > { %v948_v0 = vmul.f32 %v946_v46, %v7249_v38  ;;  %v949_v1 = vmul.f32 %v947_v55, %v7251_v39 }
 0x12e   : > { %v881_v4 = vpop.permute.xlu1 %880  ;;  %v879_v5 = vpop.permute.xlu0 %878  ;;  %v6201_v6 = vpack.c.bf16 %v949_v1, %v928_v61  ;;  %v6200_v14 = vpack.c.bf16 %v948_v0, %v927_v56 }
 0x12f   : > { %v883_v28 = vsel %vm9109_vm0, %v879_v5, %v881_v4  ;;  %v884_v33 = vsel %vm9109_vm0, %v881_v4, %v879_v5  ;;  %vm840_vm0 = vcmp.lt.s32.totalorder %v6956_v13, 113 }
 0x130   : > { %1224 = vmatprep.subr.bf16.mxu0 %v6201_v6  ;;  %v885_v55 = vmul.f32 %v883_v28, %v7266_v15  ;;  %v886_v56 = vmul.f32 %v884_v33, %v7269_v27 }
 0x131   : > { %1225 = vmatpush2.bf16.msra.mxu0 %v6200_v14  ;;  %v7288_v14 = vld [vmem:[#allocation7 + $0x100] sm:$0xff] }
 0x132   : > { %v902_v36 = vpop.permute.xlu1 %901  ;;  %v900_v40 = vpop.permute.xlu0 %899 }
 0x133   : > { %v904_v42 = vsel %vm903_vm15, %v900_v40, %v902_v36  ;;  %v905_v46 = vsel %vm903_vm15, %v902_v36, %v900_v40  ;;  %v7291_v36 = vld [vmem:[#allocation7 + $0x108] sm:$0xff]  ;;  %v7297_v40 = vld [vmem:[#allocation7 + $0x110] sm:$0xff] }
 0x134   : > { %v906_v61 = vmul.f32 %v904_v42, %v7275_v34  ;;  %v907_v0 = vmul.f32 %v905_v46, %v7277_v12  ;;  %v7299_v42 = vld [vmem:[#allocation7 + $0x118] sm:$0xff]  ;;  %v5625_v34 = vcombine.low %v6921_v8, %v6921_v8 }
 0x136   : > { %v839_v1 = vpop.permute.xlu1 %838  ;;  %v837_v4 = vpop.permute.xlu0 %836  ;;  %v6199_v5 = vpack.c.bf16 %v907_v0, %v886_v56  ;;  %v6198_v6 = vpack.c.bf16 %v906_v61, %v885_v55 }
 0x137   : > { %v841_v28 = vsel %vm840_vm0, %v837_v4, %v839_v1  ;;  %v842_v33 = vsel %vm840_vm0, %v839_v1, %v837_v4 }
 0x138   : > { %1226 = vmatprep.subr.bf16.mxu0 %v6199_v5  ;;  %v843_v0 = vmul.f32 %v841_v28, %v7288_v14  ;;  %v844_v5 = vmul.f32 %v842_v33, %v7291_v36 }
 0x139   : > { %1227 = vmatpush2.bf16.msra.mxu0 %v6198_v6 }
 0x13a   : > { %v860_v46 = vpop.permute.xlu1 %859  ;;  %v858_v55 = vpop.permute.xlu0 %857 }
 0x13b   : > { %v862_v56 = vsel %vm861_vm14, %v858_v55, %v860_v46  ;;  %v863_v61 = vsel %vm861_vm14, %v860_v46, %v858_v55 }
 0x13c   : > { %v864_v12 = vmul.f32 %v862_v56, %v7297_v40  ;;  %v865_v1 = vmul.f32 %v863_v61, %v7299_v42 }
 0x13e   : > { %v6197_v4 = vpack.c.bf16 %v865_v1, %v844_v5  ;;  %v6196_v6 = vpack.c.bf16 %v864_v12, %v843_v0  ;;  %v1508_v27 = vpop.permute.xlu1 %1507  ;;  %v1506_v15 = vpop.permute.xlu0 %1505 }
 0x13f   : > { %v1509_v46 = vsel %vm798_vm2, %v1506_v15, %v1508_v27  ;;  %v1510_v28 = vsel %vm798_vm2, %v1508_v27, %v1506_v15 }
 0x140   : > { %1228 = vmatprep.subr.bf16.mxu0 %v6197_v4  ;;  %v1511_v33 = vmul.f32 %v1509_v46, %v6968_v18  ;;  %v1512_v12 = vmul.f32 %v1510_v28, %v6964_v16 }
 0x141   : > { %1229 = vmatpush2.bf16.msra.mxu0 %v6196_v6 }
 0x142   : > { %v1527_v55 = vpop.permute.xlu1 %1526  ;;  %v1525_v56 = vpop.permute.xlu0 %1524 }
 0x143   : > { %v1528_v61 = vsel %vm819_vm1, %v1525_v56, %v1527_v55  ;;  %v1529_v8 = vsel %vm819_vm1, %v1527_v55, %v1525_v56 }
 0x144   : > { %1231 = vmatmul.mubr.bf16.vlgmr.msra.gmra.mxu0 %v5625_v34  ;;  %v1530_v34 = vmul.f32 %v1528_v61, %v6970_v19  ;;  %v1531_v0 = vmul.f32 %v1529_v8, %v6966_v17 }
 0x146   : > { %v6242_v5 = vpack.c.bf16 %v1530_v34, %v1511_v33  ;;  %v1489_v1 = vpop.permute.xlu1 %1488  ;;  %v1487_v4 = vpop.permute.xlu0 %1486  ;;  %v6243_v15 = vpack.c.bf16 %v1531_v0, %v1512_v12 }
 0x147   : > { %v1490_v18 = vsel %vm777_vm3, %v1487_v4, %v1489_v1  ;;  %v1491_v16 = vsel %vm777_vm3, %v1489_v1, %v1487_v4 }
 0x148   : > { %3051 = vmatprep.subr.bf16.mxu0 %v6243_v15  ;;  %v1492_v27 = vmul.f32 %v1490_v18, %v6989_v30  ;;  %v1493_v19 = vmul.f32 %v1491_v16, %v6991_v31 }
 0x149   : > { %3052 = vmatpush1.bf16.msra.mxu0 %v6242_v5 }
 0x14a   : > { %v1442_v6 = vpop.permute.xlu1 %1441  ;;  %v1440_v46 = vpop.permute.xlu0 %1439  ;;  %v6240_v33 = vpack.c.bf16 %v1492_v27, %v6937_v11  ;;  %v6241_v8 = vpack.c.bf16 %v1493_v19, %v6935_v10 }
 0x14b   : > { %v1444_v17 = vsel %vm726_vm4, %v1442_v6, %v1440_v46  ;;  %v1443_v28 = vsel %vm726_vm4, %v1440_v46, %v1442_v6 }
 0x14c   : > { %v1445_v55 = vmul.f32 %v1444_v17, %v7010_v44  ;;  %v1446_v61 = vmul.f32 %v1443_v28, %v7013_v45  ;;  %3053 = vmatprep.subr.bf16.mxu0 %v6241_v8 }
 0x14d   : > { %3054 = vmatpush1.bf16.msra.mxu0 %v6240_v33 }
 0x14e   : > { %v1461_v56 = vpop.permute.xlu1 %1460  ;;  %v1459_v12 = vpop.permute.xlu0 %1458 }
 0x14f   : > { %v1462_v30 = vsel %vm747_vm5, %v1459_v12, %v1461_v56  ;;  %v1463_v31 = vsel %vm747_vm5, %v1461_v56, %v1459_v12 }
 0x150   : > { %v1464_v34 = vmul.f32 %v1463_v31, %v7019_v48  ;;  %v1465_v0 = vmul.f32 %v1462_v30, %v7021_v49 }
 0x152   : > { %v6238_v11 = vpack.c.bf16 %v1464_v34, %v1445_v55  ;;  %v1404_v44 = vpop.permute.xlu1 %1403  ;;  %v1402_v5 = vpop.permute.xlu0 %1401  ;;  %v6239_v1 = vpack.c.bf16 %v1465_v0, %v1446_v61 }
 0x153   : > { %v1406_v45 = vsel %vm684_vm6, %v1404_v44, %v1402_v5  ;;  %v1405_v4 = vsel %vm684_vm6, %v1402_v5, %v1404_v44 }
 0x154   : > { %3055 = vmatprep.subr.bf16.mxu0 %v6239_v1  ;;  %v1407_v18 = vmul.f32 %v1406_v45, %v7040_v62  ;;  %v1408_v49 = vmul.f32 %v1405_v4, %v7043_v63 }
 0x155   : > { %3056 = vmatpush1.bf16.msra.mxu0 %v6238_v11 }
 0x156   : > { %v1423_v10 = vpop.permute.xlu1 %1422 }
 0x157   : > { %v1421_v48 = vpop.permute.xlu0 %1420 }
 0x158   : > { %v1424_v15 = vsel %vm705_vm7, %v1421_v48, %v1423_v10  ;;  %v1425_v16 = vsel %vm705_vm7, %v1423_v10, %v1421_v48 }
 0x159   : > { %v1426_v27 = vmul.f32 %v1425_v16, %v7049_v2  ;;  %v1427_v6 = vmul.f32 %v1424_v15, %v7051_v3 }
 0x15a   : > { %v1366_v19 = vpop.permute.xlu1 %1365 }
 0x15b   : > { %v6236_v46 = vpack.c.bf16 %v1426_v27, %v1407_v18  ;;  %v1364_v17 = vpop.permute.xlu0 %1363  ;;  %v6237_v28 = vpack.c.bf16 %v1427_v6, %v1408_v49 }
 0x15c   : > { %v1368_v62 = vsel %vm9136_vm8, %v1366_v19, %v1364_v17  ;;  %v1367_v63 = vsel %vm9136_vm8, %v1364_v17, %v1366_v19 }
 0x15d   : > { %3057 = vmatprep.subr.bf16.mxu0 %v6237_v28  ;;  %v1369_v33 = vmul.f32 %v1368_v62, %v7070_v25  ;;  %v1370_v2 = vmul.f32 %v1367_v63, %v7073_v26 }
 0x15e   : > { %3058 = vmatpush1.bf16.msra.mxu0 %v6236_v46  ;;  %v1385_v55 = vpop.permute.xlu1 %1384 }
 0x15f   : > { %v1383_v56 = vpop.permute.xlu0 %1382 }
 0x160   : > { %v1386_v3 = vsel %vm663_vm9, %v1383_v56, %v1385_v55  ;;  %v1387_v12 = vsel %vm663_vm9, %v1385_v55, %v1383_v56 }
 0x161   : > { %v1388_v61 = vmul.f32 %v1387_v12, %v7079_v29  ;;  %v1389_v30 = vmul.f32 %v1386_v3, %v7081_v32 }
 0x162   : > { %v1328_v8 = vpop.permute.xlu1 %1327 }
 0x163   : > { %v6234_v31 = vpack.c.bf16 %v1388_v61, %v1369_v33  ;;  %v1326_v34 = vpop.permute.xlu0 %1325  ;;  %v6235_v0 = vpack.c.bf16 %v1389_v30, %v1370_v2 }
 0x164   : > { %v1330_v25 = vsel %vm9118_vm10, %v1328_v8, %v1326_v34  ;;  %v1329_v26 = vsel %vm9118_vm10, %v1326_v34, %v1328_v8 }
 0x165   : > { %3059 = vmatprep.subr.bf16.mxu0 %v6235_v0  ;;  %v1331_v11 = vmul.f32 %v1330_v25, %v7100_v47  ;;  %v1332_v29 = vmul.f32 %v1329_v26, %v7103_v50 }
 0x166   : > { %3060 = vmatpush1.bf16.msra.mxu0 %v6234_v31  ;;  %v1347_v44 = vpop.permute.xlu1 %1346 }
 0x167   : > { %v1345_v5 = vpop.permute.xlu0 %1344 }
 0x168   : > { %v1348_v32 = vsel %vm9116_vm11, %v1345_v5, %v1347_v44  ;;  %v1349_v45 = vsel %vm9116_vm11, %v1347_v44, %v1345_v5 }
 0x169   : > { %v1350_v1 = vmul.f32 %v1349_v45, %v7109_v53  ;;  %v1351_v4 = vmul.f32 %v1348_v32, %v7111_v54 }
 0x16a   : > { %v1290_v10 = vpop.permute.xlu1 %1289 }
 0x16b   : > { %v6232_v18 = vpack.c.bf16 %v1350_v1, %v1331_v11  ;;  %v1288_v48 = vpop.permute.xlu0 %1287  ;;  %v6233_v49 = vpack.c.bf16 %v1351_v4, %v1332_v29 }
 0x16c   : > { %v1292_v47 = vsel %vm9115_vm12, %v1290_v10, %v1288_v48  ;;  %v1291_v50 = vsel %vm9115_vm12, %v1288_v48, %v1290_v10  ;;  %vm9195_vm12 = vcmp.lt.s32.totalorder %v6956_v13, 34 }
 0x16d   : > { %3061 = vmatprep.subr.bf16.mxu0 %v6233_v49  ;;  %v1293_v15 = vmul.f32 %v1292_v47, %v7130_v7  ;;  %v1294_v53 = vmul.f32 %v1291_v50, %v7133_v9  ;;  %vm9196_vm11 = vmmov %vm9195_vm12 }
 0x16e   : > { %3062 = vmatpush1.bf16.msra.mxu0 %v6232_v18  ;;  %v1309_v16 = vpop.permute.xlu1 %1308 }
 0x16f   : > { %v1307_v27 = vpop.permute.xlu0 %1306 }
 0x170   : > { %v1310_v54 = vsel %vm9117_vm13, %v1307_v27, %v1309_v16  ;;  %v1311_v6 = vsel %vm9117_vm13, %v1309_v16, %v1307_v27  ;;  %vm9197_vm13 = vcmp.lt.s32.totalorder %v6956_v13, 33 }
 0x171   : > { %v1312_v46 = vmul.f32 %v1311_v6, %v7139_v20  ;;  %v1313_v19 = vmul.f32 %v1310_v54, %v7141_v21  ;;  %vm9198_vm10 = vmmov %vm9197_vm13 }
 0x172   : > { %v1252_v62 = vpop.permute.xlu1 %1251 }
 0x173   : > { %v6230_v17 = vpack.c.bf16 %v1312_v46, %v1293_v15  ;;  %v1250_v28 = vpop.permute.xlu0 %1249  ;;  %v6231_v63 = vpack.c.bf16 %v1313_v19, %v1294_v53 }
 0x174   : > { %v1254_v7 = vsel %vm9195_vm12, %v1252_v62, %v1250_v28  ;;  %v1253_v9 = vsel %vm9196_vm11, %v1250_v28, %v1252_v62  ;;  %vm9199_vm11 = vcmp.lt.s32.totalorder %v6956_v13, 94  ;;  %v9211_v62 = vld [vmem:[#allocation19_spill] sm:$0xff] }
 0x175   : > { %3063 = vmatprep.subr.bf16.mxu0 %v6231_v63  ;;  %v1255_v33 = vmul.f32 %v1254_v7, %v7161_v43  ;;  %v1256_v20 = vmul.f32 %v1253_v9, %v7164_v52  ;;  %vm9200_vm12 = vmmov %vm9199_vm11  ;;  %v9212_v7 = vld [vmem:[#allocation20_spill] sm:$0xff] }
 0x176   : > { %3064 = vmatpush1.bf16.msra.mxu0 %v6230_v17  ;;  %v1271_v55 = vpop.permute.xlu1 %1270 }
 0x177   : > { %v1269_v56 = vpop.permute.xlu0 %1268 }
 0x178   : > { %v1272_v21 = vsel %vm9197_vm13, %v1269_v56, %v1271_v55  ;;  %v1273_v2 = vsel %vm9198_vm10, %v1271_v55, %v1269_v56  ;;  %vm9201_vm10 = vcmp.lt.s32.totalorder %v6956_v13, 96  ;;  %v9213_v55 = vld [vmem:[#allocation21_spill] sm:$0xff] }
 0x179   : > { %v1274_v3 = vmul.f32 %v1273_v2, %v7170_v57  ;;  %v1275_v12 = vmul.f32 %v1272_v21, %v7172_v58  ;;  %vm9202_vm13 = vmmov %vm9201_vm10 }
 0x17a   : > { %v1698_v30 = vpop.permute.xlu1 %1697 }
 0x17b   : > { %v6228_v61 = vpack.c.bf16 %v1274_v3, %v1255_v33  ;;  %v1696_v31 = vpop.permute.xlu0 %1695  ;;  %v6229_v52 = vpack.c.bf16 %v1275_v12, %v1256_v20  ;;  %v9214_v20 = vld [vmem:[#allocation22_spill] sm:$0xff] }
 0x17c   : > { %v1699_v43 = vsel %vm9199_vm11, %v1696_v31, %v1698_v30  ;;  %v1700_v8 = vsel %vm9200_vm12, %v1698_v30, %v1696_v31  ;;  %vm9203_vm11 = vcmp.lt.s32.totalorder %v6956_v13, 95 }
 0x17d   : > { %v1701_v34 = vmul.f32 %v1699_v43, %v7187_v23  ;;  %v1702_v25 = vmul.f32 %v1700_v8, %v7189_v24  ;;  %3065 = vmatprep.subr.bf16.mxu0 %v6229_v52  ;;  %vm9204_vm12 = vmmov %vm9203_vm11 }
 0x17e   : > { %3066 = vmatpush1.bf16.msra.mxu0 %v6228_v61  ;;  %v1660_v0 = vpop.permute.xlu1 %1659 }
 0x17f   : > { %v1658_v57 = vpop.permute.xlu0 %1657  ;;  %v6053_v11 = vpack.c.bf16 %v1702_v25, %v1701_v34 }
 0x180   : > { %v1661_v58 = vsel %vm9201_vm10, %v1658_v57, %v1660_v0  ;;  %v1662_v26 = vsel %vm9202_vm13, %v1660_v0, %v1658_v57  ;;  %vm9205_vm10 = vcmp.lt.s32.totalorder %v6956_v13, 98 }
 0x181   : > { %v1663_v44 = vmul.f32 %v1661_v58, %v7208_v41  ;;  %v1664_v32 = vmul.f32 %v1662_v26, %v7213_v51  ;;  %v5791_v45 = vcombine.high %v6053_v11, %v7201_v37  ;;  %v5790_v18 = vcombine.low %v6053_v11, %v7201_v37  ;;  %vm9206_vm13 = vmmov %vm9205_vm10 }
 0x182   : > { %v1679_v5 = vpop.permute.xlu1 %1678 }
 0x183   : > { %v1677_v29 = vpop.permute.xlu0 %1676  ;;  %3073 = vmatprep.subr.bf16.mxu0 %v5791_v45  ;;  %v7568_v45 = vld [vmem:[%s1742_s9 + $0x8] sm:$0xff] }
 0x184   : > { %v1680_v23 = vsel %vm9203_vm11, %v1677_v29, %v1679_v5  ;;  %v1681_v24 = vsel %vm9204_vm12, %v1679_v5, %v1677_v29  ;;  %3074 = vmatpush2.bf16.msra.mxu0 %v5790_v18  ;;  %vm9207_vm11 = vcmp.lt.s32.totalorder %v6956_v13, 97 }
 0x185   : > { %v1682_v1 = vmul.f32 %v1680_v23, %v7219_v59  ;;  %v1683_v4 = vmul.f32 %v1681_v24, %v7221_v60  ;;  %vm9208_vm12 = vmmov %vm9207_vm11  ;;  %v7566_v24 = vld [vmem:[%s1742_s9] sm:$0xff]  ;;  %s8177_s9 = sshll.u32 %s9437_s20, 4 }
 0x186   : > { %v1622_v10 = vpop.permute.xlu1 %1621  ;;  %s8183_s14 = scalar_lea.vmem %s9054_s1, %s8177_s9 }
 0x187   : > { %v6250_v41 = vpack.c.bf16 %v1682_v1, %v1663_v44  ;;  %v1620_v48 = vpop.permute.xlu0 %1619  ;;  %v6251_v49 = vpack.c.bf16 %v1683_v4, %v1664_v32  ;;  %v7552_v32 = vld [vmem:[#allocation11] sm:$0xff] }
 0x188   : > { %v1623_v51 = vsel %vm9205_vm10, %v1620_v48, %v1622_v10  ;;  %v1624_v47 = vsel %vm9206_vm13, %v1622_v10, %v1620_v48  ;;  %vm9209_vm10 = vcmp.lt.s32.totalorder %v6956_v13, 111  ;;  %v5736_v23 = vcombine.high %v7552_v32, %v7552_v32 }
 0x189   : > { %3075 = vmatprep.subr.bf16.mxu0 %v6251_v49  ;;  %v1625_v50 = vmul.f32 %v1623_v51, %v7240_v22  ;;  %v1626_v59 = vmul.f32 %v1624_v47, %v7243_v35  ;;  %vm9210_vm13 = vmmov %vm9209_vm10  ;;  %v7596_v51 = vld [vmem:[#allocation7 + $0xf8] sm:$0xff]  ;;  %v7598_v47 = vld [vmem:[#allocation7 + $0xe0] sm:$0xff] }
 0x18a   : > { %3076 = vmatpush2.bf16.msra.mxu0 %v6250_v41  ;;  %v1641_v60 = vpop.permute.xlu1 %1640  ;;  %v7590_v41 = vld [vmem:[#allocation7 + $0xe8] sm:$0xff]  ;;  %v7600_v49 = vld [vmem:[#allocation7 + $0xf0] sm:$0xff] }
 0x18b   : > { %v1639_v15 = vpop.permute.xlu0 %1638 }
 0x18c   : > { %v1642_v16 = vsel %vm9207_vm11, %v1639_v15, %v1641_v60  ;;  %v1643_v27 = vsel %vm9208_vm12, %v1641_v60, %v1639_v15  ;;  %vm9223_vm11 = vcmask 654336  }
 0x18d   : > { %v1644_v53 = vmul.f32 %v1642_v16, %v7249_v38  ;;  %v1645_v54 = vmul.f32 %v1643_v27, %v7251_v39  ;;  %vm9225_vm12 = vmmov %vm9223_vm11 }
 0x18e   : > { %v1584_v46 = vpop.permute.xlu1 %1583  ;;  %5763 = vmatprep.mubr.msk.bf16.mxu1 %vm9225_vm12, %v5736_v23 }
 0x18f   : > { %v6248_v6 = vpack.c.bf16 %v1644_v53, %v1625_v50  ;;  %v1582_v19 = vpop.permute.xlu0 %1581  ;;  %v6249_v17 = vpack.c.bf16 %v1645_v54, %v1626_v59 }
 0x190   : > { %v1585_v22 = vsel %vm9209_vm10, %v1582_v19, %v1584_v46  ;;  %v1586_v35 = vsel %vm9210_vm13, %v1584_v46, %v1582_v19  ;;  %v7616_v46 = vld [vmem:[#allocation7 + $0xd8] sm:$0xff]  ;;  %vm9230_vm10 = vcmp.lt.s32.totalorder %v6956_v13, 30 }
 0x191   : > { %3077 = vmatprep.subr.bf16.mxu0 %v6249_v17  ;;  %v1587_v28 = vmul.f32 %v1585_v22, %v9211_v62  ;;  %v1588_v63 = vmul.f32 %v1586_v35, %v9212_v7  ;;  %vm9231_vm13 = vmmov %vm9230_vm10 }
 0x192   : > { %3078 = vmatpush2.bf16.msra.mxu0 %v6248_v6  ;;  %v1603_v9 = vpop.permute.xlu1 %1602  ;;  %v7614_v6 = vld [vmem:[#allocation7 + $0xd0] sm:$0xff] }
 0x193   : > { %v1601_v38 = vpop.permute.xlu0 %1600 }
 0x194   : > { %v1604_v39 = vsel %vm903_vm15, %v1601_v38, %v1603_v9  ;;  %v1605_v33 = vsel %vm903_vm15, %v1603_v9, %v1601_v38 }
 0x195   : > { %v1606_v56 = vmul.f32 %v1604_v39, %v9213_v55  ;;  %v1607_v21 = vmul.f32 %v1605_v33, %v9214_v20  ;;  %v7634_v33 = vld [vmem:[#allocation7 + $0xa0] sm:$0xff] }
 0x196   : > { %v1546_v3 = vpop.permute.xlu1 %1545 }
 0x197   : > { %v6246_v2 = vpack.c.bf16 %v1606_v56, %v1587_v28  ;;  %v1544_v12 = vpop.permute.xlu0 %1543  ;;  %v6247_v61 = vpack.c.bf16 %v1607_v21, %v1588_v63  ;;  %v7636_v56 = vld [vmem:[#allocation7 + $0xa8] sm:$0xff] }
 0x198   : > { %v1547_v30 = vsel %vm840_vm0, %v1544_v12, %v1546_v3  ;;  %v1548_v31 = vsel %vm840_vm0, %v1546_v3, %v1544_v12  ;;  %v7644_v3 = vld [vmem:[#allocation7 + $0xb8] sm:$0xff] }
 0x199   : > { %3079 = vmatprep.subr.bf16.mxu0 %v6247_v61  ;;  %v1549_v43 = vmul.f32 %v1547_v30, %v7288_v14  ;;  %v1550_v8 = vmul.f32 %v1548_v31, %v7291_v36 }
 0x19a   : > { %3080 = vmatpush2.bf16.msra.mxu0 %v6246_v2  ;;  %v1565_v52 = vpop.permute.xlu1 %1564  ;;  %v7642_v2 = vld [vmem:[#allocation7 + $0xb0] sm:$0xff] }
 0x19b   : > { %v1563_v34 = vpop.permute.xlu0 %1562 }
 0x19c   : > { %v1566_v25 = vsel %vm861_vm14, %v1563_v34, %v1565_v52  ;;  %v1567_v0 = vsel %vm861_vm14, %v1565_v52, %v1563_v34 }
 0x19d   : > { %v1568_v57 = vmul.f32 %v1566_v25, %v7297_v40  ;;  %v1569_v58 = vmul.f32 %v1567_v0, %v7299_v42  ;;  %v1246_v42 = vld [vmem:[#allocation9 + $0x8] sm:$0xff] }
 0x19e   : > { %v5765_v5 = vcombine.high %v1246_v42, %v1246_v42  ;;  %v5764_v29 = vcombine.low %v1246_v42, %v1246_v42 }
 0x19f   : > { %v6244_v26 = vpack.c.bf16 %v1568_v57, %v1549_v43  ;;  %v6245_v11 = vpack.c.bf16 %v1569_v58, %v1550_v8  ;;  %v7662_v58 = vld [vmem:[#allocation7 + $0x80] sm:$0xff] }
 0x1a0   : > { %5792 = vmatprep.mubr.msk.bf16.mxu0 %vm9223_vm11, %v5765_v5  ;;  %vm9232_vm11 = vcmp.lt.s32.totalorder %v6956_v13, 18 }
 0x1a1   : > { %3081 = vmatprep.subr.bf16.mxu0 %v6245_v11  ;;  %v7664_v11 = vld [vmem:[#allocation7 + $0x88] sm:$0xff]  ;;  %vm9233_vm12 = vmmov %vm9232_vm11 }
 0x1a2   : > { %3082 = vmatpush2.bf16.msra.mxu0 %v6244_v26 }
 0x1a5   : > { %3084 = vmatmul.mubr.bf16.vlgmr.msra.gmra.mxu0 %v5764_v29 }
 0x204   : > { %v7459_v44 = vpop.f32.mrf.mxu0 }
 0x205   : > { %2498 = vrot.lane.b32.xlu0 %v7459_v44, %s9121_s15 }
 0x206   : > { %v7463_v14 = vpop.f32.mrf.mxu0 }
 0x207   : > { %2500 = vrot.lane.b32.xlu1 %v7463_v14, %s9121_s15  ;;  %s9216_s15 = smov 1  }
 0x208   : > { %v1236_v36 = vpop.f32.mrf.mxu0 }
 0x209   : > { %2517 = vrot.lane.b32.xlu0 %v7459_v44, %s9125_s18  ;;  %v7670_v36 = vld [vmem:[#allocation7 + $0x90] sm:$0xff] }
 0x20a   : > { %v1237_v40 = vpop.f32.mrf.mxu0 }
 0x20b   : > { %2519 = vrot.lane.b32.xlu1 %v7463_v14, %s9125_s18  ;;  %s9218_s18 = smov 14   ;;  %v7672_v40 = vld [vmem:[#allocation7 + $0x98] sm:$0xff] }
 0x20d   : > { %2479 = vrot.lane.b32.xlu0 %v7459_v44, %s9127_s11 }
 0x20f   : > { %2481 = vrot.lane.b32.xlu1 %v7463_v14, %s9127_s11  ;;  %s9219_s11 = smov 17  }
 0x211   : > { %2432 = vrot.lane.b32.xlu0 %v7459_v44, %s9215_s28 }
 0x213   : > { %2434 = vrot.lane.b32.xlu1 %v7463_v14, %s9215_s28 }
 0x215   : > { %2451 = vrot.lane.b32.xlu0 %v7459_v44, %s9216_s15 }
 0x217   : > { %2453 = vrot.lane.b32.xlu1 %v7463_v14, %s9216_s15 }
 0x219   : > { %2394 = vrot.lane.b32.xlu0 %v7459_v44, %s9217_s12 }
 0x21b   : > { %2396 = vrot.lane.b32.xlu1 %v7463_v14, %s9217_s12 }
 0x21d   : > { %2413 = vrot.lane.b32.xlu0 %v7459_v44, %s9218_s18 }
 0x21f   : > { %2415 = vrot.lane.b32.xlu1 %v7463_v14, %s9218_s18 }
 0x221   : > { %2356 = vrot.lane.b32.xlu0 %v7459_v44, %s9219_s11 }
 0x223   : > { %2358 = vrot.lane.b32.xlu1 %v7463_v14, %s9219_s11 }
 0x225   : > { %2375 = vrot.lane.b32.xlu0 %v7459_v44, %s9220_s2 }
 0x227   : > { %2377 = vrot.lane.b32.xlu1 %v7463_v14, %s9220_s2 }
 0x229   : > { %2318 = vrot.lane.b32.xlu0 %v7459_v44, %s9221_s4 }
 0x22b   : > { %2320 = vrot.lane.b32.xlu1 %v7463_v14, %s9221_s4 }
 0x22d   : > { %2337 = vrot.lane.b32.xlu0 %v7459_v44, %s9222_s5 }
 0x22f   : > { %2339 = vrot.lane.b32.xlu1 %v7463_v14, %s9222_s5 }
 0x231   : > { %2280 = vrot.lane.b32.xlu0 %v7459_v44, %s9179_s0 }
 0x233   : > { %2282 = vrot.lane.b32.xlu1 %v7463_v14, %s9179_s0 }
 0x235   : > { %2299 = vrot.lane.b32.xlu0 %v7459_v44, %s9180_s25 }
 0x237   : > { %2301 = vrot.lane.b32.xlu1 %v7463_v14, %s9180_s25 }
 0x239   : > { %2242 = vrot.lane.b32.xlu0 %v7459_v44, %s9181_s26 }
 0x23b   : > { %2244 = vrot.lane.b32.xlu1 %v7463_v14, %s9181_s26 }
 0x23d   : > { %2261 = vrot.lane.b32.xlu0 %v7459_v44, %s9182_s13 }
 0x23f   : > { %2263 = vrot.lane.b32.xlu1 %v7463_v14, %s9182_s13 }
 0x241   : > { %2688 = vrot.lane.b32.xlu0 %v7459_v44, %s9183_s30 }
 0x243   : > { %2690 = vrot.lane.b32.xlu1 %v7463_v14, %s9183_s30 }
 0x245   : > { %2650 = vrot.lane.b32.xlu0 %v7459_v44, %s9184_s29 }
 0x247   : > { %2652 = vrot.lane.b32.xlu1 %v7463_v14, %s9184_s29 }
 0x249   : > { %2669 = vrot.lane.b32.xlu0 %v7459_v44, %s9185_s27 }
 0x24b   : > { %2671 = vrot.lane.b32.xlu1 %v7463_v14, %s9185_s27 }
 0x24d   : > { %2612 = vrot.lane.b32.xlu0 %v7459_v44, %s9186_s23 }
 0x24f   : > { %2614 = vrot.lane.b32.xlu1 %v7463_v14, %s9186_s23 }
 0x251   : > { %2631 = vrot.lane.b32.xlu0 %v7459_v44, %s9187_s22 }
 0x253   : > { %2633 = vrot.lane.b32.xlu1 %v7463_v14, %s9187_s22 }
 0x255   : > { %2574 = vrot.lane.b32.xlu0 %v7459_v44, %s9189_s17 }
 0x257   : > { %2576 = vrot.lane.b32.xlu1 %v7463_v14, %s9189_s17 }
 0x259   : > { %2593 = vrot.lane.b32.xlu0 %v7459_v44, %s9190_s16 }
 0x25b   : > { %2595 = vrot.lane.b32.xlu1 %v7463_v14, %s9190_s16 }
 0x25d   : > { %2536 = vrot.lane.b32.xlu0 %v7459_v44, %s9224_s6 }
 0x25f   : > { %2538 = vrot.lane.b32.xlu1 %v7463_v14, %s9224_s6 }
 0x261   : > { %2555 = vrot.lane.b32.xlu0 %v7459_v44, %s9226_s19 }
 0x263   : > { %2557 = vrot.lane.b32.xlu1 %v7463_v14, %s9226_s19 }
 0x265   : > { %2005 = vrot.lane.b32.xlu0 %v7566_v24, %s9227_s8 }
 0x267   : > { %2007 = vrot.lane.b32.xlu1 %v7568_v45, %s9227_s8 }
 0x269   : > { %2024 = vrot.lane.b32.xlu0 %v7566_v24, %s9228_s10 }
 0x26b   : > { %2026 = vrot.lane.b32.xlu1 %v7568_v45, %s9228_s10 }
 0x26d   : > { %1986 = vrot.lane.b32.xlu0 %v7566_v24, %s9229_s3 }
 0x26f   : > { %1988 = vrot.lane.b32.xlu1 %v7568_v45, %s9229_s3 }
 0x271   : > { %1939 = vrot.lane.b32.xlu0 %v7566_v24, %s9215_s28 }
 0x273   : > { %1941 = vrot.lane.b32.xlu1 %v7568_v45, %s9215_s28 }
 0x275   : > { %1958 = vrot.lane.b32.xlu0 %v7566_v24, %s9216_s15 }
 0x277   : > { %v2499_v1 = vpop.permute.xlu0 %2498  ;;  %1960 = vrot.lane.b32.xlu1 %v7568_v45, %s9216_s15 }
 0x279   : > { %v2501_v4 = vpop.permute.xlu1 %2500  ;;  %1901 = vrot.lane.b32.xlu0 %v7566_v24, %s9217_s12 }
 0x27a   : > { %v2502_v10 = vsel %vm798_vm2, %v2499_v1, %v2501_v4  ;;  %v2503_v48 = vsel %vm798_vm2, %v2501_v4, %v2499_v1 }
 0x27b   : > { %v2518_v18 = vpop.permute.xlu0 %2517  ;;  %1903 = vrot.lane.b32.xlu1 %v7568_v45, %s9217_s12  ;;  %v2505_v16 = vmul.f32 %v2503_v48, %v7590_v41  ;;  %v2504_v53 = vmul.f32 %v2502_v10, %v7598_v47 }
 0x27d   : > { %v2520_v50 = vpop.permute.xlu1 %2519  ;;  %1920 = vrot.lane.b32.xlu0 %v7566_v24, %s9218_s18 }
 0x27e   : > { %v2521_v59 = vsel %vm819_vm1, %v2518_v18, %v2520_v50  ;;  %v2522_v60 = vsel %vm819_vm1, %v2520_v50, %v2518_v18 }
 0x27f   : > { %v2480_v15 = vpop.permute.xlu0 %2479  ;;  %v2524_v27 = vmul.f32 %v2522_v60, %v7596_v51  ;;  %v2523_v54 = vmul.f32 %v2521_v59, %v7600_v49  ;;  %1922 = vrot.lane.b32.xlu1 %v7568_v45, %s9218_s18  ;;  %v7690_v60 = vld [vmem:[#allocation7 + $0x60] sm:$0xff] }
 0x281   : > { %v2482_v19 = vpop.permute.xlu1 %2481  ;;  %v6219_v17 = vpack.c.bf16 %v2524_v27, %v2505_v16  ;;  %v6218_v22 = vpack.c.bf16 %v2523_v54, %v2504_v53  ;;  %1863 = vrot.lane.b32.xlu0 %v7566_v24, %s9219_s11  ;;  %v7692_v16 = vld [vmem:[#allocation7 + $0x68] sm:$0xff]  ;;  %v7698_v54 = vld [vmem:[#allocation7 + $0x70] sm:$0xff] }
 0x282   : > { %v2483_v35 = vsel %vm777_vm3, %v2480_v15, %v2482_v19  ;;  %v2484_v62 = vsel %vm777_vm3, %v2482_v19, %v2480_v15  ;;  %v7700_v19 = vld [vmem:[#allocation7 + $0x78] sm:$0xff] }
 0x283   : > { %v2485_v28 = vmul.f32 %v2483_v35, %v7614_v6  ;;  %v2486_v7 = vmul.f32 %v2484_v62, %v7616_v46  ;;  %2871 = vmatprep.subr.bf16.mxu1 %v6219_v17  ;;  %v2433_v63 = vpop.permute.xlu0 %2432  ;;  %1865 = vrot.lane.b32.xlu1 %v7568_v45, %s9219_s11 }
 0x284   : > { %2872 = vmatpush1.bf16.msra.mxu1 %v6218_v22 }
 0x285   : > { %v2435_v9 = vpop.permute.xlu1 %2434  ;;  %v6217_v38 = vpack.c.bf16 %v2486_v7, %v7463_v14  ;;  %v6216_v39 = vpack.c.bf16 %v2485_v28, %v7459_v44  ;;  %1882 = vrot.lane.b32.xlu0 %v7566_v24, %s9220_s2 }
 0x286   : > { %v2436_v20 = vsel %vm726_vm4, %v2433_v63, %v2435_v9  ;;  %v2437_v21 = vsel %vm726_vm4, %v2435_v9, %v2433_v63 }
 0x287   : > { %2873 = vmatprep.subr.bf16.mxu1 %v6217_v38  ;;  %v2452_v55 = vpop.permute.xlu0 %2451  ;;  %1884 = vrot.lane.b32.xlu1 %v7568_v45, %s9220_s2  ;;  %v2438_v31 = vmul.f32 %v2437_v21, %v7634_v33  ;;  %v2439_v43 = vmul.f32 %v2436_v20, %v7636_v56  ;;  %v7718_v20 = vld [vmem:[#allocation7 + $0x40] sm:$0xff] }
 0x288   : > { %2874 = vmatpush1.bf16.msra.mxu1 %v6216_v39 }
 0x289   : > { %v2454_v12 = vpop.permute.xlu1 %2453  ;;  %1825 = vrot.lane.b32.xlu0 %v7566_v24, %s9221_s4 }
 0x28a   : > { %v2455_v61 = vsel %vm747_vm5, %v2452_v55, %v2454_v12  ;;  %v2456_v30 = vsel %vm747_vm5, %v2454_v12, %v2452_v55  ;;  %v7720_v12 = vld [vmem:[#allocation7 + $0x48] sm:$0xff] }
 0x28b   : > { %v2457_v8 = vmul.f32 %v2456_v30, %v7642_v2  ;;  %v2458_v52 = vmul.f32 %v2455_v61, %v7644_v3  ;;  %v2395_v34 = vpop.permute.xlu0 %2394  ;;  %1827 = vrot.lane.b32.xlu1 %v7568_v45, %s9221_s4 }
 0x28d   : > { %v2397_v25 = vpop.permute.xlu1 %2396  ;;  %v6215_v0 = vpack.c.bf16 %v2458_v52, %v2439_v43  ;;  %v6214_v57 = vpack.c.bf16 %v2457_v8, %v2438_v31  ;;  %1844 = vrot.lane.b32.xlu0 %v7566_v24, %s9222_s5  ;;  %v7726_v31 = vld [vmem:[#allocation7 + $0x50] sm:$0xff]  ;;  %v7728_v43 = vld [vmem:[#allocation7 + $0x58] sm:$0xff] }
 0x28e   : > { %v2398_v44 = vsel %vm684_vm6, %v2395_v34, %v2397_v25  ;;  %v2399_v14 = vsel %vm684_vm6, %v2397_v25, %v2395_v34 }
 0x28f   : > { %2875 = vmatprep.subr.bf16.mxu1 %v6215_v0  ;;  %v2414_v26 = vpop.permute.xlu0 %2413  ;;  %1846 = vrot.lane.b32.xlu1 %v7568_v45, %s9222_s5  ;;  %v2400_v23 = vmul.f32 %v2399_v14, %v7662_v58  ;;  %v2401_v1 = vmul.f32 %v2398_v44, %v7664_v11 }
 0x290   : > { %2876 = vmatpush1.bf16.msra.mxu1 %v6214_v57 }
 0x291   : > { %v2416_v42 = vpop.permute.xlu1 %2415  ;;  %1787 = vrot.lane.b32.xlu0 %v7566_v24, %s9179_s0 }
 0x292   : > { %v2417_v5 = vsel %vm705_vm7, %v2414_v26, %v2416_v42  ;;  %v2418_v29 = vsel %vm705_vm7, %v2416_v42, %v2414_v26 }
 0x293   : > { %v2419_v4 = vmul.f32 %v2418_v29, %v7670_v36  ;;  %v2420_v18 = vmul.f32 %v2417_v5, %v7672_v40  ;;  %v2357_v10 = vpop.permute.xlu0 %2356  ;;  %1789 = vrot.lane.b32.xlu1 %v7568_v45, %s9179_s0  ;;  %v7746_v29 = vld [vmem:[#allocation7 + $0x20] sm:$0xff] }
 0x295   : > { %v2359_v48 = vpop.permute.xlu1 %2358  ;;  %v6213_v50 = vpack.c.bf16 %v2420_v18, %v2401_v1  ;;  %v6212_v59 = vpack.c.bf16 %v2419_v4, %v2400_v23  ;;  %1806 = vrot.lane.b32.xlu0 %v7566_v24, %s9180_s25  ;;  %v7748_v1 = vld [vmem:[#allocation7 + $0x28] sm:$0xff] }
 0x296   : > { %v2360_v27 = vsel %vm9136_vm8, %v2357_v10, %v2359_v48  ;;  %v2361_v53 = vsel %vm9136_vm8, %v2359_v48, %v2357_v10  ;;  %v7754_v10 = vld [vmem:[#allocation7 + $0x30] sm:$0xff]  ;;  %v7756_v48 = vld [vmem:[#allocation7 + $0x38] sm:$0xff] }
 0x297   : > { %2877 = vmatprep.subr.bf16.mxu1 %v6213_v50  ;;  %v2376_v15 = vpop.permute.xlu0 %2375  ;;  %1808 = vrot.lane.b32.xlu1 %v7568_v45, %s9180_s25  ;;  %v2362_v62 = vmul.f32 %v2361_v53, %v7690_v60  ;;  %v2363_v28 = vmul.f32 %v2360_v27, %v7692_v16 }
 0x298   : > { %2878 = vmatpush1.bf16.msra.mxu1 %v6212_v59 }
 0x299   : > { %v2378_v17 = vpop.permute.xlu1 %2377  ;;  %1749 = vrot.lane.b32.xlu0 %v7566_v24, %s9181_s26 }
 0x29a   : > { %v2379_v22 = vsel %vm663_vm9, %v2376_v15, %v2378_v17  ;;  %v2380_v35 = vsel %vm663_vm9, %v2378_v17, %v2376_v15 }
 0x29b   : > { %v2381_v7 = vmul.f32 %v2380_v35, %v7698_v54  ;;  %v2382_v63 = vmul.f32 %v2379_v22, %v7700_v19  ;;  %v2319_v9 = vpop.permute.xlu0 %2318  ;;  %1751 = vrot.lane.b32.xlu1 %v7568_v45, %s9181_s26 }
 0x29d   : > { %v2321_v38 = vpop.permute.xlu1 %2320  ;;  %v6211_v39 = vpack.c.bf16 %v2382_v63, %v2363_v28  ;;  %v6210_v55 = vpack.c.bf16 %v2381_v7, %v2362_v62  ;;  %1768 = vrot.lane.b32.xlu0 %v7566_v24, %s9182_s13  ;;  %v7774_v63 = vld [vmem:[#allocation7] sm:$0xff] }
 0x29e   : > { %v2322_v61 = vsel %vm9230_vm10, %v2319_v9, %v2321_v38  ;;  %v2323_v30 = vsel %vm9231_vm13, %v2321_v38, %v2319_v9  ;;  %vm9234_vm10 = vcmp.lt.s32.totalorder %v6956_v13, 32  ;;  %v7776_v38 = vld [vmem:[#allocation7 + $0x8] sm:$0xff] }
 0x29f   : > { %2879 = vmatprep.subr.bf16.mxu1 %v6211_v39  ;;  %v2338_v21 = vpop.permute.xlu0 %2337  ;;  %1770 = vrot.lane.b32.xlu1 %v7568_v45, %s9182_s13  ;;  %v2324_v25 = vmul.f32 %v2323_v30, %v7718_v20  ;;  %v2325_v0 = vmul.f32 %v2322_v61, %v7720_v12  ;;  %vm9235_vm13 = vmmov %vm9234_vm10  ;;  %v7784_v61 = vld [vmem:[#allocation7 + $0x18] sm:$0xff] }
 0x2a0   : > { %2880 = vmatpush1.bf16.msra.mxu1 %v6210_v55 }
 0x2a1   : > { %v2340_v8 = vpop.permute.xlu1 %2339  ;;  %2195 = vrot.lane.b32.xlu0 %v7566_v24, %s9183_s30 }
 0x2a2   : > { %v2341_v52 = vsel %vm9232_vm11, %v2338_v21, %v2340_v8  ;;  %v2342_v34 = vsel %vm9233_vm12, %v2340_v8, %v2338_v21  ;;  %vm9236_vm11 = vcmp.lt.s32.totalorder %v6956_v13, 31  ;;  %v7782_v21 = vld [vmem:[#allocation7 + $0x10] sm:$0xff] }
 0x2a3   : > { %v2343_v57 = vmul.f32 %v2342_v34, %v7726_v31  ;;  %v2344_v26 = vmul.f32 %v2341_v52, %v7728_v43  ;;  %v2281_v44 = vpop.permute.xlu0 %2280  ;;  %2197 = vrot.lane.b32.xlu1 %v7568_v45, %s9183_s30  ;;  %vm9237_vm12 = vmmov %vm9236_vm11 }
 0x2a5   : > { %v2283_v14 = vpop.permute.xlu1 %2282  ;;  %v6209_v42 = vpack.c.bf16 %v2344_v26, %v2325_v0  ;;  %v6208_v5 = vpack.c.bf16 %v2343_v57, %v2324_v25  ;;  %2157 = vrot.lane.b32.xlu0 %v7566_v24, %s9184_s29 }
 0x2a6   : > { %v2284_v4 = vsel %vm9234_vm10, %v2281_v44, %v2283_v14  ;;  %v2285_v18 = vsel %vm9235_vm13, %v2283_v14, %v2281_v44  ;;  %vm9238_vm10 = vcmp.lt.s32.totalorder %v6956_v13, 34  ;;  %v7798_v44 = vld [vmem:[#allocation7 + $0x180] sm:$0xff]  ;;  %v7800_v14 = vld [vmem:[#allocation7 + $0x188] sm:$0xff] }
 0x2a7   : > { %2881 = vmatprep.subr.bf16.mxu1 %v6209_v42  ;;  %v2300_v23 = vpop.permute.xlu0 %2299  ;;  %2159 = vrot.lane.b32.xlu1 %v7568_v45, %s9184_s29  ;;  %v2286_v27 = vmul.f32 %v2285_v18, %v7746_v29  ;;  %v2287_v53 = vmul.f32 %v2284_v4, %v7748_v1  ;;  %vm9239_vm13 = vmmov %vm9238_vm10 }
 0x2a8   : > { %2882 = vmatpush1.bf16.msra.mxu1 %v6208_v5 }
 0x2a9   : > { %v2302_v50 = vpop.permute.xlu1 %2301  ;;  %2176 = vrot.lane.b32.xlu0 %v7566_v24, %s9185_s27 }
 0x2aa   : > { %v2303_v59 = vsel %vm9236_vm11, %v2300_v23, %v2302_v50  ;;  %v2304_v15 = vsel %vm9237_vm12, %v2302_v50, %v2300_v23  ;;  %vm9240_vm11 = vcmp.lt.s32.totalorder %v6956_v13, 33 }
 0x2ab   : > { %v2305_v17 = vmul.f32 %v2304_v15, %v7754_v10  ;;  %v2306_v22 = vmul.f32 %v2303_v59, %v7756_v48  ;;  %v2243_v35 = vpop.permute.xlu0 %2242  ;;  %2178 = vrot.lane.b32.xlu1 %v7568_v45, %s9185_s27  ;;  %vm9241_vm12 = vmmov %vm9240_vm11 }
 0x2ad   : > { %v2245_v62 = vpop.permute.xlu1 %2244  ;;  %v6207_v28 = vpack.c.bf16 %v2306_v22, %v2287_v53  ;;  %v6206_v7 = vpack.c.bf16 %v2305_v17, %v2286_v27  ;;  %2119 = vrot.lane.b32.xlu0 %v7566_v24, %s9186_s23  ;;  %v7816_v17 = vld [vmem:[#allocation7 + $0x160] sm:$0xff] }
 0x2ae   : > { %v2246_v39 = vsel %vm9238_vm10, %v2243_v35, %v2245_v62  ;;  %v2247_v55 = vsel %vm9239_vm13, %v2245_v62, %v2243_v35  ;;  %vm9242_vm10 = vcmp.lt.s32.totalorder %v6956_v13, 94 }
 0x2af   : > { %2883 = vmatprep.subr.bf16.mxu1 %v6207_v28  ;;  %v2262_v9 = vpop.permute.xlu0 %2261  ;;  %2121 = vrot.lane.b32.xlu1 %v7568_v45, %s9186_s23  ;;  %v2248_v34 = vmul.f32 %v2247_v55, %v7774_v63  ;;  %v2249_v25 = vmul.f32 %v2246_v39, %v7776_v38  ;;  %vm9243_vm13 = vmmov %vm9242_vm10  ;;  %v7820_v28 = vld [vmem:[#allocation7 + $0x168] sm:$0xff]  ;;  %v7826_v39 = vld [vmem:[#allocation7 + $0x170] sm:$0xff] }
 0x2b0   : > { %2884 = vmatpush1.bf16.msra.mxu1 %v6206_v7  ;;  %v7828_v55 = vld [vmem:[#allocation7 + $0x178] sm:$0xff] }
 0x2b1   : > { %v2264_v30 = vpop.permute.xlu1 %2263  ;;  %2138 = vrot.lane.b32.xlu0 %v7566_v24, %s9187_s22 }
 0x2b2   : > { %v2265_v8 = vsel %vm9240_vm11, %v2262_v9, %v2264_v30  ;;  %v2266_v52 = vsel %vm9241_vm12, %v2264_v30, %v2262_v9  ;;  %vm9244_vm11 = vcmp.lt.s32.totalorder %v6956_v13, 96 }
 0x2b3   : > { %v2267_v0 = vmul.f32 %v2266_v52, %v7782_v21  ;;  %v2268_v57 = vmul.f32 %v2265_v8, %v7784_v61  ;;  %v2689_v26 = vpop.permute.xlu0 %2688  ;;  %2140 = vrot.lane.b32.xlu1 %v7568_v45, %s9187_s22  ;;  %vm9245_vm12 = vmmov %vm9244_vm11 }
 0x2b5   : > { %v2691_v42 = vpop.permute.xlu1 %2690  ;;  %v6205_v5 = vpack.c.bf16 %v2268_v57, %v2249_v25  ;;  %v6204_v23 = vpack.c.bf16 %v2267_v0, %v2248_v34  ;;  %2081 = vrot.lane.b32.xlu0 %v7566_v24, %s9189_s17 }
 0x2b6   : > { %v2692_v4 = vsel %vm9242_vm10, %v2689_v26, %v2691_v42  ;;  %v2693_v18 = vsel %vm9243_vm13, %v2691_v42, %v2689_v26  ;;  %vm9246_vm10 = vcmp.lt.s32.totalorder %v6956_v13, 95 }
 0x2b7   : > { %v2694_v50 = vmul.f32 %v2692_v4, %v7798_v44  ;;  %v2695_v59 = vmul.f32 %v2693_v18, %v7800_v14  ;;  %2885 = vmatprep.subr.bf16.mxu1 %v6205_v5  ;;  %v2651_v15 = vpop.permute.xlu0 %2650  ;;  %2083 = vrot.lane.b32.xlu1 %v7568_v45, %s9189_s17  ;;  %vm9247_vm13 = vmmov %vm9246_vm10  ;;  %v7846_v4 = vld [vmem:[#allocation7 + $0x140] sm:$0xff] }
 0x2b8   : > { %2886 = vmatpush1.bf16.msra.mxu1 %v6204_v23 }
 0x2b9   : > { %v2653_v27 = vpop.permute.xlu1 %2652  ;;  %v6104_v53 = vpack.c.bf16 %v2695_v59, %v2694_v50  ;;  %2100 = vrot.lane.b32.xlu0 %v7566_v24, %s9190_s16  ;;  %v7848_v50 = vld [vmem:[#allocation7 + $0x148] sm:$0xff] }
 0x2ba   : > { %v2654_v7 = vsel %vm9244_vm11, %v2651_v15, %v2653_v27  ;;  %v2655_v9 = vsel %vm9245_vm12, %v2653_v27, %v2651_v15  ;;  %vm9248_vm11 = vcmp.lt.s32.totalorder %v6956_v13, 98  ;;  %v7854_v27 = vld [vmem:[#allocation7 + $0x150] sm:$0xff] }
 0x2bb   : > { %v2670_v22 = vpop.permute.xlu0 %2669  ;;  %v5762_v35 = vcombine.high %v6104_v53, %v7201_v37  ;;  %v5761_v62 = vcombine.low %v6104_v53, %v7201_v37  ;;  %2102 = vrot.lane.b32.xlu1 %v7568_v45, %s9190_s16  ;;  %v2656_v34 = vmul.f32 %v2654_v7, %v7816_v17  ;;  %v2657_v25 = vmul.f32 %v2655_v9, %v7820_v28  ;;  %vm9249_vm12 = vmmov %vm9248_vm11  ;;  %v7856_v53 = vld [vmem:[#allocation7 + $0x158] sm:$0xff] }
 0x2bc   : > { %9250 = vst [vmem:[#allocation19_spill] sm:$0xff] %v7856_v53 }
 0x2bd   : > { %v2672_v30 = vpop.permute.xlu1 %2671  ;;  %2893 = vmatprep.subr.bf16.mxu1 %v5762_v35  ;;  %2043 = vrot.lane.b32.xlu0 %v7566_v24, %s9224_s6 }
 0x2be   : > { %v2673_v8 = vsel %vm9246_vm10, %v2670_v22, %v2672_v30  ;;  %v2674_v52 = vsel %vm9247_vm13, %v2672_v30, %v2670_v22  ;;  %2894 = vmatpush2.bf16.msra.mxu1 %v5761_v62  ;;  %vm9251_vm10 = vcmp.lt.s32.totalorder %v6956_v13, 97 }
 0x2bf   : > { %v2675_v0 = vmul.f32 %v2673_v8, %v7826_v39  ;;  %v2676_v57 = vmul.f32 %v2674_v52, %v7828_v55  ;;  %v2613_v26 = vpop.permute.xlu0 %2612  ;;  %2045 = vrot.lane.b32.xlu1 %v7568_v45, %s9224_s6  ;;  %vm9252_vm13 = vmmov %vm9251_vm10 }
 0x2c1   : > { %v2615_v42 = vpop.permute.xlu1 %2614  ;;  %v6227_v5 = vpack.c.bf16 %v2676_v57, %v2657_v25  ;;  %v6226_v23 = vpack.c.bf16 %v2675_v0, %v2656_v34  ;;  %2062 = vrot.lane.b32.xlu0 %v7566_v24, %s9226_s19  ;;  %v7870_v57 = vld [vmem:[#allocation7 + $0x120] sm:$0xff] }
 0x2c2   : > { %v2616_v59 = vsel %vm9248_vm11, %v2613_v26, %v2615_v42  ;;  %v2617_v15 = vsel %vm9249_vm12, %v2615_v42, %v2613_v26  ;;  %v7872_v42 = vld [vmem:[#allocation7 + $0x128] sm:$0xff]  ;;  %vm9254_vm11 = vcmp.lt.s32.totalorder %v6956_v13, 111 }
 0x2c3   : > { %2895 = vmatprep.subr.bf16.mxu1 %v6227_v5  ;;  %v2632_v18 = vpop.permute.xlu0 %2631  ;;  %2064 = vrot.lane.b32.xlu1 %v7568_v45, %s9226_s19  ;;  %v2618_v7 = vmul.f32 %v2616_v59, %v7846_v4  ;;  %v2619_v9 = vmul.f32 %v2617_v15, %v7848_v50  ;;  %9253 = vst [vmem:[#allocation20_spill] sm:$0xff] %v7872_v42  ;;  %vm9255_vm12 = vmmov %vm9254_vm11  ;;  %v7880_v59 = vld [vmem:[#allocation7 + $0x138] sm:$0xff] }
 0x2c4   : > { %2896 = vmatpush2.bf16.msra.mxu1 %v6226_v23  ;;  %9257 = vst [vmem:[#allocation22_spill] sm:$0xff] %v7880_v59 }
 0x2c5   : > { %v2634_v22 = vpop.permute.xlu1 %2633 }
 0x2c6   : > { %v2635_v35 = vsel %vm9251_vm10, %v2632_v18, %v2634_v22  ;;  %v2636_v62 = vsel %vm9252_vm13, %v2634_v22, %v2632_v18  ;;  %v7878_v18 = vld [vmem:[#allocation7 + $0x130] sm:$0xff]  ;;  %vm9259_vm10 = vcmp.lt.s32.totalorder %v6956_v13, 30 }
 0x2c7   : > { %v2637_v30 = vmul.f32 %v2635_v35, %v7854_v27  ;;  %v2638_v8 = vmul.f32 %v2636_v62, %v7856_v53  ;;  %v2575_v52 = vpop.permute.xlu0 %2574  ;;  %9256 = vst [vmem:[#allocation21_spill] sm:$0xff] %v7878_v18  ;;  %v7892_v53 = vld [vmem:[#allocation7 + $0x108] sm:$0xff]  ;;  %vm9260_vm13 = vmmov %vm9259_vm10 }
 0x2c9   : > { %v2577_v34 = vpop.permute.xlu1 %2576  ;;  %v6225_v25 = vpack.c.bf16 %v2638_v8, %v2619_v9  ;;  %v6224_v0 = vpack.c.bf16 %v2637_v30, %v2618_v7 }
 0x2ca   : > { %v2578_v5 = vsel %vm9254_vm11, %v2575_v52, %v2577_v34  ;;  %v2579_v23 = vsel %vm9255_vm12, %v2577_v34, %v2575_v52  ;;  %vm9261_vm11 = vcmp.lt.s32.totalorder %v6956_v13, 18 }
 0x2cb   : > { %2897 = vmatprep.subr.bf16.mxu1 %v6225_v25  ;;  %v2594_v26 = vpop.permute.xlu0 %2593  ;;  %v2580_v62 = vmul.f32 %v2578_v5, %v7870_v57  ;;  %v2581_v7 = vmul.f32 %v2579_v23, %v7872_v42  ;;  %v7898_v23 = vld [vmem:[#allocation7 + $0x110] sm:$0xff]  ;;  %vm9262_vm12 = vmmov %vm9261_vm11 }
 0x2cc   : > { %2898 = vmatpush2.bf16.msra.mxu1 %v6224_v0  ;;  %v7890_v0 = vld [vmem:[#allocation7 + $0x100] sm:$0xff] }
 0x2cd   : > { %v2596_v15 = vpop.permute.xlu1 %2595 }
 0x2ce   : > { %v2597_v22 = vsel %vm903_vm15, %v2594_v26, %v2596_v15  ;;  %v2598_v35 = vsel %vm903_vm15, %v2596_v15, %v2594_v26  ;;  %v7900_v15 = vld [vmem:[#allocation7 + $0x118] sm:$0xff] }
 0x2cf   : > { %v2599_v9 = vmul.f32 %v2597_v22, %v7878_v18  ;;  %v2600_v30 = vmul.f32 %v2598_v35, %v7880_v59  ;;  %v2537_v8 = vpop.permute.xlu0 %2536  ;;  %v5735_v59 = vcombine.low %v7552_v32, %v7552_v32  ;;  %v7912_v18 = vpop.f32.mrf.mxu0 }
 0x2d1   : > { %v2539_v52 = vpop.permute.xlu1 %2538  ;;  %v6223_v34 = vpack.c.bf16 %v2600_v30, %v2581_v7  ;;  %v6222_v25 = vpack.c.bf16 %v2599_v9, %v2580_v62  ;;  %v7914_v42 = vpop.f32.mrf.mxu0 }
 0x2d2   : > { %v2540_v26 = vsel %vm840_vm0, %v2537_v8, %v2539_v52  ;;  %v2541_v5 = vsel %vm840_vm0, %v2539_v52, %v2537_v8  ;;  %9258 = vst [vmem:[#allocation23_spill] sm:$0xff] %v7914_v42 }
 0x2d3   : > { %2899 = vmatprep.subr.bf16.mxu1 %v6223_v34  ;;  %v2556_v22 = vpop.permute.xlu0 %2555  ;;  %v2542_v9 = vmul.f32 %v2540_v26, %v7890_v0  ;;  %v2543_v30 = vmul.f32 %v2541_v5, %v7892_v53 }
 0x2d4   : > { %2900 = vmatpush2.bf16.msra.mxu1 %v6222_v25 }
 0x2d5   : > { %v2558_v35 = vpop.permute.xlu1 %2557 }
 0x2d6   : > { %v2559_v62 = vsel %vm861_vm14, %v2556_v22, %v2558_v35  ;;  %v2560_v7 = vsel %vm861_vm14, %v2558_v35, %v2556_v22  ;;  %v3089_v22 = vpop.f32.mrf.mxu0 }
 0x2d7   : > { %v2561_v34 = vmul.f32 %v2559_v62, %v7898_v23  ;;  %v2562_v8 = vmul.f32 %v2560_v7, %v7900_v15  ;;  %v2006_v5 = vpop.permute.xlu0 %2005 }
 0x2d8   : > { %v3090_v26 = vpop.f32.mrf.mxu0 }
 0x2d9   : > { %v6221_v52 = vpack.c.bf16 %v2562_v8, %v2543_v30  ;;  %v6220_v25 = vpack.c.bf16 %v2561_v34, %v2542_v9  ;;  %v2008_v35 = vpop.permute.xlu1 %2007 }
 0x2da   : > { %v2009_v62 = vsel %vm798_vm2, %v2006_v5, %v2008_v35  ;;  %v2010_v7 = vsel %vm798_vm2, %v2008_v35, %v2006_v5 }
 0x2db   : > { %2901 = vmatprep.subr.bf16.mxu1 %v6221_v52  ;;  %v2011_v9 = vmul.f32 %v7598_v47, %v2009_v62  ;;  %v2025_v32 = vpop.permute.xlu0 %2024 }
 0x2dc   : > { %2902 = vmatpush2.bf16.msra.mxu1 %v6220_v25 }
 0x2dd   : > { %v2027_v30 = vpop.permute.xlu1 %2026 }
 0x2de   : > { %v2028_v34 = vsel %vm819_vm1, %v2025_v32, %v2027_v30  ;;  %v2029_v8 = vsel %vm819_vm1, %v2027_v30, %v2025_v32 }
 0x2df   : > { %2904 = vmatmul.mubr.bf16.vlgmr.msra.gmra.mxu1 %v5735_v59  ;;  %v2012_v59 = vmul.f32 %v7590_v41, %v2010_v7  ;;  %v2030_v52 = vmul.f32 %v7600_v49, %v2028_v34  ;;  %v2031_v25 = vmul.f32 %v7596_v51, %v2029_v8  ;;  %v1987_v42 = vpop.permute.xlu0 %1986 }
 0x2e1   : > { %v6290_v22 = vpack.c.bf16 %v2030_v52, %v2011_v9  ;;  %v1989_v26 = vpop.permute.xlu1 %1988  ;;  %v6291_v35 = vpack.c.bf16 %v2031_v25, %v2012_v59 }
 0x2e2   : > { %v1990_v47 = vsel %vm777_vm3, %v1987_v42, %v1989_v26  ;;  %v1991_v41 = vsel %vm777_vm3, %v1989_v26, %v1987_v42 }
 0x2e3   : > { %3905 = vmatprep.subr.bf16.mxu0 %v6291_v35  ;;  %v1992_v5 = vmul.f32 %v7614_v6, %v1990_v47  ;;  %v1940_v7 = vpop.permute.xlu0 %1939  ;;  %v1993_v49 = vmul.f32 %v7616_v46, %v1991_v41 }
 0x2e4   : > { %3906 = vmatpush1.bf16.msra.mxu0 %v6290_v22 }
 0x2e5   : > { %v1942_v62 = vpop.permute.xlu1 %1941  ;;  %v6288_v30 = vpack.c.bf16 %v1992_v5, %v7566_v24  ;;  %v6289_v8 = vpack.c.bf16 %v1993_v49, %v7568_v45 }
 0x2e6   : > { %v1944_v51 = vsel %vm726_vm4, %v1942_v62, %v1940_v7  ;;  %v1943_v9 = vsel %vm726_vm4, %v1940_v7, %v1942_v62 }
 0x2e7   : > { %v1945_v32 = vmul.f32 %v7634_v33, %v1944_v51  ;;  %v1959_v42 = vpop.permute.xlu0 %1958  ;;  %v1946_v34 = vmul.f32 %v7636_v56, %v1943_v9  ;;  %3907 = vmatprep.subr.bf16.mxu0 %v6289_v8 }
 0x2e8   : > { %3908 = vmatpush1.bf16.msra.mxu0 %v6288_v30 }
 0x2e9   : > { %v1961_v59 = vpop.permute.xlu1 %1960 }
 0x2ea   : > { %v1962_v6 = vsel %vm747_vm5, %v1959_v42, %v1961_v59  ;;  %v1963_v46 = vsel %vm747_vm5, %v1961_v59, %v1959_v42 }
 0x2eb   : > { %v1964_v52 = vmul.f32 %v7642_v2, %v1963_v46  ;;  %v1965_v25 = vmul.f32 %v7644_v3, %v1962_v6  ;;  %v1902_v22 = vpop.permute.xlu0 %1901 }
 0x2ed   : > { %v6286_v24 = vpack.c.bf16 %v1964_v52, %v1945_v32  ;;  %v1904_v33 = vpop.permute.xlu1 %1903  ;;  %v6287_v26 = vpack.c.bf16 %v1965_v25, %v1946_v34 }
 0x2ee   : > { %v1906_v56 = vsel %vm684_vm6, %v1904_v33, %v1902_v22  ;;  %v1905_v47 = vsel %vm684_vm6, %v1902_v22, %v1904_v33 }
 0x2ef   : > { %3909 = vmatprep.subr.bf16.mxu0 %v6287_v26  ;;  %v1907_v35 = vmul.f32 %v7662_v58, %v1906_v56  ;;  %v1921_v2 = vpop.permute.xlu0 %1920  ;;  %v1908_v3 = vmul.f32 %v7664_v11, %v1905_v47 }
 0x2f0   : > { %3910 = vmatpush1.bf16.msra.mxu0 %v6286_v24 }
 0x2f1   : > { %v1923_v45 = vpop.permute.xlu1 %1922 }
 0x2f2   : > { %v1924_v41 = vsel %vm705_vm7, %v1921_v2, %v1923_v45  ;;  %v1925_v5 = vsel %vm705_vm7, %v1923_v45, %v1921_v2 }
 0x2f3   : > { %v1926_v62 = vmul.f32 %v7670_v36, %v1925_v5  ;;  %v1927_v7 = vmul.f32 %v7672_v40, %v1924_v41  ;;  %v1864_v9 = vpop.permute.xlu0 %1863 }
 0x2f5   : > { %v6284_v49 = vpack.c.bf16 %v1926_v62, %v1907_v35  ;;  %v1866_v51 = vpop.permute.xlu1 %1865  ;;  %v6285_v30 = vpack.c.bf16 %v1927_v7, %v1908_v3 }
 0x2f6   : > { %v1868_v58 = vsel %vm9136_vm8, %v1866_v51, %v1864_v9  ;;  %v1867_v11 = vsel %vm9136_vm8, %v1864_v9, %v1866_v51 }
 0x2f7   : > { %3911 = vmatprep.subr.bf16.mxu0 %v6285_v30  ;;  %v1869_v32 = vmul.f32 %v7690_v60, %v1868_v58  ;;  %v1883_v42 = vpop.permute.xlu0 %1882  ;;  %v1870_v36 = vmul.f32 %v7692_v16, %v1867_v11 }
 0x2f8   : > { %3912 = vmatpush1.bf16.msra.mxu0 %v6284_v49 }
 0x2f9   : > { %v1885_v59 = vpop.permute.xlu1 %1884 }
 0x2fa   : > { %v1886_v40 = vsel %vm663_vm9, %v1883_v42, %v1885_v59  ;;  %v1887_v34 = vsel %vm663_vm9, %v1885_v59, %v1883_v42 }
 0x2fb   : > { %v1888_v6 = vmul.f32 %v7698_v54, %v1887_v34  ;;  %v1889_v46 = vmul.f32 %v7700_v19, %v1886_v40  ;;  %v1826_v25 = vpop.permute.xlu0 %1825 }
 0x2fd   : > { %v6282_v8 = vpack.c.bf16 %v1888_v6, %v1869_v32  ;;  %v1828_v52 = vpop.permute.xlu1 %1827  ;;  %v6283_v24 = vpack.c.bf16 %v1889_v46, %v1870_v36 }
 0x2fe   : > { %v1830_v60 = vsel %vm9259_vm10, %v1828_v52, %v1826_v25  ;;  %v1829_v16 = vsel %vm9260_vm13, %v1826_v25, %v1828_v52  ;;  %vm9263_vm10 = vcmp.lt.s32.totalorder %v6956_v13, 32 }
 0x2ff   : > { %3913 = vmatprep.subr.bf16.mxu0 %v6283_v24  ;;  %v1831_v33 = vmul.f32 %v7718_v20, %v1830_v60  ;;  %v1845_v56 = vpop.permute.xlu0 %1844  ;;  %v1832_v54 = vmul.f32 %v7720_v12, %v1829_v16  ;;  %vm9264_vm13 = vmmov %vm9263_vm10 }
 0x300   : > { %3914 = vmatpush1.bf16.msra.mxu0 %v6282_v8 }
 0x301   : > { %v1847_v22 = vpop.permute.xlu1 %1846 }
 0x302   : > { %v1848_v19 = vsel %vm9261_vm11, %v1845_v56, %v1847_v22  ;;  %v1849_v26 = vsel %vm9262_vm12, %v1847_v22, %v1845_v56  ;;  %vm9265_vm11 = vcmp.lt.s32.totalorder %v6956_v13, 31 }
 0x303   : > { %v1850_v47 = vmul.f32 %v7726_v31, %v1849_v26  ;;  %v1851_v35 = vmul.f32 %v7728_v43, %v1848_v19  ;;  %v1788_v3 = vpop.permute.xlu0 %1787  ;;  %vm9266_vm12 = vmmov %vm9265_vm11 }
 0x305   : > { %v6280_v45 = vpack.c.bf16 %v1850_v47, %v1831_v33  ;;  %v1790_v2 = vpop.permute.xlu1 %1789  ;;  %v6281_v41 = vpack.c.bf16 %v1851_v35, %v1832_v54 }
 0x306   : > { %v1792_v20 = vsel %vm9263_vm10, %v1790_v2, %v1788_v3  ;;  %v1791_v12 = vsel %vm9264_vm13, %v1788_v3, %v1790_v2  ;;  %vm9267_vm10 = vcmp.lt.s32.totalorder %v6956_v13, 34 }
 0x307   : > { %3915 = vmatprep.subr.bf16.mxu0 %v6281_v41  ;;  %v1793_v5 = vmul.f32 %v7746_v29, %v1792_v20  ;;  %v1807_v7 = vpop.permute.xlu0 %1806  ;;  %v1794_v31 = vmul.f32 %v7748_v1, %v1791_v12  ;;  %vm9268_vm13 = vmmov %vm9267_vm10 }
 0x308   : > { %3916 = vmatpush1.bf16.msra.mxu0 %v6280_v45 }
 0x309   : > { %v1809_v62 = vpop.permute.xlu1 %1808 }
 0x30a   : > { %v1810_v43 = vsel %vm9265_vm11, %v1807_v7, %v1809_v62  ;;  %v1811_v49 = vsel %vm9266_vm12, %v1809_v62, %v1807_v7  ;;  %vm9269_vm11 = vcmp.lt.s32.totalorder %v6956_v13, 33 }
 0x30b   : > { %v1812_v51 = vmul.f32 %v7754_v10, %v1811_v49  ;;  %v1813_v9 = vmul.f32 %v7756_v48, %v1810_v43  ;;  %v1750_v11 = vpop.permute.xlu0 %1749  ;;  %vm9270_vm12 = vmmov %vm9269_vm11  ;;  %v9281_v49 = vld [vmem:[#allocation19_spill] sm:$0xff] }
 0x30d   : > { %v6278_v58 = vpack.c.bf16 %v1812_v51, %v1793_v5  ;;  %v1752_v30 = vpop.permute.xlu1 %1751  ;;  %v6279_v32 = vpack.c.bf16 %v1813_v9, %v1794_v31 }
 0x30e   : > { %v1754_v29 = vsel %vm9267_vm10, %v1752_v30, %v1750_v11  ;;  %v1753_v1 = vsel %vm9268_vm13, %v1750_v11, %v1752_v30  ;;  %vm9271_vm10 = vcmp.lt.s32.totalorder %v6956_v13, 94 }
 0x30f   : > { %3917 = vmatprep.subr.bf16.mxu0 %v6279_v32  ;;  %v1755_v59 = vmul.f32 %v7774_v63, %v1754_v29  ;;  %v1769_v36 = vpop.permute.xlu0 %1768  ;;  %v1756_v10 = vmul.f32 %v7776_v38, %v1753_v1  ;;  %vm9272_vm13 = vmmov %vm9271_vm10  ;;  %v9284_v32 = vld [vmem:[#allocation20_spill] sm:$0xff] }
 0x310   : > { %3918 = vmatpush1.bf16.msra.mxu0 %v6278_v58 }
 0x311   : > { %v1771_v42 = vpop.permute.xlu1 %1770 }
 0x312   : > { %v1772_v48 = vsel %vm9269_vm11, %v1769_v36, %v1771_v42  ;;  %v1773_v40 = vsel %vm9270_vm12, %v1771_v42, %v1769_v36  ;;  %vm9273_vm11 = vcmp.lt.s32.totalorder %v6956_v13, 96 }
 0x313   : > { %v1774_v34 = vmul.f32 %v7782_v21, %v1773_v40  ;;  %v1775_v6 = vmul.f32 %v7784_v61, %v1772_v48  ;;  %v2196_v52 = vpop.permute.xlu0 %2195  ;;  %vm9274_vm12 = vmmov %vm9273_vm11  ;;  %v9286_v40 = vld [vmem:[#allocation22_spill] sm:$0xff] }
 0x315   : > { %v6276_v46 = vpack.c.bf16 %v1774_v34, %v1755_v59  ;;  %v2198_v8 = vpop.permute.xlu1 %2197  ;;  %v6277_v38 = vpack.c.bf16 %v1775_v6, %v1756_v10  ;;  %v9285_v10 = vld [vmem:[#allocation21_spill] sm:$0xff] }
 0x316   : > { %v2199_v63 = vsel %vm9271_vm10, %v2196_v52, %v2198_v8  ;;  %v2200_v25 = vsel %vm9272_vm13, %v2198_v8, %v2196_v52  ;;  %vm9275_vm10 = vcmp.lt.s32.totalorder %v6956_v13, 95 }
 0x317   : > { %v2201_v60 = vmul.f32 %v7798_v44, %v2199_v63  ;;  %v2202_v24 = vmul.f32 %v7800_v14, %v2200_v25  ;;  %3919 = vmatprep.subr.bf16.mxu0 %v6277_v38  ;;  %v2158_v21 = vpop.permute.xlu0 %2157  ;;  %vm9276_vm13 = vmmov %vm9275_vm10 }
 0x318   : > { %3920 = vmatpush1.bf16.msra.mxu0 %v6276_v46 }
 0x319   : > { %v2160_v16 = vpop.permute.xlu1 %2159  ;;  %v6079_v22 = vpack.c.bf16 %v2202_v24, %v2201_v60 }
 0x31a   : > { %v2161_v61 = vsel %vm9273_vm11, %v2158_v21, %v2160_v16  ;;  %v2162_v33 = vsel %vm9274_vm12, %v2160_v16, %v2158_v21  ;;  %vm9277_vm11 = vcmp.lt.s32.totalorder %v6956_v13, 98 }
 0x31b   : > { %v2163_v56 = vmul.f32 %v7816_v17, %v2161_v61  ;;  %v2177_v19 = vpop.permute.xlu0 %2176  ;;  %v2164_v26 = vmul.f32 %v7820_v28, %v2162_v33  ;;  %v5874_v47 = vcombine.high %v6079_v22, %v7201_v37  ;;  %v5873_v2 = vcombine.low %v6079_v22, %v7201_v37  ;;  %vm9278_vm12 = vmmov %vm9277_vm11 }
 0x31d   : > { %v2179_v54 = vpop.permute.xlu1 %2178  ;;  %3927 = vmatprep.subr.bf16.mxu0 %v5874_v47  ;;  %v8159_v47 = vld [vmem:[#allocation11 + $0x8] sm:$0xff] }
 0x31e   : > { %v2180_v44 = vsel %vm9275_vm10, %v2177_v19, %v2179_v54  ;;  %v2181_v14 = vsel %vm9276_vm13, %v2179_v54, %v2177_v19  ;;  %3928 = vmatpush2.bf16.msra.mxu0 %v5873_v2  ;;  %vm9279_vm10 = vcmp.lt.s32.totalorder %v6956_v13, 97  ;;  %v9287_v19 = vld [vmem:[#allocation23_spill] sm:$0xff]  ;;  %v8189_v2 = vld [vmem:[%s8183_s14 + $0x8] sm:$0xff] }
 0x31f   : > { %v2182_v35 = vmul.f32 %v7826_v39, %v2180_v44  ;;  %v2183_v45 = vmul.f32 %v7828_v55, %v2181_v14  ;;  %v2120_v20 = vpop.permute.xlu0 %2119  ;;  %vm9280_vm13 = vmmov %vm9279_vm10 }
 0x321   : > { %v6298_v17 = vpack.c.bf16 %v2182_v35, %v2163_v56  ;;  %v2122_v3 = vpop.permute.xlu1 %2121  ;;  %v6299_v12 = vpack.c.bf16 %v2183_v45, %v2164_v26  ;;  %v5819_v35 = vcombine.high %v8159_v47, %v8159_v47  ;;  %v8186_v45 = vld [vmem:[%s8183_s14] sm:$0xff] }
 0x322   : > { %v2123_v28 = vsel %vm9277_vm11, %v2120_v20, %v2122_v3  ;;  %v2124_v41 = vsel %vm9278_vm12, %v2122_v3, %v2120_v20  ;;  %vm9282_vm11 = vcmp.lt.s32.totalorder %v6956_v13, 111  ;;  %v3350_v20 = vld [vmem:[#allocation7 + $0xe0] sm:$0xff] }
 0x323   : > { %3929 = vmatprep.subr.bf16.mxu0 %v6299_v12  ;;  %v2125_v5 = vmul.f32 %v7846_v4, %v2123_v28  ;;  %v2126_v39 = vmul.f32 %v7848_v50, %v2124_v41  ;;  %v2139_v62 = vpop.permute.xlu0 %2138  ;;  %vm9283_vm12 = vmmov %vm9282_vm11  ;;  %v3351_v41 = vld [vmem:[#allocation7 + $0xe8] sm:$0xff] }
 0x324   : > { %3930 = vmatpush2.bf16.msra.mxu0 %v6298_v17 }
 0x325   : > { %v2141_v55 = vpop.permute.xlu1 %2140 }
 0x326   : > { %v2142_v7 = vsel %vm9279_vm10, %v2139_v62, %v2141_v55  ;;  %v2143_v31 = vsel %vm9280_vm13, %v2141_v55, %v2139_v62  ;;  %vm9288_vm10 = vcmask 654336   ;;  %v3370_v55 = vld [vmem:[#allocation7 + $0xf8] sm:$0xff] }
 0x327   : > { %v2144_v43 = vmul.f32 %v7854_v27, %v2142_v7  ;;  %v2145_v51 = vmul.f32 %v9281_v49, %v2143_v31  ;;  %v2082_v30 = vpop.permute.xlu0 %2081  ;;  %vm9289_vm13 = vmmov %vm9288_vm10 }
 0x328   : > { %5846 = vmatprep.mubr.msk.bf16.mxu1 %vm9289_vm13, %v5819_v35 }
 0x329   : > { %v6296_v9 = vpack.c.bf16 %v2144_v43, %v2125_v5  ;;  %v2084_v58 = vpop.permute.xlu1 %2083  ;;  %v6297_v11 = vpack.c.bf16 %v2145_v51, %v2126_v39  ;;  %v3369_v39 = vld [vmem:[#allocation7 + $0xf0] sm:$0xff] }
 0x32a   : > { %v2085_v4 = vsel %vm9282_vm11, %v2082_v30, %v2084_v58  ;;  %v2086_v50 = vsel %vm9283_vm12, %v2084_v58, %v2082_v30  ;;  %v3331_v30 = vld [vmem:[#allocation7 + $0xd0] sm:$0xff]  ;;  %vm9290_vm11 = vcmp.lt.s32.totalorder %v6956_v13, 30 }
 0x32b   : > { %3931 = vmatprep.subr.bf16.mxu0 %v6297_v11  ;;  %v2087_v29 = vmul.f32 %v7870_v57, %v2085_v4  ;;  %v2088_v1 = vmul.f32 %v9284_v32, %v2086_v50  ;;  %v2101_v27 = vpop.permute.xlu0 %2100  ;;  %v3332_v11 = vld [vmem:[#allocation7 + $0xd8] sm:$0xff]  ;;  %vm9291_vm12 = vmmov %vm9290_vm11 }
 0x32c   : > { %3932 = vmatpush2.bf16.msra.mxu0 %v6296_v9 }
 0x32d   : > { %v2103_v59 = vpop.permute.xlu1 %2102 }
 0x32e   : > { %v2104_v42 = vsel %vm903_vm15, %v2101_v27, %v2103_v59  ;;  %v2105_v36 = vsel %vm903_vm15, %v2103_v59, %v2101_v27 }
 0x32f   : > { %v2106_v48 = vmul.f32 %v9285_v10, %v2104_v42  ;;  %v2107_v34 = vmul.f32 %v9286_v40, %v2105_v36  ;;  %v2044_v8 = vpop.permute.xlu0 %2043  ;;  %v3284_v40 = vld [vmem:[#allocation7 + $0xa0] sm:$0xff] }
 0x331   : > { %v6294_v6 = vpack.c.bf16 %v2106_v48, %v2087_v29  ;;  %v2046_v46 = vpop.permute.xlu1 %2045  ;;  %v6295_v52 = vpack.c.bf16 %v2107_v34, %v2088_v1 }
 0x332   : > { %v2047_v57 = vsel %vm840_vm0, %v2044_v8, %v2046_v46  ;;  %v2048_v63 = vsel %vm840_vm0, %v2046_v46, %v2044_v8 }
 0x333   : > { %3933 = vmatprep.subr.bf16.mxu0 %v6295_v52  ;;  %v2049_v25 = vmul.f32 %v7890_v0, %v2047_v57  ;;  %v2050_v38 = vmul.f32 %v7892_v53, %v2048_v63  ;;  %v2063_v24 = vpop.permute.xlu0 %2062  ;;  %v3303_v52 = vld [vmem:[#allocation7 + $0xb0] sm:$0xff]  ;;  %v3304_v57 = vld [vmem:[#allocation7 + $0xb8] sm:$0xff] }
 0x334   : > { %3934 = vmatpush2.bf16.msra.mxu0 %v6294_v6  ;;  %v3285_v6 = vld [vmem:[#allocation7 + $0xa8] sm:$0xff] }
 0x335   : > { %v2065_v60 = vpop.permute.xlu1 %2064 }
 0x336   : > { %v2066_v16 = vsel %vm861_vm14, %v2063_v24, %v2065_v60  ;;  %v2067_v21 = vsel %vm861_vm14, %v2065_v60, %v2063_v24 }
 0x337   : > { %v2068_v61 = vmul.f32 %v7898_v23, %v2066_v16  ;;  %v2069_v33 = vmul.f32 %v7900_v15, %v2067_v21 }
 0x339   : > { %v6292_v22 = vpack.c.bf16 %v2068_v61, %v2049_v25  ;;  %v6293_v56 = vpack.c.bf16 %v2069_v33, %v2050_v38 }
 0x33b   : > { %3935 = vmatprep.subr.bf16.mxu0 %v6293_v56 }
 0x33c   : > { %3936 = vmatpush2.bf16.msra.mxu0 %v6292_v22 }
 0x39f   : > { %v2905_v54 = vpop.f32.mrf.mxu1 }
 0x3a0   : > { %v8065_v0 = vadd.f32 %v7912_v18, %v2905_v54  ;;  %v1746_v18 = vld [vmem:[#allocation9 + $0x10] sm:$0xff] }
 0x3a1   : > { %v2907_v53 = vpop.f32.mrf.mxu1  ;;  %v5848_v15 = vcombine.high %v1746_v18, %v1746_v18  ;;  %v5847_v14 = vcombine.low %v1746_v18, %v1746_v18  ;;  %v3246_v54 = vld [vmem:[#allocation7 + $0x80] sm:$0xff] }
 0x3a2   : > { %v8068_v26 = vadd.f32 %v9287_v19, %v2907_v53  ;;  %3352 = vrot.lane.b32.xlu0 %v8065_v0, %s9227_s8  ;;  %v3247_v53 = vld [vmem:[#allocation7 + $0x88] sm:$0xff] }
 0x3a3   : > { %v2909_v44 = vpop.f32.mrf.mxu1  ;;  %5875 = vmatprep.mubr.msk.bf16.mxu0 %vm9288_vm10, %v5848_v15  ;;  %vm9292_vm10 = vcmp.lt.s32.totalorder %v6956_v13, 18 }
 0x3a4   : > { %3354 = vrot.lane.b32.xlu1 %v8068_v26, %s9227_s8  ;;  %3938 = vmatmul.mubr.bf16.vlgmr.msra.gmra.mxu0 %v5847_v14  ;;  %v3265_v44 = vld [vmem:[#allocation7 + $0x90] sm:$0xff]  ;;  %vm9293_vm13 = vmmov %vm9292_vm10 }
 0x3a5   : > { %v2910_v23 = vpop.f32.mrf.mxu1 }
 0x3a6   : > { %3371 = vrot.lane.b32.xlu0 %v8065_v0, %s9228_s10  ;;  %v3266_v23 = vld [vmem:[#allocation7 + $0x98] sm:$0xff] }
 0x3a8   : > { %3373 = vrot.lane.b32.xlu1 %v8068_v26, %s9228_s10 }
 0x3aa   : > { %3333 = vrot.lane.b32.xlu0 %v8065_v0, %s9229_s3 }
 0x3ac   : > { %3335 = vrot.lane.b32.xlu1 %v8068_v26, %s9229_s3 }
 0x3ae   : > { %3286 = vrot.lane.b32.xlu0 %v8065_v0, %s9215_s28 }
 0x3b0   : > { %3288 = vrot.lane.b32.xlu1 %v8068_v26, %s9215_s28 }
 0x3b2   : > { %3305 = vrot.lane.b32.xlu0 %v8065_v0, %s9216_s15 }
 0x3b4   : > { %3307 = vrot.lane.b32.xlu1 %v8068_v26, %s9216_s15 }
 0x3b6   : > { %3248 = vrot.lane.b32.xlu0 %v8065_v0, %s9217_s12 }
 0x3b8   : > { %3250 = vrot.lane.b32.xlu1 %v8068_v26, %s9217_s12 }
 0x3ba   : > { %3267 = vrot.lane.b32.xlu0 %v8065_v0, %s9218_s18 }
 0x3bc   : > { %3269 = vrot.lane.b32.xlu1 %v8068_v26, %s9218_s18 }
 0x3be   : > { %3210 = vrot.lane.b32.xlu0 %v8065_v0, %s9219_s11 }
 0x3c0   : > { %3212 = vrot.lane.b32.xlu1 %v8068_v26, %s9219_s11 }
 0x3c2   : > { %3229 = vrot.lane.b32.xlu0 %v8065_v0, %s9220_s2 }
 0x3c4   : > { %3231 = vrot.lane.b32.xlu1 %v8068_v26, %s9220_s2 }
 0x3c6   : > { %3172 = vrot.lane.b32.xlu0 %v8065_v0, %s9221_s4 }
 0x3c8   : > { %3174 = vrot.lane.b32.xlu1 %v8068_v26, %s9221_s4 }
 0x3ca   : > { %3191 = vrot.lane.b32.xlu0 %v8065_v0, %s9222_s5 }
 0x3cc   : > { %3193 = vrot.lane.b32.xlu1 %v8068_v26, %s9222_s5 }
 0x3ce   : > { %3134 = vrot.lane.b32.xlu0 %v8065_v0, %s9179_s0 }
 0x3d0   : > { %3136 = vrot.lane.b32.xlu1 %v8068_v26, %s9179_s0 }
 0x3d2   : > { %3153 = vrot.lane.b32.xlu0 %v8065_v0, %s9180_s25 }
 0x3d4   : > { %3155 = vrot.lane.b32.xlu1 %v8068_v26, %s9180_s25 }
 0x3d6   : > { %3096 = vrot.lane.b32.xlu0 %v8065_v0, %s9181_s26 }
 0x3d8   : > { %3098 = vrot.lane.b32.xlu1 %v8068_v26, %s9181_s26 }
 0x3da   : > { %3115 = vrot.lane.b32.xlu0 %v8065_v0, %s9182_s13 }
 0x3dc   : > { %3117 = vrot.lane.b32.xlu1 %v8068_v26, %s9182_s13 }
 0x3de   : > { %3542 = vrot.lane.b32.xlu0 %v8065_v0, %s9183_s30 }
 0x3e0   : > { %3544 = vrot.lane.b32.xlu1 %v8068_v26, %s9183_s30 }
 0x3e2   : > { %3504 = vrot.lane.b32.xlu0 %v8065_v0, %s9184_s29 }
 0x3e4   : > { %3506 = vrot.lane.b32.xlu1 %v8068_v26, %s9184_s29 }
 0x3e6   : > { %3523 = vrot.lane.b32.xlu0 %v8065_v0, %s9185_s27 }
 0x3e8   : > { %3525 = vrot.lane.b32.xlu1 %v8068_v26, %s9185_s27 }
 0x3ea   : > { %3466 = vrot.lane.b32.xlu0 %v8065_v0, %s9186_s23 }
 0x3ec   : > { %3468 = vrot.lane.b32.xlu1 %v8068_v26, %s9186_s23 }
 0x3ee   : > { %3485 = vrot.lane.b32.xlu0 %v8065_v0, %s9187_s22 }
 0x3f0   : > { %3487 = vrot.lane.b32.xlu1 %v8068_v26, %s9187_s22 }
 0x3f2   : > { %3428 = vrot.lane.b32.xlu0 %v8065_v0, %s9189_s17 }
 0x3f4   : > { %3430 = vrot.lane.b32.xlu1 %v8068_v26, %s9189_s17 }
 0x3f6   : > { %3447 = vrot.lane.b32.xlu0 %v8065_v0, %s9190_s16 }
 0x3f8   : > { %3449 = vrot.lane.b32.xlu1 %v8068_v26, %s9190_s16 }
 0x3fa   : > { %3390 = vrot.lane.b32.xlu0 %v8065_v0, %s9224_s6 }
 0x3fc   : > { %3392 = vrot.lane.b32.xlu1 %v8068_v26, %s9224_s6 }
 0x3fe   : > { %3409 = vrot.lane.b32.xlu0 %v8065_v0, %s9226_s19 }
 0x400   : > { %3411 = vrot.lane.b32.xlu1 %v8068_v26, %s9226_s19 }
 0x402   : > { %4210 = vrot.lane.b32.xlu0 %v8186_v45, %s9220_s2 }
 0x404   : > { %4212 = vrot.lane.b32.xlu1 %v8189_v2, %s9220_s2 }
 0x406   : > { %4174 = vrot.lane.b32.xlu0 %v8186_v45, %s9219_s11 }
 0x408   : > { %4176 = vrot.lane.b32.xlu1 %v8189_v2, %s9219_s11 }
 0x40a   : > { %4138 = vrot.lane.b32.xlu0 %v8186_v45, %s9222_s5 }
 0x40c   : > { %4140 = vrot.lane.b32.xlu1 %v8189_v2, %s9222_s5 }
 0x40e   : > { %4102 = vrot.lane.b32.xlu0 %v8186_v45, %s9221_s4 }
 0x410   : > { %4104 = vrot.lane.b32.xlu1 %v8189_v2, %s9221_s4 }
 0x412   : > { %4066 = vrot.lane.b32.xlu0 %v8186_v45, %s9180_s25 }
 0x414   : > { %v3353_v17 = vpop.permute.xlu0 %3352  ;;  %4068 = vrot.lane.b32.xlu1 %v8189_v2, %s9180_s25 }
 0x416   : > { %v3355_v3 = vpop.permute.xlu1 %3354  ;;  %4030 = vrot.lane.b32.xlu0 %v8186_v45, %s9179_s0 }
 0x417   : > { %v3356_v12 = vsel %vm798_vm2, %v3353_v17, %v3355_v3  ;;  %v3357_v5 = vsel %vm798_vm2, %v3355_v3, %v3353_v17 }
 0x418   : > { %v3372_v28 = vpop.permute.xlu0 %3371  ;;  %4032 = vrot.lane.b32.xlu1 %v8189_v2, %s9179_s0  ;;  %v3358_v43 = vmul.f32 %v3356_v12, %v3350_v20  ;;  %v3359_v49 = vmul.f32 %v3357_v5, %v3351_v41 }
 0x41a   : > { %v3374_v62 = vpop.permute.xlu1 %3373  ;;  %3994 = vrot.lane.b32.xlu0 %v8186_v45, %s9182_s13 }
 0x41b   : > { %v3375_v7 = vsel %vm819_vm1, %v3372_v28, %v3374_v62  ;;  %v3376_v31 = vsel %vm819_vm1, %v3374_v62, %v3372_v28  ;;  %v8275_v62 = vld [vmem:[#allocation7 + $0x68] sm:$0xff] }
 0x41c   : > { %v3377_v51 = vmul.f32 %v3375_v7, %v3369_v39  ;;  %v3378_v9 = vmul.f32 %v3376_v31, %v3370_v55  ;;  %v3334_v58 = vpop.permute.xlu0 %3333  ;;  %3996 = vrot.lane.b32.xlu1 %v8189_v2, %s9182_s13  ;;  %v8271_v39 = vld [vmem:[#allocation7 + $0x60] sm:$0xff] }
 0x41e   : > { %v6266_v4 = vpack.c.bf16 %v3377_v51, %v3358_v43  ;;  %v3336_v50 = vpop.permute.xlu1 %3335  ;;  %v6267_v29 = vpack.c.bf16 %v3378_v9, %v3359_v49  ;;  %4768 = vrot.lane.b32.xlu0 %v8186_v45, %s9185_s27  ;;  %v8281_v43 = vld [vmem:[#allocation7 + $0x70] sm:$0xff]  ;;  %v8283_v49 = vld [vmem:[#allocation7 + $0x78] sm:$0xff] }
 0x41f   : > { %v3337_v32 = vsel %vm777_vm3, %v3334_v58, %v3336_v50  ;;  %v3338_v1 = vsel %vm777_vm3, %v3336_v50, %v3334_v58 }
 0x420   : > { %v3339_v59 = vmul.f32 %v3337_v32, %v3331_v30  ;;  %v3340_v27 = vmul.f32 %v3338_v1, %v3332_v11  ;;  %3725 = vmatprep.subr.bf16.mxu1 %v6267_v29  ;;  %v3287_v42 = vpop.permute.xlu0 %3286  ;;  %4770 = vrot.lane.b32.xlu1 %v8189_v2, %s9185_s27 }
 0x421   : > { %3726 = vmatpush1.bf16.msra.mxu1 %v6266_v4 }
 0x422   : > { %v6264_v36 = vpack.c.bf16 %v3339_v59, %v8065_v0  ;;  %v3289_v10 = vpop.permute.xlu1 %3288  ;;  %v6265_v48 = vpack.c.bf16 %v3340_v27, %v8068_v26  ;;  %3958 = vrot.lane.b32.xlu0 %v8186_v45, %s9181_s26  ;;  %v8299_v27 = vld [vmem:[#allocation7 + $0x40] sm:$0xff] }
 0x423   : > { %v3290_v46 = vsel %vm726_vm4, %v3287_v42, %v3289_v10  ;;  %v3291_v8 = vsel %vm726_vm4, %v3289_v10, %v3287_v42 }
 0x424   : > { %3727 = vmatprep.subr.bf16.mxu1 %v6265_v48  ;;  %v3306_v34 = vpop.permute.xlu0 %3305  ;;  %3960 = vrot.lane.b32.xlu1 %v8189_v2, %s9181_s26  ;;  %v3292_v60 = vmul.f32 %v3291_v8, %v3284_v40  ;;  %v3293_v24 = vmul.f32 %v3290_v46, %v3285_v6  ;;  %v8309_v40 = vld [vmem:[#allocation7 + $0x50] sm:$0xff] }
 0x425   : > { %3728 = vmatpush1.bf16.msra.mxu1 %v6264_v36  ;;  %v8303_v36 = vld [vmem:[#allocation7 + $0x48] sm:$0xff] }
 0x426   : > { %v3308_v63 = vpop.permute.xlu1 %3307  ;;  %4732 = vrot.lane.b32.xlu0 %v8186_v45, %s9184_s29 }
 0x427   : > { %v3309_v25 = vsel %vm747_vm5, %v3306_v34, %v3308_v63  ;;  %v3310_v38 = vsel %vm747_vm5, %v3308_v63, %v3306_v34  ;;  %v8311_v34 = vld [vmem:[#allocation7 + $0x58] sm:$0xff] }
 0x428   : > { %v3311_v16 = vmul.f32 %v3310_v38, %v3303_v52  ;;  %v3312_v21 = vmul.f32 %v3309_v25, %v3304_v57  ;;  %v3249_v61 = vpop.permute.xlu0 %3248  ;;  %4734 = vrot.lane.b32.xlu1 %v8189_v2, %s9184_s29 }
 0x42a   : > { %v6262_v33 = vpack.c.bf16 %v3311_v16, %v3292_v60  ;;  %v3251_v22 = vpop.permute.xlu1 %3250  ;;  %v6263_v56 = vpack.c.bf16 %v3312_v21, %v3293_v24  ;;  %4480 = vrot.lane.b32.xlu0 %v8186_v45, %s9228_s10  ;;  %v8327_v21 = vld [vmem:[#allocation7 + $0x20] sm:$0xff] }
 0x42b   : > { %v3252_v19 = vsel %vm684_vm6, %v3249_v61, %v3251_v22  ;;  %v3253_v26 = vsel %vm684_vm6, %v3251_v22, %v3249_v61 }
 0x42c   : > { %3729 = vmatprep.subr.bf16.mxu1 %v6263_v56  ;;  %v3268_v0 = vpop.permute.xlu0 %3267  ;;  %4482 = vrot.lane.b32.xlu1 %v8189_v2, %s9228_s10  ;;  %v3254_v35 = vmul.f32 %v3253_v26, %v3246_v54  ;;  %v3255_v17 = vmul.f32 %v3252_v19, %v3247_v53  ;;  %v8337_v54 = vld [vmem:[#allocation7 + $0x30] sm:$0xff] }
 0x42d   : > { %3730 = vmatpush1.bf16.msra.mxu1 %v6262_v33  ;;  %v8331_v33 = vld [vmem:[#allocation7 + $0x28] sm:$0xff] }
 0x42e   : > { %v3270_v18 = vpop.permute.xlu1 %3269  ;;  %4696 = vrot.lane.b32.xlu0 %v8186_v45, %s9187_s22 }
 0x42f   : > { %v3271_v15 = vsel %vm705_vm7, %v3268_v0, %v3270_v18  ;;  %v3272_v14 = vsel %vm705_vm7, %v3270_v18, %v3268_v0  ;;  %v8339_v0 = vld [vmem:[#allocation7 + $0x38] sm:$0xff] }
 0x430   : > { %v3273_v3 = vmul.f32 %v3272_v14, %v3265_v44  ;;  %v3274_v20 = vmul.f32 %v3271_v15, %v3266_v23  ;;  %v3211_v28 = vpop.permute.xlu0 %3210  ;;  %4698 = vrot.lane.b32.xlu1 %v8189_v2, %s9187_s22 }
 0x432   : > { %v6260_v41 = vpack.c.bf16 %v3273_v3, %v3254_v35  ;;  %v3213_v12 = vpop.permute.xlu1 %3212  ;;  %v6261_v5 = vpack.c.bf16 %v3274_v20, %v3255_v17  ;;  %4444 = vrot.lane.b32.xlu0 %v8186_v45, %s9227_s8  ;;  %v8355_v20 = vld [vmem:[#allocation7] sm:$0xff] }
 0x433   : > { %v3214_v7 = vsel %vm9136_vm8, %v3211_v28, %v3213_v12  ;;  %v3215_v31 = vsel %vm9136_vm8, %v3213_v12, %v3211_v28 }
 0x434   : > { %3731 = vmatprep.subr.bf16.mxu1 %v6261_v5  ;;  %v3230_v55 = vpop.permute.xlu0 %3229  ;;  %4446 = vrot.lane.b32.xlu1 %v8189_v2, %s9227_s8  ;;  %v3216_v30 = vmul.f32 %v3215_v31, %v8271_v39  ;;  %v3217_v11 = vmul.f32 %v3214_v7, %v8275_v62  ;;  %v8367_v7 = vld [vmem:[#allocation7 + $0x18] sm:$0xff] }
 0x435   : > { %3732 = vmatpush1.bf16.msra.mxu1 %v6260_v41  ;;  %v8359_v41 = vld [vmem:[#allocation7 + $0x8] sm:$0xff] }
 0x436   : > { %v3232_v51 = vpop.permute.xlu1 %3231  ;;  %4660 = vrot.lane.b32.xlu0 %v8186_v45, %s9186_s23 }
 0x437   : > { %v3233_v9 = vsel %vm663_vm9, %v3230_v55, %v3232_v51  ;;  %v3234_v58 = vsel %vm663_vm9, %v3232_v51, %v3230_v55  ;;  %v8365_v55 = vld [vmem:[#allocation7 + $0x10] sm:$0xff] }
 0x438   : > { %v3235_v4 = vmul.f32 %v3234_v58, %v8281_v43  ;;  %v3236_v50 = vmul.f32 %v3233_v9, %v8283_v49  ;;  %v3173_v29 = vpop.permute.xlu0 %3172  ;;  %4662 = vrot.lane.b32.xlu1 %v8189_v2, %s9186_s23 }
 0x43a   : > { %v6258_v32 = vpack.c.bf16 %v3235_v4, %v3216_v30  ;;  %v3175_v1 = vpop.permute.xlu1 %3174  ;;  %v6259_v59 = vpack.c.bf16 %v3236_v50, %v3217_v11  ;;  %4408 = vrot.lane.b32.xlu0 %v8186_v45, %s9229_s3 }
 0x43b   : > { %v3176_v10 = vsel %vm9290_vm11, %v3173_v29, %v3175_v1  ;;  %v3177_v48 = vsel %vm9291_vm12, %v3175_v1, %v3173_v29  ;;  %vm9294_vm11 = vcmp.lt.s32.totalorder %v6956_v13, 32  ;;  %v3540_v29 = vld [vmem:[#allocation7 + $0x180] sm:$0xff] }
 0x43c   : > { %3733 = vmatprep.subr.bf16.mxu1 %v6259_v59  ;;  %v3192_v42 = vpop.permute.xlu0 %3191  ;;  %4410 = vrot.lane.b32.xlu1 %v8189_v2, %s9229_s3  ;;  %v3178_v52 = vmul.f32 %v3177_v48, %v8299_v27  ;;  %v3179_v57 = vmul.f32 %v3176_v10, %v8303_v36  ;;  %vm9295_vm12 = vmmov %vm9294_vm11 }
 0x43d   : > { %3734 = vmatpush1.bf16.msra.mxu1 %v6258_v32  ;;  %v3541_v32 = vld [vmem:[#allocation7 + $0x188] sm:$0xff] }
 0x43e   : > { %v3194_v6 = vpop.permute.xlu1 %3193  ;;  %4624 = vrot.lane.b32.xlu0 %v8186_v45, %s9190_s16 }
 0x43f   : > { %v3195_v46 = vsel %vm9292_vm10, %v3192_v42, %v3194_v6  ;;  %v3196_v8 = vsel %vm9293_vm13, %v3194_v6, %v3192_v42  ;;  %vm9296_vm10 = vcmp.lt.s32.totalorder %v6956_v13, 31 }
 0x440   : > { %v3197_v63 = vmul.f32 %v3196_v8, %v8309_v40  ;;  %v3198_v25 = vmul.f32 %v3195_v46, %v8311_v34  ;;  %v3135_v38 = vpop.permute.xlu0 %3134  ;;  %4626 = vrot.lane.b32.xlu1 %v8189_v2, %s9190_s16  ;;  %vm9297_vm13 = vmmov %vm9296_vm10 }
 0x442   : > { %v6256_v60 = vpack.c.bf16 %v3197_v63, %v3178_v52  ;;  %v3137_v24 = vpop.permute.xlu1 %3136  ;;  %v6257_v16 = vpack.c.bf16 %v3198_v25, %v3179_v57  ;;  %4588 = vrot.lane.b32.xlu0 %v8186_v45, %s9189_s17  ;;  %v8391_v63 = vld [vmem:[#allocation7 + $0x160] sm:$0xff] }
 0x443   : > { %v3138_v22 = vsel %vm9294_vm11, %v3135_v38, %v3137_v24  ;;  %v3139_v56 = vsel %vm9295_vm12, %v3137_v24, %v3135_v38  ;;  %vm9298_vm11 = vcmp.lt.s32.totalorder %v6956_v13, 34  ;;  %v8397_v24 = vld [vmem:[#allocation7 + $0x168] sm:$0xff] }
 0x444   : > { %3735 = vmatprep.subr.bf16.mxu1 %v6257_v16  ;;  %v3154_v61 = vpop.permute.xlu0 %3153  ;;  %4590 = vrot.lane.b32.xlu1 %v8189_v2, %s9189_s17  ;;  %v3140_v44 = vmul.f32 %v3139_v56, %v8327_v21  ;;  %v3141_v23 = vmul.f32 %v3138_v22, %v8331_v33  ;;  %vm9299_vm12 = vmmov %vm9298_vm11  ;;  %v8403_v22 = vld [vmem:[#allocation7 + $0x170] sm:$0xff]  ;;  %v8405_v56 = vld [vmem:[#allocation7 + $0x178] sm:$0xff] }
 0x445   : > { %3736 = vmatpush1.bf16.msra.mxu1 %v6256_v60 }
 0x446   : > { %v3156_v53 = vpop.permute.xlu1 %3155  ;;  %4354 = vrot.lane.b32.xlu0 %v8186_v45, %s9216_s15 }
 0x447   : > { %v3157_v19 = vsel %vm9296_vm10, %v3154_v61, %v3156_v53  ;;  %v3158_v26 = vsel %vm9297_vm13, %v3156_v53, %v3154_v61  ;;  %vm9300_vm10 = vcmp.lt.s32.totalorder %v6956_v13, 33 }
 0x448   : > { %v3159_v18 = vmul.f32 %v3158_v26, %v8337_v54  ;;  %v3160_v15 = vmul.f32 %v3157_v19, %v8339_v0  ;;  %v3097_v14 = vpop.permute.xlu0 %3096  ;;  %4356 = vrot.lane.b32.xlu1 %v8189_v2, %s9216_s15  ;;  %vm9301_vm13 = vmmov %vm9300_vm10 }
 0x44a   : > { %v6254_v35 = vpack.c.bf16 %v3159_v18, %v3140_v44  ;;  %v3099_v17 = vpop.permute.xlu1 %3098  ;;  %v6255_v3 = vpack.c.bf16 %v3160_v15, %v3141_v23  ;;  %4552 = vrot.lane.b32.xlu0 %v8186_v45, %s9226_s19 }
 0x44b   : > { %v3100_v12 = vsel %vm9298_vm11, %v3097_v14, %v3099_v17  ;;  %v3101_v5 = vsel %vm9299_vm12, %v3099_v17, %v3097_v14  ;;  %vm9302_vm11 = vcmp.lt.s32.totalorder %v6956_v13, 94 }
 0x44c   : > { %3737 = vmatprep.subr.bf16.mxu1 %v6255_v3  ;;  %v3116_v28 = vpop.permute.xlu0 %3115  ;;  %4554 = vrot.lane.b32.xlu1 %v8189_v2, %s9226_s19  ;;  %v3102_v58 = vmul.f32 %v3101_v5, %v8355_v20  ;;  %v3103_v30 = vmul.f32 %v3100_v12, %v8359_v41  ;;  %vm9303_vm12 = vmmov %vm9302_vm11  ;;  %v8425_v5 = vld [vmem:[#allocation7 + $0x148] sm:$0xff] }
 0x44d   : > { %3738 = vmatpush1.bf16.msra.mxu1 %v6254_v35  ;;  %9308 = vst [vmem:[#allocation19_spill] sm:$0xff] %v8425_v5 }
 0x44e   : > { %v3118_v31 = vpop.permute.xlu1 %3117  ;;  %4318 = vrot.lane.b32.xlu0 %v8186_v45, %s9215_s28 }
 0x44f   : > { %v3119_v51 = vsel %vm9300_vm10, %v3116_v28, %v3118_v31  ;;  %v3120_v9 = vsel %vm9301_vm13, %v3118_v31, %v3116_v28  ;;  %vm9304_vm10 = vcmp.lt.s32.totalorder %v6956_v13, 96  ;;  %v8421_v28 = vld [vmem:[#allocation7 + $0x140] sm:$0xff] }
 0x450   : > { %v3121_v11 = vmul.f32 %v3120_v9, %v8365_v55  ;;  %v3122_v4 = vmul.f32 %v3119_v51, %v8367_v7  ;;  %v3543_v50 = vpop.permute.xlu0 %3542  ;;  %4320 = vrot.lane.b32.xlu1 %v8189_v2, %s9215_s28  ;;  %vm9305_vm13 = vmmov %vm9304_vm10  ;;  %v8431_v9 = vld [vmem:[#allocation7 + $0x150] sm:$0xff] }
 0x452   : > { %v6252_v1 = vpack.c.bf16 %v3121_v11, %v3102_v58  ;;  %v3545_v59 = vpop.permute.xlu1 %3544  ;;  %v6253_v42 = vpack.c.bf16 %v3122_v4, %v3103_v30  ;;  %4516 = vrot.lane.b32.xlu0 %v8186_v45, %s9224_s6  ;;  %v8433_v58 = vld [vmem:[#allocation7 + $0x158] sm:$0xff] }
 0x453   : > { %v3546_v10 = vsel %vm9302_vm11, %v3543_v50, %v3545_v59  ;;  %v3547_v48 = vsel %vm9303_vm12, %v3545_v59, %v3543_v50  ;;  %vm9306_vm11 = vcmp.lt.s32.totalorder %v6956_v13, 95 }
 0x454   : > { %v3548_v6 = vmul.f32 %v3546_v10, %v3540_v29  ;;  %v3549_v46 = vmul.f32 %v3547_v48, %v3541_v32  ;;  %3739 = vmatprep.subr.bf16.mxu1 %v6253_v42  ;;  %v3505_v8 = vpop.permute.xlu0 %3504  ;;  %4518 = vrot.lane.b32.xlu1 %v8189_v2, %s9224_s6  ;;  %vm9307_vm12 = vmmov %vm9306_vm11  ;;  %v8443_v10 = vld [vmem:[#allocation7 + $0x120] sm:$0xff] }
 0x455   : > { %3740 = vmatpush1.bf16.msra.mxu1 %v6252_v1  ;;  %9313 = vst [vmem:[#allocation20_spill] sm:$0xff] %v8443_v10 }
 0x456   : > { %v3507_v52 = vpop.permute.xlu1 %3506  ;;  %v6129_v57 = vpack.c.bf16 %v3549_v46, %v3548_v6  ;;  %4282 = vrot.lane.b32.xlu0 %v8186_v45, %s9218_s18  ;;  %v8445_v6 = vld [vmem:[#allocation7 + $0x128] sm:$0xff] }
 0x457   : > { %v3508_v16 = vsel %vm9304_vm10, %v3505_v8, %v3507_v52  ;;  %v3509_v61 = vsel %vm9305_vm13, %v3507_v52, %v3505_v8  ;;  %vm9309_vm10 = vcmp.lt.s32.totalorder %v6956_v13, 98  ;;  %9314 = vst [vmem:[#allocation21_spill] sm:$0xff] %v8445_v6  ;;  %v8451_v52 = vld [vmem:[#allocation7 + $0x130] sm:$0xff] }
 0x458   : > { %v3524_v25 = vpop.permute.xlu0 %3523  ;;  %v5845_v38 = vcombine.high %v6129_v57, %v7201_v37  ;;  %v5844_v60 = vcombine.low %v6129_v57, %v7201_v37  ;;  %4284 = vrot.lane.b32.xlu1 %v8189_v2, %s9218_s18  ;;  %v3510_v44 = vmul.f32 %v3508_v16, %v8391_v63  ;;  %v3511_v23 = vmul.f32 %v3509_v61, %v8397_v24  ;;  %vm9310_vm13 = vmmov %vm9309_vm10  ;;  %v8453_v57 = vld [vmem:[#allocation7 + $0x138] sm:$0xff] }
 0x459   : > { %9317 = vst [vmem:[#allocation22_spill] sm:$0xff] %v8451_v52  ;;  %9318 = vst [vmem:[#allocation23_spill] sm:$0xff] %v8453_v57 }
 0x45a   : > { %v3526_v53 = vpop.permute.xlu1 %3525  ;;  %3747 = vmatprep.subr.bf16.mxu1 %v5845_v38  ;;  %4246 = vrot.lane.b32.xlu0 %v8186_v45, %s9217_s12 }
 0x45b   : > { %v3527_v19 = vsel %vm9306_vm11, %v3524_v25, %v3526_v53  ;;  %v3528_v26 = vsel %vm9307_vm12, %v3526_v53, %v3524_v25  ;;  %3748 = vmatpush2.bf16.msra.mxu1 %v5844_v60  ;;  %vm9311_vm11 = vcmp.lt.s32.totalorder %v6956_v13, 97 }
 0x45c   : > { %v3529_v18 = vmul.f32 %v3527_v19, %v8403_v22  ;;  %v3530_v15 = vmul.f32 %v3528_v26, %v8405_v56  ;;  %v3467_v14 = vpop.permute.xlu0 %3466  ;;  %4248 = vrot.lane.b32.xlu1 %v8189_v2, %s9217_s12  ;;  %vm9312_vm12 = vmmov %vm9311_vm11 }
 0x45e   : > { %v6274_v35 = vpack.c.bf16 %v3529_v18, %v3510_v44  ;;  %v3469_v17 = vpop.permute.xlu1 %3468  ;;  %v6275_v3 = vpack.c.bf16 %v3530_v15, %v3511_v23  ;;  %4804 = vrot.lane.b32.xlu0 %v8186_v45, %s9183_s30  ;;  %v8463_v15 = vld [vmem:[#allocation7 + $0x100] sm:$0xff] }
 0x45f   : > { %v3470_v31 = vsel %vm9309_vm10, %v3467_v14, %v3469_v17  ;;  %v3471_v51 = vsel %vm9310_vm13, %v3469_v17, %v3467_v14  ;;  %vm9315_vm10 = vcmp.lt.s32.totalorder %v6956_v13, 111  ;;  %9319 = vst [vmem:[#allocation24_spill] sm:$0xff] %v8463_v15  ;;  %v8465_v14 = vld [vmem:[#allocation7 + $0x108] sm:$0xff] }
 0x460   : > { %3749 = vmatprep.subr.bf16.mxu1 %v6275_v3  ;;  %v3486_v12 = vpop.permute.xlu0 %3485  ;;  %4806 = vrot.lane.b32.xlu1 %v8189_v2, %s9183_s30  ;;  %v3472_v11 = vmul.f32 %v3470_v31, %v8421_v28  ;;  %v3473_v4 = vmul.f32 %v3471_v51, %v8425_v5  ;;  %vm9316_vm13 = vmmov %vm9315_vm10  ;;  %9320 = vst [vmem:[#allocation25_spill] sm:$0xff] %v8465_v14  ;;  %v8471_v3 = vld [vmem:[#allocation7 + $0x110] sm:$0xff] }
 0x461   : > { %3750 = vmatpush2.bf16.msra.mxu1 %v6274_v35  ;;  %9321 = vst [vmem:[#allocation26_spill] sm:$0xff] %v8471_v3 }
 0x462   : > { %v3488_v45 = vpop.permute.xlu1 %3487 }
 0x463   : > { %v3489_v30 = vsel %vm9311_vm11, %v3486_v12, %v3488_v45  ;;  %v3490_v2 = vsel %vm9312_vm12, %v3488_v45, %v3486_v12  ;;  %v8473_v12 = vld [vmem:[#allocation7 + $0x118] sm:$0xff]  ;;  %vm9323_vm11 = vcmp.lt.s32.totalorder %v6956_v13, 18 }
 0x464   : > { %v3491_v50 = vmul.f32 %v3489_v30, %v8431_v9  ;;  %v3492_v29 = vmul.f32 %v3490_v2, %v8433_v58  ;;  %v3429_v32 = vpop.permute.xlu0 %3428  ;;  %9322 = vst [vmem:[#allocation27_spill] sm:$0xff] %v8473_v12  ;;  %vm9324_vm12 = vmmov %vm9323_vm11 }
 0x466   : > { %v6272_v1 = vpack.c.bf16 %v3491_v50, %v3472_v11  ;;  %v3431_v59 = vpop.permute.xlu1 %3430  ;;  %v6273_v42 = vpack.c.bf16 %v3492_v29, %v3473_v4 }
 0x467   : > { %v3432_v46 = vsel %vm9315_vm10, %v3429_v32, %v3431_v59  ;;  %v3433_v8 = vsel %vm9316_vm13, %v3431_v59, %v3429_v32  ;;  %v8485_v59 = vpop.f32.mrf.mxu0  ;;  %vm9325_vm10 = vcmp.lt.s32.totalorder %v6956_v13, 30 }
 0x468   : > { %3751 = vmatprep.subr.bf16.mxu1 %v6273_v42  ;;  %v3448_v48 = vpop.permute.xlu0 %3447  ;;  %v3434_v16 = vmul.f32 %v3432_v46, %v8443_v10  ;;  %v3435_v61 = vmul.f32 %v3433_v8, %v8445_v6  ;;  %vm9326_vm13 = vmmov %vm9325_vm10 }
 0x469   : > { %3752 = vmatpush2.bf16.msra.mxu1 %v6272_v1  ;;  %v5818_v1 = vcombine.low %v8159_v47, %v8159_v47  ;;  %v8487_v42 = vpop.f32.mrf.mxu0 }
 0x46a   : > { %v3450_v25 = vpop.permute.xlu1 %3449 }
 0x46b   : > { %v3451_v38 = vsel %vm903_vm15, %v3448_v48, %v3450_v25  ;;  %v3452_v60 = vsel %vm903_vm15, %v3450_v25, %v3448_v48  ;;  %v3943_v48 = vpop.f32.mrf.mxu0 }
 0x46c   : > { %v3453_v53 = vmul.f32 %v3451_v38, %v8451_v52  ;;  %v3454_v19 = vmul.f32 %v3452_v60, %v8453_v57  ;;  %v3391_v26 = vpop.permute.xlu0 %3390 }
 0x46d   : > { %v3944_v46 = vpop.f32.mrf.mxu0 }
 0x46e   : > { %v6270_v44 = vpack.c.bf16 %v3453_v53, %v3434_v16  ;;  %v3393_v23 = vpop.permute.xlu1 %3392  ;;  %v6271_v18 = vpack.c.bf16 %v3454_v19, %v3435_v61 }
 0x46f   : > { %v3394_v35 = vsel %vm840_vm0, %v3391_v26, %v3393_v23  ;;  %v3395_v17 = vsel %vm840_vm0, %v3393_v23, %v3391_v26 }
 0x470   : > { %3753 = vmatprep.subr.bf16.mxu1 %v6271_v18  ;;  %v3410_v31 = vpop.permute.xlu0 %3409  ;;  %v3396_v2 = vmul.f32 %v3394_v35, %v8463_v15  ;;  %v3397_v11 = vmul.f32 %v3395_v17, %v8465_v14 }
 0x471   : > { %3754 = vmatpush2.bf16.msra.mxu1 %v6270_v44 }
 0x472   : > { %v3412_v51 = vpop.permute.xlu1 %3411 }
 0x473   : > { %v3413_v45 = vsel %vm861_vm14, %v3410_v31, %v3412_v51  ;;  %v3414_v30 = vsel %vm861_vm14, %v3412_v51, %v3410_v31 }
 0x474   : > { %v3415_v4 = vmul.f32 %v3413_v45, %v8471_v3  ;;  %v3416_v50 = vmul.f32 %v3414_v30, %v8473_v12  ;;  %v4211_v8 = vpop.permute.xlu0 %4210 }
 0x476   : > { %v6268_v29 = vpack.c.bf16 %v3415_v4, %v3396_v2  ;;  %v6269_v32 = vpack.c.bf16 %v3416_v50, %v3397_v11  ;;  %v4213_v25 = vpop.permute.xlu1 %4212 }
 0x477   : > { %v8491_v38 = vsel %vm663_vm9, %v4211_v8, %v4213_v25  ;;  %v8495_v60 = vsel %vm663_vm9, %v4213_v25, %v4211_v8 }
 0x478   : > { %3755 = vmatprep.subr.bf16.mxu1 %v6269_v32  ;;  %v4175_v16 = vpop.permute.xlu0 %4174 }
 0x479   : > { %3756 = vmatpush2.bf16.msra.mxu1 %v6268_v29 }
 0x47a   : > { %v4177_v47 = vpop.permute.xlu1 %4176 }
 0x47b   : > { %v8499_v61 = vsel %vm9136_vm8, %v4175_v16, %v4177_v47  ;;  %v8503_v53 = vsel %vm9136_vm8, %v4177_v47, %v4175_v16  ;;  %vm9327_vm8 = vcmp.lt.s32.totalorder %v6956_v13, 31 }
 0x47c   : > { %3758 = vmatmul.mubr.bf16.vlgmr.msra.gmra.mxu1 %v5818_v1  ;;  %v4139_v19 = vpop.permute.xlu0 %4138 }
 0x47e   : > { %v4141_v26 = vpop.permute.xlu1 %4140 }
 0x47f   : > { %v8507_v44 = vsel %vm9323_vm11, %v4139_v19, %v4141_v26  ;;  %v8511_v23 = vsel %vm9324_vm12, %v4141_v26, %v4139_v19  ;;  %vm9328_vm11 = vmmov %vm9327_vm8  ;;  %vm9329_vm12 = vcmp.lt.s32.totalorder %v6956_v13, 32 }
 0x480   : > { %v4103_v18 = vpop.permute.xlu0 %4102 }
 0x482   : > { %v4105_v35 = vpop.permute.xlu1 %4104 }
 0x483   : > { %v8515_v17 = vsel %vm9325_vm10, %v4103_v18, %v4105_v35  ;;  %v8519_v31 = vsel %vm9326_vm13, %v4105_v35, %v4103_v18  ;;  %vm9330_vm10 = vmmov %vm9329_vm12  ;;  %vm9331_vm13 = vcmp.lt.s32.totalorder %v6956_v13, 33 }
 0x484   : > { %v4067_v51 = vpop.permute.xlu0 %4066 }
 0x486   : > { %v4069_v45 = vpop.permute.xlu1 %4068 }
 0x487   : > { %v8523_v30 = vsel %vm9327_vm8, %v4067_v51, %v4069_v45  ;;  %v8527_v2 = vsel %vm9328_vm11, %v4069_v45, %v4067_v51  ;;  %vm9332_vm8 = vmmov %vm9331_vm13  ;;  %vm9333_vm11 = vcmp.lt.s32.totalorder %v6956_v13, 95 }
 0x488   : > { %v4031_v11 = vpop.permute.xlu0 %4030 }
 0x48a   : > { %v4033_v4 = vpop.permute.xlu1 %4032 }
 0x48b   : > { %v8531_v50 = vsel %vm9329_vm12, %v4031_v11, %v4033_v4  ;;  %v8535_v29 = vsel %vm9330_vm10, %v4033_v4, %v4031_v11  ;;  %vm9334_vm12 = vmmov %vm9333_vm11  ;;  %vm9335_vm10 = vcmp.lt.s32.totalorder %v6956_v13, 34 }
 0x48c   : > { %v3995_v32 = vpop.permute.xlu0 %3994 }
 0x48e   : > { %v3997_v1 = vpop.permute.xlu1 %3996 }
 0x48f   : > { %v8539_v48 = vsel %vm9331_vm13, %v3995_v32, %v3997_v1  ;;  %v8543_v46 = vsel %vm9332_vm8, %v3997_v1, %v3995_v32  ;;  %vm9336_vm13 = vmmov %vm9335_vm10  ;;  %vm9337_vm8 = vcmp.lt.s32.totalorder %v6956_v13, 96 }
 0x490   : > { %v4769_v8 = vpop.permute.xlu0 %4768 }
 0x492   : > { %v4771_v25 = vpop.permute.xlu1 %4770 }
 0x493   : > { %v8547_v16 = vsel %vm9333_vm11, %v4769_v8, %v4771_v25  ;;  %v8551_v47 = vsel %vm9334_vm12, %v4771_v25, %v4769_v8  ;;  %vm9338_vm11 = vmmov %vm9337_vm8  ;;  %vm9339_vm12 = vcmp.lt.s32.totalorder %v6956_v13, 97 }
 0x494   : > { %v3959_v19 = vpop.permute.xlu0 %3958 }
 0x496   : > { %v3961_v26 = vpop.permute.xlu1 %3960 }
 0x497   : > { %v8555_v18 = vsel %vm9335_vm10, %v3959_v19, %v3961_v26  ;;  %v8559_v35 = vsel %vm9336_vm13, %v3961_v26, %v3959_v19  ;;  %vm9340_vm10 = vmmov %vm9339_vm12  ;;  %vm9341_vm13 = vcmp.lt.s32.totalorder %v6956_v13, 98 }
 0x498   : > { %v4733_v51 = vpop.permute.xlu0 %4732 }
 0x49a   : > { %v4735_v45 = vpop.permute.xlu1 %4734 }
 0x49b   : > { %v8563_v11 = vsel %vm9337_vm8, %v4733_v51, %v4735_v45  ;;  %v8567_v4 = vsel %vm9338_vm11, %v4735_v45, %v4733_v51  ;;  %vm9342_vm8 = vmmov %vm9341_vm13  ;;  %vm9348_vm11 = vcmp.lt.s32.totalorder %v6956_v13, 111 }
 0x49c   : > { %v4481_v32 = vpop.permute.xlu0 %4480 }
 0x49e   : > { %v4483_v1 = vpop.permute.xlu1 %4482 }
 0x49f   : > { %v8571_v8 = vsel %vm819_vm1, %v4481_v32, %v4483_v1  ;;  %v8575_v25 = vsel %vm819_vm1, %v4483_v1, %v4481_v32 }
 0x4a0   : > { %v4697_v19 = vpop.permute.xlu0 %4696 }
 0x4a2   : > { %v4699_v26 = vpop.permute.xlu1 %4698 }
 0x4a3   : > { %v8579_v37 = vsel %vm9339_vm12, %v4697_v19, %v4699_v26  ;;  %v8583_v51 = vsel %vm9340_vm10, %v4699_v26, %v4697_v19  ;;  %vm9350_vm12 = vmmov %vm9348_vm11  ;;  %vm5183_vm10 = vcmask 195584  }
 0x4a4   : > { %v4445_v45 = vpop.permute.xlu0 %4444 }
 0x4a6   : > { %v4447_v14 = vpop.permute.xlu1 %4446 }
 0x4a7   : > { %v8587_v15 = vsel %vm798_vm2, %v4445_v45, %v4447_v14  ;;  %v8591_v32 = vsel %vm798_vm2, %v4447_v14, %v4445_v45 }
 0x4a8   : > { %v4661_v1 = vpop.permute.xlu0 %4660 }
 0x4aa   : > { %v4663_v12 = vpop.permute.xlu1 %4662 }
 0x4ab   : > { %v8595_v3 = vsel %vm9341_vm13, %v4661_v1, %v4663_v12  ;;  %v8599_v19 = vsel %vm9342_vm8, %v4663_v12, %v4661_v1  ;;  %vm9368_vm13 = vcmp.lt.s32.totalorder %v6956_v13, 17 }
 0x4ac   : > { %9343 = vst [vmem:[#allocation28_spill] sm:$0xff] %v8599_v19  ;;  %v4409_v26 = vpop.permute.xlu0 %4408  ;;  %vm9369_vm8 = vmmov %vm9368_vm13 }
 0x4ae   : > { %v4411_v6 = vpop.permute.xlu1 %4410 }
 0x4af   : > { %v8603_v10 = vsel %vm777_vm3, %v4409_v26, %v4411_v6  ;;  %v8607_v14 = vsel %vm777_vm3, %v4411_v6, %v4409_v26 }
 0x4b0   : > { %9344 = vst [vmem:[#allocation29_spill] sm:$0xff] %v8603_v10  ;;  %9345 = vst [vmem:[#allocation30_spill] sm:$0xff] %v8607_v14  ;;  %v4625_v45 = vpop.permute.xlu0 %4624 }
 0x4b2   : > { %v4627_v57 = vpop.permute.xlu1 %4626 }
 0x4b3   : > { %v8611_v52 = vsel %vm903_vm15, %v4625_v45, %v4627_v57  ;;  %v8615_v12 = vsel %vm903_vm15, %v4627_v57, %v4625_v45 }
 0x4b4   : > { %9346 = vst [vmem:[#allocation31_spill] sm:$0xff] %v8611_v52  ;;  %9347 = vst [vmem:[#allocation32_spill] sm:$0xff] %v8615_v12  ;;  %v4589_v1 = vpop.permute.xlu0 %4588 }
 0x4b6   : > { %v4591_v19 = vpop.permute.xlu1 %4590 }
 0x4b7   : > { %v8619_v5 = vsel %vm9348_vm11, %v4589_v1, %v4591_v19  ;;  %v8623_v6 = vsel %vm9350_vm12, %v4591_v19, %v4589_v1  ;;  %vm9372_vm12 = vcmp.lt.s32.totalorder %v6956_v13, 30 }
 0x4b8   : > { %9349 = vst [vmem:[#allocation33_spill] sm:$0xff] %v8619_v5  ;;  %9351 = vst [vmem:[#allocation34_spill] sm:$0xff] %v8623_v6  ;;  %v4355_v26 = vpop.permute.xlu0 %4354 }
 0x4ba   : > { %v4357_v14 = vpop.permute.xlu1 %4356 }
 0x4bb   : > { %v8627_v10 = vsel %vm747_vm5, %v4355_v26, %v4357_v14  ;;  %v8631_v57 = vsel %vm747_vm5, %v4357_v14, %v4355_v26 }
 0x4bc   : > { %9352 = vst [vmem:[#allocation35_spill] sm:$0xff] %v8627_v10  ;;  %9353 = vst [vmem:[#allocation36_spill] sm:$0xff] %v8631_v57  ;;  %v4553_v45 = vpop.permute.xlu0 %4552 }
 0x4be   : > { %v4555_v12 = vpop.permute.xlu1 %4554 }
 0x4bf   : > { %v8635_v52 = vsel %vm861_vm14, %v4553_v45, %v4555_v12  ;;  %v8639_v19 = vsel %vm861_vm14, %v4555_v12, %v4553_v45 }
 0x4c0   : > { %9354 = vst [vmem:[#allocation37_spill] sm:$0xff] %v8635_v52  ;;  %9355 = vst [vmem:[#allocation38_spill] sm:$0xff] %v8639_v19  ;;  %v4319_v1 = vpop.permute.xlu0 %4318 }
 0x4c2   : > { %v4321_v6 = vpop.permute.xlu1 %4320 }
 0x4c3   : > { %v8643_v5 = vsel %vm726_vm4, %v4319_v1, %v4321_v6  ;;  %v8647_v14 = vsel %vm726_vm4, %v4321_v6, %v4319_v1 }
 0x4c4   : > { %9356 = vst [vmem:[#allocation39_spill] sm:$0xff] %v8643_v5  ;;  %9357 = vst [vmem:[#allocation40_spill] sm:$0xff] %v8647_v14  ;;  %v4517_v26 = vpop.permute.xlu0 %4516 }
 0x4c6   : > { %v4519_v10 = vpop.permute.xlu1 %4518 }
 0x4c7   : > { %v8651_v57 = vsel %vm840_vm0, %v4517_v26, %v4519_v10  ;;  %v8655_v12 = vsel %vm840_vm0, %v4519_v10, %v4517_v26 }
 0x4c8   : > { %9358 = vst [vmem:[#allocation41_spill] sm:$0xff] %v8651_v57  ;;  %9359 = vst [vmem:[#allocation42_spill] sm:$0xff] %v8655_v12  ;;  %v4283_v45 = vpop.permute.xlu0 %4282 }
 0x4ca   : > { %v4285_v19 = vpop.permute.xlu1 %4284 }
 0x4cb   : > { %v8659_v52 = vsel %vm705_vm7, %v4283_v45, %v4285_v19  ;;  %v8663_v6 = vsel %vm705_vm7, %v4285_v19, %v4283_v45 }
 0x4cc   : > { %9360 = vst [vmem:[#allocation43_spill] sm:$0xff] %v8659_v52  ;;  %9361 = vst [vmem:[#allocation44_spill] sm:$0xff] %v8663_v6  ;;  %v4247_v1 = vpop.permute.xlu0 %4246 }
 0x4ce   : > { %v4249_v5 = vpop.permute.xlu1 %4248 }
 0x4cf   : > { %v8667_v14 = vsel %vm684_vm6, %v4247_v1, %v4249_v5  ;;  %v8671_v10 = vsel %vm684_vm6, %v4249_v5, %v4247_v1  ;;  %v6450_v5 = vld [vmem:[%s9060_s7 + $0x4] ss:$16 sps:$4 sm:$0xff]  }
 0x4d0   : > { %9362 = vst [vmem:[#allocation45_spill] sm:$0xff] %v8667_v14  ;;  %9363 = vst [vmem:[#allocation46_spill] sm:$0xff] %v8671_v10  ;;  %5229 = vmatprep.mubr.bf16.mxu1 %v6450_v5  ;;  %v4216_v5 = vmul.f32 %v8495_v60, %v8281_v43  ;;  %v4180_v60 = vmul.f32 %v8503_v53, %v8271_v39  ;;  %v4144_v53 = vmul.f32 %v8511_v23, %v8309_v40 }
 0x4d1   : > { %v4108_v23 = vmul.f32 %v8519_v31, %v8299_v27  ;;  %v4072_v31 = vmul.f32 %v8527_v2, %v8337_v54  ;;  %v4036_v2 = vmul.f32 %v8535_v29, %v8327_v21  ;;  %v4000_v29 = vmul.f32 %v8543_v46, %v8365_v55 }
 0x4d2   : > { %v4774_v46 = vmul.f32 %v8547_v16, %v8403_v22  ;;  %v3964_v16 = vmul.f32 %v8559_v35, %v8355_v20  ;;  %v4738_v35 = vmul.f32 %v8563_v11, %v8391_v63  ;;  %v6492_v11 = vld [vmem:[#allocation7 + $0xf0] sm:$0xff] }
 0x53c   : > { %v3759_v26 = vpop.f32.mrf.mxu1 }
 0x53d   : > { %v8674_v12 = vadd.f32 %v8485_v59, %v3759_v26  ;;  %v6451_v59 = vld [vmem:[%s9060_s7 + $0xc] ss:$16 sps:$4 sm:$0xff]  }
 0x53e   : > { %v3761_v57 = vpop.f32.mrf.mxu1  ;;  %5987 = vmatprep.mubr.msk.bf16.mxu0 %vm5183_vm10, %v6451_v59  ;;  %v4217_v59 = vmul.f32 %v8491_v38, %v8283_v49  ;;  %v4181_v38 = vmul.f32 %v8499_v61, %v8275_v62 }
 0x53f   : > { %9364 = vst [vmem:[#allocation47_spill] sm:$0xff] %v8674_v12  ;;  %v8677_v52 = vadd.f32 %v8487_v42, %v3761_v57  ;;  %4227 = vrot.lane.b32.xlu0 %v8674_v12, %s9220_s2  ;;  %v8782_v42 = vpop.permute.xlu0 %4804  ;;  %v8784_v57 = vpop.permute.xlu1 %4806 }
 0x540   : > { %v3763_v19 = vpop.f32.mrf.mxu1  ;;  %9366 = vst [vmem:[#allocation49_spill] sm:$0xff] %v8782_v42  ;;  %9367 = vst [vmem:[#allocation50_spill] sm:$0xff] %v8784_v57 }
 0x541   : > { %9365 = vst [vmem:[#allocation48_spill] sm:$0xff] %v8677_v52  ;;  %4229 = vrot.lane.b32.xlu1 %v8677_v52, %s9220_s2 }
 0x542   : > { %v3764_v45 = vpop.f32.mrf.mxu1 }
 0x543   : > { %4191 = vrot.lane.b32.xlu0 %v8674_v12, %s9219_s11 }
 0x545   : > { %4193 = vrot.lane.b32.xlu1 %v8677_v52, %s9219_s11 }
 0x547   : > { %4155 = vrot.lane.b32.xlu0 %v8674_v12, %s9222_s5 }
 0x549   : > { %4157 = vrot.lane.b32.xlu1 %v8677_v52, %s9222_s5 }
 0x54b   : > { %4119 = vrot.lane.b32.xlu0 %v8674_v12, %s9221_s4 }
 0x54d   : > { %4121 = vrot.lane.b32.xlu1 %v8677_v52, %s9221_s4 }
 0x54f   : > { %4083 = vrot.lane.b32.xlu0 %v8674_v12, %s9180_s25 }
 0x551   : > { %4085 = vrot.lane.b32.xlu1 %v8677_v52, %s9180_s25 }
 0x553   : > { %4047 = vrot.lane.b32.xlu0 %v8674_v12, %s9179_s0 }
 0x555   : > { %4049 = vrot.lane.b32.xlu1 %v8677_v52, %s9179_s0 }
 0x557   : > { %4011 = vrot.lane.b32.xlu0 %v8674_v12, %s9182_s13 }
 0x559   : > { %4013 = vrot.lane.b32.xlu1 %v8677_v52, %s9182_s13 }
 0x55b   : > { %4785 = vrot.lane.b32.xlu0 %v8674_v12, %s9185_s27 }
 0x55d   : > { %4787 = vrot.lane.b32.xlu1 %v8677_v52, %s9185_s27 }
 0x55f   : > { %3975 = vrot.lane.b32.xlu0 %v8674_v12, %s9181_s26 }
 0x561   : > { %3977 = vrot.lane.b32.xlu1 %v8677_v52, %s9181_s26  ;;  %s9430_s26 = sld [smem:[#allocation58_spill]] }
 0x563   : > { %4749 = vrot.lane.b32.xlu0 %v8674_v12, %s9184_s29 }
 0x565   : > { %4751 = vrot.lane.b32.xlu1 %v8677_v52, %s9184_s29  ;;  %s5591_s29 = sld [smem:[#allocation5 + $0x3]] }
 0x567   : > { %4497 = vrot.lane.b32.xlu0 %v8674_v12, %s9228_s10  ;;  %s493_s21 = scalar_lea.vmem %s9430_s26, %s8177_s9 }
 0x569   : > { %4499 = vrot.lane.b32.xlu1 %v8677_v52, %s9228_s10 }
 0x56b   : > { %4713 = vrot.lane.b32.xlu0 %v8674_v12, %s9187_s22  ;;  %p479_p11 = scmp.lt.s32.totalorder %s5591_s29, 2 }
 0x56d   : > { %4715 = vrot.lane.b32.xlu1 %v8677_v52, %s9187_s22  ;;  %s9439_s29 = smov (!%p479_p11, %s5591_s29), 2 }
 0x56f   : > { %4461 = vrot.lane.b32.xlu0 %v8674_v12, %s9227_s8 }
 0x571   : > { %4463 = vrot.lane.b32.xlu1 %v8677_v52, %s9227_s8 }
 0x573   : > { %4677 = vrot.lane.b32.xlu0 %v8674_v12, %s9186_s23 }
 0x575   : > { %4679 = vrot.lane.b32.xlu1 %v8677_v52, %s9186_s23 }
 0x577   : > { %4425 = vrot.lane.b32.xlu0 %v8674_v12, %s9229_s3 }
 0x579   : > { %4427 = vrot.lane.b32.xlu1 %v8677_v52, %s9229_s3 }
 0x57b   : > { %4641 = vrot.lane.b32.xlu0 %v8674_v12, %s9190_s16 }
 0x57d   : > { %4643 = vrot.lane.b32.xlu1 %v8677_v52, %s9190_s16 }
 0x57f   : > { %4605 = vrot.lane.b32.xlu0 %v8674_v12, %s9189_s17 }
 0x581   : > { %4607 = vrot.lane.b32.xlu1 %v8677_v52, %s9189_s17 }
 0x583   : > { %4371 = vrot.lane.b32.xlu0 %v8674_v12, %s9216_s15 }
 0x585   : > { %4373 = vrot.lane.b32.xlu1 %v8677_v52, %s9216_s15 }
 0x587   : > { %4569 = vrot.lane.b32.xlu0 %v8674_v12, %s9226_s19 }
 0x589   : > { %4571 = vrot.lane.b32.xlu1 %v8677_v52, %s9226_s19 }
 0x58b   : > { %4335 = vrot.lane.b32.xlu0 %v8674_v12, %s9215_s28 }
 0x58d   : > { %4337 = vrot.lane.b32.xlu1 %v8677_v52, %s9215_s28  ;;  %s9429_s28 = sld [smem:[#allocation52_spill]] }
 0x58f   : > { %4533 = vrot.lane.b32.xlu0 %v8674_v12, %s9224_s6 }
 0x591   : > { %4535 = vrot.lane.b32.xlu1 %v8677_v52, %s9224_s6  ;;  %s9431_s6 = sld [smem:[#allocation56_spill]] }
 0x593   : > { %4299 = vrot.lane.b32.xlu0 %v8674_v12, %s9218_s18 }
 0x595   : > { %4301 = vrot.lane.b32.xlu1 %v8677_v52, %s9218_s18  ;;  %s9432_s18 = sld [smem:[#allocation57_spill]] }
 0x597   : > { %4263 = vrot.lane.b32.xlu0 %v8674_v12, %s9217_s12  ;;  %s477_s8 = scalar_lea.vmem %s9431_s6, %s8177_s9 }
 0x599   : > { %4265 = vrot.lane.b32.xlu1 %v8677_v52, %s9217_s12  ;;  %s472_s12 = scalar_lea.vmem %s9429_s28, %s8177_s9 }
 0x59b   : > { %4821 = vrot.lane.b32.xlu0 %v8674_v12, %s9183_s30 }
 0x59d   : > { %4823 = vrot.lane.b32.xlu1 %v8677_v52, %s9183_s30 }
 0x5b1   : > { %v4228_v1 = vpop.permute.xlu0 %4227 }
 0x5b3   : > { %v4230_v26 = vpop.permute.xlu1 %4229 }
 0x5b4   : > { %v4231_v19 = vsel %vm663_vm9, %v4228_v1, %v4230_v26  ;;  %v4232_v45 = vsel %vm663_vm9, %v4230_v26, %v4228_v1  ;;  %vm9370_vm9 = vcmp.lt.s32.totalorder %v6956_v13, 18 }
 0x5b5   : > { %v4233_v14 = vmul.f32 %v4232_v45, %v8281_v43  ;;  %v4234_v42 = vmul.f32 %v4231_v19, %v8283_v49  ;;  %v4192_v10 = vpop.permute.xlu0 %4191  ;;  %vm9371_vm11 = vmmov %vm9370_vm9 }
 0x5b7   : > { %v6314_v57 = vpack.c.bf16 %v4233_v14, %v4216_v5  ;;  %v4194_v6 = vpop.permute.xlu1 %4193  ;;  %v6315_v12 = vpack.c.bf16 %v4234_v42, %v4217_v59 }
 0x5b8   : > { %v4195_v52 = vsel %vm9368_vm13, %v4192_v10, %v4194_v6  ;;  %v4196_v1 = vsel %vm9369_vm8, %v4194_v6, %v4192_v10  ;;  %vm9373_vm13 = vmmov %vm9372_vm12  ;;  %vm9374_vm8 = vcmp.lt.s32.totalorder %v6956_v13, 31 }
 0x5b9   : > { %v4197_v43 = vmul.f32 %v4196_v1, %v8271_v39  ;;  %v4198_v49 = vmul.f32 %v4195_v52, %v8275_v62  ;;  %5197 = vmatprep.subr.bf16.mxu1 %v6315_v12  ;;  %v4156_v14 = vpop.permute.xlu0 %4155  ;;  %v4145_v39 = vmul.f32 %v8507_v44, %v8311_v34 }
 0x5ba   : > { %5198 = vmatpush1.bf16.msra.mxu1 %v6314_v57 }
 0x5bb   : > { %v6312_v42 = vpack.c.bf16 %v4197_v43, %v4180_v60  ;;  %v4158_v26 = vpop.permute.xlu1 %4157  ;;  %v6313_v19 = vpack.c.bf16 %v4198_v49, %v4181_v38 }
 0x5bc   : > { %v4159_v45 = vsel %vm9370_vm9, %v4156_v14, %v4158_v26  ;;  %v4160_v6 = vsel %vm9371_vm11, %v4158_v26, %v4156_v14  ;;  %vm9375_vm9 = vmmov %vm9374_vm8  ;;  %vm9376_vm11 = vcmp.lt.s32.totalorder %v6956_v13, 32 }
 0x5bd   : > { %v4161_v62 = vmul.f32 %v4160_v6, %v8309_v40  ;;  %v4162_v52 = vmul.f32 %v4159_v45, %v8311_v34  ;;  %5199 = vmatprep.subr.bf16.mxu1 %v6313_v19  ;;  %v4120_v61 = vpop.permute.xlu0 %4119  ;;  %v4109_v40 = vmul.f32 %v8515_v17, %v8303_v36 }
 0x5be   : > { %5200 = vmatpush1.bf16.msra.mxu1 %v6312_v42 }
 0x5bf   : > { %v6310_v12 = vpack.c.bf16 %v4161_v62, %v4144_v53  ;;  %v4122_v10 = vpop.permute.xlu1 %4121  ;;  %v6311_v57 = vpack.c.bf16 %v4162_v52, %v4145_v39 }
 0x5c0   : > { %v4123_v5 = vsel %vm9372_vm12, %v4120_v61, %v4122_v10  ;;  %v4124_v59 = vsel %vm9373_vm13, %v4122_v10, %v4120_v61  ;;  %vm9377_vm12 = vmmov %vm9376_vm11  ;;  %vm9378_vm13 = vcmp.lt.s32.totalorder %v6956_v13, 33 }
 0x5c1   : > { %v4125_v34 = vmul.f32 %v4124_v59, %v8299_v27  ;;  %v4126_v44 = vmul.f32 %v4123_v5, %v8303_v36  ;;  %5201 = vmatprep.subr.bf16.mxu1 %v6311_v57  ;;  %v4084_v1 = vpop.permute.xlu0 %4083  ;;  %v4073_v27 = vmul.f32 %v8523_v30, %v8339_v0 }
 0x5c2   : > { %5202 = vmatpush1.bf16.msra.mxu1 %v6310_v12 }
 0x5c3   : > { %v6308_v60 = vpack.c.bf16 %v4125_v34, %v4108_v23  ;;  %v4086_v38 = vpop.permute.xlu1 %4085  ;;  %v6309_v43 = vpack.c.bf16 %v4126_v44, %v4109_v40 }
 0x5c4   : > { %v4087_v49 = vsel %vm9374_vm8, %v4084_v1, %v4086_v38  ;;  %v4088_v14 = vsel %vm9375_vm9, %v4086_v38, %v4084_v1  ;;  %vm9379_vm8 = vmmov %vm9378_vm13  ;;  %vm9380_vm9 = vcmp.lt.s32.totalorder %v6956_v13, 95 }
 0x5c5   : > { %v4089_v36 = vmul.f32 %v4088_v14, %v8337_v54  ;;  %v4090_v17 = vmul.f32 %v4087_v49, %v8339_v0  ;;  %5203 = vmatprep.subr.bf16.mxu1 %v6309_v43  ;;  %v4048_v42 = vpop.permute.xlu0 %4047  ;;  %v4037_v54 = vmul.f32 %v8531_v50, %v8331_v33 }
 0x5c6   : > { %5204 = vmatpush1.bf16.msra.mxu1 %v6308_v60 }
 0x5c7   : > { %v6306_v26 = vpack.c.bf16 %v4089_v36, %v4072_v31  ;;  %v4050_v19 = vpop.permute.xlu1 %4049  ;;  %v6307_v45 = vpack.c.bf16 %v4090_v17, %v4073_v27 }
 0x5c8   : > { %v4051_v6 = vsel %vm9376_vm11, %v4048_v42, %v4050_v19  ;;  %v4052_v53 = vsel %vm9377_vm12, %v4050_v19, %v4048_v42  ;;  %vm9381_vm11 = vmmov %vm9380_vm9  ;;  %vm9382_vm12 = vcmp.lt.s32.totalorder %v6956_v13, 34 }
 0x5c9   : > { %v4053_v0 = vmul.f32 %v4052_v53, %v8327_v21  ;;  %v4054_v30 = vmul.f32 %v4051_v6, %v8331_v33  ;;  %5205 = vmatprep.subr.bf16.mxu1 %v6307_v45  ;;  %v4012_v39 = vpop.permute.xlu0 %4011  ;;  %v4001_v21 = vmul.f32 %v8539_v48, %v8367_v7 }
 0x5ca   : > { %5206 = vmatpush1.bf16.msra.mxu1 %v6306_v26 }
 0x5cb   : > { %v6304_v62 = vpack.c.bf16 %v4053_v0, %v4036_v2  ;;  %v4014_v52 = vpop.permute.xlu1 %4013  ;;  %v6305_v61 = vpack.c.bf16 %v4054_v30, %v4037_v54  ;;  %v4486_v54 = vmul.f32 %v6492_v11, %v8571_v8  ;;  %v4702_v8 = vmul.f32 %v8579_v37, %v8431_v9  ;;  %v6494_v37 = vld [vmem:[#allocation7 + $0xe0] sm:$0xff] }
 0x5cc   : > { %v4015_v12 = vsel %vm9378_vm13, %v4012_v39, %v4014_v52  ;;  %v4016_v10 = vsel %vm9379_vm8, %v4014_v52, %v4012_v39  ;;  %vm9383_vm13 = vmmov %vm9382_vm12  ;;  %vm9384_vm8 = vcmp.lt.s32.totalorder %v6956_v13, 96 }
 0x5cd   : > { %v4017_v33 = vmul.f32 %v4016_v10, %v8365_v55  ;;  %v4018_v50 = vmul.f32 %v4015_v12, %v8367_v7  ;;  %5207 = vmatprep.subr.bf16.mxu1 %v6305_v61  ;;  %v4786_v57 = vpop.permute.xlu0 %4785  ;;  %v4775_v55 = vmul.f32 %v8551_v47, %v8405_v56 }
 0x5ce   : > { %5208 = vmatpush1.bf16.msra.mxu1 %v6304_v62 }
 0x5cf   : > { %v6302_v5 = vpack.c.bf16 %v4017_v33, %v4000_v29  ;;  %v4788_v59 = vpop.permute.xlu1 %4787  ;;  %v6303_v23 = vpack.c.bf16 %v4018_v50, %v4001_v21 }
 0x5d0   : > { %v4789_v40 = vsel %vm9380_vm9, %v4786_v57, %v4788_v59  ;;  %v4790_v34 = vsel %vm9381_vm11, %v4788_v59, %v4786_v57  ;;  %vm9385_vm9 = vmmov %vm9384_vm8  ;;  %vm9386_vm11 = vcmp.lt.s32.totalorder %v6956_v13, 97 }
 0x5d1   : > { %v4791_v7 = vmul.f32 %v4789_v40, %v8403_v22  ;;  %v4792_v48 = vmul.f32 %v4790_v34, %v8405_v56  ;;  %5209 = vmatprep.subr.bf16.mxu1 %v6303_v23  ;;  %v3976_v44 = vpop.permute.xlu0 %3975  ;;  %v3965_v22 = vmul.f32 %v8555_v18, %v8359_v41  ;;  %v4450_v23 = vmul.f32 %v6494_v37, %v8587_v15 }
 0x5d2   : > { %5210 = vmatpush1.bf16.msra.mxu1 %v6302_v5  ;;  %v4666_v15 = vmul.f32 %v8595_v3, %v8421_v28  ;;  %v6496_v3 = vld [vmem:[#allocation7 + $0xd0] sm:$0xff] }
 0x5d3   : > { %v6346_v1 = vpack.c.bf16 %v4791_v7, %v4774_v46  ;;  %v3978_v60 = vpop.permute.xlu1 %3977  ;;  %v6347_v38 = vpack.c.bf16 %v4792_v48, %v4775_v55 }
 0x5d4   : > { %v3979_v43 = vsel %vm9382_vm12, %v3976_v44, %v3978_v60  ;;  %v3980_v49 = vsel %vm9383_vm13, %v3978_v60, %v3976_v44  ;;  %vm9387_vm12 = vmmov %vm9386_vm11  ;;  %v9391_v60 = vld [vmem:[#allocation28_spill] sm:$0xff] }
 0x5d5   : > { %v3981_v56 = vmul.f32 %v3980_v49, %v8355_v20  ;;  %v3982_v47 = vmul.f32 %v3979_v43, %v8359_v41  ;;  %5250 = vmatprep.subr.bf16.mxu0 %v6347_v38  ;;  %v4750_v14 = vpop.permute.xlu0 %4749  ;;  %v4739_v20 = vmul.f32 %v8567_v4, %v8397_v24  ;;  %v6493_v4 = vld [vmem:[#allocation7 + $0xf8] sm:$0xff] }
 0x5d6   : > { %5251 = vmatpush1.bf16.msra.mxu0 %v6346_v1  ;;  %v9390_v1 = vld [vmem:[#allocation19_spill] sm:$0xff] }
 0x5d7   : > { %v6300_v31 = vpack.c.bf16 %v3981_v56, %v3964_v16  ;;  %v4752_v27 = vpop.permute.xlu1 %4751  ;;  %v6301_v36 = vpack.c.bf16 %v3982_v47, %v3965_v22 }
 0x5d8   : > { %v4753_v17 = vsel %vm9384_vm8, %v4750_v14, %v4752_v27  ;;  %v4754_v42 = vsel %vm9385_vm9, %v4752_v27, %v4750_v14 }
 0x5d9   : > { %v4755_v41 = vmul.f32 %v4753_v17, %v8391_v63  ;;  %v4756_v18 = vmul.f32 %v4754_v42, %v8397_v24  ;;  %5211 = vmatprep.subr.bf16.mxu1 %v6301_v36  ;;  %v4498_v26 = vpop.permute.xlu0 %4497  ;;  %v4487_v63 = vmul.f32 %v6493_v4, %v8575_v25  ;;  %v4703_v25 = vmul.f32 %v8583_v51, %v8433_v58  ;;  %v6495_v51 = vld [vmem:[#allocation7 + $0xe8] sm:$0xff]  ;;  %v6497_v36 = vld [vmem:[#allocation7 + $0xd8] sm:$0xff] }
 0x5da   : > { %5212 = vmatpush1.bf16.msra.mxu1 %v6300_v31  ;;  %v9392_v31 = vld [vmem:[#allocation29_spill] sm:$0xff]  ;;  %v9393_v17 = vld [vmem:[#allocation30_spill] sm:$0xff] }
 0x5db   : > { %v6344_v19 = vpack.c.bf16 %v4755_v41, %v4738_v35  ;;  %v4500_v45 = vpop.permute.xlu1 %4499  ;;  %v6345_v6 = vpack.c.bf16 %v4756_v18, %v4739_v20  ;;  %v4414_v27 = vmul.f32 %v6496_v3, %v9392_v31 }
 0x5dc   : > { %v4501_v53 = vsel %vm819_vm1, %v4498_v26, %v4500_v45  ;;  %v4502_v2 = vsel %vm819_vm1, %v4500_v45, %v4498_v26  ;;  %vm9388_vm1 = vcmp.lt.s32.totalorder %v6956_v13, 98  ;;  %v9395_v45 = vld [vmem:[#allocation31_spill] sm:$0xff] }
 0x5dd   : > { %v4503_v0 = vmul.f32 %v6492_v11, %v4501_v53  ;;  %v4504_v24 = vmul.f32 %v6493_v4, %v4502_v2  ;;  %5252 = vmatprep.subr.bf16.mxu0 %v6345_v6  ;;  %v4714_v30 = vpop.permute.xlu0 %4713  ;;  %vm9389_vm13 = vmmov %vm9388_vm1  ;;  %v9396_v11 = vld [vmem:[#allocation23_spill] sm:$0xff] }
 0x5de   : > { %5253 = vmatpush1.bf16.msra.mxu0 %v6344_v19  ;;  %v9394_v19 = vld [vmem:[#allocation22_spill] sm:$0xff] }
 0x5df   : > { %v6330_v39 = vpack.c.bf16 %v4503_v0, %v4486_v54  ;;  %v4716_v62 = vpop.permute.xlu1 %4715  ;;  %v6331_v52 = vpack.c.bf16 %v4504_v24, %v4487_v63  ;;  %v4630_v6 = vmul.f32 %v9395_v45, %v9394_v19  ;;  %v9397_v54 = vld [vmem:[#allocation32_spill] sm:$0xff]  ;;  %v6502_v45 = vld [vmem:[#allocation7 + $0xa0] sm:$0xff] }
 0x5e0   : > { %v4717_v61 = vsel %vm9386_vm11, %v4714_v30, %v4716_v62  ;;  %v4718_v12 = vsel %vm9387_vm12, %v4716_v62, %v4714_v30  ;;  %v4631_v4 = vmul.f32 %v9397_v54, %v9396_v11  ;;  %v6498_v30 = vld [vmem:[%s8183_s14 + $0x8] sm:$0xff] }
 0x5e1   : > { %v4719_v10 = vmul.f32 %v4717_v61, %v8431_v9  ;;  %v4720_v29 = vmul.f32 %v4718_v12, %v8433_v58  ;;  %5213 = vmatprep.subr.bf16.mxu1 %v6331_v52  ;;  %v4462_v21 = vpop.permute.xlu0 %4461  ;;  %v4451_v9 = vmul.f32 %v6495_v51, %v8591_v32  ;;  %v4667_v32 = vmul.f32 %v9391_v60, %v9390_v1 }
 0x5e2   : > { %5214 = vmatpush2.bf16.msra.mxu1 %v6330_v39  ;;  %v9398_v39 = vld [vmem:[#allocation48_spill] sm:$0xff] }
 0x5e3   : > { %v6342_v33 = vpack.c.bf16 %v4719_v10, %v4702_v8  ;;  %v4464_v50 = vpop.permute.xlu1 %4463  ;;  %v6343_v57 = vpack.c.bf16 %v4720_v29, %v4703_v25  ;;  %v6325_v62 = vpack.c.bf16 %v9398_v39, %v6498_v30  ;;  %v6499_v10 = vld [vmem:[%s8183_s14] sm:$0xff]  ;;  %s5593_s14 = sshll.u32 %s9439_s29, 2 }
 0x5e4   : > { %v4465_v5 = vsel %vm798_vm2, %v4462_v21, %v4464_v50  ;;  %v4466_v59 = vsel %vm798_vm2, %v4464_v50, %v4462_v21  ;;  %vm9399_vm2 = vcmp.lt.s32.totalorder %v6956_v13, 111  ;;  %v9401_v29 = vld [vmem:[#allocation47_spill] sm:$0xff]  ;;  %v9403_v50 = vld [vmem:[#allocation33_spill] sm:$0xff]  ;;  %s485_s2 = sadd.s32 %s5593_s14, %s5592_s24 }
 0x5e5   : > { %v4467_v40 = vmul.f32 %v6494_v37, %v4465_v5  ;;  %v4468_v58 = vmul.f32 %v6495_v51, %v4466_v59  ;;  %5254 = vmatprep.subr.bf16.mxu0 %v6343_v57  ;;  %v4678_v34 = vpop.permute.xlu0 %4677  ;;  %v6324_v21 = vpack.c.bf16 %v9401_v29, %v6499_v10  ;;  %v9404_v5 = vld [vmem:[#allocation21_spill] sm:$0xff]  ;;  %v9405_v59 = vld [vmem:[#allocation34_spill] sm:$0xff]  ;;  %s5594_s3 = sshll.u32 %s485_s2, 3 }
 0x5e6   : > { %5255 = vmatpush1.bf16.msra.mxu0 %v6342_v33  ;;  %v9402_v33 = vld [vmem:[#allocation20_spill] sm:$0xff]  ;;  %v4595_v37 = vmul.f32 %v9405_v59, %v9404_v5  ;;  %v9417_v10 = vld [vmem:[#allocation42_spill] sm:$0xff]  ;;  %s487_s15 = scalar_lea.vmem %s9432_s18, %s5594_s3 }
 0x5e7   : > { %v6328_v46 = vpack.c.bf16 %v4467_v40, %v4450_v23  ;;  %v4680_v55 = vpop.permute.xlu1 %4679  ;;  %v6329_v7 = vpack.c.bf16 %v4468_v58, %v4451_v9  ;;  %v4594_v57 = vmul.f32 %v9403_v50, %v9402_v33 }
 0x5e8   : > { %v4681_v48 = vsel %vm9388_vm1, %v4678_v34, %v4680_v55  ;;  %v4682_v44 = vsel %vm9389_vm13, %v4680_v55, %v4678_v34 }
 0x5e9   : > { %v4683_v38 = vmul.f32 %v4681_v48, %v8421_v28  ;;  %v4684_v43 = vmul.f32 %v4682_v44, %v9390_v1  ;;  %5215 = vmatprep.subr.bf16.mxu1 %v6329_v7  ;;  %v4426_v49 = vpop.permute.xlu0 %4425  ;;  %v4415_v28 = vmul.f32 %v6497_v36, %v9393_v17  ;;  %v6500_v7 = vld [vmem:[#allocation7 + $0xb0] sm:$0xff]  ;;  %v9406_v48 = vld [vmem:[#allocation36_spill] sm:$0xff]  ;;  %v9407_v1 = vld [vmem:[#allocation35_spill] sm:$0xff] }
 0x5ea   : > { %5216 = vmatpush2.bf16.msra.mxu1 %v6328_v46  ;;  %v4360_v44 = vmul.f32 %v6500_v7, %v9406_v48 }
 0x5eb   : > { %v6340_v16 = vpack.c.bf16 %v4683_v38, %v4666_v15  ;;  %v4428_v22 = vpop.permute.xlu1 %4427  ;;  %v6341_v56 = vpack.c.bf16 %v4684_v43, %v4667_v32  ;;  %v6501_v15 = vld [vmem:[#allocation7 + $0xb8] sm:$0xff] }
 0x5ec   : > { %v4429_v47 = vsel %vm777_vm3, %v4426_v49, %v4428_v22  ;;  %v4430_v14 = vsel %vm777_vm3, %v4428_v22, %v4426_v49  ;;  %vm9400_vm3 = vmmov %vm9399_vm2  ;;  %v4361_v60 = vmul.f32 %v6501_v15, %v9407_v1 }
 0x5ed   : > { %v4431_v42 = vmul.f32 %v6496_v3, %v4429_v47  ;;  %v4432_v35 = vmul.f32 %v6497_v36, %v4430_v14  ;;  %5256 = vmatprep.subr.bf16.mxu0 %v6341_v56  ;;  %v4642_v20 = vpop.permute.xlu0 %4641  ;;  %v9408_v14 = vld [vmem:[#allocation26_spill] sm:$0xff]  ;;  %v9409_v3 = vld [vmem:[#allocation37_spill] sm:$0xff] }
 0x5ee   : > { %5257 = vmatpush1.bf16.msra.mxu0 %v6340_v16  ;;  %v4558_v31 = vmul.f32 %v9409_v3, %v9408_v14  ;;  %v9411_v36 = vld [vmem:[#allocation38_spill] sm:$0xff]  ;;  %v9422_v3 = vld [vmem:[#allocation45_spill] sm:$0xff] }
 0x5ef   : > { %v6326_v41 = vpack.c.bf16 %v4431_v42, %v4414_v27  ;;  %v4644_v18 = vpop.permute.xlu1 %4643  ;;  %v6327_v26 = vpack.c.bf16 %v4432_v35, %v4415_v28  ;;  %v9410_v27 = vld [vmem:[#allocation27_spill] sm:$0xff] }
 0x5f0   : > { %v4645_v53 = vsel %vm903_vm15, %v4642_v20, %v4644_v18  ;;  %v4646_v2 = vsel %vm903_vm15, %v4644_v18, %v4642_v20  ;;  %v4559_v17 = vmul.f32 %v9411_v36, %v9410_v27 }
 0x5f1   : > { %v4647_v63 = vmul.f32 %v4645_v53, %v9394_v19  ;;  %v4648_v0 = vmul.f32 %v4646_v2, %v9396_v11  ;;  %5217 = vmatprep.subr.bf16.mxu1 %v6327_v26  ;;  %v4606_v24 = vpop.permute.xlu0 %4605  ;;  %v6503_v2 = vld [vmem:[#allocation7 + $0xa8] sm:$0xff]  ;;  %v9413_v11 = vld [vmem:[#allocation39_spill] sm:$0xff] }
 0x5f2   : > { %5218 = vmatpush2.bf16.msra.mxu1 %v6326_v41  ;;  %v4325_v54 = vmul.f32 %v6503_v2, %v9413_v11 }
 0x5f3   : > { %v6338_v52 = vpack.c.bf16 %v4647_v63, %v4630_v6  ;;  %v4608_v61 = vpop.permute.xlu1 %4607  ;;  %5219 = vmatprep.subr.bf16.mxu1 %v6325_v62  ;;  %v6339_v12 = vpack.c.bf16 %v4648_v0, %v4631_v4  ;;  %v9412_v6 = vld [vmem:[#allocation40_spill] sm:$0xff] }
 0x5f4   : > { %v4609_v8 = vsel %vm9399_vm2, %v4606_v24, %v4608_v61  ;;  %v4610_v25 = vsel %vm9400_vm3, %v4608_v61, %v4606_v24  ;;  %v4324_v53 = vmul.f32 %v6502_v45, %v9412_v6  ;;  %v9414_v61 = vld [vmem:[#allocation24_spill] sm:$0xff]  ;;  %v6508_v6 = vld [vmem:[#allocation7 + $0x180] sm:$0xff] }
 0x5f5   : > { %v4611_v23 = vmul.f32 %v4609_v8, %v9402_v33  ;;  %v4612_v51 = vmul.f32 %v4610_v25, %v9404_v5  ;;  %5258 = vmatprep.subr.bf16.mxu0 %v6339_v12  ;;  %v4372_v9 = vpop.permute.xlu0 %4371  ;;  %v9415_v12 = vld [vmem:[#allocation41_spill] sm:$0xff] }
 0x5f6   : > { %5220 = vmatpush2.bf16.msra.mxu1 %v6324_v21  ;;  %5259 = vmatpush1.bf16.msra.mxu0 %v6338_v52  ;;  %v4522_v8 = vmul.f32 %v9415_v12, %v9414_v61  ;;  %v9416_v25 = vld [vmem:[#allocation25_spill] sm:$0xff] }
 0x5f7   : > { %v6336_v40 = vpack.c.bf16 %v4611_v23, %v4594_v57  ;;  %v4374_v58 = vpop.permute.xlu1 %4373  ;;  %v6337_v34 = vpack.c.bf16 %v4612_v51, %v4595_v37  ;;  %v4523_v29 = vmul.f32 %v9417_v10, %v9416_v25  ;;  %v9418_v37 = vld [vmem:[#allocation18_spill] sm:$0xff] }
 0x5f8   : > { %v4375_v46 = vsel %vm747_vm5, %v4372_v9, %v4374_v58  ;;  %v4376_v55 = vsel %vm747_vm5, %v4374_v58, %v4372_v9  ;;  %v5985_v23 = vcombine.high %v9418_v37, %v9418_v37  ;;  %v5984_v51 = vcombine.low %v9418_v37, %v9418_v37  ;;  %v6504_v58 = vld [vmem:[#allocation7 + $0x90] sm:$0xff] }
 0x5f9   : > { %v4377_v32 = vmul.f32 %v6500_v7, %v4376_v55  ;;  %v4378_v38 = vmul.f32 %v6501_v15, %v4375_v46  ;;  %5260 = vmatprep.subr.bf16.mxu0 %v6337_v34  ;;  %v4570_v43 = vpop.permute.xlu0 %4569  ;;  %v9419_v34 = vld [vmem:[#allocation44_spill] sm:$0xff]  ;;  %v6505_v55 = vld [vmem:[#allocation7 + $0x98] sm:$0xff]  ;;  %v9420_v7 = vld [vmem:[#allocation43_spill] sm:$0xff] }
 0x5fa   : > { %5261 = vmatpush1.bf16.msra.mxu0 %v6336_v40  ;;  %v4288_v46 = vmul.f32 %v6504_v58, %v9419_v34  ;;  %v4289_v48 = vmul.f32 %v6505_v55, %v9420_v7 }
 0x5fb   : > { %v6322_v49 = vpack.c.bf16 %v4377_v32, %v4360_v44  ;;  %v4572_v16 = vpop.permute.xlu1 %4571  ;;  %v6323_v22 = vpack.c.bf16 %v4378_v38, %v4361_v60 }
 0x5fc   : > { %v4573_v56 = vsel %vm861_vm14, %v4570_v43, %v4572_v16  ;;  %v4574_v47 = vsel %vm861_vm14, %v4572_v16, %v4570_v43 }
 0x5fd   : > { %v4575_v28 = vmul.f32 %v4573_v56, %v9408_v14  ;;  %v4576_v42 = vmul.f32 %v4574_v47, %v9410_v27  ;;  %5221 = vmatprep.subr.bf16.mxu1 %v6323_v22  ;;  %v4336_v35 = vpop.permute.xlu0 %4335  ;;  %v6506_v22 = vld [vmem:[#allocation7 + $0x80] sm:$0xff]  ;;  %v9421_v56 = vld [vmem:[#allocation46_spill] sm:$0xff]  ;;  %v6507_v14 = vld [vmem:[#allocation7 + $0x88] sm:$0xff] }
 0x5fe   : > { %5222 = vmatpush2.bf16.msra.mxu1 %v6322_v49  ;;  %v4252_v47 = vmul.f32 %v6506_v22, %v9421_v56 }
 0x5ff   : > { %v6334_v20 = vpack.c.bf16 %v4575_v28, %v4558_v31  ;;  %v4338_v41 = vpop.permute.xlu1 %4337  ;;  %v6335_v18 = vpack.c.bf16 %v4576_v42, %v4559_v17  ;;  %v4253_v31 = vmul.f32 %v6507_v14, %v9422_v3  ;;  %v9423_v17 = vld [vmem:[#allocation50_spill] sm:$0xff]  ;;  %v9424_v28 = vld [vmem:[#allocation49_spill] sm:$0xff] }
 0x600   : > { %v4339_v26 = vsel %vm726_vm4, %v4336_v35, %v4338_v41  ;;  %v4340_v19 = vsel %vm726_vm4, %v4338_v41, %v4336_v35  ;;  %vm9425_vm4 = vcmp.lt.s32.totalorder %v6956_v13, 94  ;;  %v6453_v13 = vld [vmem:[%s9060_s7 + $0x8] ss:$16 sps:$4 sm:$0xff]  }
 0x601   : > { %v4341_v4 = vmul.f32 %v6502_v45, %v4340_v19  ;;  %v4342_v63 = vmul.f32 %v6503_v2, %v4339_v26  ;;  %5262 = vmatprep.subr.bf16.mxu0 %v6335_v18  ;;  %v4534_v0 = vpop.permute.xlu0 %4533  ;;  %v4808_v42 = vsel %vm9425_vm4, %v9424_v28, %v9423_v17  ;;  %vm9426_vm5 = vmmov %vm9425_vm4  ;;  %v6509_v2 = vld [vmem:[#allocation7 + $0x188] sm:$0xff] }
 0x602   : > { %5263 = vmatpush1.bf16.msra.mxu0 %v6334_v20  ;;  %v4809_v35 = vsel %vm9426_vm5, %v9423_v17, %v9424_v28 }
 0x603   : > { %v6320_v24 = vpack.c.bf16 %v4341_v4, %v4324_v53  ;;  %v4536_v30 = vpop.permute.xlu1 %4535  ;;  %v6321_v39 = vpack.c.bf16 %v4342_v63, %v4325_v54  ;;  %v4810_v53 = vmul.f32 %v6508_v6, %v4808_v42  ;;  %v4811_v11 = vmul.f32 %v6509_v2, %v4809_v35  ;;  %v6448_v63 = vld [vmem:[%s9060_s7] ss:$16 sps:$4 sm:$0xff]  }
 0x604   : > { %v4537_v62 = vsel %vm840_vm0, %v4534_v0, %v4536_v30  ;;  %v4538_v52 = vsel %vm840_vm0, %v4536_v30, %v4534_v0  ;;  %vm5190_vm0 = vcmask 1043456   ;;  %v6454_v0 = vld [vmem:[%s9060_s7 + $0x24] ss:$16 sps:$4 sm:$0xff]  }
 0x605   : > { %v4539_v21 = vmul.f32 %v4537_v62, %v9414_v61  ;;  %v4540_v33 = vmul.f32 %v4538_v52, %v9416_v25  ;;  %5223 = vmatprep.subr.bf16.mxu1 %v6321_v39  ;;  %v4300_v50 = vpop.permute.xlu0 %4299  ;;  %v5192_v43 = vsel %vm5190_vm0, %v5984_v51, 0  ;;  %v6456_v39 = vld [vmem:[%s9060_s7 + $0x2c] ss:$16 sps:$4 sm:$0xff]   ;;  %v6458_v62 = vld [vmem:[%s9060_s7 + $0x20] ss:$16 sps:$4 sm:$0xff]  }
 0x606   : > { %5224 = vmatpush2.bf16.msra.mxu1 %v6320_v24  ;;  %v6459_v52 = vld [vmem:[%s9060_s7 + $0x28] ss:$16 sps:$4 sm:$0xff]   ;;  %v5341_v42 = vld [vmem:[%s472_s12] sm:$0xff] }
 0x607   : > { %v6332_v57 = vpack.c.bf16 %v4539_v21, %v4522_v8  ;;  %v4302_v5 = vpop.permute.xlu1 %4301  ;;  %v6333_v59 = vpack.c.bf16 %v4540_v33, %v4523_v29 }
 0x608   : > { %v4303_v9 = vsel %vm705_vm7, %v4300_v50, %v4302_v5  ;;  %v4304_v40 = vsel %vm705_vm7, %v4302_v5, %v4300_v50  ;;  %vm9428_vm7 = vmmov %vm9425_vm4 }
 0x609   : > { %v4305_v44 = vmul.f32 %v6504_v58, %v4304_v40  ;;  %v4306_v15 = vmul.f32 %v6505_v55, %v4303_v9  ;;  %5264 = vmatprep.subr.bf16.mxu0 %v6333_v59  ;;  %v4264_v1 = vpop.permute.xlu0 %4263 }
 0x60a   : > { %5265 = vmatpush1.bf16.msra.mxu0 %v6332_v57 }
 0x60b   : > { %v6318_v60 = vpack.c.bf16 %v4305_v44, %v4288_v46  ;;  %v4266_v32 = vpop.permute.xlu1 %4265  ;;  %v6319_v38 = vpack.c.bf16 %v4306_v15, %v4289_v48  ;;  %5986 = vmatprep.subr.msk.bf16.mxu0 %vm5190_vm0, %v5985_v23 }
 0x60c   : > { %v4267_v49 = vsel %vm684_vm6, %v4264_v1, %v4266_v32  ;;  %v4268_v16 = vsel %vm684_vm6, %v4266_v32, %v4264_v1  ;;  %vm9427_vm6 = vmmov %vm9425_vm4 }
 0x60d   : > { %v4269_v27 = vmul.f32 %v6506_v22, %v4268_v16  ;;  %v4270_v36 = vmul.f32 %v6507_v14, %v4267_v49  ;;  %5225 = vmatprep.subr.bf16.mxu1 %v6319_v38  ;;  %v4822_v41 = vpop.permute.xlu0 %4821 }
 0x60e   : > { %5226 = vmatpush2.bf16.msra.mxu1 %v6318_v60  ;;  %5279 = vmatpush2.bf16.msra.mxu0 %v5192_v43 }
 0x60f   : > { %v6316_v20 = vpack.c.bf16 %v4269_v27, %v4252_v47  ;;  %v4824_v18 = vpop.permute.xlu1 %4823  ;;  %v6317_v26 = vpack.c.bf16 %v4270_v36, %v4253_v31 }
 0x610   : > { %v4825_v19 = vsel %vm9427_vm6, %v4822_v41, %v4824_v18  ;;  %v4826_v45 = vsel %vm9428_vm7, %v4824_v18, %v4822_v41  ;;  %v5342_v18 = vld [vmem:[%s472_s12 + $0x8] sm:$0xff] }
 0x611   : > { %v4827_v54 = vmul.f32 %v6508_v6, %v4825_v19  ;;  %v4828_v4 = vmul.f32 %v6509_v2, %v4826_v45  ;;  %5227 = vmatprep.subr.bf16.mxu1 %v6317_v26 }
 0x612   : > { %5228 = vmatpush2.bf16.msra.mxu1 %v6316_v20 }
 0x613   : > { %v6348_v24 = vpack.c.bf16 %v4827_v54, %v4810_v53  ;;  %v6349_v30 = vpack.c.bf16 %v4828_v4, %v4811_v11 }
 0x615   : > { %5230 = vmatmul.mubr.bf16.vlgmr.msra.gmra.mxu1 %v6448_v63  ;;  %5280 = vmatprep.subr.bf16.mxu0 %v6349_v30 }
 0x616   : > { %5281 = vmatpush2.bf16.msra.mxu0 %v6348_v24  ;;  %5239 = vmatprep.mubr.bf16.mxu1 %v6454_v0 }
 0x619   : > { %5283 = vmatmul.mubr.bf16.vlgmr.msra.gmra.mxu0 %v6453_v13 }
 0x61a   : > { %5988 = vmatprep.mubr.msk.bf16.mxu0 %vm5183_vm10, %v6456_v39 }
 0x61d   : > { %5240 = vmatmul.mubr.bf16.gmra.mxu1 %v6458_v62 }
 0x621   : > { %5293 = vmatmul.mubr.bf16.gmra.mxu0 %v6459_v52 }
 0x6d5   : > { %v5231_v61 = vpop.f32.mrf.mxu1 }
 0x6d7   : > { %v5233_v12 = vpop.f32.mrf.mxu1 }
 0x6d9   : > { %v5284_v8 = vpop.f32.mrf.mxu0  ;;  %v5235_v25 = vpop.f32.mrf.mxu1 }
 0x6da   : > { %v5285_v10 = vadd.f32 %v5284_v8, %v5231_v61 }
 0x6db   : > { %v5286_v29 = vpop.f32.mrf.mxu0  ;;  %v5237_v57 = vpop.f32.mrf.mxu1 }
 0x6dc   : > { %v5989_v21 = vmul.f32 -1.442695, %v5285_v10  ;;  %v5287_v33 = vadd.f32 %v5286_v29, %v5233_v12 }
 0x6dd   : > { %v5288_v50 = vpop.f32.mrf.mxu0  ;;  %v5241_v9 = vpop.f32.mrf.mxu1 }
 0x6de   : > { %6460 = vpow2.f32 %v5989_v21  ;;  %v5990_v5 = vmul.f32 -1.442695, %v5287_v33  ;;  %v5289_v59 = vadd.f32 %v5288_v50, %v5235_v25 }
 0x6df   : > { %v5290_v37 = vpop.f32.mrf.mxu0  ;;  %v5243_v34 = vpop.f32.mrf.mxu1 }
 0x6e0   : > { %6462 = vpow2.f32 %v5990_v5  ;;  %v5991_v23 = vmul.f32 -1.442695, %v5289_v59  ;;  %v5291_v51 = vadd.f32 %v5290_v37, %v5237_v57 }
 0x6e1   : > { %v5294_v40 = vpop.f32.mrf.mxu0  ;;  %v5245_v48 = vpop.f32.mrf.mxu1 }
 0x6e2   : > { %6464 = vpow2.f32 %v5991_v23  ;;  %v5992_v58 = vmul.f32 -1.442695, %v5291_v51  ;;  %v5295_v55 = vadd.f32 %v5294_v40, %v5241_v9 }
 0x6e3   : > { %v5296_v46 = vpop.f32.mrf.mxu0  ;;  %v5247_v43 = vpop.f32.mrf.mxu1 }
 0x6e4   : > { %6466 = vpow2.f32 %v5992_v58  ;;  %v5297_v7 = vadd.f32 %v5296_v46, %v5243_v34  ;;  %v5993_v15 = vmul.f32 -1.442695, %v5295_v55 }
 0x6e5   : > { %v5298_v44 = vpop.f32.mrf.mxu0 }
 0x6e6   : > { %v5994_v1 = vmul.f32 -1.442695, %v5297_v7  ;;  %v5299_v32 = vadd.f32 %v5298_v44, %v5245_v48  ;;  %6468 = vpow2.f32 %v5993_v15 }
 0x6e7   : > { %v5300_v49 = vpop.f32.mrf.mxu0 }
 0x6e8   : > { %6470 = vpow2.f32 %v5994_v1  ;;  %v5301_v47 = vadd.f32 %v5300_v49, %v5247_v43 }
 0x6e9   : > { %6472 = vtanh.f32 %v5299_v32 }
 0x6eb   : > { %v6461_v60 = vpop.eup %6460 }
 0x6ec   : > { %v5309_v38 = vadd.f32 1.0, %v6461_v60 }
 0x6ed   : > { %v6463_v16 = vpop.eup %6462 }
 0x6ee   : > { %v5310_v22 = vadd.f32 1.0, %v6463_v16  ;;  %6474 = vrcp.f32 %v5309_v38 }
 0x6ef   : > { %v6465_v56 = vpop.eup %6464 }
 0x6f0   : > { %v5321_v14 = vadd.f32 1.0, %v6465_v56  ;;  %6476 = vrcp.f32 %v5310_v22 }
 0x6f1   : > { %v6467_v3 = vpop.eup %6466 }
 0x6f2   : > { %6478 = vrcp.f32 %v5321_v14  ;;  %v5322_v31 = vadd.f32 1.0, %v6467_v3 }
 0x6f3   : > { %6480 = vtanh.f32 %v5301_v47  ;;  %v6469_v27 = vpop.eup %6468 }
 0x6f4   : > { %6482 = vrcp.f32 %v5322_v31  ;;  %v5333_v41 = vadd.f32 1.0, %v6469_v27 }
 0x6f5   : > { %v6471_v36 = vpop.eup %6470 }
 0x6f6   : > { %v6473_v17 = vpop.eup %6472  ;;  %v5334_v53 = vadd.f32 1.0, %v6471_v36  ;;  %6484 = vrcp.f32 %v5333_v41 }
 0x6fb   : > { %v6475_v28 = vpop.eup %6474 }
 0x6fc   : > { %v5345_v45 = vmul.f32 %v6475_v28, %v6473_v17 }
 0x6fd   : > { %v6477_v35 = vpop.eup %6476 }
 0x6ff   : > { %v6479_v20 = vpop.eup %6478 }
 0x700   : > { %v6481_v26 = vpop.eup %6480  ;;  %v5343_v19 = vmul.f32 %v6479_v20, %v5341_v42 }
 0x701   : > { %v6483_v6 = vpop.eup %6482  ;;  %v5346_v54 = vmul.f32 %v6481_v26, %v6477_v35 }
 0x702   : > { %v5347_v2 = vadd.f32 %v5345_v45, %v5343_v19  ;;  %v5344_v11 = vmul.f32 %v6483_v6, %v5342_v18 }
 0x703   : > { %v6485_v63 = vpop.eup %6484 }
 0x704   : > { %6486 = vtanh.f32 %v5347_v2  ;;  %v5348_v4 = vadd.f32 %v5346_v54, %v5344_v11  ;;  %5355 = vst [vmem:[%s493_s21] sm:$0xff] %v5347_v2 }
 0x705   : > { %6488 = vrcp.f32 %v5334_v53 }
 0x706   : > { %6490 = vtanh.f32 %v5348_v4  ;;  %5356 = vst [vmem:[%s493_s21 + $0x8] sm:$0xff] %v5348_v4 }
 0x711   : > { %v6487_v0 = vpop.eup %6486 }
 0x712   : > { %v6489_v24 = vpop.eup %6488  ;;  %v5351_v30 = vmul.f32 %v6487_v0, %v6485_v63 }
 0x713   : > { %v6491_v13 = vpop.eup %6490 }
 0x714   : > { %5353 = vst [vmem:[%s477_s8] sm:$0xff] %v5351_v30  ;;  %5357 = vst [vmem:[%s487_s15] sm:$0xff] %v5351_v30  ;;  %v5352_v39 = vmul.f32 %v6491_v13, %v6489_v24 }
 0x716   : > { %5354 = vst [vmem:[%s477_s8 + $0x8] sm:$0xff] %v5352_v39  ;;  %5358 = vst [vmem:[%s487_s15 + $0x8] sm:$0xff] %v5352_v39 }
 0x717 PF: > { %s9433_s0 = sld [smem:[#allocation16_spill]] }
 0x718   : > { %s9434_s18 = sld [smem:[#allocation15_spill]] }
 0x719   : > { %s9435_s19 = sld [smem:[#allocation17_spill]] }
 0x71d   : > { %p26_p12 = scmp.ge.s32.totalorder %s9433_s0, 4  }
 0x71f   :  { %28 = sbr.rel (!%p26_p12) target bundleno = 20 (0x14), region = 178 }
 0x724   :  { %5423 = vsyncpa [#allocation8], 1 }
 0x725   :  { %5425 = vsyncpa [#allocation8 + $0x1], 1 }
 0x726   :  { %5426 = vsyncpa [#allocation10], 1 }

</bundles_post_ra>
